<compile_context>
chip_gen: v6e
topology: v6e:2x2x1
jax: 0.10.0
libtpu: 0.0.40
codegen_flags: <defaults>
</compile_context>

<pallas_src>
import functools

import jax
import jax.numpy as jnp
from jax.experimental import pallas as pl
from jax.experimental.pallas import tpu as pltpu


_VMEM_LIMIT = 32 * 1024 * 1024   # >= every scoped default, <= physical on all gens


# ----------------------------- static helpers -------------------------------
def _ceil_to(v, m):
    return ((v + m - 1) // m) * m


def _divisor_tile(n, cap):
    """Largest divisor of n that is <= cap."""
    for t in range(min(cap, n), 0, -1):
        if n % t == 0:
            return t
    return n


def _mm_tile_targets():
    """Generation-aware (tm, tn) targets for the matmul kernels."""
    try:
        kind = jax.devices()[0].device_kind.lower()
    except Exception:
        kind = ""
    if "v5" in kind:              # v5e: 4x 128x128 MXUs -> 128-lane tiles
        return 128, 256
    return 256, 512               # v6e / v7x: 256-wide MXUs, wide-N panels


def _m_tiling(M, target):
    """(Mp, tm): prefer a multiple-of-8 divisor of ceil8(M) -> no big pad pass."""
    Mp = _ceil_to(M, 8)
    cap = min(target, Mp)
    best = None
    t = 8
    while t <= cap:
        if Mp % t == 0:
            best = t
        t += 8
    if best is not None and best >= max(8, cap // 4):
        return Mp, best
    Mp2 = _ceil_to(Mp, target)
    return Mp2, target


def _n_tile(N, target):
    if N <= target:
        return N
    t = (target // 128) * 128
    while t >= 128:
        if N % t == 0:
            return t
        t -= 128
    return N


# ------------------------------ Pallas kernels -------------------------------
def _mm_kernel(x_ref, w_ref, s_ref, o_ref, *, relu):
    """Full-K matmul tile; epilogue adds folded-BN shift (+ ReLU)."""
    y = jnp.dot(x_ref[...], w_ref[...], preferred_element_type=jnp.float32)
    y = y + s_ref[...]
    if relu:
        y = jnp.maximum(y, 0.0)
    o_ref[...] = y.astype(o_ref.dtype)


def _mm_res_kernel(x_ref, w_ref, s_ref, r_ref, o_ref, *, relu):
    """Matmul tile + BN shift + fused residual add (+ ReLU)."""
    y = jnp.dot(x_ref[...], w_ref[...], preferred_element_type=jnp.float32)
    y = y + s_ref[...] + r_ref[...].astype(jnp.float32)
    if relu:
        y = jnp.maximum(y, 0.0)
    o_ref[...] = y.astype(o_ref.dtype)


def _conv_tap_kernel(xph_ref, w_ref, s_ref, o_ref, *, taps, cin, tr, wo, relu):
    """Tap-accumulated 3x3 conv (no im2col).

    xph_ref: (1, n_phase, Hq, Wq, Cin)  resident phase-split activation
    w_ref  : (9*Cin, tn)                folded conv*BN weights ((ki,kj,ci) rows)
    s_ref  : (1, tn)                    BN shift
    o_ref  : (1, tr, Wo, tn)            output row-tile
    """
    row0 = pl.program_id(1) * tr
    shift = s_ref[...]                                       # (1, tn) f32

    def row_body(r, carry):
        row = row0 + r
        p0, oi0, oj0 = taps[0]
        slab = xph_ref[0, p0, pl.ds(row + oi0, 1), pl.ds(oj0, wo), :][0]
        acc = jnp.dot(slab, w_ref[pl.ds(0, cin), :],
                      preferred_element_type=jnp.float32) + shift
        for t in range(1, len(taps)):
            p, oi, oj = taps[t]
            slab = xph_ref[0, p, pl.ds(row + oi, 1), pl.ds(oj, wo), :][0]
            acc = acc + jnp.dot(slab, w_ref[pl.ds(t * cin, cin), :],
                                preferred_element_type=jnp.float32)
        if relu:
            acc = jnp.maximum(acc, 0.0)
        o_ref[0, pl.ds(r, 1), :, :] = acc[None].astype(o_ref.dtype)
        return carry

    jax.lax.fori_loop(0, tr, row_body, 0)


def _maxpool_tap_kernel(xph_ref, o_ref, *, taps, tr, wo):
    """Fused 3x3 / stride-2 / pad-1 max-pool on the phase-split activation."""
    row0 = pl.program_id(1) * tr

    def row_body(r, carry):
        row = row0 + r
        p0, oi0, oj0 = taps[0]
        m = xph_ref[0, p0, pl.ds(row + oi0, 1), pl.ds(oj0, wo), :]
        for t in range(1, len(taps)):
            p, oi, oj = taps[t]
            m = jnp.maximum(m, xph_ref[0, p, pl.ds(row + oi, 1),
                                       pl.ds(oj, wo), :])
        o_ref[0, pl.ds(r, 1), :, :] = m
        return carry

    jax.lax.fori_loop(0, tr, row_body, 0)


def _spatial_mean_kernel(x_ref, o_ref):
    # x block: (B, H*W, tc) -> mean over the spatial axis (avg-pool to 1x1)
    o_ref[...] = jnp.mean(x_ref[...].astype(jnp.float32),
                          axis=1).astype(o_ref.dtype)


# ------------------------------ Pallas wrappers ------------------------------
def fused_matmul(x, w, shift, residual=None, *, relu, out_dtype=jnp.bfloat16):
    """out = [relu](x @ w + shift [+ residual]); full-K blocks, M/N parallel."""
    M, K = x.shape
    Kw, N = w.shape
    assert Kw == K
    tm_t, tn_t = _mm_tile_targets()
    Mp, tm = _m_tiling(M, tm_t)
    tn = _n_tile(N, tn_t)
    # Keep >=2 parallel tiles when possible so dual-TC chips (v7x) stay busy.
    if (Mp // tm) * (N // tn) < 2:
        if tn > 128 and (tn // 2) % 128 == 0:
            tn //= 2
        elif tm > 8 and (tm // 2) % 8 == 0 and Mp % (tm // 2) == 0:
            tm //= 2
    if Mp != M:
        x = jnp.pad(x, ((0, Mp - M), (0, 0)))
        if residual is not None:
            residual = jnp.pad(residual, ((0, Mp - M), (0, 0)))

    grid = (Mp // tm, N // tn)
    x_spec = pl.BlockSpec((tm, K), lambda i, j: (i, 0))
    w_spec = pl.BlockSpec((K, tn), lambda i, j: (0, j))
    s_spec = pl.BlockSpec((1, tn), lambda i, j: (0, j))
    o_spec = pl.BlockSpec((tm, tn), lambda i, j: (i, j))
    common = dict(
        out_shape=jax.ShapeDtypeStruct((Mp, N), out_dtype),
        grid=grid,
        out_specs=o_spec,
        compiler_params=pltpu.CompilerParams(
            dimension_semantics=("parallel", "parallel"),
            vmem_limit_bytes=_VMEM_LIMIT),
        cost_estimate=pl.CostEstimate(
            flops=2 * Mp * N * K, transcendentals=0,
            bytes_accessed=(Mp * K + K * N + Mp * N) * 2),
    )
    if residual is None:
        out = pl.pallas_call(functools.partial(_mm_kernel, relu=relu),
                             in_specs=[x_spec, w_spec, s_spec],
                             **common)(x, w, shift)
    else:
        out = pl.pallas_call(functools.partial(_mm_res_kernel, relu=relu),
                             in_specs=[x_spec, w_spec, s_spec, o_spec],
                             **common)(x, w, shift, residual)
    return out[:M] if Mp != M else out


def _phase_split(x, kh, kw, stride, pad, pad_value=0.0):
    """Pad x spatially once and split into stride-phases.

    Returns (xph, Ho, Wo, Hq, Wq) with xph shape (B, stride*stride, Hq, Wq, C)
    where xph[b, pi*stride+pj, q, r, c] == xpad[b, q*stride+pi, r*stride+pj, c],
    so every conv / pool tap becomes a unit-stride in-kernel slice.
    """
    B, H, W, C = x.shape
    s = stride
    Ho = (H + 2 * pad - kh) // s + 1
    Wo = (W + 2 * pad - kw) // s + 1
    Hq = Ho + (kh - 1) // s
    Wq = Wo + (kw - 1) // s
    Hp, Wp = Hq * s, Wq * s
    xp = jnp.pad(x, ((0, 0), (pad, Hp - H - pad), (pad, Wp - W - pad), (0, 0)),
                 constant_values=pad_value)
    if s == 1:
        xph = xp[:, None]
    else:
        xph = jnp.stack([xp[:, pi::s, pj::s, :]
                         for pi in range(s) for pj in range(s)], axis=1)
    return xph, Ho, Wo, Hq, Wq


def _taps(kh, kw, stride):
    s = stride
    return tuple(((ki % s) * s + (kj % s), ki // s, kj // s)
                 for ki in range(kh) for kj in range(kw))


def conv1x1_bn(x, f, *, stride, relu, residual=None):
    """1x1 conv + folded BN (+ fused ReLU / residual) as a plain matmul."""
    B = x.shape[0]
    if stride > 1:
        x = x[:, ::stride, ::stride, :]
    Ho, Wo, Cin = x.shape[1], x.shape[2], x.shape[3]
    cout = f["w"].shape[1]
    cols = x.reshape(B * Ho * Wo, Cin)
    res2d = None if residual is None else residual.reshape(B * Ho * Wo, cout)
    y = fused_matmul(cols, f["w"], f["shift"], residual=res2d, relu=relu)
    return y.reshape(B, Ho, Wo, cout)


def conv3x3_bn(x, f, *, stride, relu=True):
    """3x3 conv + folded BN via in-kernel tap accumulation (no im2col)."""
    B, H, W, Cin = x.shape
    w2, shift = f["w"], f["shift"]
    cout = w2.shape[1]
    assert w2.shape[0] == 9 * Cin
    xph, Ho, Wo, Hq, Wq = _phase_split(x, 3, 3, stride, 1, pad_value=0.0)
    taps = _taps(3, 3, stride)
    n_phase = stride * stride
    tr = _divisor_tile(Ho, 32)
    tn = _n_tile(cout, 256)
    grid = (B, Ho // tr, cout // tn)
    kernel = functools.partial(_conv_tap_kernel, taps=taps, cin=Cin,
                               tr=tr, wo=Wo, relu=relu)
    return pl.pallas_call(
        kernel,
        out_shape=jax.ShapeDtypeStruct((B, Ho, Wo, cout), jnp.bfloat16),
        grid=grid,
        in_specs=[
            pl.BlockSpec((1, n_phase, Hq, Wq, Cin),
                         lambda b, i, j: (b, 0, 0, 0, 0)),
            pl.BlockSpec((9 * Cin, tn), lambda b, i, j: (0, j)),
            pl.BlockSpec((1, tn), lambda b, i, j: (0, j)),
        ],
        out_specs=pl.BlockSpec((1, tr, Wo, tn), lambda b, i, j: (b, i, 0, j)),
        compiler_params=pltpu.CompilerParams(
            dimension_semantics=("parallel", "parallel", "parallel"),
            vmem_limit_bytes=_VMEM_LIMIT),
        cost_estimate=pl.CostEstimate(
            flops=2 * B * Ho * Wo * 9 * Cin * cout, transcendentals=0,
            bytes_accessed=(xph.size + w2.size + B * Ho * Wo * cout) * 2),
    )(xph, w2, shift)


def maxpool2d_3x3_s2(x):
    """Fused 3x3 / stride-2 / pad-1 max-pool: single Pallas pass."""
    B, H, W, C = x.shape
    xph, Ho, Wo, Hq, Wq = _phase_split(x, 3, 3, 2, 1, pad_value=-jnp.inf)
    taps = _taps(3, 3, 2)
    tr = _divisor_tile(Ho, 32)
    kernel = functools.partial(_maxpool_tap_kernel, taps=taps, tr=tr, wo=Wo)
    return pl.pallas_call(
        kernel,
        out_shape=jax.ShapeDtypeStruct((B, Ho, Wo, C), x.dtype),
        grid=(B, Ho // tr),
        in_specs=[pl.BlockSpec((1, 4, Hq, Wq, C),
                               lambda b, i: (b, 0, 0, 0, 0))],
        out_specs=pl.BlockSpec((1, tr, Wo, C), lambda b, i: (b, i, 0, 0)),
        compiler_params=pltpu.CompilerParams(
            dimension_semantics=("parallel", "parallel"),
            vmem_limit_bytes=_VMEM_LIMIT),
    )(xph)


def pallas_global_avgpool(x):
    """Adaptive avg-pool to 1x1, channel-tiled: (B,H,W,C) -> (B,C)."""
    B, H, W, C = x.shape
    x2 = x.reshape(B, H * W, C)
    tc = 128 if C % 128 == 0 else C
    return pl.pallas_call(
        _spatial_mean_kernel,
        out_shape=jax.ShapeDtypeStruct((B, C), x.dtype),
        grid=(C // tc,),
        in_specs=[pl.BlockSpec((B, H * W, tc), lambda j: (0, 0, j))],
        out_specs=pl.BlockSpec((B, tc), lambda j: (0, j)),
        compiler_params=pltpu.CompilerParams(
            dimension_semantics=("parallel",),
            vmem_limit_bytes=_VMEM_LIMIT),
    )(x2)


# ------------------------- stem conv (im2col) glue ----------------------------
def _im2col(x, kh, kw, stride, pad):
    """(B,H,W,C) -> (B*Ho*Wo, kh*kw*C) with (ki,kj,c) ordering (stem only).

    # TODO(synk): the 7x7/Cin=3 stem stays on im2col (tap accumulation with
    # K=3 per tap would starve the MXU); a space-to-depth stem would fix both.
    """
    B, H, W, C = x.shape
    xp = jnp.pad(x, ((0, 0), (pad, pad), (pad, pad), (0, 0)))
    Ho = (H + 2 * pad - kh) // stride + 1
    Wo = (W + 2 * pad - kw) // stride + 1
    pieces = []
    for i in range(kh):
        h_end = i + (Ho - 1) * stride + 1
        for j in range(kw):
            w_end = j + (Wo - 1) * stride + 1
            pieces.append(xp[:, i:h_end:stride, j:w_end:stride, :])
    cols = jnp.concatenate(pieces, axis=-1)
    return cols.reshape(B * Ho * Wo, kh * kw * C), Ho, Wo


def conv_stem_bn(x, f):
    """Stem: 7x7 / stride-2 / pad-3 conv + folded BN + ReLU."""
    B = x.shape[0]
    cols, Ho, Wo = _im2col(x, 7, 7, 2, 3)
    y = fused_matmul(cols, f["w"], f["shift"], relu=True)
    return y.reshape(B, Ho, Wo, f["w"].shape[1])


# ------------------ parameter construction (synthetic init) ------------------
def _conv_init(key, cout, cin, kh, kw):
    fan_in = cin * kh * kw
    return jax.random.normal(key, (cout, cin, kh, kw), jnp.float32) * (
        1.0 / jnp.sqrt(jnp.float32(fan_in)))


def _bn_init(key, c):
    k1, k2, k3 = jax.random.split(key, 3)
    gamma = 1.0 + 0.1 * jax.random.normal(k1, (c,), jnp.float32)
    beta = 0.1 * jax.random.normal(k2, (c,), jnp.float32)
    mean = 0.05 * jax.random.normal(k3, (c,), jnp.float32)
    var = jnp.ones((c,), jnp.float32)
    return (gamma, beta, mean, var)


def _fold_conv_bn(w_conv, bn):
    """Fold inference BN into the conv: W' = W*scale (bf16); shift = b - m*s."""
    gamma, beta, mean, var = bn
    scale = gamma * jax.lax.rsqrt(var + 1e-5)
    shift = beta - mean * scale
    cout, cin, kh, kw = w_conv.shape
    w2 = jnp.transpose(w_conv, (2, 3, 1, 0)).reshape(kh * kw * cin, cout)
    return {"w": (w2 * scale[None, :]).astype(jnp.bfloat16),
            "shift": shift.reshape(1, cout).astype(jnp.float32)}


def _make_bottleneck_raw(key, inplanes, planes, stride):
    keys = jax.random.split(key, 8)
    p = {
        "conv1": _conv_init(keys[0], planes, inplanes, 1, 1),
        "bn1": _bn_init(keys[1], planes),
        "conv2": _conv_init(keys[2], planes, planes, 3, 3),
        "bn2": _bn_init(keys[3], planes),
        "conv3": _conv_init(keys[4], planes * 4, planes, 1, 1),
        "bn3": _bn_init(keys[5], planes * 4),
        "downsample": None,
    }
    if stride != 1 or inplanes != planes * 4:
        p["downsample"] = {
            "conv": _conv_init(keys[6], planes * 4, inplanes, 1, 1),
            "bn": _bn_init(keys[7], planes * 4),
        }
    return p


def make_encoder_params(key, embed_size, base_width):
    """ResNet-50 topology ([3,4,6,3] bottlenecks, expansion 4) + Linear embed.

    # TODO(synk): pretrained torchvision weights cannot be loaded in-script;
    # parameters are deterministic synthetic values.
    """
    blocks_per_layer = [3, 4, 6, 3]
    layer_planes = [base_width, base_width * 2, base_width * 4, base_width * 8]
    layer_strides = [1, 2, 2, 2]
    keys = jax.random.split(key, 7)
    params = {"stem": _fold_conv_bn(_conv_init(keys[0], base_width, 3, 7, 7),
                                    _bn_init(keys[1], base_width))}
    inplanes = base_width
    layers = []
    for li in range(4):
        nb = blocks_per_layer[li]
        lkeys = jax.random.split(keys[2 + li], nb)
        blocks = []
        for bi in range(nb):
            s = layer_strides[li] if bi == 0 else 1
            raw = _make_bottleneck_raw(lkeys[bi], inplanes, layer_planes[li], s)
            fb = {"conv1": _fold_conv_bn(raw["conv1"], raw["bn1"]),
                  "conv2": _fold_conv_bn(raw["conv2"], raw["bn2"]),
                  "conv3": _fold_conv_bn(raw["conv3"], raw["bn3"])}
            if raw["downsample"] is not None:
                fb["downsample"] = _fold_conv_bn(raw["downsample"]["conv"],
                                                 raw["downsample"]["bn"])
            blocks.append(fb)
            inplanes = layer_planes[li] * 4
        layers.append(blocks)
    params["layers"] = layers
    in_features = inplanes                               # 2048 at base_width=64
    kfw, kfb = jax.random.split(keys[6])
    fc_w = jax.random.normal(kfw, (embed_size, in_features), jnp.float32) * (
        1.0 / in_features ** 0.5)
    fc_b = 0.1 * jax.random.normal(kfb, (embed_size,), jnp.float32)
    params["fc"] = {"w": fc_w.T.astype(jnp.bfloat16),
                    "b": fc_b.reshape(1, embed_size).astype(jnp.float32)}
    return params


# --------------------------------- forward -----------------------------------
def _bottleneck_forward(x, p, *, stride):
    out = conv1x1_bn(x, p["conv1"], stride=1, relu=True)
    out = conv3x3_bn(out, p["conv2"], stride=stride, relu=True)
    if "downsample" in p:
        identity = conv1x1_bn(x, p["downsample"], stride=stride, relu=False)
    else:
        identity = x
    # conv3 + BN + residual add + ReLU fused into one matmul epilogue
    return conv1x1_bn(out, p["conv3"], stride=1, relu=True, residual=identity)


@jax.jit
def encoder_cnn_forward(params, images_nchw):
    """EncoderCNN.forward: resnet(images) -> flatten -> Linear(embed_size)."""
    x = jnp.transpose(images_nchw, (0, 2, 3, 1)).astype(jnp.bfloat16)   # NHWC
    # stem: 7x7/2 conv + BN + ReLU, then fused 3x3/2 max-pool
    x = conv_stem_bn(x, params["stem"])
    x = maxpool2d_3x3_s2(x)
    # 4 bottleneck stages
    for li, layer in enumerate(params["layers"]):
        for bi, block in enumerate(layer):
            stride = 2 if (li > 0 and bi == 0) else 1
            x = _bottleneck_forward(x, block, stride=stride)
    # adaptive avg-pool to 1x1 + flatten (== features.view(B, -1))
    feats = pallas_global_avgpool(x)                      # (B, in_features)
    # embed = Linear(in_features, embed_size)
    return fused_matmul(feats, params["fc"]["w"], params["fc"]["b"],
                        relu=False, out_dtype=jnp.float32)


# -----------------------------------------------------------------------------
if __name__ == "__main__":
    EMBED_SIZE = 32
    BASE_WIDTH = 8          # real ResNet-50 uses 64 (-> fc.in_features = 2048)

    key = jax.random.PRNGKey(0)
    kparams, kimg = jax.random.split(key)

    params = make_encoder_params(kparams, EMBED_SIZE, BASE_WIDTH)
    images = jax.random.normal(kimg, (2, 3, 64, 64), jnp.float32)   # NCHW

    features = jax.block_until_ready(encoder_cnn_forward(params, images))

    assert features.shape == (2, EMBED_SIZE), features.shape
    assert bool(jnp.all(jnp.isfinite(features)))
    print("KERNEL_OK")
</pallas_src>

<mosaic_0001>
module attributes {stable_mosaic.version = 11 : i64} {
  func.func @_mm_kernel(%arg0: i32, %arg1: i32, %arg2: memref<256x147xbf16, #tpu.memory_space<vmem>>, %arg3: memref<147x8xbf16, #tpu.memory_space<vmem>>, %arg4: memref<1x8xf32, #tpu.memory_space<vmem>>, %arg5: memref<256x8xbf16, #tpu.memory_space<vmem>>) attributes {dimension_semantics = [#tpu.dimension_semantics<parallel>, #tpu.dimension_semantics<parallel>], iteration_bounds = array<i64: 8, 1>, scalar_prefetch = 0 : i64, scratch_operands = 0 : i64, tpu.core_type = #tpu.core_type<tc>, window_params = [{transform_indices = @transform_0, window_bounds = array<i64: 256, 147>}, {transform_indices = @transform_1, window_bounds = array<i64: 147, 8>}, {transform_indices = @transform_2, window_bounds = array<i64: 1, 8>}, {transform_indices = @transform_3, window_bounds = array<i64: 256, 8>}]} {
    %c0 = arith.constant 0 : index
    %c0_0 = arith.constant 0 : index
    %0 = vector.load %arg2[%c0, %c0_0] : memref<256x147xbf16, #tpu.memory_space<vmem>>, vector<256x147xbf16>
    %c0_1 = arith.constant 0 : index
    %c0_2 = arith.constant 0 : index
    %1 = vector.load %arg3[%c0_1, %c0_2] : memref<147x8xbf16, #tpu.memory_space<vmem>>, vector<147x8xbf16>
    %cst = arith.constant dense<0.000000e+00> : vector<256x8xf32>
    %2 = tpu.matmul %0, %1, %cst {dimension_numbers = #tpu.dot_dimension_numbers<[1], [0], [0], [1], [0, 0, 1, 1], [], []>} : vector<256x147xbf16>, vector<147x8xbf16>, vector<256x8xf32> -> vector<256x8xf32>
    %c0_3 = arith.constant 0 : index
    %c0_4 = arith.constant 0 : index
    %3 = vector.load %arg4[%c0_3, %c0_4] : memref<1x8xf32, #tpu.memory_space<vmem>>, vector<1x8xf32>
    %4 = vector.broadcast %3 : vector<1x8xf32> to vector<256x8xf32>
    %5 = arith.addf %2, %4 : vector<256x8xf32>
    %cst_5 = arith.constant 0.000000e+00 : f32
    %6 = vector.broadcast %cst_5 : f32 to vector<256x8xf32>
    %7 = arith.maximumf %5, %6 : vector<256x8xf32>
    %8 = arith.truncf %7 : vector<256x8xf32> to vector<256x8xbf16>
    %c0_6 = arith.constant 0 : index
    %c0_7 = arith.constant 0 : index
    %9 = vector.load %arg5[%c0_6, %c0_7] : memref<256x8xbf16, #tpu.memory_space<vmem>>, vector<256x8xbf16>
    tpu.vector_store %arg5[%c0_6, %c0_7], %8 {strides = array<i32>} : memref<256x8xbf16, #tpu.memory_space<vmem>>, vector<256x8xbf16>,
    return
  }
  func.func @transform_0(%arg0: i32, %arg1: i32) -> (i32, i32) {
    %c0_i32 = arith.constant 0 : i32
    %c0_i32_0 = arith.constant 0 : i32
    return %arg0, %c0_i32 : i32, i32
  }
  func.func @transform_1(%arg0: i32, %arg1: i32) -> (i32, i32) {
    %c0_i32 = arith.constant 0 : i32
    %c0_i32_0 = arith.constant 0 : i32
    return %c0_i32, %arg1 : i32, i32
  }
  func.func @transform_2(%arg0: i32, %arg1: i32) -> (i32, i32) {
    %c0_i32 = arith.constant 0 : i32
    %c0_i32_0 = arith.constant 0 : i32
    return %c0_i32, %arg1 : i32, i32
  }
  func.func @transform_3(%arg0: i32, %arg1: i32) -> (i32, i32) {
    %c0_i32 = arith.constant 0 : i32
    return %arg0, %arg1 : i32, i32
  }
}

module attributes {stable_mosaic.version = 11 : i64} {
  func.func @_maxpool_tap_kernel(%arg0: i32, %arg1: i32, %arg2: memref<1x4x17x17x8xbf16, #tpu.memory_space<vmem>>, %arg3: memref<1x16x16x8xbf16, #tpu.memory_space<vmem>>) attributes {dimension_semantics = [#tpu.dimension_semantics<parallel>, #tpu.dimension_semantics<parallel>], iteration_bounds = array<i64: 2, 1>, scalar_prefetch = 0 : i64, scratch_operands = 0 : i64, tpu.core_type = #tpu.core_type<tc>, window_params = [{transform_indices = @transform_0, window_bounds = array<i64: 1, 4, 17, 17, 8>}, {transform_indices = @transform_1, window_bounds = array<i64: 1, 16, 16, 8>}]} {
    %c16_i32 = arith.constant 16 : i32
    %0 = arith.muli %arg1, %c16_i32 : i32
    %c0_i32 = arith.constant 0 : i32
    %c16_i32_0 = arith.constant 16 : i32
    %1 = arith.addi %c0_i32, %c16_i32_0 : i32
    %c1_i32 = arith.constant 1 : i32
    scf.for %arg4 = %c0_i32 to %1 step %c1_i32  : i32 {
      %2 = arith.addi %0, %arg4 : i32
      %c0_i32_2 = arith.constant 0 : i32
      %3 = arith.addi %2, %c0_i32_2 : i32
      %c0 = arith.constant 0 : index
      %c0_3 = arith.constant 0 : index
      %4 = arith.index_cast %3 : i32 to index
      %c0_4 = arith.constant 0 : index
      %c0_5 = arith.constant 0 : index
      %5 = vector.load %arg2[%c0, %c0_3, %4, %c0_4, %c0_5] : memref<1x4x17x17x8xbf16, #tpu.memory_space<vmem>>, vector<1x1x1x16x8xbf16>
      %6 = vector.shape_cast %5 : vector<1x1x1x16x8xbf16> to vector<1x16x8xbf16>
      %c0_i32_6 = arith.constant 0 : i32
      %7 = arith.addi %2, %c0_i32_6 : i32
      %c0_7 = arith.constant 0 : index
      %c1 = arith.constant 1 : index
      %8 = arith.index_cast %7 : i32 to index
      %c0_8 = arith.constant 0 : index
      %c0_9 = arith.constant 0 : index
      %9 = vector.load %arg2[%c0_7, %c1, %8, %c0_8, %c0_9] : memref<1x4x17x17x8xbf16, #tpu.memory_space<vmem>>, vector<1x1x1x16x8xbf16>
      %10 = vector.shape_cast %9 : vector<1x1x1x16x8xbf16> to vector<1x16x8xbf16>
      %11 = arith.maximumf %6, %10 : vector<1x16x8xbf16>
      %c0_i32_10 = arith.constant 0 : i32
      %12 = arith.addi %2, %c0_i32_10 : i32
      %c0_11 = arith.constant 0 : index
      %c0_12 = arith.constant 0 : index
      %13 = arith.index_cast %12 : i32 to index
      %c1_13 = arith.constant 1 : index
      %c0_14 = arith.constant 0 : index
      %14 = vector.load %arg2[%c0_11, %c0_12, %13, %c1_13, %c0_14] : memref<1x4x17x17x8xbf16, #tpu.memory_space<vmem>>, vector<1x1x1x16x8xbf16>
      %15 = vector.shape_cast %14 : vector<1x1x1x16x8xbf16> to vector<1x16x8xbf16>
      %16 = arith.maximumf %11, %15 : vector<1x16x8xbf16>
      %c0_i32_15 = arith.constant 0 : i32
      %17 = arith.addi %2, %c0_i32_15 : i32
      %c0_16 = arith.constant 0 : index
      %c2 = arith.constant 2 : index
      %18 = arith.index_cast %17 : i32 to index
      %c0_17 = arith.constant 0 : index
      %c0_18 = arith.constant 0 : index
      %19 = vector.load %arg2[%c0_16, %c2, %18, %c0_17, %c0_18] : memref<1x4x17x17x8xbf16, #tpu.memory_space<vmem>>, vector<1x1x1x16x8xbf16>
      %20 = vector.shape_cast %19 : vector<1x1x1x16x8xbf16> to vector<1x16x8xbf16>
      %21 = arith.maximumf %16, %20 : vector<1x16x8xbf16>
      %c0_i32_19 = arith.constant 0 : i32
      %22 = arith.addi %2, %c0_i32_19 : i32
      %c0_20 = arith.constant 0 : index
      %c3 = arith.constant 3 : index
      %23 = arith.index_cast %22 : i32 to index
      %c0_21 = arith.constant 0 : index
      %c0_22 = arith.constant 0 : index
      %24 = vector.load %arg2[%c0_20, %c3, %23, %c0_21, %c0_22] : memref<1x4x17x17x8xbf16, #tpu.memory_space<vmem>>, vector<1x1x1x16x8xbf16>
      %25 = vector.shape_cast %24 : vector<1x1x1x16x8xbf16> to vector<1x16x8xbf16>
      %26 = arith.maximumf %21, %25 : vector<1x16x8xbf16>
      %c0_i32_23 = arith.constant 0 : i32
      %27 = arith.addi %2, %c0_i32_23 : i32
      %c0_24 = arith.constant 0 : index
      %c2_25 = arith.constant 2 : index
      %28 = arith.index_cast %27 : i32 to index
      %c1_26 = arith.constant 1 : index
      %c0_27 = arith.constant 0 : index
      %29 = vector.load %arg2[%c0_24, %c2_25, %28, %c1_26, %c0_27] : memref<1x4x17x17x8xbf16, #tpu.memory_space<vmem>>, vector<1x1x1x16x8xbf16>
      %30 = vector.shape_cast %29 : vector<1x1x1x16x8xbf16> to vector<1x16x8xbf16>
      %31 = arith.maximumf %26, %30 : vector<1x16x8xbf16>
      %c1_i32_28 = arith.constant 1 : i32
      %32 = arith.addi %2, %c1_i32_28 : i32
      %c0_29 = arith.constant 0 : index
      %c0_30 = arith.constant 0 : index
      %33 = arith.index_cast %32 : i32 to index
      %c0_31 = arith.constant 0 : index
      %c0_32 = arith.constant 0 : index
      %34 = vector.load %arg2[%c0_29, %c0_30, %33, %c0_31, %c0_32] : memref<1x4x17x17x8xbf16, #tpu.memory_space<vmem>>, vector<1x1x1x16x8xbf16>
      %35 = vector.shape_cast %34 : vector<1x1x1x16x8xbf16> to vector<1x16x8xbf16>
      %36 = arith.maximumf %31, %35 : vector<1x16x8xbf16>
      %c1_i32_33 = arith.constant 1 : i32
      %37 = arith.addi %2, %c1_i32_33 : i32
      %c0_34 = arith.constant 0 : index
      %c1_35 = arith.constant 1 : index
      %38 = arith.index_cast %37 : i32 to index
      %c0_36 = arith.constant 0 : index
      %c0_37 = arith.constant 0 : index
      %39 = vector.load %arg2[%c0_34, %c1_35, %38, %c0_36, %c0_37] : memref<1x4x17x17x8xbf16, #tpu.memory_space<vmem>>, vector<1x1x1x16x8xbf16>
      %40 = vector.shape_cast %39 : vector<1x1x1x16x8xbf16> to vector<1x16x8xbf16>
      %41 = arith.maximumf %36, %40 : vector<1x16x8xbf16>
      %c1_i32_38 = arith.constant 1 : i32
      %42 = arith.addi %2, %c1_i32_38 : i32
      %c0_39 = arith.constant 0 : index
      %c0_40 = arith.constant 0 : index
      %43 = arith.index_cast %42 : i32 to index
      %c1_41 = arith.constant 1 : index
      %c0_42 = arith.constant 0 : index
      %44 = vector.load %arg2[%c0_39, %c0_40, %43, %c1_41, %c0_42] : memref<1x4x17x17x8xbf16, #tpu.memory_space<vmem>>, vector<1x1x1x16x8xbf16>
      %45 = vector.shape_cast %44 : vector<1x1x1x16x8xbf16> to vector<1x16x8xbf16>
      %46 = arith.maximumf %41, %45 : vector<1x16x8xbf16>
      %c0_43 = arith.constant 0 : index
      %47 = arith.index_cast %arg4 : i32 to index
      %c0_44 = arith.constant 0 : index
      %c0_45 = arith.constant 0 : index
      %48 = vector.load %arg3[%c0_43, %47, %c0_44, %c0_45] : memref<1x16x16x8xbf16, #tpu.memory_space<vmem>>, vector<1x1x16x8xbf16>
      %49 = vector.shape_cast %48 : vector<1x1x16x8xbf16> to vector<1x16x8xbf16>
      %50 = vector.shape_cast %46 : vector<1x16x8xbf16> to vector<1x1x16x8xbf16>
      tpu.vector_store %arg3[%c0_43, %47, %c0_44, %c0_45], %50 {strides = array<i32>} : memref<1x16x16x8xbf16, #tpu.memory_space<vmem>>, vector<1x1x16x8xbf16>,
    }
    %c16_i32_1 = arith.constant 16 : i32
    return
  }
  func.func @transform_0(%arg0: i32, %arg1: i32) -> (i32, i32, i32, i32, i32) {
    %c0_i32 = arith.constant 0 : i32
    %c0_i32_0 = arith.constant 0 : i32
    %c0_i32_1 = arith.constant 0 : i32
    %c0_i32_2 = arith.constant 0 : i32
    %c0_i32_3 = arith.constant 0 : i32
    return %arg0, %c0_i32, %c0_i32_0, %c0_i32_1, %c0_i32_2 : i32, i32, i32, i32, i32
  }
  func.func @transform_1(%arg0: i32, %arg1: i32) -> (i32, i32, i32, i32) {
    %c0_i32 = arith.constant 0 : i32
    %c0_i32_0 = arith.constant 0 : i32
    %c0_i32_1 = arith.constant 0 : i32
    return %arg0, %arg1, %c0_i32, %c0_i32_0 : i32, i32, i32, i32
  }
}

module attributes {stable_mosaic.version = 11 : i64} {
  func.func @_mm_kernel(%arg0: i32, %arg1: i32, %arg2: memref<256x8xbf16, #tpu.memory_space<vmem>>, %arg3: memref<8x8xbf16, #tpu.memory_space<vmem>>, %arg4: memref<1x8xf32, #tpu.memory_space<vmem>>, %arg5: memref<256x8xbf16, #tpu.memory_space<vmem>>) attributes {dimension_semantics = [#tpu.dimension_semantics<parallel>, #tpu.dimension_semantics<parallel>], iteration_bounds = array<i64: 2, 1>, scalar_prefetch = 0 : i64, scratch_operands = 0 : i64, tpu.core_type = #tpu.core_type<tc>, window_params = [{transform_indices = @transform_0, window_bounds = array<i64: 256, 8>}, {transform_indices = @transform_1, window_bounds = array<i64: 8, 8>}, {transform_indices = @transform_2, window_bounds = array<i64: 1, 8>}, {transform_indices = @transform_3, window_bounds = array<i64: 256, 8>}]} {
    %c0 = arith.constant 0 : index
    %c0_0 = arith.constant 0 : index
    %0 = vector.load %arg2[%c0, %c0_0] : memref<256x8xbf16, #tpu.memory_space<vmem>>, vector<256x8xbf16>
    %c0_1 = arith.constant 0 : index
    %c0_2 = arith.constant 0 : index
    %1 = vector.load %arg3[%c0_1, %c0_2] : memref<8x8xbf16, #tpu.memory_space<vmem>>, vector<8x8xbf16>
    %cst = arith.constant dense<0.000000e+00> : vector<256x8xf32>
    %2 = tpu.matmul %0, %1, %cst {dimension_numbers = #tpu.dot_dimension_numbers<[1], [0], [0], [1], [0, 0, 1, 1], [], []>} : vector<256x8xbf16>, vector<8x8xbf16>, vector<256x8xf32> -> vector<256x8xf32>
    %c0_3 = arith.constant 0 : index
    %c0_4 = arith.constant 0 : index
    %3 = vector.load %arg4[%c0_3, %c0_4] : memref<1x8xf32, #tpu.memory_space<vmem>>, vector<1x8xf32>
    %4 = vector.broadcast %3 : vector<1x8xf32> to vector<256x8xf32>
    %5 = arith.addf %2, %4 : vector<256x8xf32>
    %cst_5 = arith.constant 0.000000e+00 : f32
    %6 = vector.broadcast %cst_5 : f32 to vector<256x8xf32>
    %7 = arith.maximumf %5, %6 : vector<256x8xf32>
    %8 = arith.truncf %7 : vector<256x8xf32> to vector<256x8xbf16>
    %c0_6 = arith.constant 0 : index
    %c0_7 = arith.constant 0 : index
    %9 = vector.load %arg5[%c0_6, %c0_7] : memref<256x8xbf16, #tpu.memory_space<vmem>>, vector<256x8xbf16>
    tpu.vector_store %arg5[%c0_6, %c0_7], %8 {strides = array<i32>} : memref<256x8xbf16, #tpu.memory_space<vmem>>, vector<256x8xbf16>,
    return
  }
  func.func @transform_0(%arg0: i32, %arg1: i32) -> (i32, i32) {
    %c0_i32 = arith.constant 0 : i32
    %c0_i32_0 = arith.constant 0 : i32
    return %arg0, %c0_i32 : i32, i32
  }
  func.func @transform_1(%arg0: i32, %arg1: i32) -> (i32, i32) {
    %c0_i32 = arith.constant 0 : i32
    %c0_i32_0 = arith.constant 0 : i32
    return %c0_i32, %arg1 : i32, i32
  }
  func.func @transform_2(%arg0: i32, %arg1: i32) -> (i32, i32) {
    %c0_i32 = arith.constant 0 : i32
    %c0_i32_0 = arith.constant 0 : i32
    return %c0_i32, %arg1 : i32, i32
  }
  func.func @transform_3(%arg0: i32, %arg1: i32) -> (i32, i32) {
    %c0_i32 = arith.constant 0 : i32
    return %arg0, %arg1 : i32, i32
  }
}

module attributes {stable_mosaic.version = 11 : i64} {
  func.func @_conv_tap_kernel(%arg0: i32, %arg1: i32, %arg2: i32, %arg3: memref<1x1x18x18x8xbf16, #tpu.memory_space<vmem>>, %arg4: memref<72x8xbf16, #tpu.memory_space<vmem>>, %arg5: memref<1x8xf32, #tpu.memory_space<vmem>>, %arg6: memref<1x16x16x8xbf16, #tpu.memory_space<vmem>>) attributes {dimension_semantics = [#tpu.dimension_semantics<parallel>, #tpu.dimension_semantics<parallel>, #tpu.dimension_semantics<parallel>], iteration_bounds = array<i64: 2, 1, 1>, scalar_prefetch = 0 : i64, scratch_operands = 0 : i64, tpu.core_type = #tpu.core_type<tc>, window_params = [{transform_indices = @transform_0, window_bounds = array<i64: 1, 1, 18, 18, 8>}, {transform_indices = @transform_1, window_bounds = array<i64: 72, 8>}, {transform_indices = @transform_2, window_bounds = array<i64: 1, 8>}, {transform_indices = @transform_3, window_bounds = array<i64: 1, 16, 16, 8>}]} {
    %c16_i32 = arith.constant 16 : i32
    %0 = arith.muli %arg1, %c16_i32 : i32
    %c0 = arith.constant 0 : index
    %c0_0 = arith.constant 0 : index
    %1 = vector.load %arg5[%c0, %c0_0] : memref<1x8xf32, #tpu.memory_space<vmem>>, vector<1x8xf32>
    %c0_i32 = arith.constant 0 : i32
    %c16_i32_1 = arith.constant 16 : i32
    %2 = arith.addi %c0_i32, %c16_i32_1 : i32
    %c1_i32 = arith.constant 1 : i32
    scf.for %arg7 = %c0_i32 to %2 step %c1_i32  : i32 {
      %3 = arith.addi %0, %arg7 : i32
      %c0_i32_3 = arith.constant 0 : i32
      %4 = arith.addi %3, %c0_i32_3 : i32
      %c0_4 = arith.constant 0 : index
      %c0_5 = arith.constant 0 : index
      %5 = arith.index_cast %4 : i32 to index
      %c0_6 = arith.constant 0 : index
      %c0_7 = arith.constant 0 : index
      %6 = vector.load %arg3[%c0_4, %c0_5, %5, %c0_6, %c0_7] : memref<1x1x18x18x8xbf16, #tpu.memory_space<vmem>>, vector<1x1x1x16x8xbf16>
      %7 = vector.shape_cast %6 : vector<1x1x1x16x8xbf16> to vector<1x16x8xbf16>
      %8 = vector.shape_cast %7 : vector<1x16x8xbf16> to vector<16x8xbf16>
      %c0_8 = arith.constant 0 : index
      %c0_9 = arith.constant 0 : index
      %9 = vector.load %arg4[%c0_8, %c0_9] : memref<72x8xbf16, #tpu.memory_space<vmem>>, vector<8x8xbf16>
      %cst = arith.constant dense<0.000000e+00> : vector<16x8xf32>
      %10 = tpu.matmul %8, %9, %cst {dimension_numbers = #tpu.dot_dimension_numbers<[1], [0], [0], [1], [0, 0, 1, 1], [], []>} : vector<16x8xbf16>, vector<8x8xbf16>, vector<16x8xf32> -> vector<16x8xf32>
      %11 = vector.broadcast %1 : vector<1x8xf32> to vector<16x8xf32>
      %12 = arith.addf %10, %11 : vector<16x8xf32>
      %c0_i32_10 = arith.constant 0 : i32
      %13 = arith.addi %3, %c0_i32_10 : i32
      %c0_11 = arith.constant 0 : index
      %c0_12 = arith.constant 0 : index
      %14 = arith.index_cast %13 : i32 to index
      %c1 = arith.constant 1 : index
      %c0_13 = arith.constant 0 : index
      %15 = vector.load %arg3[%c0_11, %c0_12, %14, %c1, %c0_13] : memref<1x1x18x18x8xbf16, #tpu.memory_space<vmem>>, vector<1x1x1x16x8xbf16>
      %16 = vector.shape_cast %15 : vector<1x1x1x16x8xbf16> to vector<1x16x8xbf16>
      %17 = vector.shape_cast %16 : vector<1x16x8xbf16> to vector<16x8xbf16>
      %c8 = arith.constant 8 : index
      %c0_14 = arith.constant 0 : index
      %18 = vector.load %arg4[%c8, %c0_14] : memref<72x8xbf16, #tpu.memory_space<vmem>>, vector<8x8xbf16>
      %cst_15 = arith.constant dense<0.000000e+00> : vector<16x8xf32>
      %19 = tpu.matmul %17, %18, %cst_15 {dimension_numbers = #tpu.dot_dimension_numbers<[1], [0], [0], [1], [0, 0, 1, 1], [], []>} : vector<16x8xbf16>, vector<8x8xbf16>, vector<16x8xf32> -> vector<16x8xf32>
      %20 = arith.addf %12, %19 : vector<16x8xf32>
      %c0_i32_16 = arith.constant 0 : i32
      %21 = arith.addi %3, %c0_i32_16 : i32
      %c0_17 = arith.constant 0 : index
      %c0_18 = arith.constant 0 : index
      %22 = arith.index_cast %21 : i32 to index
      %c2 = arith.constant 2 : index
      %c0_19 = arith.constant 0 : index
      %23 = vector.load %arg3[%c0_17, %c0_18, %22, %c2, %c0_19] : memref<1x1x18x18x8xbf16, #tpu.memory_space<vmem>>, vector<1x1x1x16x8xbf16>
      %24 = vector.shape_cast %23 : vector<1x1x1x16x8xbf16> to vector<1x16x8xbf16>
      %25 = vector.shape_cast %24 : vector<1x16x8xbf16> to vector<16x8xbf16>
      %c16 = arith.constant 16 : index
      %c0_20 = arith.constant 0 : index
      %26 = vector.load %arg4[%c16, %c0_20] : memref<72x8xbf16, #tpu.memory_space<vmem>>, vector<8x8xbf16>
      %cst_21 = arith.constant dense<0.000000e+00> : vector<16x8xf32>
      %27 = tpu.matmul %25, %26, %cst_21 {dimension_numbers = #tpu.dot_dimension_numbers<[1], [0], [0], [1], [0, 0, 1, 1], [], []>} : vector<16x8xbf16>, vector<8x8xbf16>, vector<16x8xf32> -> vector<16x8xf32>
      %28 = arith.addf %20, %27 : vector<16x8xf32>
      %c1_i32_22 = arith.constant 1 : i32
      %29 = arith.addi %3, %c1_i32_22 : i32
      %c0_23 = arith.constant 0 : index
      %c0_24 = arith.constant 0 : index
      %30 = arith.index_cast %29 : i32 to index
      %c0_25 = arith.constant 0 : index
      %c0_26 = arith.constant 0 : index
      %31 = vector.load %arg3[%c0_23, %c0_24, %30, %c0_25, %c0_26] : memref<1x1x18x18x8xbf16, #tpu.memory_space<vmem>>, vector<1x1x1x16x8xbf16>
      %32 = vector.shape_cast %31 : vector<1x1x1x16x8xbf16> to vector<1x16x8xbf16>
      %33 = vector.shape_cast %32 : vector<1x16x8xbf16> to vector<16x8xbf16>
      %c24 = arith.constant 24 : index
      %c0_27 = arith.constant 0 : index
      %34 = vector.load %arg4[%c24, %c0_27] : memref<72x8xbf16, #tpu.memory_space<vmem>>, vector<8x8xbf16>
      %cst_28 = arith.constant dense<0.000000e+00> : vector<16x8xf32>
      %35 = tpu.matmul %33, %34, %cst_28 {dimension_numbers = #tpu.dot_dimension_numbers<[1], [0], [0], [1], [0, 0, 1, 1], [], []>} : vector<16x8xbf16>, vector<8x8xbf16>, vector<16x8xf32> -> vector<16x8xf32>
      %36 = arith.addf %28, %35 : vector<16x8xf32>
      %c1_i32_29 = arith.constant 1 : i32
      %37 = arith.addi %3, %c1_i32_29 : i32
      %c0_30 = arith.constant 0 : index
      %c0_31 = arith.constant 0 : index
      %38 = arith.index_cast %37 : i32 to index
      %c1_32 = arith.constant 1 : index
      %c0_33 = arith.constant 0 : index
      %39 = vector.load %arg3[%c0_30, %c0_31, %38, %c1_32, %c0_33] : memref<1x1x18x18x8xbf16, #tpu.memory_space<vmem>>, vector<1x1x1x16x8xbf16>
      %40 = vector.shape_cast %39 : vector<1x1x1x16x8xbf16> to vector<1x16x8xbf16>
      %41 = vector.shape_cast %40 : vector<1x16x8xbf16> to vector<16x8xbf16>
      %c32 = arith.constant 32 : index
      %c0_34 = arith.constant 0 : index
      %42 = vector.load %arg4[%c32, %c0_34] : memref<72x8xbf16, #tpu.memory_space<vmem>>, vector<8x8xbf16>
      %cst_35 = arith.constant dense<0.000000e+00> : vector<16x8xf32>
      %43 = tpu.matmul %41, %42, %cst_35 {dimension_numbers = #tpu.dot_dimension_numbers<[1], [0], [0], [1], [0, 0, 1, 1], [], []>} : vector<16x8xbf16>, vector<8x8xbf16>, vector<16x8xf32> -> vector<16x8xf32>
      %44 = arith.addf %36, %43 : vector<16x8xf32>
      %c1_i32_36 = arith.constant 1 : i32
      %45 = arith.addi %3, %c1_i32_36 : i32
      %c0_37 = arith.constant 0 : index
      %c0_38 = arith.constant 0 : index
      %46 = arith.index_cast %45 : i32 to index
      %c2_39 = arith.constant 2 : index
      %c0_40 = arith.constant 0 : index
      %47 = vector.load %arg3[%c0_37, %c0_38, %46, %c2_39, %c0_40] : memref<1x1x18x18x8xbf16, #tpu.memory_space<vmem>>, vector<1x1x1x16x8xbf16>
      %48 = vector.shape_cast %47 : vector<1x1x1x16x8xbf16> to vector<1x16x8xbf16>
      %49 = vector.shape_cast %48 : vector<1x16x8xbf16> to vector<16x8xbf16>
      %c40 = arith.constant 40 : index
      %c0_41 = arith.constant 0 : index
      %50 = vector.load %arg4[%c40, %c0_41] : memref<72x8xbf16, #tpu.memory_space<vmem>>, vector<8x8xbf16>
      %cst_42 = arith.constant dense<0.000000e+00> : vector<16x8xf32>
      %51 = tpu.matmul %49, %50, %cst_42 {dimension_numbers = #tpu.dot_dimension_numbers<[1], [0], [0], [1], [0, 0, 1, 1], [], []>} : vector<16x8xbf16>, vector<8x8xbf16>, vector<16x8xf32> -> vector<16x8xf32>
      %52 = arith.addf %44, %51 : vector<16x8xf32>
      %c2_i32 = arith.constant 2 : i32
      %53 = arith.addi %3, %c2_i32 : i32
      %c0_43 = arith.constant 0 : index
      %c0_44 = arith.constant 0 : index
      %54 = arith.index_cast %53 : i32 to index
      %c0_45 = arith.constant 0 : index
      %c0_46 = arith.constant 0 : index
      %55 = vector.load %arg3[%c0_43, %c0_44, %54, %c0_45, %c0_46] : memref<1x1x18x18x8xbf16, #tpu.memory_space<vmem>>, vector<1x1x1x16x8xbf16>
      %56 = vector.shape_cast %55 : vector<1x1x1x16x8xbf16> to vector<1x16x8xbf16>
      %57 = vector.shape_cast %56 : vector<1x16x8xbf16> to vector<16x8xbf16>
      %c48 = arith.constant 48 : index
      %c0_47 = arith.constant 0 : index
      %58 = vector.load %arg4[%c48, %c0_47] : memref<72x8xbf16, #tpu.memory_space<vmem>>, vector<8x8xbf16>
      %cst_48 = arith.constant dense<0.000000e+00> : vector<16x8xf32>
      %59 = tpu.matmul %57, %58, %cst_48 {dimension_numbers = #tpu.dot_dimension_numbers<[1], [0], [0], [1], [0, 0, 1, 1], [], []>} : vector<16x8xbf16>, vector<8x8xbf16>, vector<16x8xf32> -> vector<16x8xf32>
      %60 = arith.addf %52, %59 : vector<16x8xf32>
      %c2_i32_49 = arith.constant 2 : i32
      %61 = arith.addi %3, %c2_i32_49 : i32
      %c0_50 = arith.constant 0 : index
      %c0_51 = arith.constant 0 : index
      %62 = arith.index_cast %61 : i32 to index
      %c1_52 = arith.constant 1 : index
      %c0_53 = arith.constant 0 : index
      %63 = vector.load %arg3[%c0_50, %c0_51, %62, %c1_52, %c0_53] : memref<1x1x18x18x8xbf16, #tpu.memory_space<vmem>>, vector<1x1x1x16x8xbf16>
      %64 = vector.shape_cast %63 : vector<1x1x1x16x8xbf16> to vector<1x16x8xbf16>
      %65 = vector.shape_cast %64 : vector<1x16x8xbf16> to vector<16x8xbf16>
      %c56 = arith.constant 56 : index
      %c0_54 = arith.constant 0 : index
      %66 = vector.load %arg4[%c56, %c0_54] : memref<72x8xbf16, #tpu.memory_space<vmem>>, vector<8x8xbf16>
      %cst_55 = arith.constant dense<0.000000e+00> : vector<16x8xf32>
      %67 = tpu.matmul %65, %66, %cst_55 {dimension_numbers = #tpu.dot_dimension_numbers<[1], [0], [0], [1], [0, 0, 1, 1], [], []>} : vector<16x8xbf16>, vector<8x8xbf16>, vector<16x8xf32> -> vector<16x8xf32>
      %68 = arith.addf %60, %67 : vector<16x8xf32>
      %c2_i32_56 = arith.constant 2 : i32
      %69 = arith.addi %3, %c2_i32_56 : i32
      %c0_57 = arith.constant 0 : index
      %c0_58 = arith.constant 0 : index
      %70 = arith.index_cast %69 : i32 to index
      %c2_59 = arith.constant 2 : index
      %c0_60 = arith.constant 0 : index
      %71 = vector.load %arg3[%c0_57, %c0_58, %70, %c2_59, %c0_60] : memref<1x1x18x18x8xbf16, #tpu.memory_space<vmem>>, vector<1x1x1x16x8xbf16>
      %72 = vector.shape_cast %71 : vector<1x1x1x16x8xbf16> to vector<1x16x8xbf16>
      %73 = vector.shape_cast %72 : vector<1x16x8xbf16> to vector<16x8xbf16>
      %c64 = arith.constant 64 : index
      %c0_61 = arith.constant 0 : index
      %74 = vector.load %arg4[%c64, %c0_61] : memref<72x8xbf16, #tpu.memory_space<vmem>>, vector<8x8xbf16>
      %cst_62 = arith.constant dense<0.000000e+00> : vector<16x8xf32>
      %75 = tpu.matmul %73, %74, %cst_62 {dimension_numbers = #tpu.dot_dimension_numbers<[1], [0], [0], [1], [0, 0, 1, 1], [], []>} : vector<16x8xbf16>, vector<8x8xbf16>, vector<16x8xf32> -> vector<16x8xf32>
      %76 = arith.addf %68, %75 : vector<16x8xf32>
      %cst_63 = arith.constant 0.000000e+00 : f32
      %77 = vector.broadcast %cst_63 : f32 to vector<16x8xf32>
      %78 = arith.maximumf %76, %77 : vector<16x8xf32>
      %79 = vector.shape_cast %78 : vector<16x8xf32> to vector<1x16x8xf32>
      %80 = arith.truncf %79 : vector<1x16x8xf32> to vector<1x16x8xbf16>
      %c0_64 = arith.constant 0 : index
      %81 = arith.index_cast %arg7 : i32 to index
      %c0_65 = arith.constant 0 : index
      %c0_66 = arith.constant 0 : index
      %82 = vector.load %arg6[%c0_64, %81, %c0_65, %c0_66] : memref<1x16x16x8xbf16, #tpu.memory_space<vmem>>, vector<1x1x16x8xbf16>
      %83 = vector.shape_cast %82 : vector<1x1x16x8xbf16> to vector<1x16x8xbf16>
      %84 = vector.shape_cast %80 : vector<1x16x8xbf16> to vector<1x1x16x8xbf16>
      tpu.vector_store %arg6[%c0_64, %81, %c0_65, %c0_66], %84 {strides = array<i32>} : memref<1x16x16x8xbf16, #tpu.memory_space<vmem>>, vector<1x1x16x8xbf16>,
    }
    %c16_i32_2 = arith.constant 16 : i32
    return
  }
  func.func @transform_0(%arg0: i32, %arg1: i32, %arg2: i32) -> (i32, i32, i32, i32, i32) {
    %c0_i32 = arith.constant 0 : i32
    %c0_i32_0 = arith.constant 0 : i32
    %c0_i32_1 = arith.constant 0 : i32
    %c0_i32_2 = arith.constant 0 : i32
    %c0_i32_3 = arith.constant 0 : i32
    return %arg0, %c0_i32, %c0_i32_0, %c0_i32_1, %c0_i32_2 : i32, i32, i32, i32, i32
  }
  func.func @transform_1(%arg0: i32, %arg1: i32, %arg2: i32) -> (i32, i32) {
    %c0_i32 = arith.constant 0 : i32
    %c0_i32_0 = arith.constant 0 : i32
    return %c0_i32, %arg2 : i32, i32
  }
  func.func @transform_2(%arg0: i32, %arg1: i32, %arg2: i32) -> (i32, i32) {
    %c0_i32 = arith.constant 0 : i32
    %c0_i32_0 = arith.constant 0 : i32
    return %c0_i32, %arg2 : i32, i32
  }
  func.func @transform_3(%arg0: i32, %arg1: i32, %arg2: i32) -> (i32, i32, i32, i32) {
    %c0_i32 = arith.constant 0 : i32
    %c0_i32_0 = arith.constant 0 : i32
    return %arg0, %arg1, %c0_i32, %arg2 : i32, i32, i32, i32
  }
}

module attributes {stable_mosaic.version = 11 : i64} {
  func.func @_mm_kernel(%arg0: i32, %arg1: i32, %arg2: memref<256x8xbf16, #tpu.memory_space<vmem>>, %arg3: memref<8x32xbf16, #tpu.memory_space<vmem>>, %arg4: memref<1x32xf32, #tpu.memory_space<vmem>>, %arg5: memref<256x32xbf16, #tpu.memory_space<vmem>>) attributes {dimension_semantics = [#tpu.dimension_semantics<parallel>, #tpu.dimension_semantics<parallel>], iteration_bounds = array<i64: 2, 1>, scalar_prefetch = 0 : i64, scratch_operands = 0 : i64, tpu.core_type = #tpu.core_type<tc>, window_params = [{transform_indices = @transform_0, window_bounds = array<i64: 256, 8>}, {transform_indices = @transform_1, window_bounds = array<i64: 8, 32>}, {transform_indices = @transform_2, window_bounds = array<i64: 1, 32>}, {transform_indices = @transform_3, window_bounds = array<i64: 256, 32>}]} {
    %c0 = arith.constant 0 : index
    %c0_0 = arith.constant 0 : index
    %0 = vector.load %arg2[%c0, %c0_0] : memref<256x8xbf16, #tpu.memory_space<vmem>>, vector<256x8xbf16>
    %c0_1 = arith.constant 0 : index
    %c0_2 = arith.constant 0 : index
    %1 = vector.load %arg3[%c0_1, %c0_2] : memref<8x32xbf16, #tpu.memory_space<vmem>>, vector<8x32xbf16>
    %cst = arith.constant dense<0.000000e+00> : vector<256x32xf32>
    %2 = tpu.matmul %0, %1, %cst {dimension_numbers = #tpu.dot_dimension_numbers<[1], [0], [0], [1], [0, 0, 1, 1], [], []>} : vector<256x8xbf16>, vector<8x32xbf16>, vector<256x32xf32> -> vector<256x32xf32>
    %c0_3 = arith.constant 0 : index
    %c0_4 = arith.constant 0 : index
    %3 = vector.load %arg4[%c0_3, %c0_4] : memref<1x32xf32, #tpu.memory_space<vmem>>, vector<1x32xf32>
    %4 = vector.broadcast %3 : vector<1x32xf32> to vector<256x32xf32>
    %5 = arith.addf %2, %4 : vector<256x32xf32>
    %6 = arith.truncf %5 : vector<256x32xf32> to vector<256x32xbf16>
    %c0_5 = arith.constant 0 : index
    %c0_6 = arith.constant 0 : index
    %7 = vector.load %arg5[%c0_5, %c0_6] : memref<256x32xbf16, #tpu.memory_space<vmem>>, vector<256x32xbf16>
    tpu.vector_store %arg5[%c0_5, %c0_6], %6 {strides = array<i32>} : memref<256x32xbf16, #tpu.memory_space<vmem>>, vector<256x32xbf16>,
    return
  }
  func.func @transform_0(%arg0: i32, %arg1: i32) -> (i32, i32) {
    %c0_i32 = arith.constant 0 : i32
    %c0_i32_0 = arith.constant 0 : i32
    return %arg0, %c0_i32 : i32, i32
  }
  func.func @transform_1(%arg0: i32, %arg1: i32) -> (i32, i32) {
    %c0_i32 = arith.constant 0 : i32
    %c0_i32_0 = arith.constant 0 : i32
    return %c0_i32, %arg1 : i32, i32
  }
  func.func @transform_2(%arg0: i32, %arg1: i32) -> (i32, i32) {
    %c0_i32 = arith.constant 0 : i32
    %c0_i32_0 = arith.constant 0 : i32
    return %c0_i32, %arg1 : i32, i32
  }
  func.func @transform_3(%arg0: i32, %arg1: i32) -> (i32, i32) {
    %c0_i32 = arith.constant 0 : i32
    return %arg0, %arg1 : i32, i32
  }
}

module attributes {stable_mosaic.version = 11 : i64} {
  func.func @_mm_res_kernel(%arg0: i32, %arg1: i32, %arg2: memref<256x8xbf16, #tpu.memory_space<vmem>>, %arg3: memref<8x32xbf16, #tpu.memory_space<vmem>>, %arg4: memref<1x32xf32, #tpu.memory_space<vmem>>, %arg5: memref<256x32xbf16, #tpu.memory_space<vmem>>, %arg6: memref<256x32xbf16, #tpu.memory_space<vmem>>) attributes {dimension_semantics = [#tpu.dimension_semantics<parallel>, #tpu.dimension_semantics<parallel>], iteration_bounds = array<i64: 2, 1>, scalar_prefetch = 0 : i64, scratch_operands = 0 : i64, tpu.core_type = #tpu.core_type<tc>, window_params = [{transform_indices = @transform_0, window_bounds = array<i64: 256, 8>}, {transform_indices = @transform_1, window_bounds = array<i64: 8, 32>}, {transform_indices = @transform_2, window_bounds = array<i64: 1, 32>}, {transform_indices = @transform_3, window_bounds = array<i64: 256, 32>}, {transform_indices = @transform_4, window_bounds = array<i64: 256, 32>}]} {
    %c0 = arith.constant 0 : index
    %c0_0 = arith.constant 0 : index
    %0 = vector.load %arg2[%c0, %c0_0] : memref<256x8xbf16, #tpu.memory_space<vmem>>, vector<256x8xbf16>
    %c0_1 = arith.constant 0 : index
    %c0_2 = arith.constant 0 : index
    %1 = vector.load %arg3[%c0_1, %c0_2] : memref<8x32xbf16, #tpu.memory_space<vmem>>, vector<8x32xbf16>
    %cst = arith.constant dense<0.000000e+00> : vector<256x32xf32>
    %2 = tpu.matmul %0, %1, %cst {dimension_numbers = #tpu.dot_dimension_numbers<[1], [0], [0], [1], [0, 0, 1, 1], [], []>} : vector<256x8xbf16>, vector<8x32xbf16>, vector<256x32xf32> -> vector<256x32xf32>
    %c0_3 = arith.constant 0 : index
    %c0_4 = arith.constant 0 : index
    %3 = vector.load %arg4[%c0_3, %c0_4] : memref<1x32xf32, #tpu.memory_space<vmem>>, vector<1x32xf32>
    %4 = vector.broadcast %3 : vector<1x32xf32> to vector<256x32xf32>
    %5 = arith.addf %2, %4 : vector<256x32xf32>
    %c0_5 = arith.constant 0 : index
    %c0_6 = arith.constant 0 : index
    %6 = vector.load %arg5[%c0_5, %c0_6] : memref<256x32xbf16, #tpu.memory_space<vmem>>, vector<256x32xbf16>
    %7 = arith.extf %6 : vector<256x32xbf16> to vector<256x32xf32>
    %8 = arith.addf %5, %7 : vector<256x32xf32>
    %cst_7 = arith.constant 0.000000e+00 : f32
    %9 = vector.broadcast %cst_7 : f32 to vector<256x32xf32>
    %10 = arith.maximumf %8, %9 : vector<256x32xf32>
    %11 = arith.truncf %10 : vector<256x32xf32> to vector<256x32xbf16>
    %c0_8 = arith.constant 0 : index
    %c0_9 = arith.constant 0 : index
    %12 = vector.load %arg6[%c0_8, %c0_9] : memref<256x32xbf16, #tpu.memory_space<vmem>>, vector<256x32xbf16>
    tpu.vector_store %arg6[%c0_8, %c0_9], %11 {strides = array<i32>} : memref<256x32xbf16, #tpu.memory_space<vmem>>, vector<256x32xbf16>,
    return
  }
  func.func @transform_0(%arg0: i32, %arg1: i32) -> (i32, i32) {
    %c0_i32 = arith.constant 0 : i32
    %c0_i32_0 = arith.constant 0 : i32
    return %arg0, %c0_i32 : i32, i32
  }
  func.func @transform_1(%arg0: i32, %arg1: i32) -> (i32, i32) {
    %c0_i32 = arith.constant 0 : i32
    %c0_i32_0 = arith.constant 0 : i32
    return %c0_i32, %arg1 : i32, i32
  }
  func.func @transform_2(%arg0: i32, %arg1: i32) -> (i32, i32) {
    %c0_i32 = arith.constant 0 : i32
    %c0_i32_0 = arith.constant 0 : i32
    return %c0_i32, %arg1 : i32, i32
  }
  func.func @transform_3(%arg0: i32, %arg1: i32) -> (i32, i32) {
    %c0_i32 = arith.constant 0 : i32
    return %arg0, %arg1 : i32, i32
  }
  func.func @transform_4(%arg0: i32, %arg1: i32) -> (i32, i32) {
    %c0_i32 = arith.constant 0 : i32
    return %arg0, %arg1 : i32, i32
  }
}

module attributes {stable_mosaic.version = 11 : i64} {
  func.func @_mm_kernel(%arg0: i32, %arg1: i32, %arg2: memref<256x32xbf16, #tpu.memory_space<vmem>>, %arg3: memref<32x8xbf16, #tpu.memory_space<vmem>>, %arg4: memref<1x8xf32, #tpu.memory_space<vmem>>, %arg5: memref<256x8xbf16, #tpu.memory_space<vmem>>) attributes {dimension_semantics = [#tpu.dimension_semantics<parallel>, #tpu.dimension_semantics<parallel>], iteration_bounds = array<i64: 2, 1>, scalar_prefetch = 0 : i64, scratch_operands = 0 : i64, tpu.core_type = #tpu.core_type<tc>, window_params = [{transform_indices = @transform_0, window_bounds = array<i64: 256, 32>}, {transform_indices = @transform_1, window_bounds = array<i64: 32, 8>}, {transform_indices = @transform_2, window_bounds = array<i64: 1, 8>}, {transform_indices = @transform_3, window_bounds = array<i64: 256, 8>}]} {
    %c0 = arith.constant 0 : index
    %c0_0 = arith.constant 0 : index
    %0 = vector.load %arg2[%c0, %c0_0] : memref<256x32xbf16, #tpu.memory_space<vmem>>, vector<256x32xbf16>
    %c0_1 = arith.constant 0 : index
    %c0_2 = arith.constant 0 : index
    %1 = vector.load %arg3[%c0_1, %c0_2] : memref<32x8xbf16, #tpu.memory_space<vmem>>, vector<32x8xbf16>
    %cst = arith.constant dense<0.000000e+00> : vector<256x8xf32>
    %2 = tpu.matmul %0, %1, %cst {dimension_numbers = #tpu.dot_dimension_numbers<[1], [0], [0], [1], [0, 0, 1, 1], [], []>} : vector<256x32xbf16>, vector<32x8xbf16>, vector<256x8xf32> -> vector<256x8xf32>
    %c0_3 = arith.constant 0 : index
    %c0_4 = arith.constant 0 : index
    %3 = vector.load %arg4[%c0_3, %c0_4] : memref<1x8xf32, #tpu.memory_space<vmem>>, vector<1x8xf32>
    %4 = vector.broadcast %3 : vector<1x8xf32> to vector<256x8xf32>
    %5 = arith.addf %2, %4 : vector<256x8xf32>
    %cst_5 = arith.constant 0.000000e+00 : f32
    %6 = vector.broadcast %cst_5 : f32 to vector<256x8xf32>
    %7 = arith.maximumf %5, %6 : vector<256x8xf32>
    %8 = arith.truncf %7 : vector<256x8xf32> to vector<256x8xbf16>
    %c0_6 = arith.constant 0 : index
    %c0_7 = arith.constant 0 : index
    %9 = vector.load %arg5[%c0_6, %c0_7] : memref<256x8xbf16, #tpu.memory_space<vmem>>, vector<256x8xbf16>
    tpu.vector_store %arg5[%c0_6, %c0_7], %8 {strides = array<i32>} : memref<256x8xbf16, #tpu.memory_space<vmem>>, vector<256x8xbf16>,
    return
  }
  func.func @transform_0(%arg0: i32, %arg1: i32) -> (i32, i32) {
    %c0_i32 = arith.constant 0 : i32
    %c0_i32_0 = arith.constant 0 : i32
    return %arg0, %c0_i32 : i32, i32
  }
  func.func @transform_1(%arg0: i32, %arg1: i32) -> (i32, i32) {
    %c0_i32 = arith.constant 0 : i32
    %c0_i32_0 = arith.constant 0 : i32
    return %c0_i32, %arg1 : i32, i32
  }
  func.func @transform_2(%arg0: i32, %arg1: i32) -> (i32, i32) {
    %c0_i32 = arith.constant 0 : i32
    %c0_i32_0 = arith.constant 0 : i32
    return %c0_i32, %arg1 : i32, i32
  }
  func.func @transform_3(%arg0: i32, %arg1: i32) -> (i32, i32) {
    %c0_i32 = arith.constant 0 : i32
    return %arg0, %arg1 : i32, i32
  }
}

module attributes {stable_mosaic.version = 11 : i64} {
  func.func @_mm_kernel(%arg0: i32, %arg1: i32, %arg2: memref<256x32xbf16, #tpu.memory_space<vmem>>, %arg3: memref<32x16xbf16, #tpu.memory_space<vmem>>, %arg4: memref<1x16xf32, #tpu.memory_space<vmem>>, %arg5: memref<256x16xbf16, #tpu.memory_space<vmem>>) attributes {dimension_semantics = [#tpu.dimension_semantics<parallel>, #tpu.dimension_semantics<parallel>], iteration_bounds = array<i64: 2, 1>, scalar_prefetch = 0 : i64, scratch_operands = 0 : i64, tpu.core_type = #tpu.core_type<tc>, window_params = [{transform_indices = @transform_0, window_bounds = array<i64: 256, 32>}, {transform_indices = @transform_1, window_bounds = array<i64: 32, 16>}, {transform_indices = @transform_2, window_bounds = array<i64: 1, 16>}, {transform_indices = @transform_3, window_bounds = array<i64: 256, 16>}]} {
    %c0 = arith.constant 0 : index
    %c0_0 = arith.constant 0 : index
    %0 = vector.load %arg2[%c0, %c0_0] : memref<256x32xbf16, #tpu.memory_space<vmem>>, vector<256x32xbf16>
    %c0_1 = arith.constant 0 : index
    %c0_2 = arith.constant 0 : index
    %1 = vector.load %arg3[%c0_1, %c0_2] : memref<32x16xbf16, #tpu.memory_space<vmem>>, vector<32x16xbf16>
    %cst = arith.constant dense<0.000000e+00> : vector<256x16xf32>
    %2 = tpu.matmul %0, %1, %cst {dimension_numbers = #tpu.dot_dimension_numbers<[1], [0], [0], [1], [0, 0, 1, 1], [], []>} : vector<256x32xbf16>, vector<32x16xbf16>, vector<256x16xf32> -> vector<256x16xf32>
    %c0_3 = arith.constant 0 : index
    %c0_4 = arith.constant 0 : index
    %3 = vector.load %arg4[%c0_3, %c0_4] : memref<1x16xf32, #tpu.memory_space<vmem>>, vector<1x16xf32>
    %4 = vector.broadcast %3 : vector<1x16xf32> to vector<256x16xf32>
    %5 = arith.addf %2, %4 : vector<256x16xf32>
    %cst_5 = arith.constant 0.000000e+00 : f32
    %6 = vector.broadcast %cst_5 : f32 to vector<256x16xf32>
    %7 = arith.maximumf %5, %6 : vector<256x16xf32>
    %8 = arith.truncf %7 : vector<256x16xf32> to vector<256x16xbf16>
    %c0_6 = arith.constant 0 : index
    %c0_7 = arith.constant 0 : index
    %9 = vector.load %arg5[%c0_6, %c0_7] : memref<256x16xbf16, #tpu.memory_space<vmem>>, vector<256x16xbf16>
    tpu.vector_store %arg5[%c0_6, %c0_7], %8 {strides = array<i32>} : memref<256x16xbf16, #tpu.memory_space<vmem>>, vector<256x16xbf16>,
    return
  }
  func.func @transform_0(%arg0: i32, %arg1: i32) -> (i32, i32) {
    %c0_i32 = arith.constant 0 : i32
    %c0_i32_0 = arith.constant 0 : i32
    return %arg0, %c0_i32 : i32, i32
  }
  func.func @transform_1(%arg0: i32, %arg1: i32) -> (i32, i32) {
    %c0_i32 = arith.constant 0 : i32
    %c0_i32_0 = arith.constant 0 : i32
    return %c0_i32, %arg1 : i32, i32
  }
  func.func @transform_2(%arg0: i32, %arg1: i32) -> (i32, i32) {
    %c0_i32 = arith.constant 0 : i32
    %c0_i32_0 = arith.constant 0 : i32
    return %c0_i32, %arg1 : i32, i32
  }
  func.func @transform_3(%arg0: i32, %arg1: i32) -> (i32, i32) {
    %c0_i32 = arith.constant 0 : i32
    return %arg0, %arg1 : i32, i32
  }
}

module attributes {stable_mosaic.version = 11 : i64} {
  func.func @_conv_tap_kernel(%arg0: i32, %arg1: i32, %arg2: i32, %arg3: memref<1x4x9x9x16xbf16, #tpu.memory_space<vmem>>, %arg4: memref<144x16xbf16, #tpu.memory_space<vmem>>, %arg5: memref<1x16xf32, #tpu.memory_space<vmem>>, %arg6: memref<1x8x8x16xbf16, #tpu.memory_space<vmem>>) attributes {dimension_semantics = [#tpu.dimension_semantics<parallel>, #tpu.dimension_semantics<parallel>, #tpu.dimension_semantics<parallel>], iteration_bounds = array<i64: 2, 1, 1>, scalar_prefetch = 0 : i64, scratch_operands = 0 : i64, tpu.core_type = #tpu.core_type<tc>, window_params = [{transform_indices = @transform_0, window_bounds = array<i64: 1, 4, 9, 9, 16>}, {transform_indices = @transform_1, window_bounds = array<i64: 144, 16>}, {transform_indices = @transform_2, window_bounds = array<i64: 1, 16>}, {transform_indices = @transform_3, window_bounds = array<i64: 1, 8, 8, 16>}]} {
    %c8_i32 = arith.constant 8 : i32
    %0 = arith.muli %arg1, %c8_i32 : i32
    %c0 = arith.constant 0 : index
    %c0_0 = arith.constant 0 : index
    %1 = vector.load %arg5[%c0, %c0_0] : memref<1x16xf32, #tpu.memory_space<vmem>>, vector<1x16xf32>
    %c0_i32 = arith.constant 0 : i32
    %c8_i32_1 = arith.constant 8 : i32
    %2 = arith.addi %c0_i32, %c8_i32_1 : i32
    %c1_i32 = arith.constant 1 : i32
    scf.for %arg7 = %c0_i32 to %2 step %c1_i32  : i32 {
      %3 = arith.addi %0, %arg7 : i32
      %c0_i32_3 = arith.constant 0 : i32
      %4 = arith.addi %3, %c0_i32_3 : i32
      %c0_4 = arith.constant 0 : index
      %c0_5 = arith.constant 0 : index
      %5 = arith.index_cast %4 : i32 to index
      %c0_6 = arith.constant 0 : index
      %c0_7 = arith.constant 0 : index
      %6 = vector.load %arg3[%c0_4, %c0_5, %5, %c0_6, %c0_7] : memref<1x4x9x9x16xbf16, #tpu.memory_space<vmem>>, vector<1x1x1x8x16xbf16>
      %7 = vector.shape_cast %6 : vector<1x1x1x8x16xbf16> to vector<1x8x16xbf16>
      %8 = vector.shape_cast %7 : vector<1x8x16xbf16> to vector<8x16xbf16>
      %c0_8 = arith.constant 0 : index
      %c0_9 = arith.constant 0 : index
      %9 = vector.load %arg4[%c0_8, %c0_9] : memref<144x16xbf16, #tpu.memory_space<vmem>>, vector<16x16xbf16>
      %cst = arith.constant dense<0.000000e+00> : vector<8x16xf32>
      %10 = tpu.matmul %8, %9, %cst {dimension_numbers = #tpu.dot_dimension_numbers<[1], [0], [0], [1], [0, 0, 1, 1], [], []>} : vector<8x16xbf16>, vector<16x16xbf16>, vector<8x16xf32> -> vector<8x16xf32>
      %11 = vector.broadcast %1 : vector<1x16xf32> to vector<8x16xf32>
      %12 = arith.addf %10, %11 : vector<8x16xf32>
      %c0_i32_10 = arith.constant 0 : i32
      %13 = arith.addi %3, %c0_i32_10 : i32
      %c0_11 = arith.constant 0 : index
      %c1 = arith.constant 1 : index
      %14 = arith.index_cast %13 : i32 to index
      %c0_12 = arith.constant 0 : index
      %c0_13 = arith.constant 0 : index
      %15 = vector.load %arg3[%c0_11, %c1, %14, %c0_12, %c0_13] : memref<1x4x9x9x16xbf16, #tpu.memory_space<vmem>>, vector<1x1x1x8x16xbf16>
      %16 = vector.shape_cast %15 : vector<1x1x1x8x16xbf16> to vector<1x8x16xbf16>
      %17 = vector.shape_cast %16 : vector<1x8x16xbf16> to vector<8x16xbf16>
      %c16 = arith.constant 16 : index
      %c0_14 = arith.constant 0 : index
      %18 = vector.load %arg4[%c16, %c0_14] : memref<144x16xbf16, #tpu.memory_space<vmem>>, vector<16x16xbf16>
      %cst_15 = arith.constant dense<0.000000e+00> : vector<8x16xf32>
      %19 = tpu.matmul %17, %18, %cst_15 {dimension_numbers = #tpu.dot_dimension_numbers<[1], [0], [0], [1], [0, 0, 1, 1], [], []>} : vector<8x16xbf16>, vector<16x16xbf16>, vector<8x16xf32> -> vector<8x16xf32>
      %20 = arith.addf %12, %19 : vector<8x16xf32>
      %c0_i32_16 = arith.constant 0 : i32
      %21 = arith.addi %3, %c0_i32_16 : i32
      %c0_17 = arith.constant 0 : index
      %c0_18 = arith.constant 0 : index
      %22 = arith.index_cast %21 : i32 to index
      %c1_19 = arith.constant 1 : index
      %c0_20 = arith.constant 0 : index
      %23 = vector.load %arg3[%c0_17, %c0_18, %22, %c1_19, %c0_20] : memref<1x4x9x9x16xbf16, #tpu.memory_space<vmem>>, vector<1x1x1x8x16xbf16>
      %24 = vector.shape_cast %23 : vector<1x1x1x8x16xbf16> to vector<1x8x16xbf16>
      %25 = vector.shape_cast %24 : vector<1x8x16xbf16> to vector<8x16xbf16>
      %c32 = arith.constant 32 : index
      %c0_21 = arith.constant 0 : index
      %26 = vector.load %arg4[%c32, %c0_21] : memref<144x16xbf16, #tpu.memory_space<vmem>>, vector<16x16xbf16>
      %cst_22 = arith.constant dense<0.000000e+00> : vector<8x16xf32>
      %27 = tpu.matmul %25, %26, %cst_22 {dimension_numbers = #tpu.dot_dimension_numbers<[1], [0], [0], [1], [0, 0, 1, 1], [], []>} : vector<8x16xbf16>, vector<16x16xbf16>, vector<8x16xf32> -> vector<8x16xf32>
      %28 = arith.addf %20, %27 : vector<8x16xf32>
      %c0_i32_23 = arith.constant 0 : i32
      %29 = arith.addi %3, %c0_i32_23 : i32
      %c0_24 = arith.constant 0 : index
      %c2 = arith.constant 2 : index
      %30 = arith.index_cast %29 : i32 to index
      %c0_25 = arith.constant 0 : index
      %c0_26 = arith.constant 0 : index
      %31 = vector.load %arg3[%c0_24, %c2, %30, %c0_25, %c0_26] : memref<1x4x9x9x16xbf16, #tpu.memory_space<vmem>>, vector<1x1x1x8x16xbf16>
      %32 = vector.shape_cast %31 : vector<1x1x1x8x16xbf16> to vector<1x8x16xbf16>
      %33 = vector.shape_cast %32 : vector<1x8x16xbf16> to vector<8x16xbf16>
      %c48 = arith.constant 48 : index
      %c0_27 = arith.constant 0 : index
      %34 = vector.load %arg4[%c48, %c0_27] : memref<144x16xbf16, #tpu.memory_space<vmem>>, vector<16x16xbf16>
      %cst_28 = arith.constant dense<0.000000e+00> : vector<8x16xf32>
      %35 = tpu.matmul %33, %34, %cst_28 {dimension_numbers = #tpu.dot_dimension_numbers<[1], [0], [0], [1], [0, 0, 1, 1], [], []>} : vector<8x16xbf16>, vector<16x16xbf16>, vector<8x16xf32> -> vector<8x16xf32>
      %36 = arith.addf %28, %35 : vector<8x16xf32>
      %c0_i32_29 = arith.constant 0 : i32
      %37 = arith.addi %3, %c0_i32_29 : i32
      %c0_30 = arith.constant 0 : index
      %c3 = arith.constant 3 : index
      %38 = arith.index_cast %37 : i32 to index
      %c0_31 = arith.constant 0 : index
      %c0_32 = arith.constant 0 : index
      %39 = vector.load %arg3[%c0_30, %c3, %38, %c0_31, %c0_32] : memref<1x4x9x9x16xbf16, #tpu.memory_space<vmem>>, vector<1x1x1x8x16xbf16>
      %40 = vector.shape_cast %39 : vector<1x1x1x8x16xbf16> to vector<1x8x16xbf16>
      %41 = vector.shape_cast %40 : vector<1x8x16xbf16> to vector<8x16xbf16>
      %c64 = arith.constant 64 : index
      %c0_33 = arith.constant 0 : index
      %42 = vector.load %arg4[%c64, %c0_33] : memref<144x16xbf16, #tpu.memory_space<vmem>>, vector<16x16xbf16>
      %cst_34 = arith.constant dense<0.000000e+00> : vector<8x16xf32>
      %43 = tpu.matmul %41, %42, %cst_34 {dimension_numbers = #tpu.dot_dimension_numbers<[1], [0], [0], [1], [0, 0, 1, 1], [], []>} : vector<8x16xbf16>, vector<16x16xbf16>, vector<8x16xf32> -> vector<8x16xf32>
      %44 = arith.addf %36, %43 : vector<8x16xf32>
      %c0_i32_35 = arith.constant 0 : i32
      %45 = arith.addi %3, %c0_i32_35 : i32
      %c0_36 = arith.constant 0 : index
      %c2_37 = arith.constant 2 : index
      %46 = arith.index_cast %45 : i32 to index
      %c1_38 = arith.constant 1 : index
      %c0_39 = arith.constant 0 : index
      %47 = vector.load %arg3[%c0_36, %c2_37, %46, %c1_38, %c0_39] : memref<1x4x9x9x16xbf16, #tpu.memory_space<vmem>>, vector<1x1x1x8x16xbf16>
      %48 = vector.shape_cast %47 : vector<1x1x1x8x16xbf16> to vector<1x8x16xbf16>
      %49 = vector.shape_cast %48 : vector<1x8x16xbf16> to vector<8x16xbf16>
      %c80 = arith.constant 80 : index
      %c0_40 = arith.constant 0 : index
      %50 = vector.load %arg4[%c80, %c0_40] : memref<144x16xbf16, #tpu.memory_space<vmem>>, vector<16x16xbf16>
      %cst_41 = arith.constant dense<0.000000e+00> : vector<8x16xf32>
      %51 = tpu.matmul %49, %50, %cst_41 {dimension_numbers = #tpu.dot_dimension_numbers<[1], [0], [0], [1], [0, 0, 1, 1], [], []>} : vector<8x16xbf16>, vector<16x16xbf16>, vector<8x16xf32> -> vector<8x16xf32>
      %52 = arith.addf %44, %51 : vector<8x16xf32>
      %c1_i32_42 = arith.constant 1 : i32
      %53 = arith.addi %3, %c1_i32_42 : i32
      %c0_43 = arith.constant 0 : index
      %c0_44 = arith.constant 0 : index
      %54 = arith.index_cast %53 : i32 to index
      %c0_45 = arith.constant 0 : index
      %c0_46 = arith.constant 0 : index
      %55 = vector.load %arg3[%c0_43, %c0_44, %54, %c0_45, %c0_46] : memref<1x4x9x9x16xbf16, #tpu.memory_space<vmem>>, vector<1x1x1x8x16xbf16>
      %56 = vector.shape_cast %55 : vector<1x1x1x8x16xbf16> to vector<1x8x16xbf16>
      %57 = vector.shape_cast %56 : vector<1x8x16xbf16> to vector<8x16xbf16>
      %c96 = arith.constant 96 : index
      %c0_47 = arith.constant 0 : index
      %58 = vector.load %arg4[%c96, %c0_47] : memref<144x16xbf16, #tpu.memory_space<vmem>>, vector<16x16xbf16>
      %cst_48 = arith.constant dense<0.000000e+00> : vector<8x16xf32>
      %59 = tpu.matmul %57, %58, %cst_48 {dimension_numbers = #tpu.dot_dimension_numbers<[1], [0], [0], [1], [0, 0, 1, 1], [], []>} : vector<8x16xbf16>, vector<16x16xbf16>, vector<8x16xf32> -> vector<8x16xf32>
      %60 = arith.addf %52, %59 : vector<8x16xf32>
      %c1_i32_49 = arith.constant 1 : i32
      %61 = arith.addi %3, %c1_i32_49 : i32
      %c0_50 = arith.constant 0 : index
      %c1_51 = arith.constant 1 : index
      %62 = arith.index_cast %61 : i32 to index
      %c0_52 = arith.constant 0 : index
      %c0_53 = arith.constant 0 : index
      %63 = vector.load %arg3[%c0_50, %c1_51, %62, %c0_52, %c0_53] : memref<1x4x9x9x16xbf16, #tpu.memory_space<vmem>>, vector<1x1x1x8x16xbf16>
      %64 = vector.shape_cast %63 : vector<1x1x1x8x16xbf16> to vector<1x8x16xbf16>
      %65 = vector.shape_cast %64 : vector<1x8x16xbf16> to vector<8x16xbf16>
      %c112 = arith.constant 112 : index
      %c0_54 = arith.constant 0 : index
      %66 = vector.load %arg4[%c112, %c0_54] : memref<144x16xbf16, #tpu.memory_space<vmem>>, vector<16x16xbf16>
      %cst_55 = arith.constant dense<0.000000e+00> : vector<8x16xf32>
      %67 = tpu.matmul %65, %66, %cst_55 {dimension_numbers = #tpu.dot_dimension_numbers<[1], [0], [0], [1], [0, 0, 1, 1], [], []>} : vector<8x16xbf16>, vector<16x16xbf16>, vector<8x16xf32> -> vector<8x16xf32>
      %68 = arith.addf %60, %67 : vector<8x16xf32>
      %c1_i32_56 = arith.constant 1 : i32
      %69 = arith.addi %3, %c1_i32_56 : i32
      %c0_57 = arith.constant 0 : index
      %c0_58 = arith.constant 0 : index
      %70 = arith.index_cast %69 : i32 to index
      %c1_59 = arith.constant 1 : index
      %c0_60 = arith.constant 0 : index
      %71 = vector.load %arg3[%c0_57, %c0_58, %70, %c1_59, %c0_60] : memref<1x4x9x9x16xbf16, #tpu.memory_space<vmem>>, vector<1x1x1x8x16xbf16>
      %72 = vector.shape_cast %71 : vector<1x1x1x8x16xbf16> to vector<1x8x16xbf16>
      %73 = vector.shape_cast %72 : vector<1x8x16xbf16> to vector<8x16xbf16>
      %c128 = arith.constant 128 : index
      %c0_61 = arith.constant 0 : index
      %74 = vector.load %arg4[%c128, %c0_61] : memref<144x16xbf16, #tpu.memory_space<vmem>>, vector<16x16xbf16>
      %cst_62 = arith.constant dense<0.000000e+00> : vector<8x16xf32>
      %75 = tpu.matmul %73, %74, %cst_62 {dimension_numbers = #tpu.dot_dimension_numbers<[1], [0], [0], [1], [0, 0, 1, 1], [], []>} : vector<8x16xbf16>, vector<16x16xbf16>, vector<8x16xf32> -> vector<8x16xf32>
      %76 = arith.addf %68, %75 : vector<8x16xf32>
      %cst_63 = arith.constant 0.000000e+00 : f32
      %77 = vector.broadcast %cst_63 : f32 to vector<8x16xf32>
      %78 = arith.maximumf %76, %77 : vector<8x16xf32>
      %79 = vector.shape_cast %78 : vector<8x16xf32> to vector<1x8x16xf32>
      %80 = arith.truncf %79 : vector<1x8x16xf32> to vector<1x8x16xbf16>
      %c0_64 = arith.constant 0 : index
      %81 = arith.index_cast %arg7 : i32 to index
      %c0_65 = arith.constant 0 : index
      %c0_66 = arith.constant 0 : index
      %82 = vector.load %arg6[%c0_64, %81, %c0_65, %c0_66] : memref<1x8x8x16xbf16, #tpu.memory_space<vmem>>, vector<1x1x8x16xbf16>
      %83 = vector.shape_cast %82 : vector<1x1x8x16xbf16> to vector<1x8x16xbf16>
      %84 = vector.shape_cast %80 : vector<1x8x16xbf16> to vector<1x1x8x16xbf16>
      tpu.vector_store %arg6[%c0_64, %81, %c0_65, %c0_66], %84 {strides = array<i32>} : memref<1x8x8x16xbf16, #tpu.memory_space<vmem>>, vector<1x1x8x16xbf16>,
    }
    %c8_i32_2 = arith.constant 8 : i32
    return
  }
  func.func @transform_0(%arg0: i32, %arg1: i32, %arg2: i32) -> (i32, i32, i32, i32, i32) {
    %c0_i32 = arith.constant 0 : i32
    %c0_i32_0 = arith.constant 0 : i32
    %c0_i32_1 = arith.constant 0 : i32
    %c0_i32_2 = arith.constant 0 : i32
    %c0_i32_3 = arith.constant 0 : i32
    return %arg0, %c0_i32, %c0_i32_0, %c0_i32_1, %c0_i32_2 : i32, i32, i32, i32, i32
  }
  func.func @transform_1(%arg0: i32, %arg1: i32, %arg2: i32) -> (i32, i32) {
    %c0_i32 = arith.constant 0 : i32
    %c0_i32_0 = arith.constant 0 : i32
    return %c0_i32, %arg2 : i32, i32
  }
  func.func @transform_2(%arg0: i32, %arg1: i32, %arg2: i32) -> (i32, i32) {
    %c0_i32 = arith.constant 0 : i32
    %c0_i32_0 = arith.constant 0 : i32
    return %c0_i32, %arg2 : i32, i32
  }
  func.func @transform_3(%arg0: i32, %arg1: i32, %arg2: i32) -> (i32, i32, i32, i32) {
    %c0_i32 = arith.constant 0 : i32
    %c0_i32_0 = arith.constant 0 : i32
    return %arg0, %arg1, %c0_i32, %arg2 : i32, i32, i32, i32
  }
}

module attributes {stable_mosaic.version = 11 : i64} {
  func.func @_mm_kernel(%arg0: i32, %arg1: i32, %arg2: memref<64x32xbf16, #tpu.memory_space<vmem>>, %arg3: memref<32x64xbf16, #tpu.memory_space<vmem>>, %arg4: memref<1x64xf32, #tpu.memory_space<vmem>>, %arg5: memref<64x64xbf16, #tpu.memory_space<vmem>>) attributes {dimension_semantics = [#tpu.dimension_semantics<parallel>, #tpu.dimension_semantics<parallel>], iteration_bounds = array<i64: 2, 1>, scalar_prefetch = 0 : i64, scratch_operands = 0 : i64, tpu.core_type = #tpu.core_type<tc>, window_params = [{transform_indices = @transform_0, window_bounds = array<i64: 64, 32>}, {transform_indices = @transform_1, window_bounds = array<i64: 32, 64>}, {transform_indices = @transform_2, window_bounds = array<i64: 1, 64>}, {transform_indices = @transform_3, window_bounds = array<i64: 64, 64>}]} {
    %c0 = arith.constant 0 : index
    %c0_0 = arith.constant 0 : index
    %0 = vector.load %arg2[%c0, %c0_0] : memref<64x32xbf16, #tpu.memory_space<vmem>>, vector<64x32xbf16>
    %c0_1 = arith.constant 0 : index
    %c0_2 = arith.constant 0 : index
    %1 = vector.load %arg3[%c0_1, %c0_2] : memref<32x64xbf16, #tpu.memory_space<vmem>>, vector<32x64xbf16>
    %cst = arith.constant dense<0.000000e+00> : vector<64x64xf32>
    %2 = tpu.matmul %0, %1, %cst {dimension_numbers = #tpu.dot_dimension_numbers<[1], [0], [0], [1], [0, 0, 1, 1], [], []>} : vector<64x32xbf16>, vector<32x64xbf16>, vector<64x64xf32> -> vector<64x64xf32>
    %c0_3 = arith.constant 0 : index
    %c0_4 = arith.constant 0 : index
    %3 = vector.load %arg4[%c0_3, %c0_4] : memref<1x64xf32, #tpu.memory_space<vmem>>, vector<1x64xf32>
    %4 = vector.broadcast %3 : vector<1x64xf32> to vector<64x64xf32>
    %5 = arith.addf %2, %4 : vector<64x64xf32>
    %6 = arith.truncf %5 : vector<64x64xf32> to vector<64x64xbf16>
    %c0_5 = arith.constant 0 : index
    %c0_6 = arith.constant 0 : index
    %7 = vector.load %arg5[%c0_5, %c0_6] : memref<64x64xbf16, #tpu.memory_space<vmem>>, vector<64x64xbf16>
    tpu.vector_store %arg5[%c0_5, %c0_6], %6 {strides = array<i32>} : memref<64x64xbf16, #tpu.memory_space<vmem>>, vector<64x64xbf16>,
    return
  }
  func.func @transform_0(%arg0: i32, %arg1: i32) -> (i32, i32) {
    %c0_i32 = arith.constant 0 : i32
    %c0_i32_0 = arith.constant 0 : i32
    return %arg0, %c0_i32 : i32, i32
  }
  func.func @transform_1(%arg0: i32, %arg1: i32) -> (i32, i32) {
    %c0_i32 = arith.constant 0 : i32
    %c0_i32_0 = arith.constant 0 : i32
    return %c0_i32, %arg1 : i32, i32
  }
  func.func @transform_2(%arg0: i32, %arg1: i32) -> (i32, i32) {
    %c0_i32 = arith.constant 0 : i32
    %c0_i32_0 = arith.constant 0 : i32
    return %c0_i32, %arg1 : i32, i32
  }
  func.func @transform_3(%arg0: i32, %arg1: i32) -> (i32, i32) {
    %c0_i32 = arith.constant 0 : i32
    return %arg0, %arg1 : i32, i32
  }
}

module attributes {stable_mosaic.version = 11 : i64} {
  func.func @_mm_res_kernel(%arg0: i32, %arg1: i32, %arg2: memref<64x16xbf16, #tpu.memory_space<vmem>>, %arg3: memref<16x64xbf16, #tpu.memory_space<vmem>>, %arg4: memref<1x64xf32, #tpu.memory_space<vmem>>, %arg5: memref<64x64xbf16, #tpu.memory_space<vmem>>, %arg6: memref<64x64xbf16, #tpu.memory_space<vmem>>) attributes {dimension_semantics = [#tpu.dimension_semantics<parallel>, #tpu.dimension_semantics<parallel>], iteration_bounds = array<i64: 2, 1>, scalar_prefetch = 0 : i64, scratch_operands = 0 : i64, tpu.core_type = #tpu.core_type<tc>, window_params = [{transform_indices = @transform_0, window_bounds = array<i64: 64, 16>}, {transform_indices = @transform_1, window_bounds = array<i64: 16, 64>}, {transform_indices = @transform_2, window_bounds = array<i64: 1, 64>}, {transform_indices = @transform_3, window_bounds = array<i64: 64, 64>}, {transform_indices = @transform_4, window_bounds = array<i64: 64, 64>}]} {
    %c0 = arith.constant 0 : index
    %c0_0 = arith.constant 0 : index
    %0 = vector.load %arg2[%c0, %c0_0] : memref<64x16xbf16, #tpu.memory_space<vmem>>, vector<64x16xbf16>
    %c0_1 = arith.constant 0 : index
    %c0_2 = arith.constant 0 : index
    %1 = vector.load %arg3[%c0_1, %c0_2] : memref<16x64xbf16, #tpu.memory_space<vmem>>, vector<16x64xbf16>
    %cst = arith.constant dense<0.000000e+00> : vector<64x64xf32>
    %2 = tpu.matmul %0, %1, %cst {dimension_numbers = #tpu.dot_dimension_numbers<[1], [0], [0], [1], [0, 0, 1, 1], [], []>} : vector<64x16xbf16>, vector<16x64xbf16>, vector<64x64xf32> -> vector<64x64xf32>
    %c0_3 = arith.constant 0 : index
    %c0_4 = arith.constant 0 : index
    %3 = vector.load %arg4[%c0_3, %c0_4] : memref<1x64xf32, #tpu.memory_space<vmem>>, vector<1x64xf32>
    %4 = vector.broadcast %3 : vector<1x64xf32> to vector<64x64xf32>
    %5 = arith.addf %2, %4 : vector<64x64xf32>
    %c0_5 = arith.constant 0 : index
    %c0_6 = arith.constant 0 : index
    %6 = vector.load %arg5[%c0_5, %c0_6] : memref<64x64xbf16, #tpu.memory_space<vmem>>, vector<64x64xbf16>
    %7 = arith.extf %6 : vector<64x64xbf16> to vector<64x64xf32>
    %8 = arith.addf %5, %7 : vector<64x64xf32>
    %cst_7 = arith.constant 0.000000e+00 : f32
    %9 = vector.broadcast %cst_7 : f32 to vector<64x64xf32>
    %10 = arith.maximumf %8, %9 : vector<64x64xf32>
    %11 = arith.truncf %10 : vector<64x64xf32> to vector<64x64xbf16>
    %c0_8 = arith.constant 0 : index
    %c0_9 = arith.constant 0 : index
    %12 = vector.load %arg6[%c0_8, %c0_9] : memref<64x64xbf16, #tpu.memory_space<vmem>>, vector<64x64xbf16>
    tpu.vector_store %arg6[%c0_8, %c0_9], %11 {strides = array<i32>} : memref<64x64xbf16, #tpu.memory_space<vmem>>, vector<64x64xbf16>,
    return
  }
  func.func @transform_0(%arg0: i32, %arg1: i32) -> (i32, i32) {
    %c0_i32 = arith.constant 0 : i32
    %c0_i32_0 = arith.constant 0 : i32
    return %arg0, %c0_i32 : i32, i32
  }
  func.func @transform_1(%arg0: i32, %arg1: i32) -> (i32, i32) {
    %c0_i32 = arith.constant 0 : i32
    %c0_i32_0 = arith.constant 0 : i32
    return %c0_i32, %arg1 : i32, i32
  }
  func.func @transform_2(%arg0: i32, %arg1: i32) -> (i32, i32) {
    %c0_i32 = arith.constant 0 : i32
    %c0_i32_0 = arith.constant 0 : i32
    return %c0_i32, %arg1 : i32, i32
  }
  func.func @transform_3(%arg0: i32, %arg1: i32) -> (i32, i32) {
    %c0_i32 = arith.constant 0 : i32
    return %arg0, %arg1 : i32, i32
  }
  func.func @transform_4(%arg0: i32, %arg1: i32) -> (i32, i32) {
    %c0_i32 = arith.constant 0 : i32
    return %arg0, %arg1 : i32, i32
  }
}

module attributes {stable_mosaic.version = 11 : i64} {
  func.func @_mm_kernel(%arg0: i32, %arg1: i32, %arg2: memref<64x64xbf16, #tpu.memory_space<vmem>>, %arg3: memref<64x16xbf16, #tpu.memory_space<vmem>>, %arg4: memref<1x16xf32, #tpu.memory_space<vmem>>, %arg5: memref<64x16xbf16, #tpu.memory_space<vmem>>) attributes {dimension_semantics = [#tpu.dimension_semantics<parallel>, #tpu.dimension_semantics<parallel>], iteration_bounds = array<i64: 2, 1>, scalar_prefetch = 0 : i64, scratch_operands = 0 : i64, tpu.core_type = #tpu.core_type<tc>, window_params = [{transform_indices = @transform_0, window_bounds = array<i64: 64, 64>}, {transform_indices = @transform_1, window_bounds = array<i64: 64, 16>}, {transform_indices = @transform_2, window_bounds = array<i64: 1, 16>}, {transform_indices = @transform_3, window_bounds = array<i64: 64, 16>}]} {
    %c0 = arith.constant 0 : index
    %c0_0 = arith.constant 0 : index
    %0 = vector.load %arg2[%c0, %c0_0] : memref<64x64xbf16, #tpu.memory_space<vmem>>, vector<64x64xbf16>
    %c0_1 = arith.constant 0 : index
    %c0_2 = arith.constant 0 : index
    %1 = vector.load %arg3[%c0_1, %c0_2] : memref<64x16xbf16, #tpu.memory_space<vmem>>, vector<64x16xbf16>
    %cst = arith.constant dense<0.000000e+00> : vector<64x16xf32>
    %2 = tpu.matmul %0, %1, %cst {dimension_numbers = #tpu.dot_dimension_numbers<[1], [0], [0], [1], [0, 0, 1, 1], [], []>} : vector<64x64xbf16>, vector<64x16xbf16>, vector<64x16xf32> -> vector<64x16xf32>
    %c0_3 = arith.constant 0 : index
    %c0_4 = arith.constant 0 : index
    %3 = vector.load %arg4[%c0_3, %c0_4] : memref<1x16xf32, #tpu.memory_space<vmem>>, vector<1x16xf32>
    %4 = vector.broadcast %3 : vector<1x16xf32> to vector<64x16xf32>
    %5 = arith.addf %2, %4 : vector<64x16xf32>
    %cst_5 = arith.constant 0.000000e+00 : f32
    %6 = vector.broadcast %cst_5 : f32 to vector<64x16xf32>
    %7 = arith.maximumf %5, %6 : vector<64x16xf32>
    %8 = arith.truncf %7 : vector<64x16xf32> to vector<64x16xbf16>
    %c0_6 = arith.constant 0 : index
    %c0_7 = arith.constant 0 : index
    %9 = vector.load %arg5[%c0_6, %c0_7] : memref<64x16xbf16, #tpu.memory_space<vmem>>, vector<64x16xbf16>
    tpu.vector_store %arg5[%c0_6, %c0_7], %8 {strides = array<i32>} : memref<64x16xbf16, #tpu.memory_space<vmem>>, vector<64x16xbf16>,
    return
  }
  func.func @transform_0(%arg0: i32, %arg1: i32) -> (i32, i32) {
    %c0_i32 = arith.constant 0 : i32
    %c0_i32_0 = arith.constant 0 : i32
    return %arg0, %c0_i32 : i32, i32
  }
  func.func @transform_1(%arg0: i32, %arg1: i32) -> (i32, i32) {
    %c0_i32 = arith.constant 0 : i32
    %c0_i32_0 = arith.constant 0 : i32
    return %c0_i32, %arg1 : i32, i32
  }
  func.func @transform_2(%arg0: i32, %arg1: i32) -> (i32, i32) {
    %c0_i32 = arith.constant 0 : i32
    %c0_i32_0 = arith.constant 0 : i32
    return %c0_i32, %arg1 : i32, i32
  }
  func.func @transform_3(%arg0: i32, %arg1: i32) -> (i32, i32) {
    %c0_i32 = arith.constant 0 : i32
    return %arg0, %arg1 : i32, i32
  }
}

module attributes {stable_mosaic.version = 11 : i64} {
  func.func @_conv_tap_kernel(%arg0: i32, %arg1: i32, %arg2: i32, %arg3: memref<1x1x10x10x16xbf16, #tpu.memory_space<vmem>>, %arg4: memref<144x16xbf16, #tpu.memory_space<vmem>>, %arg5: memref<1x16xf32, #tpu.memory_space<vmem>>, %arg6: memref<1x8x8x16xbf16, #tpu.memory_space<vmem>>) attributes {dimension_semantics = [#tpu.dimension_semantics<parallel>, #tpu.dimension_semantics<parallel>, #tpu.dimension_semantics<parallel>], iteration_bounds = array<i64: 2, 1, 1>, scalar_prefetch = 0 : i64, scratch_operands = 0 : i64, tpu.core_type = #tpu.core_type<tc>, window_params = [{transform_indices = @transform_0, window_bounds = array<i64: 1, 1, 10, 10, 16>}, {transform_indices = @transform_1, window_bounds = array<i64: 144, 16>}, {transform_indices = @transform_2, window_bounds = array<i64: 1, 16>}, {transform_indices = @transform_3, window_bounds = array<i64: 1, 8, 8, 16>}]} {
    %c8_i32 = arith.constant 8 : i32
    %0 = arith.muli %arg1, %c8_i32 : i32
    %c0 = arith.constant 0 : index
    %c0_0 = arith.constant 0 : index
    %1 = vector.load %arg5[%c0, %c0_0] : memref<1x16xf32, #tpu.memory_space<vmem>>, vector<1x16xf32>
    %c0_i32 = arith.constant 0 : i32
    %c8_i32_1 = arith.constant 8 : i32
    %2 = arith.addi %c0_i32, %c8_i32_1 : i32
    %c1_i32 = arith.constant 1 : i32
    scf.for %arg7 = %c0_i32 to %2 step %c1_i32  : i32 {
      %3 = arith.addi %0, %arg7 : i32
      %c0_i32_3 = arith.constant 0 : i32
      %4 = arith.addi %3, %c0_i32_3 : i32
      %c0_4 = arith.constant 0 : index
      %c0_5 = arith.constant 0 : index
      %5 = arith.index_cast %4 : i32 to index
      %c0_6 = arith.constant 0 : index
      %c0_7 = arith.constant 0 : index
      %6 = vector.load %arg3[%c0_4, %c0_5, %5, %c0_6, %c0_7] : memref<1x1x10x10x16xbf16, #tpu.memory_space<vmem>>, vector<1x1x1x8x16xbf16>
      %7 = vector.shape_cast %6 : vector<1x1x1x8x16xbf16> to vector<1x8x16xbf16>
      %8 = vector.shape_cast %7 : vector<1x8x16xbf16> to vector<8x16xbf16>
      %c0_8 = arith.constant 0 : index
      %c0_9 = arith.constant 0 : index
      %9 = vector.load %arg4[%c0_8, %c0_9] : memref<144x16xbf16, #tpu.memory_space<vmem>>, vector<16x16xbf16>
      %cst = arith.constant dense<0.000000e+00> : vector<8x16xf32>
      %10 = tpu.matmul %8, %9, %cst {dimension_numbers = #tpu.dot_dimension_numbers<[1], [0], [0], [1], [0, 0, 1, 1], [], []>} : vector<8x16xbf16>, vector<16x16xbf16>, vector<8x16xf32> -> vector<8x16xf32>
      %11 = vector.broadcast %1 : vector<1x16xf32> to vector<8x16xf32>
      %12 = arith.addf %10, %11 : vector<8x16xf32>
      %c0_i32_10 = arith.constant 0 : i32
      %13 = arith.addi %3, %c0_i32_10 : i32
      %c0_11 = arith.constant 0 : index
      %c0_12 = arith.constant 0 : index
      %14 = arith.index_cast %13 : i32 to index
      %c1 = arith.constant 1 : index
      %c0_13 = arith.constant 0 : index
      %15 = vector.load %arg3[%c0_11, %c0_12, %14, %c1, %c0_13] : memref<1x1x10x10x16xbf16, #tpu.memory_space<vmem>>, vector<1x1x1x8x16xbf16>
      %16 = vector.shape_cast %15 : vector<1x1x1x8x16xbf16> to vector<1x8x16xbf16>
      %17 = vector.shape_cast %16 : vector<1x8x16xbf16> to vector<8x16xbf16>
      %c16 = arith.constant 16 : index
      %c0_14 = arith.constant 0 : index
      %18 = vector.load %arg4[%c16, %c0_14] : memref<144x16xbf16, #tpu.memory_space<vmem>>, vector<16x16xbf16>
      %cst_15 = arith.constant dense<0.000000e+00> : vector<8x16xf32>
      %19 = tpu.matmul %17, %18, %cst_15 {dimension_numbers = #tpu.dot_dimension_numbers<[1], [0], [0], [1], [0, 0, 1, 1], [], []>} : vector<8x16xbf16>, vector<16x16xbf16>, vector<8x16xf32> -> vector<8x16xf32>
      %20 = arith.addf %12, %19 : vector<8x16xf32>
      %c0_i32_16 = arith.constant 0 : i32
      %21 = arith.addi %3, %c0_i32_16 : i32
      %c0_17 = arith.constant 0 : index
      %c0_18 = arith.constant 0 : index
      %22 = arith.index_cast %21 : i32 to index
      %c2 = arith.constant 2 : index
      %c0_19 = arith.constant 0 : index
      %23 = vector.load %arg3[%c0_17, %c0_18, %22, %c2, %c0_19] : memref<1x1x10x10x16xbf16, #tpu.memory_space<vmem>>, vector<1x1x1x8x16xbf16>
      %24 = vector.shape_cast %23 : vector<1x1x1x8x16xbf16> to vector<1x8x16xbf16>
      %25 = vector.shape_cast %24 : vector<1x8x16xbf16> to vector<8x16xbf16>
      %c32 = arith.constant 32 : index
      %c0_20 = arith.constant 0 : index
      %26 = vector.load %arg4[%c32, %c0_20] : memref<144x16xbf16, #tpu.memory_space<vmem>>, vector<16x16xbf16>
      %cst_21 = arith.constant dense<0.000000e+00> : vector<8x16xf32>
      %27 = tpu.matmul %25, %26, %cst_21 {dimension_numbers = #tpu.dot_dimension_numbers<[1], [0], [0], [1], [0, 0, 1, 1], [], []>} : vector<8x16xbf16>, vector<16x16xbf16>, vector<8x16xf32> -> vector<8x16xf32>
      %28 = arith.addf %20, %27 : vector<8x16xf32>
      %c1_i32_22 = arith.constant 1 : i32
      %29 = arith.addi %3, %c1_i32_22 : i32
      %c0_23 = arith.constant 0 : index
      %c0_24 = arith.constant 0 : index
      %30 = arith.index_cast %29 : i32 to index
      %c0_25 = arith.constant 0 : index
      %c0_26 = arith.constant 0 : index
      %31 = vector.load %arg3[%c0_23, %c0_24, %30, %c0_25, %c0_26] : memref<1x1x10x10x16xbf16, #tpu.memory_space<vmem>>, vector<1x1x1x8x16xbf16>
      %32 = vector.shape_cast %31 : vector<1x1x1x8x16xbf16> to vector<1x8x16xbf16>
      %33 = vector.shape_cast %32 : vector<1x8x16xbf16> to vector<8x16xbf16>
      %c48 = arith.constant 48 : index
      %c0_27 = arith.constant 0 : index
      %34 = vector.load %arg4[%c48, %c0_27] : memref<144x16xbf16, #tpu.memory_space<vmem>>, vector<16x16xbf16>
      %cst_28 = arith.constant dense<0.000000e+00> : vector<8x16xf32>
      %35 = tpu.matmul %33, %34, %cst_28 {dimension_numbers = #tpu.dot_dimension_numbers<[1], [0], [0], [1], [0, 0, 1, 1], [], []>} : vector<8x16xbf16>, vector<16x16xbf16>, vector<8x16xf32> -> vector<8x16xf32>
      %36 = arith.addf %28, %35 : vector<8x16xf32>
      %c1_i32_29 = arith.constant 1 : i32
      %37 = arith.addi %3, %c1_i32_29 : i32
      %c0_30 = arith.constant 0 : index
      %c0_31 = arith.constant 0 : index
      %38 = arith.index_cast %37 : i32 to index
      %c1_32 = arith.constant 1 : index
      %c0_33 = arith.constant 0 : index
      %39 = vector.load %arg3[%c0_30, %c0_31, %38, %c1_32, %c0_33] : memref<1x1x10x10x16xbf16, #tpu.memory_space<vmem>>, vector<1x1x1x8x16xbf16>
      %40 = vector.shape_cast %39 : vector<1x1x1x8x16xbf16> to vector<1x8x16xbf16>
      %41 = vector.shape_cast %40 : vector<1x8x16xbf16> to vector<8x16xbf16>
      %c64 = arith.constant 64 : index
      %c0_34 = arith.constant 0 : index
      %42 = vector.load %arg4[%c64, %c0_34] : memref<144x16xbf16, #tpu.memory_space<vmem>>, vector<16x16xbf16>
      %cst_35 = arith.constant dense<0.000000e+00> : vector<8x16xf32>
      %43 = tpu.matmul %41, %42, %cst_35 {dimension_numbers = #tpu.dot_dimension_numbers<[1], [0], [0], [1], [0, 0, 1, 1], [], []>} : vector<8x16xbf16>, vector<16x16xbf16>, vector<8x16xf32> -> vector<8x16xf32>
      %44 = arith.addf %36, %43 : vector<8x16xf32>
      %c1_i32_36 = arith.constant 1 : i32
      %45 = arith.addi %3, %c1_i32_36 : i32
      %c0_37 = arith.constant 0 : index
      %c0_38 = arith.constant 0 : index
      %46 = arith.index_cast %45 : i32 to index
      %c2_39 = arith.constant 2 : index
      %c0_40 = arith.constant 0 : index
      %47 = vector.load %arg3[%c0_37, %c0_38, %46, %c2_39, %c0_40] : memref<1x1x10x10x16xbf16, #tpu.memory_space<vmem>>, vector<1x1x1x8x16xbf16>
      %48 = vector.shape_cast %47 : vector<1x1x1x8x16xbf16> to vector<1x8x16xbf16>
      %49 = vector.shape_cast %48 : vector<1x8x16xbf16> to vector<8x16xbf16>
      %c80 = arith.constant 80 : index
      %c0_41 = arith.constant 0 : index
      %50 = vector.load %arg4[%c80, %c0_41] : memref<144x16xbf16, #tpu.memory_space<vmem>>, vector<16x16xbf16>
      %cst_42 = arith.constant dense<0.000000e+00> : vector<8x16xf32>
      %51 = tpu.matmul %49, %50, %cst_42 {dimension_numbers = #tpu.dot_dimension_numbers<[1], [0], [0], [1], [0, 0, 1, 1], [], []>} : vector<8x16xbf16>, vector<16x16xbf16>, vector<8x16xf32> -> vector<8x16xf32>
      %52 = arith.addf %44, %51 : vector<8x16xf32>
      %c2_i32 = arith.constant 2 : i32
      %53 = arith.addi %3, %c2_i32 : i32
      %c0_43 = arith.constant 0 : index
      %c0_44 = arith.constant 0 : index
      %54 = arith.index_cast %53 : i32 to index
      %c0_45 = arith.constant 0 : index
      %c0_46 = arith.constant 0 : index
      %55 = vector.load %arg3[%c0_43, %c0_44, %54, %c0_45, %c0_46] : memref<1x1x10x10x16xbf16, #tpu.memory_space<vmem>>, vector<1x1x1x8x16xbf16>
      %56 = vector.shape_cast %55 : vector<1x1x1x8x16xbf16> to vector<1x8x16xbf16>
      %57 = vector.shape_cast %56 : vector<1x8x16xbf16> to vector<8x16xbf16>
      %c96 = arith.constant 96 : index
      %c0_47 = arith.constant 0 : index
      %58 = vector.load %arg4[%c96, %c0_47] : memref<144x16xbf16, #tpu.memory_space<vmem>>, vector<16x16xbf16>
      %cst_48 = arith.constant dense<0.000000e+00> : vector<8x16xf32>
      %59 = tpu.matmul %57, %58, %cst_48 {dimension_numbers = #tpu.dot_dimension_numbers<[1], [0], [0], [1], [0, 0, 1, 1], [], []>} : vector<8x16xbf16>, vector<16x16xbf16>, vector<8x16xf32> -> vector<8x16xf32>
      %60 = arith.addf %52, %59 : vector<8x16xf32>
      %c2_i32_49 = arith.constant 2 : i32
      %61 = arith.addi %3, %c2_i32_49 : i32
      %c0_50 = arith.constant 0 : index
      %c0_51 = arith.constant 0 : index
      %62 = arith.index_cast %61 : i32 to index
      %c1_52 = arith.constant 1 : index
      %c0_53 = arith.constant 0 : index
      %63 = vector.load %arg3[%c0_50, %c0_51, %62, %c1_52, %c0_53] : memref<1x1x10x10x16xbf16, #tpu.memory_space<vmem>>, vector<1x1x1x8x16xbf16>
      %64 = vector.shape_cast %63 : vector<1x1x1x8x16xbf16> to vector<1x8x16xbf16>
      %65 = vector.shape_cast %64 : vector<1x8x16xbf16> to vector<8x16xbf16>
      %c112 = arith.constant 112 : index
      %c0_54 = arith.constant 0 : index
      %66 = vector.load %arg4[%c112, %c0_54] : memref<144x16xbf16, #tpu.memory_space<vmem>>, vector<16x16xbf16>
      %cst_55 = arith.constant dense<0.000000e+00> : vector<8x16xf32>
      %67 = tpu.matmul %65, %66, %cst_55 {dimension_numbers = #tpu.dot_dimension_numbers<[1], [0], [0], [1], [0, 0, 1, 1], [], []>} : vector<8x16xbf16>, vector<16x16xbf16>, vector<8x16xf32> -> vector<8x16xf32>
      %68 = arith.addf %60, %67 : vector<8x16xf32>
      %c2_i32_56 = arith.constant 2 : i32
      %69 = arith.addi %3, %c2_i32_56 : i32
      %c0_57 = arith.constant 0 : index
      %c0_58 = arith.constant 0 : index
      %70 = arith.index_cast %69 : i32 to index
      %c2_59 = arith.constant 2 : index
      %c0_60 = arith.constant 0 : index
      %71 = vector.load %arg3[%c0_57, %c0_58, %70, %c2_59, %c0_60] : memref<1x1x10x10x16xbf16, #tpu.memory_space<vmem>>, vector<1x1x1x8x16xbf16>
      %72 = vector.shape_cast %71 : vector<1x1x1x8x16xbf16> to vector<1x8x16xbf16>
      %73 = vector.shape_cast %72 : vector<1x8x16xbf16> to vector<8x16xbf16>
      %c128 = arith.constant 128 : index
      %c0_61 = arith.constant 0 : index
      %74 = vector.load %arg4[%c128, %c0_61] : memref<144x16xbf16, #tpu.memory_space<vmem>>, vector<16x16xbf16>
      %cst_62 = arith.constant dense<0.000000e+00> : vector<8x16xf32>
      %75 = tpu.matmul %73, %74, %cst_62 {dimension_numbers = #tpu.dot_dimension_numbers<[1], [0], [0], [1], [0, 0, 1, 1], [], []>} : vector<8x16xbf16>, vector<16x16xbf16>, vector<8x16xf32> -> vector<8x16xf32>
      %76 = arith.addf %68, %75 : vector<8x16xf32>
      %cst_63 = arith.constant 0.000000e+00 : f32
      %77 = vector.broadcast %cst_63 : f32 to vector<8x16xf32>
      %78 = arith.maximumf %76, %77 : vector<8x16xf32>
      %79 = vector.shape_cast %78 : vector<8x16xf32> to vector<1x8x16xf32>
      %80 = arith.truncf %79 : vector<1x8x16xf32> to vector<1x8x16xbf16>
      %c0_64 = arith.constant 0 : index
      %81 = arith.index_cast %arg7 : i32 to index
      %c0_65 = arith.constant 0 : index
      %c0_66 = arith.constant 0 : index
      %82 = vector.load %arg6[%c0_64, %81, %c0_65, %c0_66] : memref<1x8x8x16xbf16, #tpu.memory_space<vmem>>, vector<1x1x8x16xbf16>
      %83 = vector.shape_cast %82 : vector<1x1x8x16xbf16> to vector<1x8x16xbf16>
      %84 = vector.shape_cast %80 : vector<1x8x16xbf16> to vector<1x1x8x16xbf16>
      tpu.vector_store %arg6[%c0_64, %81, %c0_65, %c0_66], %84 {strides = array<i32>} : memref<1x8x8x16xbf16, #tpu.memory_space<vmem>>, vector<1x1x8x16xbf16>,
    }
    %c8_i32_2 = arith.constant 8 : i32
    return
  }
  func.func @transform_0(%arg0: i32, %arg1: i32, %arg2: i32) -> (i32, i32, i32, i32, i32) {
    %c0_i32 = arith.constant 0 : i32
    %c0_i32_0 = arith.constant 0 : i32
    %c0_i32_1 = arith.constant 0 : i32
    %c0_i32_2 = arith.constant 0 : i32
    %c0_i32_3 = arith.constant 0 : i32
    return %arg0, %c0_i32, %c0_i32_0, %c0_i32_1, %c0_i32_2 : i32, i32, i32, i32, i32
  }
  func.func @transform_1(%arg0: i32, %arg1: i32, %arg2: i32) -> (i32, i32) {
    %c0_i32 = arith.constant 0 : i32
    %c0_i32_0 = arith.constant 0 : i32
    return %c0_i32, %arg2 : i32, i32
  }
  func.func @transform_2(%arg0: i32, %arg1: i32, %arg2: i32) -> (i32, i32) {
    %c0_i32 = arith.constant 0 : i32
    %c0_i32_0 = arith.constant 0 : i32
    return %c0_i32, %arg2 : i32, i32
  }
  func.func @transform_3(%arg0: i32, %arg1: i32, %arg2: i32) -> (i32, i32, i32, i32) {
    %c0_i32 = arith.constant 0 : i32
    %c0_i32_0 = arith.constant 0 : i32
    return %arg0, %arg1, %c0_i32, %arg2 : i32, i32, i32, i32
  }
}

module attributes {stable_mosaic.version = 11 : i64} {
  func.func @_mm_res_kernel(%arg0: i32, %arg1: i32, %arg2: memref<64x16xbf16, #tpu.memory_space<vmem>>, %arg3: memref<16x64xbf16, #tpu.memory_space<vmem>>, %arg4: memref<1x64xf32, #tpu.memory_space<vmem>>, %arg5: memref<64x64xbf16, #tpu.memory_space<vmem>>, %arg6: memref<64x64xbf16, #tpu.memory_space<vmem>>) attributes {dimension_semantics = [#tpu.dimension_semantics<parallel>, #tpu.dimension_semantics<parallel>], iteration_bounds = array<i64: 2, 1>, scalar_prefetch = 0 : i64, scratch_operands = 0 : i64, tpu.core_type = #tpu.core_type<tc>, window_params = [{transform_indices = @transform_0, window_bounds = array<i64: 64, 16>}, {transform_indices = @transform_1, window_bounds = array<i64: 16, 64>}, {transform_indices = @transform_2, window_bounds = array<i64: 1, 64>}, {transform_indices = @transform_3, window_bounds = array<i64: 64, 64>}, {transform_indices = @transform_4, window_bounds = array<i64: 64, 64>}]} {
    %c0 = arith.constant 0 : index
    %c0_0 = arith.constant 0 : index
    %0 = vector.load %arg2[%c0, %c0_0] : memref<64x16xbf16, #tpu.memory_space<vmem>>, vector<64x16xbf16>
    %c0_1 = arith.constant 0 : index
    %c0_2 = arith.constant 0 : index
    %1 = vector.load %arg3[%c0_1, %c0_2] : memref<16x64xbf16, #tpu.memory_space<vmem>>, vector<16x64xbf16>
    %cst = arith.constant dense<0.000000e+00> : vector<64x64xf32>
    %2 = tpu.matmul %0, %1, %cst {dimension_numbers = #tpu.dot_dimension_numbers<[1], [0], [0], [1], [0, 0, 1, 1], [], []>} : vector<64x16xbf16>, vector<16x64xbf16>, vector<64x64xf32> -> vector<64x64xf32>
    %c0_3 = arith.constant 0 : index
    %c0_4 = arith.constant 0 : index
    %3 = vector.load %arg4[%c0_3, %c0_4] : memref<1x64xf32, #tpu.memory_space<vmem>>, vector<1x64xf32>
    %4 = vector.broadcast %3 : vector<1x64xf32> to vector<64x64xf32>
    %5 = arith.addf %2, %4 : vector<64x64xf32>
    %c0_5 = arith.constant 0 : index
    %c0_6 = arith.constant 0 : index
    %6 = vector.load %arg5[%c0_5, %c0_6] : memref<64x64xbf16, #tpu.memory_space<vmem>>, vector<64x64xbf16>
    %7 = arith.extf %6 : vector<64x64xbf16> to vector<64x64xf32>
    %8 = arith.addf %5, %7 : vector<64x64xf32>
    %cst_7 = arith.constant 0.000000e+00 : f32
    %9 = vector.broadcast %cst_7 : f32 to vector<64x64xf32>
    %10 = arith.maximumf %8, %9 : vector<64x64xf32>
    %11 = arith.truncf %10 : vector<64x64xf32> to vector<64x64xbf16>
    %c0_8 = arith.constant 0 : index
    %c0_9 = arith.constant 0 : index
    %12 = vector.load %arg6[%c0_8, %c0_9] : memref<64x64xbf16, #tpu.memory_space<vmem>>, vector<64x64xbf16>
    tpu.vector_store %arg6[%c0_8, %c0_9], %11 {strides = array<i32>} : memref<64x64xbf16, #tpu.memory_space<vmem>>, vector<64x64xbf16>,
    return
  }
  func.func @transform_0(%arg0: i32, %arg1: i32) -> (i32, i32) {
    %c0_i32 = arith.constant 0 : i32
    %c0_i32_0 = arith.constant 0 : i32
    return %arg0, %c0_i32 : i32, i32
  }
  func.func @transform_1(%arg0: i32, %arg1: i32) -> (i32, i32) {
    %c0_i32 = arith.constant 0 : i32
    %c0_i32_0 = arith.constant 0 : i32
    return %c0_i32, %arg1 : i32, i32
  }
  func.func @transform_2(%arg0: i32, %arg1: i32) -> (i32, i32) {
    %c0_i32 = arith.constant 0 : i32
    %c0_i32_0 = arith.constant 0 : i32
    return %c0_i32, %arg1 : i32, i32
  }
  func.func @transform_3(%arg0: i32, %arg1: i32) -> (i32, i32) {
    %c0_i32 = arith.constant 0 : i32
    return %arg0, %arg1 : i32, i32
  }
  func.func @transform_4(%arg0: i32, %arg1: i32) -> (i32, i32) {
    %c0_i32 = arith.constant 0 : i32
    return %arg0, %arg1 : i32, i32
  }
}

module attributes {stable_mosaic.version = 11 : i64} {
  func.func @_mm_kernel(%arg0: i32, %arg1: i32, %arg2: memref<64x64xbf16, #tpu.memory_space<vmem>>, %arg3: memref<64x32xbf16, #tpu.memory_space<vmem>>, %arg4: memref<1x32xf32, #tpu.memory_space<vmem>>, %arg5: memref<64x32xbf16, #tpu.memory_space<vmem>>) attributes {dimension_semantics = [#tpu.dimension_semantics<parallel>, #tpu.dimension_semantics<parallel>], iteration_bounds = array<i64: 2, 1>, scalar_prefetch = 0 : i64, scratch_operands = 0 : i64, tpu.core_type = #tpu.core_type<tc>, window_params = [{transform_indices = @transform_0, window_bounds = array<i64: 64, 64>}, {transform_indices = @transform_1, window_bounds = array<i64: 64, 32>}, {transform_indices = @transform_2, window_bounds = array<i64: 1, 32>}, {transform_indices = @transform_3, window_bounds = array<i64: 64, 32>}]} {
    %c0 = arith.constant 0 : index
    %c0_0 = arith.constant 0 : index
    %0 = vector.load %arg2[%c0, %c0_0] : memref<64x64xbf16, #tpu.memory_space<vmem>>, vector<64x64xbf16>
    %c0_1 = arith.constant 0 : index
    %c0_2 = arith.constant 0 : index
    %1 = vector.load %arg3[%c0_1, %c0_2] : memref<64x32xbf16, #tpu.memory_space<vmem>>, vector<64x32xbf16>
    %cst = arith.constant dense<0.000000e+00> : vector<64x32xf32>
    %2 = tpu.matmul %0, %1, %cst {dimension_numbers = #tpu.dot_dimension_numbers<[1], [0], [0], [1], [0, 0, 1, 1], [], []>} : vector<64x64xbf16>, vector<64x32xbf16>, vector<64x32xf32> -> vector<64x32xf32>
    %c0_3 = arith.constant 0 : index
    %c0_4 = arith.constant 0 : index
    %3 = vector.load %arg4[%c0_3, %c0_4] : memref<1x32xf32, #tpu.memory_space<vmem>>, vector<1x32xf32>
    %4 = vector.broadcast %3 : vector<1x32xf32> to vector<64x32xf32>
    %5 = arith.addf %2, %4 : vector<64x32xf32>
    %cst_5 = arith.constant 0.000000e+00 : f32
    %6 = vector.broadcast %cst_5 : f32 to vector<64x32xf32>
    %7 = arith.maximumf %5, %6 : vector<64x32xf32>
    %8 = arith.truncf %7 : vector<64x32xf32> to vector<64x32xbf16>
    %c0_6 = arith.constant 0 : index
    %c0_7 = arith.constant 0 : index
    %9 = vector.load %arg5[%c0_6, %c0_7] : memref<64x32xbf16, #tpu.memory_space<vmem>>, vector<64x32xbf16>
    tpu.vector_store %arg5[%c0_6, %c0_7], %8 {strides = array<i32>} : memref<64x32xbf16, #tpu.memory_space<vmem>>, vector<64x32xbf16>,
    return
  }
  func.func @transform_0(%arg0: i32, %arg1: i32) -> (i32, i32) {
    %c0_i32 = arith.constant 0 : i32
    %c0_i32_0 = arith.constant 0 : i32
    return %arg0, %c0_i32 : i32, i32
  }
  func.func @transform_1(%arg0: i32, %arg1: i32) -> (i32, i32) {
    %c0_i32 = arith.constant 0 : i32
    %c0_i32_0 = arith.constant 0 : i32
    return %c0_i32, %arg1 : i32, i32
  }
  func.func @transform_2(%arg0: i32, %arg1: i32) -> (i32, i32) {
    %c0_i32 = arith.constant 0 : i32
    %c0_i32_0 = arith.constant 0 : i32
    return %c0_i32, %arg1 : i32, i32
  }
  func.func @transform_3(%arg0: i32, %arg1: i32) -> (i32, i32) {
    %c0_i32 = arith.constant 0 : i32
    return %arg0, %arg1 : i32, i32
  }
}

module attributes {stable_mosaic.version = 11 : i64} {
  func.func @_conv_tap_kernel(%arg0: i32, %arg1: i32, %arg2: i32, %arg3: memref<1x4x5x5x32xbf16, #tpu.memory_space<vmem>>, %arg4: memref<288x32xbf16, #tpu.memory_space<vmem>>, %arg5: memref<1x32xf32, #tpu.memory_space<vmem>>, %arg6: memref<1x4x4x32xbf16, #tpu.memory_space<vmem>>) attributes {dimension_semantics = [#tpu.dimension_semantics<parallel>, #tpu.dimension_semantics<parallel>, #tpu.dimension_semantics<parallel>], iteration_bounds = array<i64: 2, 1, 1>, scalar_prefetch = 0 : i64, scratch_operands = 0 : i64, tpu.core_type = #tpu.core_type<tc>, window_params = [{transform_indices = @transform_0, window_bounds = array<i64: 1, 4, 5, 5, 32>}, {transform_indices = @transform_1, window_bounds = array<i64: 288, 32>}, {transform_indices = @transform_2, window_bounds = array<i64: 1, 32>}, {transform_indices = @transform_3, window_bounds = array<i64: 1, 4, 4, 32>}]} {
    %c4_i32 = arith.constant 4 : i32
    %0 = arith.muli %arg1, %c4_i32 : i32
    %c0 = arith.constant 0 : index
    %c0_0 = arith.constant 0 : index
    %1 = vector.load %arg5[%c0, %c0_0] : memref<1x32xf32, #tpu.memory_space<vmem>>, vector<1x32xf32>
    %c0_i32 = arith.constant 0 : i32
    %c4_i32_1 = arith.constant 4 : i32
    %2 = arith.addi %c0_i32, %c4_i32_1 : i32
    %c1_i32 = arith.constant 1 : i32
    scf.for %arg7 = %c0_i32 to %2 step %c1_i32  : i32 {
      %3 = arith.addi %0, %arg7 : i32
      %c0_i32_3 = arith.constant 0 : i32
      %4 = arith.addi %3, %c0_i32_3 : i32
      %c0_4 = arith.constant 0 : index
      %c0_5 = arith.constant 0 : index
      %5 = arith.index_cast %4 : i32 to index
      %c0_6 = arith.constant 0 : index
      %c0_7 = arith.constant 0 : index
      %6 = vector.load %arg3[%c0_4, %c0_5, %5, %c0_6, %c0_7] : memref<1x4x5x5x32xbf16, #tpu.memory_space<vmem>>, vector<1x1x1x4x32xbf16>
      %7 = vector.shape_cast %6 : vector<1x1x1x4x32xbf16> to vector<1x4x32xbf16>
      %8 = vector.shape_cast %7 : vector<1x4x32xbf16> to vector<4x32xbf16>
      %c0_8 = arith.constant 0 : index
      %c0_9 = arith.constant 0 : index
      %9 = vector.load %arg4[%c0_8, %c0_9] : memref<288x32xbf16, #tpu.memory_space<vmem>>, vector<32x32xbf16>
      %cst = arith.constant dense<0.000000e+00> : vector<4x32xf32>
      %10 = tpu.matmul %8, %9, %cst {dimension_numbers = #tpu.dot_dimension_numbers<[1], [0], [0], [1], [0, 0, 1, 1], [], []>} : vector<4x32xbf16>, vector<32x32xbf16>, vector<4x32xf32> -> vector<4x32xf32>
      %11 = vector.broadcast %1 : vector<1x32xf32> to vector<4x32xf32>
      %12 = arith.addf %10, %11 : vector<4x32xf32>
      %c0_i32_10 = arith.constant 0 : i32
      %13 = arith.addi %3, %c0_i32_10 : i32
      %c0_11 = arith.constant 0 : index
      %c1 = arith.constant 1 : index
      %14 = arith.index_cast %13 : i32 to index
      %c0_12 = arith.constant 0 : index
      %c0_13 = arith.constant 0 : index
      %15 = vector.load %arg3[%c0_11, %c1, %14, %c0_12, %c0_13] : memref<1x4x5x5x32xbf16, #tpu.memory_space<vmem>>, vector<1x1x1x4x32xbf16>
      %16 = vector.shape_cast %15 : vector<1x1x1x4x32xbf16> to vector<1x4x32xbf16>
      %17 = vector.shape_cast %16 : vector<1x4x32xbf16> to vector<4x32xbf16>
      %c32 = arith.constant 32 : index
      %c0_14 = arith.constant 0 : index
      %18 = vector.load %arg4[%c32, %c0_14] : memref<288x32xbf16, #tpu.memory_space<vmem>>, vector<32x32xbf16>
      %cst_15 = arith.constant dense<0.000000e+00> : vector<4x32xf32>
      %19 = tpu.matmul %17, %18, %cst_15 {dimension_numbers = #tpu.dot_dimension_numbers<[1], [0], [0], [1], [0, 0, 1, 1], [], []>} : vector<4x32xbf16>, vector<32x32xbf16>, vector<4x32xf32> -> vector<4x32xf32>
      %20 = arith.addf %12, %19 : vector<4x32xf32>
      %c0_i32_16 = arith.constant 0 : i32
      %21 = arith.addi %3, %c0_i32_16 : i32
      %c0_17 = arith.constant 0 : index
      %c0_18 = arith.constant 0 : index
      %22 = arith.index_cast %21 : i32 to index
      %c1_19 = arith.constant 1 : index
      %c0_20 = arith.constant 0 : index
      %23 = vector.load %arg3[%c0_17, %c0_18, %22, %c1_19, %c0_20] : memref<1x4x5x5x32xbf16, #tpu.memory_space<vmem>>, vector<1x1x1x4x32xbf16>
      %24 = vector.shape_cast %23 : vector<1x1x1x4x32xbf16> to vector<1x4x32xbf16>
      %25 = vector.shape_cast %24 : vector<1x4x32xbf16> to vector<4x32xbf16>
      %c64 = arith.constant 64 : index
      %c0_21 = arith.constant 0 : index
      %26 = vector.load %arg4[%c64, %c0_21] : memref<288x32xbf16, #tpu.memory_space<vmem>>, vector<32x32xbf16>
      %cst_22 = arith.constant dense<0.000000e+00> : vector<4x32xf32>
      %27 = tpu.matmul %25, %26, %cst_22 {dimension_numbers = #tpu.dot_dimension_numbers<[1], [0], [0], [1], [0, 0, 1, 1], [], []>} : vector<4x32xbf16>, vector<32x32xbf16>, vector<4x32xf32> -> vector<4x32xf32>
      %28 = arith.addf %20, %27 : vector<4x32xf32>
      %c0_i32_23 = arith.constant 0 : i32
      %29 = arith.addi %3, %c0_i32_23 : i32
      %c0_24 = arith.constant 0 : index
      %c2 = arith.constant 2 : index
      %30 = arith.index_cast %29 : i32 to index
      %c0_25 = arith.constant 0 : index
      %c0_26 = arith.constant 0 : index
      %31 = vector.load %arg3[%c0_24, %c2, %30, %c0_25, %c0_26] : memref<1x4x5x5x32xbf16, #tpu.memory_space<vmem>>, vector<1x1x1x4x32xbf16>
      %32 = vector.shape_cast %31 : vector<1x1x1x4x32xbf16> to vector<1x4x32xbf16>
      %33 = vector.shape_cast %32 : vector<1x4x32xbf16> to vector<4x32xbf16>
      %c96 = arith.constant 96 : index
      %c0_27 = arith.constant 0 : index
      %34 = vector.load %arg4[%c96, %c0_27] : memref<288x32xbf16, #tpu.memory_space<vmem>>, vector<32x32xbf16>
      %cst_28 = arith.constant dense<0.000000e+00> : vector<4x32xf32>
      %35 = tpu.matmul %33, %34, %cst_28 {dimension_numbers = #tpu.dot_dimension_numbers<[1], [0], [0], [1], [0, 0, 1, 1], [], []>} : vector<4x32xbf16>, vector<32x32xbf16>, vector<4x32xf32> -> vector<4x32xf32>
      %36 = arith.addf %28, %35 : vector<4x32xf32>
      %c0_i32_29 = arith.constant 0 : i32
      %37 = arith.addi %3, %c0_i32_29 : i32
      %c0_30 = arith.constant 0 : index
      %c3 = arith.constant 3 : index
      %38 = arith.index_cast %37 : i32 to index
      %c0_31 = arith.constant 0 : index
      %c0_32 = arith.constant 0 : index
      %39 = vector.load %arg3[%c0_30, %c3, %38, %c0_31, %c0_32] : memref<1x4x5x5x32xbf16, #tpu.memory_space<vmem>>, vector<1x1x1x4x32xbf16>
      %40 = vector.shape_cast %39 : vector<1x1x1x4x32xbf16> to vector<1x4x32xbf16>
      %41 = vector.shape_cast %40 : vector<1x4x32xbf16> to vector<4x32xbf16>
      %c128 = arith.constant 128 : index
      %c0_33 = arith.constant 0 : index
      %42 = vector.load %arg4[%c128, %c0_33] : memref<288x32xbf16, #tpu.memory_space<vmem>>, vector<32x32xbf16>
      %cst_34 = arith.constant dense<0.000000e+00> : vector<4x32xf32>
      %43 = tpu.matmul %41, %42, %cst_34 {dimension_numbers = #tpu.dot_dimension_numbers<[1], [0], [0], [1], [0, 0, 1, 1], [], []>} : vector<4x32xbf16>, vector<32x32xbf16>, vector<4x32xf32> -> vector<4x32xf32>
      %44 = arith.addf %36, %43 : vector<4x32xf32>
      %c0_i32_35 = arith.constant 0 : i32
      %45 = arith.addi %3, %c0_i32_35 : i32
      %c0_36 = arith.constant 0 : index
      %c2_37 = arith.constant 2 : index
      %46 = arith.index_cast %45 : i32 to index
      %c1_38 = arith.constant 1 : index
      %c0_39 = arith.constant 0 : index
      %47 = vector.load %arg3[%c0_36, %c2_37, %46, %c1_38, %c0_39] : memref<1x4x5x5x32xbf16, #tpu.memory_space<vmem>>, vector<1x1x1x4x32xbf16>
      %48 = vector.shape_cast %47 : vector<1x1x1x4x32xbf16> to vector<1x4x32xbf16>
      %49 = vector.shape_cast %48 : vector<1x4x32xbf16> to vector<4x32xbf16>
      %c160 = arith.constant 160 : index
      %c0_40 = arith.constant 0 : index
      %50 = vector.load %arg4[%c160, %c0_40] : memref<288x32xbf16, #tpu.memory_space<vmem>>, vector<32x32xbf16>
      %cst_41 = arith.constant dense<0.000000e+00> : vector<4x32xf32>
      %51 = tpu.matmul %49, %50, %cst_41 {dimension_numbers = #tpu.dot_dimension_numbers<[1], [0], [0], [1], [0, 0, 1, 1], [], []>} : vector<4x32xbf16>, vector<32x32xbf16>, vector<4x32xf32> -> vector<4x32xf32>
      %52 = arith.addf %44, %51 : vector<4x32xf32>
      %c1_i32_42 = arith.constant 1 : i32
      %53 = arith.addi %3, %c1_i32_42 : i32
      %c0_43 = arith.constant 0 : index
      %c0_44 = arith.constant 0 : index
      %54 = arith.index_cast %53 : i32 to index
      %c0_45 = arith.constant 0 : index
      %c0_46 = arith.constant 0 : index
      %55 = vector.load %arg3[%c0_43, %c0_44, %54, %c0_45, %c0_46] : memref<1x4x5x5x32xbf16, #tpu.memory_space<vmem>>, vector<1x1x1x4x32xbf16>
      %56 = vector.shape_cast %55 : vector<1x1x1x4x32xbf16> to vector<1x4x32xbf16>
      %57 = vector.shape_cast %56 : vector<1x4x32xbf16> to vector<4x32xbf16>
      %c192 = arith.constant 192 : index
      %c0_47 = arith.constant 0 : index
      %58 = vector.load %arg4[%c192, %c0_47] : memref<288x32xbf16, #tpu.memory_space<vmem>>, vector<32x32xbf16>
      %cst_48 = arith.constant dense<0.000000e+00> : vector<4x32xf32>
      %59 = tpu.matmul %57, %58, %cst_48 {dimension_numbers = #tpu.dot_dimension_numbers<[1], [0], [0], [1], [0, 0, 1, 1], [], []>} : vector<4x32xbf16>, vector<32x32xbf16>, vector<4x32xf32> -> vector<4x32xf32>
      %60 = arith.addf %52, %59 : vector<4x32xf32>
      %c1_i32_49 = arith.constant 1 : i32
      %61 = arith.addi %3, %c1_i32_49 : i32
      %c0_50 = arith.constant 0 : index
      %c1_51 = arith.constant 1 : index
      %62 = arith.index_cast %61 : i32 to index
      %c0_52 = arith.constant 0 : index
      %c0_53 = arith.constant 0 : index
      %63 = vector.load %arg3[%c0_50, %c1_51, %62, %c0_52, %c0_53] : memref<1x4x5x5x32xbf16, #tpu.memory_space<vmem>>, vector<1x1x1x4x32xbf16>
      %64 = vector.shape_cast %63 : vector<1x1x1x4x32xbf16> to vector<1x4x32xbf16>
      %65 = vector.shape_cast %64 : vector<1x4x32xbf16> to vector<4x32xbf16>
      %c224 = arith.constant 224 : index
      %c0_54 = arith.constant 0 : index
      %66 = vector.load %arg4[%c224, %c0_54] : memref<288x32xbf16, #tpu.memory_space<vmem>>, vector<32x32xbf16>
      %cst_55 = arith.constant dense<0.000000e+00> : vector<4x32xf32>
      %67 = tpu.matmul %65, %66, %cst_55 {dimension_numbers = #tpu.dot_dimension_numbers<[1], [0], [0], [1], [0, 0, 1, 1], [], []>} : vector<4x32xbf16>, vector<32x32xbf16>, vector<4x32xf32> -> vector<4x32xf32>
      %68 = arith.addf %60, %67 : vector<4x32xf32>
      %c1_i32_56 = arith.constant 1 : i32
      %69 = arith.addi %3, %c1_i32_56 : i32
      %c0_57 = arith.constant 0 : index
      %c0_58 = arith.constant 0 : index
      %70 = arith.index_cast %69 : i32 to index
      %c1_59 = arith.constant 1 : index
      %c0_60 = arith.constant 0 : index
      %71 = vector.load %arg3[%c0_57, %c0_58, %70, %c1_59, %c0_60] : memref<1x4x5x5x32xbf16, #tpu.memory_space<vmem>>, vector<1x1x1x4x32xbf16>
      %72 = vector.shape_cast %71 : vector<1x1x1x4x32xbf16> to vector<1x4x32xbf16>
      %73 = vector.shape_cast %72 : vector<1x4x32xbf16> to vector<4x32xbf16>
      %c256 = arith.constant 256 : index
      %c0_61 = arith.constant 0 : index
      %74 = vector.load %arg4[%c256, %c0_61] : memref<288x32xbf16, #tpu.memory_space<vmem>>, vector<32x32xbf16>
      %cst_62 = arith.constant dense<0.000000e+00> : vector<4x32xf32>
      %75 = tpu.matmul %73, %74, %cst_62 {dimension_numbers = #tpu.dot_dimension_numbers<[1], [0], [0], [1], [0, 0, 1, 1], [], []>} : vector<4x32xbf16>, vector<32x32xbf16>, vector<4x32xf32> -> vector<4x32xf32>
      %76 = arith.addf %68, %75 : vector<4x32xf32>
      %cst_63 = arith.constant 0.000000e+00 : f32
      %77 = vector.broadcast %cst_63 : f32 to vector<4x32xf32>
      %78 = arith.maximumf %76, %77 : vector<4x32xf32>
      %79 = vector.shape_cast %78 : vector<4x32xf32> to vector<1x4x32xf32>
      %80 = arith.truncf %79 : vector<1x4x32xf32> to vector<1x4x32xbf16>
      %c0_64 = arith.constant 0 : index
      %81 = arith.index_cast %arg7 : i32 to index
      %c0_65 = arith.constant 0 : index
      %c0_66 = arith.constant 0 : index
      %82 = vector.load %arg6[%c0_64, %81, %c0_65, %c0_66] : memref<1x4x4x32xbf16, #tpu.memory_space<vmem>>, vector<1x1x4x32xbf16>
      %83 = vector.shape_cast %82 : vector<1x1x4x32xbf16> to vector<1x4x32xbf16>
      %84 = vector.shape_cast %80 : vector<1x4x32xbf16> to vector<1x1x4x32xbf16>
      tpu.vector_store %arg6[%c0_64, %81, %c0_65, %c0_66], %84 {strides = array<i32>} : memref<1x4x4x32xbf16, #tpu.memory_space<vmem>>, vector<1x1x4x32xbf16>,
    }
    %c4_i32_2 = arith.constant 4 : i32
    return
  }
  func.func @transform_0(%arg0: i32, %arg1: i32, %arg2: i32) -> (i32, i32, i32, i32, i32) {
    %c0_i32 = arith.constant 0 : i32
    %c0_i32_0 = arith.constant 0 : i32
    %c0_i32_1 = arith.constant 0 : i32
    %c0_i32_2 = arith.constant 0 : i32
    %c0_i32_3 = arith.constant 0 : i32
    return %arg0, %c0_i32, %c0_i32_0, %c0_i32_1, %c0_i32_2 : i32, i32, i32, i32, i32
  }
  func.func @transform_1(%arg0: i32, %arg1: i32, %arg2: i32) -> (i32, i32) {
    %c0_i32 = arith.constant 0 : i32
    %c0_i32_0 = arith.constant 0 : i32
    return %c0_i32, %arg2 : i32, i32
  }
  func.func @transform_2(%arg0: i32, %arg1: i32, %arg2: i32) -> (i32, i32) {
    %c0_i32 = arith.constant 0 : i32
    %c0_i32_0 = arith.constant 0 : i32
    return %c0_i32, %arg2 : i32, i32
  }
  func.func @transform_3(%arg0: i32, %arg1: i32, %arg2: i32) -> (i32, i32, i32, i32) {
    %c0_i32 = arith.constant 0 : i32
    %c0_i32_0 = arith.constant 0 : i32
    return %arg0, %arg1, %c0_i32, %arg2 : i32, i32, i32, i32
  }
}

module attributes {stable_mosaic.version = 11 : i64} {
  func.func @_mm_kernel(%arg0: i32, %arg1: i32, %arg2: memref<16x64xbf16, #tpu.memory_space<vmem>>, %arg3: memref<64x128xbf16, #tpu.memory_space<vmem>>, %arg4: memref<1x128xf32, #tpu.memory_space<vmem>>, %arg5: memref<16x128xbf16, #tpu.memory_space<vmem>>) attributes {dimension_semantics = [#tpu.dimension_semantics<parallel>, #tpu.dimension_semantics<parallel>], iteration_bounds = array<i64: 2, 1>, scalar_prefetch = 0 : i64, scratch_operands = 0 : i64, tpu.core_type = #tpu.core_type<tc>, window_params = [{transform_indices = @transform_0, window_bounds = array<i64: 16, 64>}, {transform_indices = @transform_1, window_bounds = array<i64: 64, 128>}, {transform_indices = @transform_2, window_bounds = array<i64: 1, 128>}, {transform_indices = @transform_3, window_bounds = array<i64: 16, 128>}]} {
    %c0 = arith.constant 0 : index
    %c0_0 = arith.constant 0 : index
    %0 = vector.load %arg2[%c0, %c0_0] : memref<16x64xbf16, #tpu.memory_space<vmem>>, vector<16x64xbf16>
    %c0_1 = arith.constant 0 : index
    %c0_2 = arith.constant 0 : index
    %1 = vector.load %arg3[%c0_1, %c0_2] : memref<64x128xbf16, #tpu.memory_space<vmem>>, vector<64x128xbf16>
    %cst = arith.constant dense<0.000000e+00> : vector<16x128xf32>
    %2 = tpu.matmul %0, %1, %cst {dimension_numbers = #tpu.dot_dimension_numbers<[1], [0], [0], [1], [0, 0, 1, 1], [], []>} : vector<16x64xbf16>, vector<64x128xbf16>, vector<16x128xf32> -> vector<16x128xf32>
    %c0_3 = arith.constant 0 : index
    %c0_4 = arith.constant 0 : index
    %3 = vector.load %arg4[%c0_3, %c0_4] : memref<1x128xf32, #tpu.memory_space<vmem>>, vector<1x128xf32>
    %4 = vector.broadcast %3 : vector<1x128xf32> to vector<16x128xf32>
    %5 = arith.addf %2, %4 : vector<16x128xf32>
    %6 = arith.truncf %5 : vector<16x128xf32> to vector<16x128xbf16>
    %c0_5 = arith.constant 0 : index
    %c0_6 = arith.constant 0 : index
    %7 = vector.load %arg5[%c0_5, %c0_6] : memref<16x128xbf16, #tpu.memory_space<vmem>>, vector<16x128xbf16>
    tpu.vector_store %arg5[%c0_5, %c0_6], %6 {strides = array<i32>} : memref<16x128xbf16, #tpu.memory_space<vmem>>, vector<16x128xbf16>,
    return
  }
  func.func @transform_0(%arg0: i32, %arg1: i32) -> (i32, i32) {
    %c0_i32 = arith.constant 0 : i32
    %c0_i32_0 = arith.constant 0 : i32
    return %arg0, %c0_i32 : i32, i32
  }
  func.func @transform_1(%arg0: i32, %arg1: i32) -> (i32, i32) {
    %c0_i32 = arith.constant 0 : i32
    %c0_i32_0 = arith.constant 0 : i32
    return %c0_i32, %arg1 : i32, i32
  }
  func.func @transform_2(%arg0: i32, %arg1: i32) -> (i32, i32) {
    %c0_i32 = arith.constant 0 : i32
    %c0_i32_0 = arith.constant 0 : i32
    return %c0_i32, %arg1 : i32, i32
  }
  func.func @transform_3(%arg0: i32, %arg1: i32) -> (i32, i32) {
    %c0_i32 = arith.constant 0 : i32
    return %arg0, %arg1 : i32, i32
  }
}

module attributes {stable_mosaic.version = 11 : i64} {
  func.func @_mm_res_kernel(%arg0: i32, %arg1: i32, %arg2: memref<16x32xbf16, #tpu.memory_space<vmem>>, %arg3: memref<32x128xbf16, #tpu.memory_space<vmem>>, %arg4: memref<1x128xf32, #tpu.memory_space<vmem>>, %arg5: memref<16x128xbf16, #tpu.memory_space<vmem>>, %arg6: memref<16x128xbf16, #tpu.memory_space<vmem>>) attributes {dimension_semantics = [#tpu.dimension_semantics<parallel>, #tpu.dimension_semantics<parallel>], iteration_bounds = array<i64: 2, 1>, scalar_prefetch = 0 : i64, scratch_operands = 0 : i64, tpu.core_type = #tpu.core_type<tc>, window_params = [{transform_indices = @transform_0, window_bounds = array<i64: 16, 32>}, {transform_indices = @transform_1, window_bounds = array<i64: 32, 128>}, {transform_indices = @transform_2, window_bounds = array<i64: 1, 128>}, {transform_indices = @transform_3, window_bounds = array<i64: 16, 128>}, {transform_indices = @transform_4, window_bounds = array<i64: 16, 128>}]} {
    %c0 = arith.constant 0 : index
    %c0_0 = arith.constant 0 : index
    %0 = vector.load %arg2[%c0, %c0_0] : memref<16x32xbf16, #tpu.memory_space<vmem>>, vector<16x32xbf16>
    %c0_1 = arith.constant 0 : index
    %c0_2 = arith.constant 0 : index
    %1 = vector.load %arg3[%c0_1, %c0_2] : memref<32x128xbf16, #tpu.memory_space<vmem>>, vector<32x128xbf16>
    %cst = arith.constant dense<0.000000e+00> : vector<16x128xf32>
    %2 = tpu.matmul %0, %1, %cst {dimension_numbers = #tpu.dot_dimension_numbers<[1], [0], [0], [1], [0, 0, 1, 1], [], []>} : vector<16x32xbf16>, vector<32x128xbf16>, vector<16x128xf32> -> vector<16x128xf32>
    %c0_3 = arith.constant 0 : index
    %c0_4 = arith.constant 0 : index
    %3 = vector.load %arg4[%c0_3, %c0_4] : memref<1x128xf32, #tpu.memory_space<vmem>>, vector<1x128xf32>
    %4 = vector.broadcast %3 : vector<1x128xf32> to vector<16x128xf32>
    %5 = arith.addf %2, %4 : vector<16x128xf32>
    %c0_5 = arith.constant 0 : index
    %c0_6 = arith.constant 0 : index
    %6 = vector.load %arg5[%c0_5, %c0_6] : memref<16x128xbf16, #tpu.memory_space<vmem>>, vector<16x128xbf16>
    %7 = arith.extf %6 : vector<16x128xbf16> to vector<16x128xf32>
    %8 = arith.addf %5, %7 : vector<16x128xf32>
    %cst_7 = arith.constant 0.000000e+00 : f32
    %9 = vector.broadcast %cst_7 : f32 to vector<16x128xf32>
    %10 = arith.maximumf %8, %9 : vector<16x128xf32>
    %11 = arith.truncf %10 : vector<16x128xf32> to vector<16x128xbf16>
    %c0_8 = arith.constant 0 : index
    %c0_9 = arith.constant 0 : index
    %12 = vector.load %arg6[%c0_8, %c0_9] : memref<16x128xbf16, #tpu.memory_space<vmem>>, vector<16x128xbf16>
    tpu.vector_store %arg6[%c0_8, %c0_9], %11 {strides = array<i32>} : memref<16x128xbf16, #tpu.memory_space<vmem>>, vector<16x128xbf16>,
    return
  }
  func.func @transform_0(%arg0: i32, %arg1: i32) -> (i32, i32) {
    %c0_i32 = arith.constant 0 : i32
    %c0_i32_0 = arith.constant 0 : i32
    return %arg0, %c0_i32 : i32, i32
  }
  func.func @transform_1(%arg0: i32, %arg1: i32) -> (i32, i32) {
    %c0_i32 = arith.constant 0 : i32
    %c0_i32_0 = arith.constant 0 : i32
    return %c0_i32, %arg1 : i32, i32
  }
  func.func @transform_2(%arg0: i32, %arg1: i32) -> (i32, i32) {
    %c0_i32 = arith.constant 0 : i32
    %c0_i32_0 = arith.constant 0 : i32
    return %c0_i32, %arg1 : i32, i32
  }
  func.func @transform_3(%arg0: i32, %arg1: i32) -> (i32, i32) {
    %c0_i32 = arith.constant 0 : i32
    return %arg0, %arg1 : i32, i32
  }
  func.func @transform_4(%arg0: i32, %arg1: i32) -> (i32, i32) {
    %c0_i32 = arith.constant 0 : i32
    return %arg0, %arg1 : i32, i32
  }
}

module attributes {stable_mosaic.version = 11 : i64} {
  func.func @_mm_kernel(%arg0: i32, %arg1: i32, %arg2: memref<16x128xbf16, #tpu.memory_space<vmem>>, %arg3: memref<128x32xbf16, #tpu.memory_space<vmem>>, %arg4: memref<1x32xf32, #tpu.memory_space<vmem>>, %arg5: memref<16x32xbf16, #tpu.memory_space<vmem>>) attributes {dimension_semantics = [#tpu.dimension_semantics<parallel>, #tpu.dimension_semantics<parallel>], iteration_bounds = array<i64: 2, 1>, scalar_prefetch = 0 : i64, scratch_operands = 0 : i64, tpu.core_type = #tpu.core_type<tc>, window_params = [{transform_indices = @transform_0, window_bounds = array<i64: 16, 128>}, {transform_indices = @transform_1, window_bounds = array<i64: 128, 32>}, {transform_indices = @transform_2, window_bounds = array<i64: 1, 32>}, {transform_indices = @transform_3, window_bounds = array<i64: 16, 32>}]} {
    %c0 = arith.constant 0 : index
    %c0_0 = arith.constant 0 : index
    %0 = vector.load %arg2[%c0, %c0_0] : memref<16x128xbf16, #tpu.memory_space<vmem>>, vector<16x128xbf16>
    %c0_1 = arith.constant 0 : index
    %c0_2 = arith.constant 0 : index
    %1 = vector.load %arg3[%c0_1, %c0_2] : memref<128x32xbf16, #tpu.memory_space<vmem>>, vector<128x32xbf16>
    %cst = arith.constant dense<0.000000e+00> : vector<16x32xf32>
    %2 = tpu.matmul %0, %1, %cst {dimension_numbers = #tpu.dot_dimension_numbers<[1], [0], [0], [1], [0, 0, 1, 1], [], []>} : vector<16x128xbf16>, vector<128x32xbf16>, vector<16x32xf32> -> vector<16x32xf32>
    %c0_3 = arith.constant 0 : index
    %c0_4 = arith.constant 0 : index
    %3 = vector.load %arg4[%c0_3, %c0_4] : memref<1x32xf32, #tpu.memory_space<vmem>>, vector<1x32xf32>
    %4 = vector.broadcast %3 : vector<1x32xf32> to vector<16x32xf32>
    %5 = arith.addf %2, %4 : vector<16x32xf32>
    %cst_5 = arith.constant 0.000000e+00 : f32
    %6 = vector.broadcast %cst_5 : f32 to vector<16x32xf32>
    %7 = arith.maximumf %5, %6 : vector<16x32xf32>
    %8 = arith.truncf %7 : vector<16x32xf32> to vector<16x32xbf16>
    %c0_6 = arith.constant 0 : index
    %c0_7 = arith.constant 0 : index
    %9 = vector.load %arg5[%c0_6, %c0_7] : memref<16x32xbf16, #tpu.memory_space<vmem>>, vector<16x32xbf16>
    tpu.vector_store %arg5[%c0_6, %c0_7], %8 {strides = array<i32>} : memref<16x32xbf16, #tpu.memory_space<vmem>>, vector<16x32xbf16>,
    return
  }
  func.func @transform_0(%arg0: i32, %arg1: i32) -> (i32, i32) {
    %c0_i32 = arith.constant 0 : i32
    %c0_i32_0 = arith.constant 0 : i32
    return %arg0, %c0_i32 : i32, i32
  }
  func.func @transform_1(%arg0: i32, %arg1: i32) -> (i32, i32) {
    %c0_i32 = arith.constant 0 : i32
    %c0_i32_0 = arith.constant 0 : i32
    return %c0_i32, %arg1 : i32, i32
  }
  func.func @transform_2(%arg0: i32, %arg1: i32) -> (i32, i32) {
    %c0_i32 = arith.constant 0 : i32
    %c0_i32_0 = arith.constant 0 : i32
    return %c0_i32, %arg1 : i32, i32
  }
  func.func @transform_3(%arg0: i32, %arg1: i32) -> (i32, i32) {
    %c0_i32 = arith.constant 0 : i32
    return %arg0, %arg1 : i32, i32
  }
}

module attributes {stable_mosaic.version = 11 : i64} {
  func.func @_mm_res_kernel(%arg0: i32, %arg1: i32, %arg2: memref<16x32xbf16, #tpu.memory_space<vmem>>, %arg3: memref<32x128xbf16, #tpu.memory_space<vmem>>, %arg4: memref<1x128xf32, #tpu.memory_space<vmem>>, %arg5: memref<16x128xbf16, #tpu.memory_space<vmem>>, %arg6: memref<16x128xbf16, #tpu.memory_space<vmem>>) attributes {dimension_semantics = [#tpu.dimension_semantics<parallel>, #tpu.dimension_semantics<parallel>], iteration_bounds = array<i64: 2, 1>, scalar_prefetch = 0 : i64, scratch_operands = 0 : i64, tpu.core_type = #tpu.core_type<tc>, window_params = [{transform_indices = @transform_0, window_bounds = array<i64: 16, 32>}, {transform_indices = @transform_1, window_bounds = array<i64: 32, 128>}, {transform_indices = @transform_2, window_bounds = array<i64: 1, 128>}, {transform_indices = @transform_3, window_bounds = array<i64: 16, 128>}, {transform_indices = @transform_4, window_bounds = array<i64: 16, 128>}]} {
    %c0 = arith.constant 0 : index
    %c0_0 = arith.constant 0 : index
    %0 = vector.load %arg2[%c0, %c0_0] : memref<16x32xbf16, #tpu.memory_space<vmem>>, vector<16x32xbf16>
    %c0_1 = arith.constant 0 : index
    %c0_2 = arith.constant 0 : index
    %1 = vector.load %arg3[%c0_1, %c0_2] : memref<32x128xbf16, #tpu.memory_space<vmem>>, vector<32x128xbf16>
    %cst = arith.constant dense<0.000000e+00> : vector<16x128xf32>
    %2 = tpu.matmul %0, %1, %cst {dimension_numbers = #tpu.dot_dimension_numbers<[1], [0], [0], [1], [0, 0, 1, 1], [], []>} : vector<16x32xbf16>, vector<32x128xbf16>, vector<16x128xf32> -> vector<16x128xf32>
    %c0_3 = arith.constant 0 : index
    %c0_4 = arith.constant 0 : index
    %3 = vector.load %arg4[%c0_3, %c0_4] : memref<1x128xf32, #tpu.memory_space<vmem>>, vector<1x128xf32>
    %4 = vector.broadcast %3 : vector<1x128xf32> to vector<16x128xf32>
    %5 = arith.addf %2, %4 : vector<16x128xf32>
    %c0_5 = arith.constant 0 : index
    %c0_6 = arith.constant 0 : index
    %6 = vector.load %arg5[%c0_5, %c0_6] : memref<16x128xbf16, #tpu.memory_space<vmem>>, vector<16x128xbf16>
    %7 = arith.extf %6 : vector<16x128xbf16> to vector<16x128xf32>
    %8 = arith.addf %5, %7 : vector<16x128xf32>
    %cst_7 = arith.constant 0.000000e+00 : f32
    %9 = vector.broadcast %cst_7 : f32 to vector<16x128xf32>
    %10 = arith.maximumf %8, %9 : vector<16x128xf32>
    %11 = arith.truncf %10 : vector<16x128xf32> to vector<16x128xbf16>
    %c0_8 = arith.constant 0 : index
    %c0_9 = arith.constant 0 : index
    %12 = vector.load %arg6[%c0_8, %c0_9] : memref<16x128xbf16, #tpu.memory_space<vmem>>, vector<16x128xbf16>
    tpu.vector_store %arg6[%c0_8, %c0_9], %11 {strides = array<i32>} : memref<16x128xbf16, #tpu.memory_space<vmem>>, vector<16x128xbf16>,
    return
  }
  func.func @transform_0(%arg0: i32, %arg1: i32) -> (i32, i32) {
    %c0_i32 = arith.constant 0 : i32
    %c0_i32_0 = arith.constant 0 : i32
    return %arg0, %c0_i32 : i32, i32
  }
  func.func @transform_1(%arg0: i32, %arg1: i32) -> (i32, i32) {
    %c0_i32 = arith.constant 0 : i32
    %c0_i32_0 = arith.constant 0 : i32
    return %c0_i32, %arg1 : i32, i32
  }
  func.func @transform_2(%arg0: i32, %arg1: i32) -> (i32, i32) {
    %c0_i32 = arith.constant 0 : i32
    %c0_i32_0 = arith.constant 0 : i32
    return %c0_i32, %arg1 : i32, i32
  }
  func.func @transform_3(%arg0: i32, %arg1: i32) -> (i32, i32) {
    %c0_i32 = arith.constant 0 : i32
    return %arg0, %arg1 : i32, i32
  }
  func.func @transform_4(%arg0: i32, %arg1: i32) -> (i32, i32) {
    %c0_i32 = arith.constant 0 : i32
    return %arg0, %arg1 : i32, i32
  }
}

module attributes {stable_mosaic.version = 11 : i64} {
  func.func @_mm_kernel(%arg0: i32, %arg1: i32, %arg2: memref<16x128xbf16, #tpu.memory_space<vmem>>, %arg3: memref<128x32xbf16, #tpu.memory_space<vmem>>, %arg4: memref<1x32xf32, #tpu.memory_space<vmem>>, %arg5: memref<16x32xbf16, #tpu.memory_space<vmem>>) attributes {dimension_semantics = [#tpu.dimension_semantics<parallel>, #tpu.dimension_semantics<parallel>], iteration_bounds = array<i64: 2, 1>, scalar_prefetch = 0 : i64, scratch_operands = 0 : i64, tpu.core_type = #tpu.core_type<tc>, window_params = [{transform_indices = @transform_0, window_bounds = array<i64: 16, 128>}, {transform_indices = @transform_1, window_bounds = array<i64: 128, 32>}, {transform_indices = @transform_2, window_bounds = array<i64: 1, 32>}, {transform_indices = @transform_3, window_bounds = array<i64: 16, 32>}]} {
    %c0 = arith.constant 0 : index
    %c0_0 = arith.constant 0 : index
    %0 = vector.load %arg2[%c0, %c0_0] : memref<16x128xbf16, #tpu.memory_space<vmem>>, vector<16x128xbf16>
    %c0_1 = arith.constant 0 : index
    %c0_2 = arith.constant 0 : index
    %1 = vector.load %arg3[%c0_1, %c0_2] : memref<128x32xbf16, #tpu.memory_space<vmem>>, vector<128x32xbf16>
    %cst = arith.constant dense<0.000000e+00> : vector<16x32xf32>
    %2 = tpu.matmul %0, %1, %cst {dimension_numbers = #tpu.dot_dimension_numbers<[1], [0], [0], [1], [0, 0, 1, 1], [], []>} : vector<16x128xbf16>, vector<128x32xbf16>, vector<16x32xf32> -> vector<16x32xf32>
    %c0_3 = arith.constant 0 : index
    %c0_4 = arith.constant 0 : index
    %3 = vector.load %arg4[%c0_3, %c0_4] : memref<1x32xf32, #tpu.memory_space<vmem>>, vector<1x32xf32>
    %4 = vector.broadcast %3 : vector<1x32xf32> to vector<16x32xf32>
    %5 = arith.addf %2, %4 : vector<16x32xf32>
    %cst_5 = arith.constant 0.000000e+00 : f32
    %6 = vector.broadcast %cst_5 : f32 to vector<16x32xf32>
    %7 = arith.maximumf %5, %6 : vector<16x32xf32>
    %8 = arith.truncf %7 : vector<16x32xf32> to vector<16x32xbf16>
    %c0_6 = arith.constant 0 : index
    %c0_7 = arith.constant 0 : index
    %9 = vector.load %arg5[%c0_6, %c0_7] : memref<16x32xbf16, #tpu.memory_space<vmem>>, vector<16x32xbf16>
    tpu.vector_store %arg5[%c0_6, %c0_7], %8 {strides = array<i32>} : memref<16x32xbf16, #tpu.memory_space<vmem>>, vector<16x32xbf16>,
    return
  }
  func.func @transform_0(%arg0: i32, %arg1: i32) -> (i32, i32) {
    %c0_i32 = arith.constant 0 : i32
    %c0_i32_0 = arith.constant 0 : i32
    return %arg0, %c0_i32 : i32, i32
  }
  func.func @transform_1(%arg0: i32, %arg1: i32) -> (i32, i32) {
    %c0_i32 = arith.constant 0 : i32
    %c0_i32_0 = arith.constant 0 : i32
    return %c0_i32, %arg1 : i32, i32
  }
  func.func @transform_2(%arg0: i32, %arg1: i32) -> (i32, i32) {
    %c0_i32 = arith.constant 0 : i32
    %c0_i32_0 = arith.constant 0 : i32
    return %c0_i32, %arg1 : i32, i32
  }
  func.func @transform_3(%arg0: i32, %arg1: i32) -> (i32, i32) {
    %c0_i32 = arith.constant 0 : i32
    return %arg0, %arg1 : i32, i32
  }
}

module attributes {stable_mosaic.version = 11 : i64} {
  func.func @_conv_tap_kernel(%arg0: i32, %arg1: i32, %arg2: i32, %arg3: memref<1x1x6x6x32xbf16, #tpu.memory_space<vmem>>, %arg4: memref<288x32xbf16, #tpu.memory_space<vmem>>, %arg5: memref<1x32xf32, #tpu.memory_space<vmem>>, %arg6: memref<1x4x4x32xbf16, #tpu.memory_space<vmem>>) attributes {dimension_semantics = [#tpu.dimension_semantics<parallel>, #tpu.dimension_semantics<parallel>, #tpu.dimension_semantics<parallel>], iteration_bounds = array<i64: 2, 1, 1>, scalar_prefetch = 0 : i64, scratch_operands = 0 : i64, tpu.core_type = #tpu.core_type<tc>, window_params = [{transform_indices = @transform_0, window_bounds = array<i64: 1, 1, 6, 6, 32>}, {transform_indices = @transform_1, window_bounds = array<i64: 288, 32>}, {transform_indices = @transform_2, window_bounds = array<i64: 1, 32>}, {transform_indices = @transform_3, window_bounds = array<i64: 1, 4, 4, 32>}]} {
    %c4_i32 = arith.constant 4 : i32
    %0 = arith.muli %arg1, %c4_i32 : i32
    %c0 = arith.constant 0 : index
    %c0_0 = arith.constant 0 : index
    %1 = vector.load %arg5[%c0, %c0_0] : memref<1x32xf32, #tpu.memory_space<vmem>>, vector<1x32xf32>
    %c0_i32 = arith.constant 0 : i32
    %c4_i32_1 = arith.constant 4 : i32
    %2 = arith.addi %c0_i32, %c4_i32_1 : i32
    %c1_i32 = arith.constant 1 : i32
    scf.for %arg7 = %c0_i32 to %2 step %c1_i32  : i32 {
      %3 = arith.addi %0, %arg7 : i32
      %c0_i32_3 = arith.constant 0 : i32
      %4 = arith.addi %3, %c0_i32_3 : i32
      %c0_4 = arith.constant 0 : index
      %c0_5 = arith.constant 0 : index
      %5 = arith.index_cast %4 : i32 to index
      %c0_6 = arith.constant 0 : index
      %c0_7 = arith.constant 0 : index
      %6 = vector.load %arg3[%c0_4, %c0_5, %5, %c0_6, %c0_7] : memref<1x1x6x6x32xbf16, #tpu.memory_space<vmem>>, vector<1x1x1x4x32xbf16>
      %7 = vector.shape_cast %6 : vector<1x1x1x4x32xbf16> to vector<1x4x32xbf16>
      %8 = vector.shape_cast %7 : vector<1x4x32xbf16> to vector<4x32xbf16>
      %c0_8 = arith.constant 0 : index
      %c0_9 = arith.constant 0 : index
      %9 = vector.load %arg4[%c0_8, %c0_9] : memref<288x32xbf16, #tpu.memory_space<vmem>>, vector<32x32xbf16>
      %cst = arith.constant dense<0.000000e+00> : vector<4x32xf32>
      %10 = tpu.matmul %8, %9, %cst {dimension_numbers = #tpu.dot_dimension_numbers<[1], [0], [0], [1], [0, 0, 1, 1], [], []>} : vector<4x32xbf16>, vector<32x32xbf16>, vector<4x32xf32> -> vector<4x32xf32>
      %11 = vector.broadcast %1 : vector<1x32xf32> to vector<4x32xf32>
      %12 = arith.addf %10, %11 : vector<4x32xf32>
      %c0_i32_10 = arith.constant 0 : i32
      %13 = arith.addi %3, %c0_i32_10 : i32
      %c0_11 = arith.constant 0 : index
      %c0_12 = arith.constant 0 : index
      %14 = arith.index_cast %13 : i32 to index
      %c1 = arith.constant 1 : index
      %c0_13 = arith.constant 0 : index
      %15 = vector.load %arg3[%c0_11, %c0_12, %14, %c1, %c0_13] : memref<1x1x6x6x32xbf16, #tpu.memory_space<vmem>>, vector<1x1x1x4x32xbf16>
      %16 = vector.shape_cast %15 : vector<1x1x1x4x32xbf16> to vector<1x4x32xbf16>
      %17 = vector.shape_cast %16 : vector<1x4x32xbf16> to vector<4x32xbf16>
      %c32 = arith.constant 32 : index
      %c0_14 = arith.constant 0 : index
      %18 = vector.load %arg4[%c32, %c0_14] : memref<288x32xbf16, #tpu.memory_space<vmem>>, vector<32x32xbf16>
      %cst_15 = arith.constant dense<0.000000e+00> : vector<4x32xf32>
      %19 = tpu.matmul %17, %18, %cst_15 {dimension_numbers = #tpu.dot_dimension_numbers<[1], [0], [0], [1], [0, 0, 1, 1], [], []>} : vector<4x32xbf16>, vector<32x32xbf16>, vector<4x32xf32> -> vector<4x32xf32>
      %20 = arith.addf %12, %19 : vector<4x32xf32>
      %c0_i32_16 = arith.constant 0 : i32
      %21 = arith.addi %3, %c0_i32_16 : i32
      %c0_17 = arith.constant 0 : index
      %c0_18 = arith.constant 0 : index
      %22 = arith.index_cast %21 : i32 to index
      %c2 = arith.constant 2 : index
      %c0_19 = arith.constant 0 : index
      %23 = vector.load %arg3[%c0_17, %c0_18, %22, %c2, %c0_19] : memref<1x1x6x6x32xbf16, #tpu.memory_space<vmem>>, vector<1x1x1x4x32xbf16>
      %24 = vector.shape_cast %23 : vector<1x1x1x4x32xbf16> to vector<1x4x32xbf16>
      %25 = vector.shape_cast %24 : vector<1x4x32xbf16> to vector<4x32xbf16>
      %c64 = arith.constant 64 : index
      %c0_20 = arith.constant 0 : index
      %26 = vector.load %arg4[%c64, %c0_20] : memref<288x32xbf16, #tpu.memory_space<vmem>>, vector<32x32xbf16>
      %cst_21 = arith.constant dense<0.000000e+00> : vector<4x32xf32>
      %27 = tpu.matmul %25, %26, %cst_21 {dimension_numbers = #tpu.dot_dimension_numbers<[1], [0], [0], [1], [0, 0, 1, 1], [], []>} : vector<4x32xbf16>, vector<32x32xbf16>, vector<4x32xf32> -> vector<4x32xf32>
      %28 = arith.addf %20, %27 : vector<4x32xf32>
      %c1_i32_22 = arith.constant 1 : i32
      %29 = arith.addi %3, %c1_i32_22 : i32
      %c0_23 = arith.constant 0 : index
      %c0_24 = arith.constant 0 : index
      %30 = arith.index_cast %29 : i32 to index
      %c0_25 = arith.constant 0 : index
      %c0_26 = arith.constant 0 : index
      %31 = vector.load %arg3[%c0_23, %c0_24, %30, %c0_25, %c0_26] : memref<1x1x6x6x32xbf16, #tpu.memory_space<vmem>>, vector<1x1x1x4x32xbf16>
      %32 = vector.shape_cast %31 : vector<1x1x1x4x32xbf16> to vector<1x4x32xbf16>
      %33 = vector.shape_cast %32 : vector<1x4x32xbf16> to vector<4x32xbf16>
      %c96 = arith.constant 96 : index
      %c0_27 = arith.constant 0 : index
      %34 = vector.load %arg4[%c96, %c0_27] : memref<288x32xbf16, #tpu.memory_space<vmem>>, vector<32x32xbf16>
      %cst_28 = arith.constant dense<0.000000e+00> : vector<4x32xf32>
      %35 = tpu.matmul %33, %34, %cst_28 {dimension_numbers = #tpu.dot_dimension_numbers<[1], [0], [0], [1], [0, 0, 1, 1], [], []>} : vector<4x32xbf16>, vector<32x32xbf16>, vector<4x32xf32> -> vector<4x32xf32>
      %36 = arith.addf %28, %35 : vector<4x32xf32>
      %c1_i32_29 = arith.constant 1 : i32
      %37 = arith.addi %3, %c1_i32_29 : i32
      %c0_30 = arith.constant 0 : index
      %c0_31 = arith.constant 0 : index
      %38 = arith.index_cast %37 : i32 to index
      %c1_32 = arith.constant 1 : index
      %c0_33 = arith.constant 0 : index
      %39 = vector.load %arg3[%c0_30, %c0_31, %38, %c1_32, %c0_33] : memref<1x1x6x6x32xbf16, #tpu.memory_space<vmem>>, vector<1x1x1x4x32xbf16>
      %40 = vector.shape_cast %39 : vector<1x1x1x4x32xbf16> to vector<1x4x32xbf16>
      %41 = vector.shape_cast %40 : vector<1x4x32xbf16> to vector<4x32xbf16>
      %c128 = arith.constant 128 : index
      %c0_34 = arith.constant 0 : index
      %42 = vector.load %arg4[%c128, %c0_34] : memref<288x32xbf16, #tpu.memory_space<vmem>>, vector<32x32xbf16>
      %cst_35 = arith.constant dense<0.000000e+00> : vector<4x32xf32>
      %43 = tpu.matmul %41, %42, %cst_35 {dimension_numbers = #tpu.dot_dimension_numbers<[1], [0], [0], [1], [0, 0, 1, 1], [], []>} : vector<4x32xbf16>, vector<32x32xbf16>, vector<4x32xf32> -> vector<4x32xf32>
      %44 = arith.addf %36, %43 : vector<4x32xf32>
      %c1_i32_36 = arith.constant 1 : i32
      %45 = arith.addi %3, %c1_i32_36 : i32
      %c0_37 = arith.constant 0 : index
      %c0_38 = arith.constant 0 : index
      %46 = arith.index_cast %45 : i32 to index
      %c2_39 = arith.constant 2 : index
      %c0_40 = arith.constant 0 : index
      %47 = vector.load %arg3[%c0_37, %c0_38, %46, %c2_39, %c0_40] : memref<1x1x6x6x32xbf16, #tpu.memory_space<vmem>>, vector<1x1x1x4x32xbf16>
      %48 = vector.shape_cast %47 : vector<1x1x1x4x32xbf16> to vector<1x4x32xbf16>
      %49 = vector.shape_cast %48 : vector<1x4x32xbf16> to vector<4x32xbf16>
      %c160 = arith.constant 160 : index
      %c0_41 = arith.constant 0 : index
      %50 = vector.load %arg4[%c160, %c0_41] : memref<288x32xbf16, #tpu.memory_space<vmem>>, vector<32x32xbf16>
      %cst_42 = arith.constant dense<0.000000e+00> : vector<4x32xf32>
      %51 = tpu.matmul %49, %50, %cst_42 {dimension_numbers = #tpu.dot_dimension_numbers<[1], [0], [0], [1], [0, 0, 1, 1], [], []>} : vector<4x32xbf16>, vector<32x32xbf16>, vector<4x32xf32> -> vector<4x32xf32>
      %52 = arith.addf %44, %51 : vector<4x32xf32>
      %c2_i32 = arith.constant 2 : i32
      %53 = arith.addi %3, %c2_i32 : i32
      %c0_43 = arith.constant 0 : index
      %c0_44 = arith.constant 0 : index
      %54 = arith.index_cast %53 : i32 to index
      %c0_45 = arith.constant 0 : index
      %c0_46 = arith.constant 0 : index
      %55 = vector.load %arg3[%c0_43, %c0_44, %54, %c0_45, %c0_46] : memref<1x1x6x6x32xbf16, #tpu.memory_space<vmem>>, vector<1x1x1x4x32xbf16>
      %56 = vector.shape_cast %55 : vector<1x1x1x4x32xbf16> to vector<1x4x32xbf16>
      %57 = vector.shape_cast %56 : vector<1x4x32xbf16> to vector<4x32xbf16>
      %c192 = arith.constant 192 : index
      %c0_47 = arith.constant 0 : index
      %58 = vector.load %arg4[%c192, %c0_47] : memref<288x32xbf16, #tpu.memory_space<vmem>>, vector<32x32xbf16>
      %cst_48 = arith.constant dense<0.000000e+00> : vector<4x32xf32>
      %59 = tpu.matmul %57, %58, %cst_48 {dimension_numbers = #tpu.dot_dimension_numbers<[1], [0], [0], [1], [0, 0, 1, 1], [], []>} : vector<4x32xbf16>, vector<32x32xbf16>, vector<4x32xf32> -> vector<4x32xf32>
      %60 = arith.addf %52, %59 : vector<4x32xf32>
      %c2_i32_49 = arith.constant 2 : i32
      %61 = arith.addi %3, %c2_i32_49 : i32
      %c0_50 = arith.constant 0 : index
      %c0_51 = arith.constant 0 : index
      %62 = arith.index_cast %61 : i32 to index
      %c1_52 = arith.constant 1 : index
      %c0_53 = arith.constant 0 : index
      %63 = vector.load %arg3[%c0_50, %c0_51, %62, %c1_52, %c0_53] : memref<1x1x6x6x32xbf16, #tpu.memory_space<vmem>>, vector<1x1x1x4x32xbf16>
      %64 = vector.shape_cast %63 : vector<1x1x1x4x32xbf16> to vector<1x4x32xbf16>
      %65 = vector.shape_cast %64 : vector<1x4x32xbf16> to vector<4x32xbf16>
      %c224 = arith.constant 224 : index
      %c0_54 = arith.constant 0 : index
      %66 = vector.load %arg4[%c224, %c0_54] : memref<288x32xbf16, #tpu.memory_space<vmem>>, vector<32x32xbf16>
      %cst_55 = arith.constant dense<0.000000e+00> : vector<4x32xf32>
      %67 = tpu.matmul %65, %66, %cst_55 {dimension_numbers = #tpu.dot_dimension_numbers<[1], [0], [0], [1], [0, 0, 1, 1], [], []>} : vector<4x32xbf16>, vector<32x32xbf16>, vector<4x32xf32> -> vector<4x32xf32>
      %68 = arith.addf %60, %67 : vector<4x32xf32>
      %c2_i32_56 = arith.constant 2 : i32
      %69 = arith.addi %3, %c2_i32_56 : i32
      %c0_57 = arith.constant 0 : index
      %c0_58 = arith.constant 0 : index
      %70 = arith.index_cast %69 : i32 to index
      %c2_59 = arith.constant 2 : index
      %c0_60 = arith.constant 0 : index
      %71 = vector.load %arg3[%c0_57, %c0_58, %70, %c2_59, %c0_60] : memref<1x1x6x6x32xbf16, #tpu.memory_space<vmem>>, vector<1x1x1x4x32xbf16>
      %72 = vector.shape_cast %71 : vector<1x1x1x4x32xbf16> to vector<1x4x32xbf16>
      %73 = vector.shape_cast %72 : vector<1x4x32xbf16> to vector<4x32xbf16>
      %c256 = arith.constant 256 : index
      %c0_61 = arith.constant 0 : index
      %74 = vector.load %arg4[%c256, %c0_61] : memref<288x32xbf16, #tpu.memory_space<vmem>>, vector<32x32xbf16>
      %cst_62 = arith.constant dense<0.000000e+00> : vector<4x32xf32>
      %75 = tpu.matmul %73, %74, %cst_62 {dimension_numbers = #tpu.dot_dimension_numbers<[1], [0], [0], [1], [0, 0, 1, 1], [], []>} : vector<4x32xbf16>, vector<32x32xbf16>, vector<4x32xf32> -> vector<4x32xf32>
      %76 = arith.addf %68, %75 : vector<4x32xf32>
      %cst_63 = arith.constant 0.000000e+00 : f32
      %77 = vector.broadcast %cst_63 : f32 to vector<4x32xf32>
      %78 = arith.maximumf %76, %77 : vector<4x32xf32>
      %79 = vector.shape_cast %78 : vector<4x32xf32> to vector<1x4x32xf32>
      %80 = arith.truncf %79 : vector<1x4x32xf32> to vector<1x4x32xbf16>
      %c0_64 = arith.constant 0 : index
      %81 = arith.index_cast %arg7 : i32 to index
      %c0_65 = arith.constant 0 : index
      %c0_66 = arith.constant 0 : index
      %82 = vector.load %arg6[%c0_64, %81, %c0_65, %c0_66] : memref<1x4x4x32xbf16, #tpu.memory_space<vmem>>, vector<1x1x4x32xbf16>
      %83 = vector.shape_cast %82 : vector<1x1x4x32xbf16> to vector<1x4x32xbf16>
      %84 = vector.shape_cast %80 : vector<1x4x32xbf16> to vector<1x1x4x32xbf16>
      tpu.vector_store %arg6[%c0_64, %81, %c0_65, %c0_66], %84 {strides = array<i32>} : memref<1x4x4x32xbf16, #tpu.memory_space<vmem>>, vector<1x1x4x32xbf16>,
    }
    %c4_i32_2 = arith.constant 4 : i32
    return
  }
  func.func @transform_0(%arg0: i32, %arg1: i32, %arg2: i32) -> (i32, i32, i32, i32, i32) {
    %c0_i32 = arith.constant 0 : i32
    %c0_i32_0 = arith.constant 0 : i32
    %c0_i32_1 = arith.constant 0 : i32
    %c0_i32_2 = arith.constant 0 : i32
    %c0_i32_3 = arith.constant 0 : i32
    return %arg0, %c0_i32, %c0_i32_0, %c0_i32_1, %c0_i32_2 : i32, i32, i32, i32, i32
  }
  func.func @transform_1(%arg0: i32, %arg1: i32, %arg2: i32) -> (i32, i32) {
    %c0_i32 = arith.constant 0 : i32
    %c0_i32_0 = arith.constant 0 : i32
    return %c0_i32, %arg2 : i32, i32
  }
  func.func @transform_2(%arg0: i32, %arg1: i32, %arg2: i32) -> (i32, i32) {
    %c0_i32 = arith.constant 0 : i32
    %c0_i32_0 = arith.constant 0 : i32
    return %c0_i32, %arg2 : i32, i32
  }
  func.func @transform_3(%arg0: i32, %arg1: i32, %arg2: i32) -> (i32, i32, i32, i32) {
    %c0_i32 = arith.constant 0 : i32
    %c0_i32_0 = arith.constant 0 : i32
    return %arg0, %arg1, %c0_i32, %arg2 : i32, i32, i32, i32
  }
}

module attributes {stable_mosaic.version = 11 : i64} {
  func.func @_mm_kernel(%arg0: i32, %arg1: i32, %arg2: memref<16x128xbf16, #tpu.memory_space<vmem>>, %arg3: memref<128x64xbf16, #tpu.memory_space<vmem>>, %arg4: memref<1x64xf32, #tpu.memory_space<vmem>>, %arg5: memref<16x64xbf16, #tpu.memory_space<vmem>>) attributes {dimension_semantics = [#tpu.dimension_semantics<parallel>, #tpu.dimension_semantics<parallel>], iteration_bounds = array<i64: 2, 1>, scalar_prefetch = 0 : i64, scratch_operands = 0 : i64, tpu.core_type = #tpu.core_type<tc>, window_params = [{transform_indices = @transform_0, window_bounds = array<i64: 16, 128>}, {transform_indices = @transform_1, window_bounds = array<i64: 128, 64>}, {transform_indices = @transform_2, window_bounds = array<i64: 1, 64>}, {transform_indices = @transform_3, window_bounds = array<i64: 16, 64>}]} {
    %c0 = arith.constant 0 : index
    %c0_0 = arith.constant 0 : index
    %0 = vector.load %arg2[%c0, %c0_0] : memref<16x128xbf16, #tpu.memory_space<vmem>>, vector<16x128xbf16>
    %c0_1 = arith.constant 0 : index
    %c0_2 = arith.constant 0 : index
    %1 = vector.load %arg3[%c0_1, %c0_2] : memref<128x64xbf16, #tpu.memory_space<vmem>>, vector<128x64xbf16>
    %cst = arith.constant dense<0.000000e+00> : vector<16x64xf32>
    %2 = tpu.matmul %0, %1, %cst {dimension_numbers = #tpu.dot_dimension_numbers<[1], [0], [0], [1], [0, 0, 1, 1], [], []>} : vector<16x128xbf16>, vector<128x64xbf16>, vector<16x64xf32> -> vector<16x64xf32>
    %c0_3 = arith.constant 0 : index
    %c0_4 = arith.constant 0 : index
    %3 = vector.load %arg4[%c0_3, %c0_4] : memref<1x64xf32, #tpu.memory_space<vmem>>, vector<1x64xf32>
    %4 = vector.broadcast %3 : vector<1x64xf32> to vector<16x64xf32>
    %5 = arith.addf %2, %4 : vector<16x64xf32>
    %cst_5 = arith.constant 0.000000e+00 : f32
    %6 = vector.broadcast %cst_5 : f32 to vector<16x64xf32>
    %7 = arith.maximumf %5, %6 : vector<16x64xf32>
    %8 = arith.truncf %7 : vector<16x64xf32> to vector<16x64xbf16>
    %c0_6 = arith.constant 0 : index
    %c0_7 = arith.constant 0 : index
    %9 = vector.load %arg5[%c0_6, %c0_7] : memref<16x64xbf16, #tpu.memory_space<vmem>>, vector<16x64xbf16>
    tpu.vector_store %arg5[%c0_6, %c0_7], %8 {strides = array<i32>} : memref<16x64xbf16, #tpu.memory_space<vmem>>, vector<16x64xbf16>,
    return
  }
  func.func @transform_0(%arg0: i32, %arg1: i32) -> (i32, i32) {
    %c0_i32 = arith.constant 0 : i32
    %c0_i32_0 = arith.constant 0 : i32
    return %arg0, %c0_i32 : i32, i32
  }
  func.func @transform_1(%arg0: i32, %arg1: i32) -> (i32, i32) {
    %c0_i32 = arith.constant 0 : i32
    %c0_i32_0 = arith.constant 0 : i32
    return %c0_i32, %arg1 : i32, i32
  }
  func.func @transform_2(%arg0: i32, %arg1: i32) -> (i32, i32) {
    %c0_i32 = arith.constant 0 : i32
    %c0_i32_0 = arith.constant 0 : i32
    return %c0_i32, %arg1 : i32, i32
  }
  func.func @transform_3(%arg0: i32, %arg1: i32) -> (i32, i32) {
    %c0_i32 = arith.constant 0 : i32
    return %arg0, %arg1 : i32, i32
  }
}

module attributes {stable_mosaic.version = 11 : i64} {
  func.func @_conv_tap_kernel(%arg0: i32, %arg1: i32, %arg2: i32, %arg3: memref<1x4x3x3x64xbf16, #tpu.memory_space<vmem>>, %arg4: memref<576x64xbf16, #tpu.memory_space<vmem>>, %arg5: memref<1x64xf32, #tpu.memory_space<vmem>>, %arg6: memref<1x2x2x64xbf16, #tpu.memory_space<vmem>>) attributes {dimension_semantics = [#tpu.dimension_semantics<parallel>, #tpu.dimension_semantics<parallel>, #tpu.dimension_semantics<parallel>], iteration_bounds = array<i64: 2, 1, 1>, scalar_prefetch = 0 : i64, scratch_operands = 0 : i64, tpu.core_type = #tpu.core_type<tc>, window_params = [{transform_indices = @transform_0, window_bounds = array<i64: 1, 4, 3, 3, 64>}, {transform_indices = @transform_1, window_bounds = array<i64: 576, 64>}, {transform_indices = @transform_2, window_bounds = array<i64: 1, 64>}, {transform_indices = @transform_3, window_bounds = array<i64: 1, 2, 2, 64>}]} {
    %c2_i32 = arith.constant 2 : i32
    %0 = arith.muli %arg1, %c2_i32 : i32
    %c0 = arith.constant 0 : index
    %c0_0 = arith.constant 0 : index
    %1 = vector.load %arg5[%c0, %c0_0] : memref<1x64xf32, #tpu.memory_space<vmem>>, vector<1x64xf32>
    %c0_i32 = arith.constant 0 : i32
    %c2_i32_1 = arith.constant 2 : i32
    %2 = arith.addi %c0_i32, %c2_i32_1 : i32
    %c1_i32 = arith.constant 1 : i32
    scf.for %arg7 = %c0_i32 to %2 step %c1_i32  : i32 {
      %3 = arith.addi %0, %arg7 : i32
      %c0_i32_3 = arith.constant 0 : i32
      %4 = arith.addi %3, %c0_i32_3 : i32
      %c0_4 = arith.constant 0 : index
      %c0_5 = arith.constant 0 : index
      %5 = arith.index_cast %4 : i32 to index
      %c0_6 = arith.constant 0 : index
      %c0_7 = arith.constant 0 : index
      %6 = vector.load %arg3[%c0_4, %c0_5, %5, %c0_6, %c0_7] : memref<1x4x3x3x64xbf16, #tpu.memory_space<vmem>>, vector<1x1x1x2x64xbf16>
      %7 = vector.shape_cast %6 : vector<1x1x1x2x64xbf16> to vector<1x2x64xbf16>
      %8 = vector.shape_cast %7 : vector<1x2x64xbf16> to vector<2x64xbf16>
      %c0_8 = arith.constant 0 : index
      %c0_9 = arith.constant 0 : index
      %9 = vector.load %arg4[%c0_8, %c0_9] : memref<576x64xbf16, #tpu.memory_space<vmem>>, vector<64x64xbf16>
      %cst = arith.constant dense<0.000000e+00> : vector<2x64xf32>
      %10 = tpu.matmul %8, %9, %cst {dimension_numbers = #tpu.dot_dimension_numbers<[1], [0], [0], [1], [0, 0, 1, 1], [], []>} : vector<2x64xbf16>, vector<64x64xbf16>, vector<2x64xf32> -> vector<2x64xf32>
      %11 = vector.broadcast %1 : vector<1x64xf32> to vector<2x64xf32>
      %12 = arith.addf %10, %11 : vector<2x64xf32>
      %c0_i32_10 = arith.constant 0 : i32
      %13 = arith.addi %3, %c0_i32_10 : i32
      %c0_11 = arith.constant 0 : index
      %c1 = arith.constant 1 : index
      %14 = arith.index_cast %13 : i32 to index
      %c0_12 = arith.constant 0 : index
      %c0_13 = arith.constant 0 : index
      %15 = vector.load %arg3[%c0_11, %c1, %14, %c0_12, %c0_13] : memref<1x4x3x3x64xbf16, #tpu.memory_space<vmem>>, vector<1x1x1x2x64xbf16>
      %16 = vector.shape_cast %15 : vector<1x1x1x2x64xbf16> to vector<1x2x64xbf16>
      %17 = vector.shape_cast %16 : vector<1x2x64xbf16> to vector<2x64xbf16>
      %c64 = arith.constant 64 : index
      %c0_14 = arith.constant 0 : index
      %18 = vector.load %arg4[%c64, %c0_14] : memref<576x64xbf16, #tpu.memory_space<vmem>>, vector<64x64xbf16>
      %cst_15 = arith.constant dense<0.000000e+00> : vector<2x64xf32>
      %19 = tpu.matmul %17, %18, %cst_15 {dimension_numbers = #tpu.dot_dimension_numbers<[1], [0], [0], [1], [0, 0, 1, 1], [], []>} : vector<2x64xbf16>, vector<64x64xbf16>, vector<2x64xf32> -> vector<2x64xf32>
      %20 = arith.addf %12, %19 : vector<2x64xf32>
      %c0_i32_16 = arith.constant 0 : i32
      %21 = arith.addi %3, %c0_i32_16 : i32
      %c0_17 = arith.constant 0 : index
      %c0_18 = arith.constant 0 : index
      %22 = arith.index_cast %21 : i32 to index
      %c1_19 = arith.constant 1 : index
      %c0_20 = arith.constant 0 : index
      %23 = vector.load %arg3[%c0_17, %c0_18, %22, %c1_19, %c0_20] : memref<1x4x3x3x64xbf16, #tpu.memory_space<vmem>>, vector<1x1x1x2x64xbf16>
      %24 = vector.shape_cast %23 : vector<1x1x1x2x64xbf16> to vector<1x2x64xbf16>
      %25 = vector.shape_cast %24 : vector<1x2x64xbf16> to vector<2x64xbf16>
      %c128 = arith.constant 128 : index
      %c0_21 = arith.constant 0 : index
      %26 = vector.load %arg4[%c128, %c0_21] : memref<576x64xbf16, #tpu.memory_space<vmem>>, vector<64x64xbf16>
      %cst_22 = arith.constant dense<0.000000e+00> : vector<2x64xf32>
      %27 = tpu.matmul %25, %26, %cst_22 {dimension_numbers = #tpu.dot_dimension_numbers<[1], [0], [0], [1], [0, 0, 1, 1], [], []>} : vector<2x64xbf16>, vector<64x64xbf16>, vector<2x64xf32> -> vector<2x64xf32>
      %28 = arith.addf %20, %27 : vector<2x64xf32>
      %c0_i32_23 = arith.constant 0 : i32
      %29 = arith.addi %3, %c0_i32_23 : i32
      %c0_24 = arith.constant 0 : index
      %c2 = arith.constant 2 : index
      %30 = arith.index_cast %29 : i32 to index
      %c0_25 = arith.constant 0 : index
      %c0_26 = arith.constant 0 : index
      %31 = vector.load %arg3[%c0_24, %c2, %30, %c0_25, %c0_26] : memref<1x4x3x3x64xbf16, #tpu.memory_space<vmem>>, vector<1x1x1x2x64xbf16>
      %32 = vector.shape_cast %31 : vector<1x1x1x2x64xbf16> to vector<1x2x64xbf16>
      %33 = vector.shape_cast %32 : vector<1x2x64xbf16> to vector<2x64xbf16>
      %c192 = arith.constant 192 : index
      %c0_27 = arith.constant 0 : index
      %34 = vector.load %arg4[%c192, %c0_27] : memref<576x64xbf16, #tpu.memory_space<vmem>>, vector<64x64xbf16>
      %cst_28 = arith.constant dense<0.000000e+00> : vector<2x64xf32>
      %35 = tpu.matmul %33, %34, %cst_28 {dimension_numbers = #tpu.dot_dimension_numbers<[1], [0], [0], [1], [0, 0, 1, 1], [], []>} : vector<2x64xbf16>, vector<64x64xbf16>, vector<2x64xf32> -> vector<2x64xf32>
      %36 = arith.addf %28, %35 : vector<2x64xf32>
      %c0_i32_29 = arith.constant 0 : i32
      %37 = arith.addi %3, %c0_i32_29 : i32
      %c0_30 = arith.constant 0 : index
      %c3 = arith.constant 3 : index
      %38 = arith.index_cast %37 : i32 to index
      %c0_31 = arith.constant 0 : index
      %c0_32 = arith.constant 0 : index
      %39 = vector.load %arg3[%c0_30, %c3, %38, %c0_31, %c0_32] : memref<1x4x3x3x64xbf16, #tpu.memory_space<vmem>>, vector<1x1x1x2x64xbf16>
      %40 = vector.shape_cast %39 : vector<1x1x1x2x64xbf16> to vector<1x2x64xbf16>
      %41 = vector.shape_cast %40 : vector<1x2x64xbf16> to vector<2x64xbf16>
      %c256 = arith.constant 256 : index
      %c0_33 = arith.constant 0 : index
      %42 = vector.load %arg4[%c256, %c0_33] : memref<576x64xbf16, #tpu.memory_space<vmem>>, vector<64x64xbf16>
      %cst_34 = arith.constant dense<0.000000e+00> : vector<2x64xf32>
      %43 = tpu.matmul %41, %42, %cst_34 {dimension_numbers = #tpu.dot_dimension_numbers<[1], [0], [0], [1], [0, 0, 1, 1], [], []>} : vector<2x64xbf16>, vector<64x64xbf16>, vector<2x64xf32> -> vector<2x64xf32>
      %44 = arith.addf %36, %43 : vector<2x64xf32>
      %c0_i32_35 = arith.constant 0 : i32
      %45 = arith.addi %3, %c0_i32_35 : i32
      %c0_36 = arith.constant 0 : index
      %c2_37 = arith.constant 2 : index
      %46 = arith.index_cast %45 : i32 to index
      %c1_38 = arith.constant 1 : index
      %c0_39 = arith.constant 0 : index
      %47 = vector.load %arg3[%c0_36, %c2_37, %46, %c1_38, %c0_39] : memref<1x4x3x3x64xbf16, #tpu.memory_space<vmem>>, vector<1x1x1x2x64xbf16>
      %48 = vector.shape_cast %47 : vector<1x1x1x2x64xbf16> to vector<1x2x64xbf16>
      %49 = vector.shape_cast %48 : vector<1x2x64xbf16> to vector<2x64xbf16>
      %c320 = arith.constant 320 : index
      %c0_40 = arith.constant 0 : index
      %50 = vector.load %arg4[%c320, %c0_40] : memref<576x64xbf16, #tpu.memory_space<vmem>>, vector<64x64xbf16>
      %cst_41 = arith.constant dense<0.000000e+00> : vector<2x64xf32>
      %51 = tpu.matmul %49, %50, %cst_41 {dimension_numbers = #tpu.dot_dimension_numbers<[1], [0], [0], [1], [0, 0, 1, 1], [], []>} : vector<2x64xbf16>, vector<64x64xbf16>, vector<2x64xf32> -> vector<2x64xf32>
      %52 = arith.addf %44, %51 : vector<2x64xf32>
      %c1_i32_42 = arith.constant 1 : i32
      %53 = arith.addi %3, %c1_i32_42 : i32
      %c0_43 = arith.constant 0 : index
      %c0_44 = arith.constant 0 : index
      %54 = arith.index_cast %53 : i32 to index
      %c0_45 = arith.constant 0 : index
      %c0_46 = arith.constant 0 : index
      %55 = vector.load %arg3[%c0_43, %c0_44, %54, %c0_45, %c0_46] : memref<1x4x3x3x64xbf16, #tpu.memory_space<vmem>>, vector<1x1x1x2x64xbf16>
      %56 = vector.shape_cast %55 : vector<1x1x1x2x64xbf16> to vector<1x2x64xbf16>
      %57 = vector.shape_cast %56 : vector<1x2x64xbf16> to vector<2x64xbf16>
      %c384 = arith.constant 384 : index
      %c0_47 = arith.constant 0 : index
      %58 = vector.load %arg4[%c384, %c0_47] : memref<576x64xbf16, #tpu.memory_space<vmem>>, vector<64x64xbf16>
      %cst_48 = arith.constant dense<0.000000e+00> : vector<2x64xf32>
      %59 = tpu.matmul %57, %58, %cst_48 {dimension_numbers = #tpu.dot_dimension_numbers<[1], [0], [0], [1], [0, 0, 1, 1], [], []>} : vector<2x64xbf16>, vector<64x64xbf16>, vector<2x64xf32> -> vector<2x64xf32>
      %60 = arith.addf %52, %59 : vector<2x64xf32>
      %c1_i32_49 = arith.constant 1 : i32
      %61 = arith.addi %3, %c1_i32_49 : i32
      %c0_50 = arith.constant 0 : index
      %c1_51 = arith.constant 1 : index
      %62 = arith.index_cast %61 : i32 to index
      %c0_52 = arith.constant 0 : index
      %c0_53 = arith.constant 0 : index
      %63 = vector.load %arg3[%c0_50, %c1_51, %62, %c0_52, %c0_53] : memref<1x4x3x3x64xbf16, #tpu.memory_space<vmem>>, vector<1x1x1x2x64xbf16>
      %64 = vector.shape_cast %63 : vector<1x1x1x2x64xbf16> to vector<1x2x64xbf16>
      %65 = vector.shape_cast %64 : vector<1x2x64xbf16> to vector<2x64xbf16>
      %c448 = arith.constant 448 : index
      %c0_54 = arith.constant 0 : index
      %66 = vector.load %arg4[%c448, %c0_54] : memref<576x64xbf16, #tpu.memory_space<vmem>>, vector<64x64xbf16>
      %cst_55 = arith.constant dense<0.000000e+00> : vector<2x64xf32>
      %67 = tpu.matmul %65, %66, %cst_55 {dimension_numbers = #tpu.dot_dimension_numbers<[1], [0], [0], [1], [0, 0, 1, 1], [], []>} : vector<2x64xbf16>, vector<64x64xbf16>, vector<2x64xf32> -> vector<2x64xf32>
      %68 = arith.addf %60, %67 : vector<2x64xf32>
      %c1_i32_56 = arith.constant 1 : i32
      %69 = arith.addi %3, %c1_i32_56 : i32
      %c0_57 = arith.constant 0 : index
      %c0_58 = arith.constant 0 : index
      %70 = arith.index_cast %69 : i32 to index
      %c1_59 = arith.constant 1 : index
      %c0_60 = arith.constant 0 : index
      %71 = vector.load %arg3[%c0_57, %c0_58, %70, %c1_59, %c0_60] : memref<1x4x3x3x64xbf16, #tpu.memory_space<vmem>>, vector<1x1x1x2x64xbf16>
      %72 = vector.shape_cast %71 : vector<1x1x1x2x64xbf16> to vector<1x2x64xbf16>
      %73 = vector.shape_cast %72 : vector<1x2x64xbf16> to vector<2x64xbf16>
      %c512 = arith.constant 512 : index
      %c0_61 = arith.constant 0 : index
      %74 = vector.load %arg4[%c512, %c0_61] : memref<576x64xbf16, #tpu.memory_space<vmem>>, vector<64x64xbf16>
      %cst_62 = arith.constant dense<0.000000e+00> : vector<2x64xf32>
      %75 = tpu.matmul %73, %74, %cst_62 {dimension_numbers = #tpu.dot_dimension_numbers<[1], [0], [0], [1], [0, 0, 1, 1], [], []>} : vector<2x64xbf16>, vector<64x64xbf16>, vector<2x64xf32> -> vector<2x64xf32>
      %76 = arith.addf %68, %75 : vector<2x64xf32>
      %cst_63 = arith.constant 0.000000e+00 : f32
      %77 = vector.broadcast %cst_63 : f32 to vector<2x64xf32>
      %78 = arith.maximumf %76, %77 : vector<2x64xf32>
      %79 = vector.shape_cast %78 : vector<2x64xf32> to vector<1x2x64xf32>
      %80 = arith.truncf %79 : vector<1x2x64xf32> to vector<1x2x64xbf16>
      %c0_64 = arith.constant 0 : index
      %81 = arith.index_cast %arg7 : i32 to index
      %c0_65 = arith.constant 0 : index
      %c0_66 = arith.constant 0 : index
      %82 = vector.load %arg6[%c0_64, %81, %c0_65, %c0_66] : memref<1x2x2x64xbf16, #tpu.memory_space<vmem>>, vector<1x1x2x64xbf16>
      %83 = vector.shape_cast %82 : vector<1x1x2x64xbf16> to vector<1x2x64xbf16>
      %84 = vector.shape_cast %80 : vector<1x2x64xbf16> to vector<1x1x2x64xbf16>
      tpu.vector_store %arg6[%c0_64, %81, %c0_65, %c0_66], %84 {strides = array<i32>} : memref<1x2x2x64xbf16, #tpu.memory_space<vmem>>, vector<1x1x2x64xbf16>,
    }
    %c2_i32_2 = arith.constant 2 : i32
    return
  }
  func.func @transform_0(%arg0: i32, %arg1: i32, %arg2: i32) -> (i32, i32, i32, i32, i32) {
    %c0_i32 = arith.constant 0 : i32
    %c0_i32_0 = arith.constant 0 : i32
    %c0_i32_1 = arith.constant 0 : i32
    %c0_i32_2 = arith.constant 0 : i32
    %c0_i32_3 = arith.constant 0 : i32
    return %arg0, %c0_i32, %c0_i32_0, %c0_i32_1, %c0_i32_2 : i32, i32, i32, i32, i32
  }
  func.func @transform_1(%arg0: i32, %arg1: i32, %arg2: i32) -> (i32, i32) {
    %c0_i32 = arith.constant 0 : i32
    %c0_i32_0 = arith.constant 0 : i32
    return %c0_i32, %arg2 : i32, i32
  }
  func.func @transform_2(%arg0: i32, %arg1: i32, %arg2: i32) -> (i32, i32) {
    %c0_i32 = arith.constant 0 : i32
    %c0_i32_0 = arith.constant 0 : i32
    return %c0_i32, %arg2 : i32, i32
  }
  func.func @transform_3(%arg0: i32, %arg1: i32, %arg2: i32) -> (i32, i32, i32, i32) {
    %c0_i32 = arith.constant 0 : i32
    %c0_i32_0 = arith.constant 0 : i32
    return %arg0, %arg1, %c0_i32, %arg2 : i32, i32, i32, i32
  }
}

module attributes {stable_mosaic.version = 11 : i64} {
  func.func @_mm_kernel(%arg0: i32, %arg1: i32, %arg2: memref<8x128xbf16, #tpu.memory_space<vmem>>, %arg3: memref<128x128xbf16, #tpu.memory_space<vmem>>, %arg4: memref<1x128xf32, #tpu.memory_space<vmem>>, %arg5: memref<8x128xbf16, #tpu.memory_space<vmem>>) attributes {dimension_semantics = [#tpu.dimension_semantics<parallel>, #tpu.dimension_semantics<parallel>], iteration_bounds = array<i64: 1, 2>, scalar_prefetch = 0 : i64, scratch_operands = 0 : i64, tpu.core_type = #tpu.core_type<tc>, window_params = [{transform_indices = @transform_0, window_bounds = array<i64: 8, 128>}, {transform_indices = @transform_1, window_bounds = array<i64: 128, 128>}, {transform_indices = @transform_2, window_bounds = array<i64: 1, 128>}, {transform_indices = @transform_3, window_bounds = array<i64: 8, 128>}]} {
    %c0 = arith.constant 0 : index
    %c0_0 = arith.constant 0 : index
    %0 = vector.load %arg2[%c0, %c0_0] : memref<8x128xbf16, #tpu.memory_space<vmem>>, vector<8x128xbf16>
    %c0_1 = arith.constant 0 : index
    %c0_2 = arith.constant 0 : index
    %1 = vector.load %arg3[%c0_1, %c0_2] : memref<128x128xbf16, #tpu.memory_space<vmem>>, vector<128x128xbf16>
    %cst = arith.constant dense<0.000000e+00> : vector<8x128xf32>
    %2 = tpu.matmul %0, %1, %cst {dimension_numbers = #tpu.dot_dimension_numbers<[1], [0], [0], [1], [0, 0, 1, 1], [], []>} : vector<8x128xbf16>, vector<128x128xbf16>, vector<8x128xf32> -> vector<8x128xf32>
    %c0_3 = arith.constant 0 : index
    %c0_4 = arith.constant 0 : index
    %3 = vector.load %arg4[%c0_3, %c0_4] : memref<1x128xf32, #tpu.memory_space<vmem>>, vector<1x128xf32>
    %4 = vector.broadcast %3 : vector<1x128xf32> to vector<8x128xf32>
    %5 = arith.addf %2, %4 : vector<8x128xf32>
    %6 = arith.truncf %5 : vector<8x128xf32> to vector<8x128xbf16>
    %c0_5 = arith.constant 0 : index
    %c0_6 = arith.constant 0 : index
    %7 = vector.load %arg5[%c0_5, %c0_6] : memref<8x128xbf16, #tpu.memory_space<vmem>>, vector<8x128xbf16>
    tpu.vector_store %arg5[%c0_5, %c0_6], %6 {strides = array<i32>} : memref<8x128xbf16, #tpu.memory_space<vmem>>, vector<8x128xbf16>,
    return
  }
  func.func @transform_0(%arg0: i32, %arg1: i32) -> (i32, i32) {
    %c0_i32 = arith.constant 0 : i32
    %c0_i32_0 = arith.constant 0 : i32
    return %arg0, %c0_i32 : i32, i32
  }
  func.func @transform_1(%arg0: i32, %arg1: i32) -> (i32, i32) {
    %c0_i32 = arith.constant 0 : i32
    %c0_i32_0 = arith.constant 0 : i32
    return %c0_i32, %arg1 : i32, i32
  }
  func.func @transform_2(%arg0: i32, %arg1: i32) -> (i32, i32) {
    %c0_i32 = arith.constant 0 : i32
    %c0_i32_0 = arith.constant 0 : i32
    return %c0_i32, %arg1 : i32, i32
  }
  func.func @transform_3(%arg0: i32, %arg1: i32) -> (i32, i32) {
    %c0_i32 = arith.constant 0 : i32
    return %arg0, %arg1 : i32, i32
  }
}

module attributes {stable_mosaic.version = 11 : i64} {
  func.func @_mm_res_kernel(%arg0: i32, %arg1: i32, %arg2: memref<8x64xbf16, #tpu.memory_space<vmem>>, %arg3: memref<64x128xbf16, #tpu.memory_space<vmem>>, %arg4: memref<1x128xf32, #tpu.memory_space<vmem>>, %arg5: memref<8x128xbf16, #tpu.memory_space<vmem>>, %arg6: memref<8x128xbf16, #tpu.memory_space<vmem>>) attributes {dimension_semantics = [#tpu.dimension_semantics<parallel>, #tpu.dimension_semantics<parallel>], iteration_bounds = array<i64: 1, 2>, scalar_prefetch = 0 : i64, scratch_operands = 0 : i64, tpu.core_type = #tpu.core_type<tc>, window_params = [{transform_indices = @transform_0, window_bounds = array<i64: 8, 64>}, {transform_indices = @transform_1, window_bounds = array<i64: 64, 128>}, {transform_indices = @transform_2, window_bounds = array<i64: 1, 128>}, {transform_indices = @transform_3, window_bounds = array<i64: 8, 128>}, {transform_indices = @transform_4, window_bounds = array<i64: 8, 128>}]} {
    %c0 = arith.constant 0 : index
    %c0_0 = arith.constant 0 : index
    %0 = vector.load %arg2[%c0, %c0_0] : memref<8x64xbf16, #tpu.memory_space<vmem>>, vector<8x64xbf16>
    %c0_1 = arith.constant 0 : index
    %c0_2 = arith.constant 0 : index
    %1 = vector.load %arg3[%c0_1, %c0_2] : memref<64x128xbf16, #tpu.memory_space<vmem>>, vector<64x128xbf16>
    %cst = arith.constant dense<0.000000e+00> : vector<8x128xf32>
    %2 = tpu.matmul %0, %1, %cst {dimension_numbers = #tpu.dot_dimension_numbers<[1], [0], [0], [1], [0, 0, 1, 1], [], []>} : vector<8x64xbf16>, vector<64x128xbf16>, vector<8x128xf32> -> vector<8x128xf32>
    %c0_3 = arith.constant 0 : index
    %c0_4 = arith.constant 0 : index
    %3 = vector.load %arg4[%c0_3, %c0_4] : memref<1x128xf32, #tpu.memory_space<vmem>>, vector<1x128xf32>
    %4 = vector.broadcast %3 : vector<1x128xf32> to vector<8x128xf32>
    %5 = arith.addf %2, %4 : vector<8x128xf32>
    %c0_5 = arith.constant 0 : index
    %c0_6 = arith.constant 0 : index
    %6 = vector.load %arg5[%c0_5, %c0_6] : memref<8x128xbf16, #tpu.memory_space<vmem>>, vector<8x128xbf16>
    %7 = arith.extf %6 : vector<8x128xbf16> to vector<8x128xf32>
    %8 = arith.addf %5, %7 : vector<8x128xf32>
    %cst_7 = arith.constant 0.000000e+00 : f32
    %9 = vector.broadcast %cst_7 : f32 to vector<8x128xf32>
    %10 = arith.maximumf %8, %9 : vector<8x128xf32>
    %11 = arith.truncf %10 : vector<8x128xf32> to vector<8x128xbf16>
    %c0_8 = arith.constant 0 : index
    %c0_9 = arith.constant 0 : index
    %12 = vector.load %arg6[%c0_8, %c0_9] : memref<8x128xbf16, #tpu.memory_space<vmem>>, vector<8x128xbf16>
    tpu.vector_store %arg6[%c0_8, %c0_9], %11 {strides = array<i32>} : memref<8x128xbf16, #tpu.memory_space<vmem>>, vector<8x128xbf16>,
    return
  }
  func.func @transform_0(%arg0: i32, %arg1: i32) -> (i32, i32) {
    %c0_i32 = arith.constant 0 : i32
    %c0_i32_0 = arith.constant 0 : i32
    return %arg0, %c0_i32 : i32, i32
  }
  func.func @transform_1(%arg0: i32, %arg1: i32) -> (i32, i32) {
    %c0_i32 = arith.constant 0 : i32
    %c0_i32_0 = arith.constant 0 : i32
    return %c0_i32, %arg1 : i32, i32
  }
  func.func @transform_2(%arg0: i32, %arg1: i32) -> (i32, i32) {
    %c0_i32 = arith.constant 0 : i32
    %c0_i32_0 = arith.constant 0 : i32
    return %c0_i32, %arg1 : i32, i32
  }
  func.func @transform_3(%arg0: i32, %arg1: i32) -> (i32, i32) {
    %c0_i32 = arith.constant 0 : i32
    return %arg0, %arg1 : i32, i32
  }
  func.func @transform_4(%arg0: i32, %arg1: i32) -> (i32, i32) {
    %c0_i32 = arith.constant 0 : i32
    return %arg0, %arg1 : i32, i32
  }
}

module attributes {stable_mosaic.version = 11 : i64} {
  func.func @_mm_kernel(%arg0: i32, %arg1: i32, %arg2: memref<8x256xbf16, #tpu.memory_space<vmem>>, %arg3: memref<256x64xbf16, #tpu.memory_space<vmem>>, %arg4: memref<1x64xf32, #tpu.memory_space<vmem>>, %arg5: memref<8x64xbf16, #tpu.memory_space<vmem>>) attributes {dimension_semantics = [#tpu.dimension_semantics<parallel>, #tpu.dimension_semantics<parallel>], iteration_bounds = array<i64: 1, 1>, scalar_prefetch = 0 : i64, scratch_operands = 0 : i64, tpu.core_type = #tpu.core_type<tc>, window_params = [{transform_indices = @transform_0, window_bounds = array<i64: 8, 256>}, {transform_indices = @transform_1, window_bounds = array<i64: 256, 64>}, {transform_indices = @transform_2, window_bounds = array<i64: 1, 64>}, {transform_indices = @transform_3, window_bounds = array<i64: 8, 64>}]} {
    %c0 = arith.constant 0 : index
    %c0_0 = arith.constant 0 : index
    %0 = vector.load %arg2[%c0, %c0_0] : memref<8x256xbf16, #tpu.memory_space<vmem>>, vector<8x256xbf16>
    %c0_1 = arith.constant 0 : index
    %c0_2 = arith.constant 0 : index
    %1 = vector.load %arg3[%c0_1, %c0_2] : memref<256x64xbf16, #tpu.memory_space<vmem>>, vector<256x64xbf16>
    %cst = arith.constant dense<0.000000e+00> : vector<8x64xf32>
    %2 = tpu.matmul %0, %1, %cst {dimension_numbers = #tpu.dot_dimension_numbers<[1], [0], [0], [1], [0, 0, 1, 1], [], []>} : vector<8x256xbf16>, vector<256x64xbf16>, vector<8x64xf32> -> vector<8x64xf32>
    %c0_3 = arith.constant 0 : index
    %c0_4 = arith.constant 0 : index
    %3 = vector.load %arg4[%c0_3, %c0_4] : memref<1x64xf32, #tpu.memory_space<vmem>>, vector<1x64xf32>
    %4 = vector.broadcast %3 : vector<1x64xf32> to vector<8x64xf32>
    %5 = arith.addf %2, %4 : vector<8x64xf32>
    %cst_5 = arith.constant 0.000000e+00 : f32
    %6 = vector.broadcast %cst_5 : f32 to vector<8x64xf32>
    %7 = arith.maximumf %5, %6 : vector<8x64xf32>
    %8 = arith.truncf %7 : vector<8x64xf32> to vector<8x64xbf16>
    %c0_6 = arith.constant 0 : index
    %c0_7 = arith.constant 0 : index
    %9 = vector.load %arg5[%c0_6, %c0_7] : memref<8x64xbf16, #tpu.memory_space<vmem>>, vector<8x64xbf16>
    tpu.vector_store %arg5[%c0_6, %c0_7], %8 {strides = array<i32>} : memref<8x64xbf16, #tpu.memory_space<vmem>>, vector<8x64xbf16>,
    return
  }
  func.func @transform_0(%arg0: i32, %arg1: i32) -> (i32, i32) {
    %c0_i32 = arith.constant 0 : i32
    %c0_i32_0 = arith.constant 0 : i32
    return %arg0, %c0_i32 : i32, i32
  }
  func.func @transform_1(%arg0: i32, %arg1: i32) -> (i32, i32) {
    %c0_i32 = arith.constant 0 : i32
    %c0_i32_0 = arith.constant 0 : i32
    return %c0_i32, %arg1 : i32, i32
  }
  func.func @transform_2(%arg0: i32, %arg1: i32) -> (i32, i32) {
    %c0_i32 = arith.constant 0 : i32
    %c0_i32_0 = arith.constant 0 : i32
    return %c0_i32, %arg1 : i32, i32
  }
  func.func @transform_3(%arg0: i32, %arg1: i32) -> (i32, i32) {
    %c0_i32 = arith.constant 0 : i32
    return %arg0, %arg1 : i32, i32
  }
}

module attributes {stable_mosaic.version = 11 : i64} {
  func.func @_conv_tap_kernel(%arg0: i32, %arg1: i32, %arg2: i32, %arg3: memref<1x1x4x4x64xbf16, #tpu.memory_space<vmem>>, %arg4: memref<576x64xbf16, #tpu.memory_space<vmem>>, %arg5: memref<1x64xf32, #tpu.memory_space<vmem>>, %arg6: memref<1x2x2x64xbf16, #tpu.memory_space<vmem>>) attributes {dimension_semantics = [#tpu.dimension_semantics<parallel>, #tpu.dimension_semantics<parallel>, #tpu.dimension_semantics<parallel>], iteration_bounds = array<i64: 2, 1, 1>, scalar_prefetch = 0 : i64, scratch_operands = 0 : i64, tpu.core_type = #tpu.core_type<tc>, window_params = [{transform_indices = @transform_0, window_bounds = array<i64: 1, 1, 4, 4, 64>}, {transform_indices = @transform_1, window_bounds = array<i64: 576, 64>}, {transform_indices = @transform_2, window_bounds = array<i64: 1, 64>}, {transform_indices = @transform_3, window_bounds = array<i64: 1, 2, 2, 64>}]} {
    %c2_i32 = arith.constant 2 : i32
    %0 = arith.muli %arg1, %c2_i32 : i32
    %c0 = arith.constant 0 : index
    %c0_0 = arith.constant 0 : index
    %1 = vector.load %arg5[%c0, %c0_0] : memref<1x64xf32, #tpu.memory_space<vmem>>, vector<1x64xf32>
    %c0_i32 = arith.constant 0 : i32
    %c2_i32_1 = arith.constant 2 : i32
    %2 = arith.addi %c0_i32, %c2_i32_1 : i32
    %c1_i32 = arith.constant 1 : i32
    scf.for %arg7 = %c0_i32 to %2 step %c1_i32  : i32 {
      %3 = arith.addi %0, %arg7 : i32
      %c0_i32_3 = arith.constant 0 : i32
      %4 = arith.addi %3, %c0_i32_3 : i32
      %c0_4 = arith.constant 0 : index
      %c0_5 = arith.constant 0 : index
      %5 = arith.index_cast %4 : i32 to index
      %c0_6 = arith.constant 0 : index
      %c0_7 = arith.constant 0 : index
      %6 = vector.load %arg3[%c0_4, %c0_5, %5, %c0_6, %c0_7] : memref<1x1x4x4x64xbf16, #tpu.memory_space<vmem>>, vector<1x1x1x2x64xbf16>
      %7 = vector.shape_cast %6 : vector<1x1x1x2x64xbf16> to vector<1x2x64xbf16>
      %8 = vector.shape_cast %7 : vector<1x2x64xbf16> to vector<2x64xbf16>
      %c0_8 = arith.constant 0 : index
      %c0_9 = arith.constant 0 : index
      %9 = vector.load %arg4[%c0_8, %c0_9] : memref<576x64xbf16, #tpu.memory_space<vmem>>, vector<64x64xbf16>
      %cst = arith.constant dense<0.000000e+00> : vector<2x64xf32>
      %10 = tpu.matmul %8, %9, %cst {dimension_numbers = #tpu.dot_dimension_numbers<[1], [0], [0], [1], [0, 0, 1, 1], [], []>} : vector<2x64xbf16>, vector<64x64xbf16>, vector<2x64xf32> -> vector<2x64xf32>
      %11 = vector.broadcast %1 : vector<1x64xf32> to vector<2x64xf32>
      %12 = arith.addf %10, %11 : vector<2x64xf32>
      %c0_i32_10 = arith.constant 0 : i32
      %13 = arith.addi %3, %c0_i32_10 : i32
      %c0_11 = arith.constant 0 : index
      %c0_12 = arith.constant 0 : index
      %14 = arith.index_cast %13 : i32 to index
      %c1 = arith.constant 1 : index
      %c0_13 = arith.constant 0 : index
      %15 = vector.load %arg3[%c0_11, %c0_12, %14, %c1, %c0_13] : memref<1x1x4x4x64xbf16, #tpu.memory_space<vmem>>, vector<1x1x1x2x64xbf16>
      %16 = vector.shape_cast %15 : vector<1x1x1x2x64xbf16> to vector<1x2x64xbf16>
      %17 = vector.shape_cast %16 : vector<1x2x64xbf16> to vector<2x64xbf16>
      %c64 = arith.constant 64 : index
      %c0_14 = arith.constant 0 : index
      %18 = vector.load %arg4[%c64, %c0_14] : memref<576x64xbf16, #tpu.memory_space<vmem>>, vector<64x64xbf16>
      %cst_15 = arith.constant dense<0.000000e+00> : vector<2x64xf32>
      %19 = tpu.matmul %17, %18, %cst_15 {dimension_numbers = #tpu.dot_dimension_numbers<[1], [0], [0], [1], [0, 0, 1, 1], [], []>} : vector<2x64xbf16>, vector<64x64xbf16>, vector<2x64xf32> -> vector<2x64xf32>
      %20 = arith.addf %12, %19 : vector<2x64xf32>
      %c0_i32_16 = arith.constant 0 : i32
      %21 = arith.addi %3, %c0_i32_16 : i32
      %c0_17 = arith.constant 0 : index
      %c0_18 = arith.constant 0 : index
      %22 = arith.index_cast %21 : i32 to index
      %c2 = arith.constant 2 : index
      %c0_19 = arith.constant 0 : index
      %23 = vector.load %arg3[%c0_17, %c0_18, %22, %c2, %c0_19] : memref<1x1x4x4x64xbf16, #tpu.memory_space<vmem>>, vector<1x1x1x2x64xbf16>
      %24 = vector.shape_cast %23 : vector<1x1x1x2x64xbf16> to vector<1x2x64xbf16>
      %25 = vector.shape_cast %24 : vector<1x2x64xbf16> to vector<2x64xbf16>
      %c128 = arith.constant 128 : index
      %c0_20 = arith.constant 0 : index
      %26 = vector.load %arg4[%c128, %c0_20] : memref<576x64xbf16, #tpu.memory_space<vmem>>, vector<64x64xbf16>
      %cst_21 = arith.constant dense<0.000000e+00> : vector<2x64xf32>
      %27 = tpu.matmul %25, %26, %cst_21 {dimension_numbers = #tpu.dot_dimension_numbers<[1], [0], [0], [1], [0, 0, 1, 1], [], []>} : vector<2x64xbf16>, vector<64x64xbf16>, vector<2x64xf32> -> vector<2x64xf32>
      %28 = arith.addf %20, %27 : vector<2x64xf32>
      %c1_i32_22 = arith.constant 1 : i32
      %29 = arith.addi %3, %c1_i32_22 : i32
      %c0_23 = arith.constant 0 : index
      %c0_24 = arith.constant 0 : index
      %30 = arith.index_cast %29 : i32 to index
      %c0_25 = arith.constant 0 : index
      %c0_26 = arith.constant 0 : index
      %31 = vector.load %arg3[%c0_23, %c0_24, %30, %c0_25, %c0_26] : memref<1x1x4x4x64xbf16, #tpu.memory_space<vmem>>, vector<1x1x1x2x64xbf16>
      %32 = vector.shape_cast %31 : vector<1x1x1x2x64xbf16> to vector<1x2x64xbf16>
      %33 = vector.shape_cast %32 : vector<1x2x64xbf16> to vector<2x64xbf16>
      %c192 = arith.constant 192 : index
      %c0_27 = arith.constant 0 : index
      %34 = vector.load %arg4[%c192, %c0_27] : memref<576x64xbf16, #tpu.memory_space<vmem>>, vector<64x64xbf16>
      %cst_28 = arith.constant dense<0.000000e+00> : vector<2x64xf32>
      %35 = tpu.matmul %33, %34, %cst_28 {dimension_numbers = #tpu.dot_dimension_numbers<[1], [0], [0], [1], [0, 0, 1, 1], [], []>} : vector<2x64xbf16>, vector<64x64xbf16>, vector<2x64xf32> -> vector<2x64xf32>
      %36 = arith.addf %28, %35 : vector<2x64xf32>
      %c1_i32_29 = arith.constant 1 : i32
      %37 = arith.addi %3, %c1_i32_29 : i32
      %c0_30 = arith.constant 0 : index
      %c0_31 = arith.constant 0 : index
      %38 = arith.index_cast %37 : i32 to index
      %c1_32 = arith.constant 1 : index
      %c0_33 = arith.constant 0 : index
      %39 = vector.load %arg3[%c0_30, %c0_31, %38, %c1_32, %c0_33] : memref<1x1x4x4x64xbf16, #tpu.memory_space<vmem>>, vector<1x1x1x2x64xbf16>
      %40 = vector.shape_cast %39 : vector<1x1x1x2x64xbf16> to vector<1x2x64xbf16>
      %41 = vector.shape_cast %40 : vector<1x2x64xbf16> to vector<2x64xbf16>
      %c256 = arith.constant 256 : index
      %c0_34 = arith.constant 0 : index
      %42 = vector.load %arg4[%c256, %c0_34] : memref<576x64xbf16, #tpu.memory_space<vmem>>, vector<64x64xbf16>
      %cst_35 = arith.constant dense<0.000000e+00> : vector<2x64xf32>
      %43 = tpu.matmul %41, %42, %cst_35 {dimension_numbers = #tpu.dot_dimension_numbers<[1], [0], [0], [1], [0, 0, 1, 1], [], []>} : vector<2x64xbf16>, vector<64x64xbf16>, vector<2x64xf32> -> vector<2x64xf32>
      %44 = arith.addf %36, %43 : vector<2x64xf32>
      %c1_i32_36 = arith.constant 1 : i32
      %45 = arith.addi %3, %c1_i32_36 : i32
      %c0_37 = arith.constant 0 : index
      %c0_38 = arith.constant 0 : index
      %46 = arith.index_cast %45 : i32 to index
      %c2_39 = arith.constant 2 : index
      %c0_40 = arith.constant 0 : index
      %47 = vector.load %arg3[%c0_37, %c0_38, %46, %c2_39, %c0_40] : memref<1x1x4x4x64xbf16, #tpu.memory_space<vmem>>, vector<1x1x1x2x64xbf16>
      %48 = vector.shape_cast %47 : vector<1x1x1x2x64xbf16> to vector<1x2x64xbf16>
      %49 = vector.shape_cast %48 : vector<1x2x64xbf16> to vector<2x64xbf16>
      %c320 = arith.constant 320 : index
      %c0_41 = arith.constant 0 : index
      %50 = vector.load %arg4[%c320, %c0_41] : memref<576x64xbf16, #tpu.memory_space<vmem>>, vector<64x64xbf16>
      %cst_42 = arith.constant dense<0.000000e+00> : vector<2x64xf32>
      %51 = tpu.matmul %49, %50, %cst_42 {dimension_numbers = #tpu.dot_dimension_numbers<[1], [0], [0], [1], [0, 0, 1, 1], [], []>} : vector<2x64xbf16>, vector<64x64xbf16>, vector<2x64xf32> -> vector<2x64xf32>
      %52 = arith.addf %44, %51 : vector<2x64xf32>
      %c2_i32_43 = arith.constant 2 : i32
      %53 = arith.addi %3, %c2_i32_43 : i32
      %c0_44 = arith.constant 0 : index
      %c0_45 = arith.constant 0 : index
      %54 = arith.index_cast %53 : i32 to index
      %c0_46 = arith.constant 0 : index
      %c0_47 = arith.constant 0 : index
      %55 = vector.load %arg3[%c0_44, %c0_45, %54, %c0_46, %c0_47] : memref<1x1x4x4x64xbf16, #tpu.memory_space<vmem>>, vector<1x1x1x2x64xbf16>
      %56 = vector.shape_cast %55 : vector<1x1x1x2x64xbf16> to vector<1x2x64xbf16>
      %57 = vector.shape_cast %56 : vector<1x2x64xbf16> to vector<2x64xbf16>
      %c384 = arith.constant 384 : index
      %c0_48 = arith.constant 0 : index
      %58 = vector.load %arg4[%c384, %c0_48] : memref<576x64xbf16, #tpu.memory_space<vmem>>, vector<64x64xbf16>
      %cst_49 = arith.constant dense<0.000000e+00> : vector<2x64xf32>
      %59 = tpu.matmul %57, %58, %cst_49 {dimension_numbers = #tpu.dot_dimension_numbers<[1], [0], [0], [1], [0, 0, 1, 1], [], []>} : vector<2x64xbf16>, vector<64x64xbf16>, vector<2x64xf32> -> vector<2x64xf32>
      %60 = arith.addf %52, %59 : vector<2x64xf32>
      %c2_i32_50 = arith.constant 2 : i32
      %61 = arith.addi %3, %c2_i32_50 : i32
      %c0_51 = arith.constant 0 : index
      %c0_52 = arith.constant 0 : index
      %62 = arith.index_cast %61 : i32 to index
      %c1_53 = arith.constant 1 : index
      %c0_54 = arith.constant 0 : index
      %63 = vector.load %arg3[%c0_51, %c0_52, %62, %c1_53, %c0_54] : memref<1x1x4x4x64xbf16, #tpu.memory_space<vmem>>, vector<1x1x1x2x64xbf16>
      %64 = vector.shape_cast %63 : vector<1x1x1x2x64xbf16> to vector<1x2x64xbf16>
      %65 = vector.shape_cast %64 : vector<1x2x64xbf16> to vector<2x64xbf16>
      %c448 = arith.constant 448 : index
      %c0_55 = arith.constant 0 : index
      %66 = vector.load %arg4[%c448, %c0_55] : memref<576x64xbf16, #tpu.memory_space<vmem>>, vector<64x64xbf16>
      %cst_56 = arith.constant dense<0.000000e+00> : vector<2x64xf32>
      %67 = tpu.matmul %65, %66, %cst_56 {dimension_numbers = #tpu.dot_dimension_numbers<[1], [0], [0], [1], [0, 0, 1, 1], [], []>} : vector<2x64xbf16>, vector<64x64xbf16>, vector<2x64xf32> -> vector<2x64xf32>
      %68 = arith.addf %60, %67 : vector<2x64xf32>
      %c2_i32_57 = arith.constant 2 : i32
      %69 = arith.addi %3, %c2_i32_57 : i32
      %c0_58 = arith.constant 0 : index
      %c0_59 = arith.constant 0 : index
      %70 = arith.index_cast %69 : i32 to index
      %c2_60 = arith.constant 2 : index
      %c0_61 = arith.constant 0 : index
      %71 = vector.load %arg3[%c0_58, %c0_59, %70, %c2_60, %c0_61] : memref<1x1x4x4x64xbf16, #tpu.memory_space<vmem>>, vector<1x1x1x2x64xbf16>
      %72 = vector.shape_cast %71 : vector<1x1x1x2x64xbf16> to vector<1x2x64xbf16>
      %73 = vector.shape_cast %72 : vector<1x2x64xbf16> to vector<2x64xbf16>
      %c512 = arith.constant 512 : index
      %c0_62 = arith.constant 0 : index
      %74 = vector.load %arg4[%c512, %c0_62] : memref<576x64xbf16, #tpu.memory_space<vmem>>, vector<64x64xbf16>
      %cst_63 = arith.constant dense<0.000000e+00> : vector<2x64xf32>
      %75 = tpu.matmul %73, %74, %cst_63 {dimension_numbers = #tpu.dot_dimension_numbers<[1], [0], [0], [1], [0, 0, 1, 1], [], []>} : vector<2x64xbf16>, vector<64x64xbf16>, vector<2x64xf32> -> vector<2x64xf32>
      %76 = arith.addf %68, %75 : vector<2x64xf32>
      %cst_64 = arith.constant 0.000000e+00 : f32
      %77 = vector.broadcast %cst_64 : f32 to vector<2x64xf32>
      %78 = arith.maximumf %76, %77 : vector<2x64xf32>
      %79 = vector.shape_cast %78 : vector<2x64xf32> to vector<1x2x64xf32>
      %80 = arith.truncf %79 : vector<1x2x64xf32> to vector<1x2x64xbf16>
      %c0_65 = arith.constant 0 : index
      %81 = arith.index_cast %arg7 : i32 to index
      %c0_66 = arith.constant 0 : index
      %c0_67 = arith.constant 0 : index
      %82 = vector.load %arg6[%c0_65, %81, %c0_66, %c0_67] : memref<1x2x2x64xbf16, #tpu.memory_space<vmem>>, vector<1x1x2x64xbf16>
      %83 = vector.shape_cast %82 : vector<1x1x2x64xbf16> to vector<1x2x64xbf16>
      %84 = vector.shape_cast %80 : vector<1x2x64xbf16> to vector<1x1x2x64xbf16>
      tpu.vector_store %arg6[%c0_65, %81, %c0_66, %c0_67], %84 {strides = array<i32>} : memref<1x2x2x64xbf16, #tpu.memory_space<vmem>>, vector<1x1x2x64xbf16>,
    }
    %c2_i32_2 = arith.constant 2 : i32
    return
  }
  func.func @transform_0(%arg0: i32, %arg1: i32, %arg2: i32) -> (i32, i32, i32, i32, i32) {
    %c0_i32 = arith.constant 0 : i32
    %c0_i32_0 = arith.constant 0 : i32
    %c0_i32_1 = arith.constant 0 : i32
    %c0_i32_2 = arith.constant 0 : i32
    %c0_i32_3 = arith.constant 0 : i32
    return %arg0, %c0_i32, %c0_i32_0, %c0_i32_1, %c0_i32_2 : i32, i32, i32, i32, i32
  }
  func.func @transform_1(%arg0: i32, %arg1: i32, %arg2: i32) -> (i32, i32) {
    %c0_i32 = arith.constant 0 : i32
    %c0_i32_0 = arith.constant 0 : i32
    return %c0_i32, %arg2 : i32, i32
  }
  func.func @transform_2(%arg0: i32, %arg1: i32, %arg2: i32) -> (i32, i32) {
    %c0_i32 = arith.constant 0 : i32
    %c0_i32_0 = arith.constant 0 : i32
    return %c0_i32, %arg2 : i32, i32
  }
  func.func @transform_3(%arg0: i32, %arg1: i32, %arg2: i32) -> (i32, i32, i32, i32) {
    %c0_i32 = arith.constant 0 : i32
    %c0_i32_0 = arith.constant 0 : i32
    return %arg0, %arg1, %c0_i32, %arg2 : i32, i32, i32, i32
  }
}

module attributes {stable_mosaic.version = 11 : i64} {
  func.func @_spatial_mean_kernel(%arg0: i32, %arg1: memref<2x4x128xbf16, #tpu.memory_space<vmem>>, %arg2: memref<2x128xbf16, #tpu.memory_space<vmem>>) attributes {dimension_semantics = [#tpu.dimension_semantics<parallel>], iteration_bounds = array<i64: 2>, scalar_prefetch = 0 : i64, scratch_operands = 0 : i64, tpu.core_type = #tpu.core_type<tc>, window_params = [{transform_indices = @transform_0, window_bounds = array<i64: 2, 4, 128>}, {transform_indices = @transform_1, window_bounds = array<i64: 2, 128>}]} {
    %c0 = arith.constant 0 : index
    %c0_0 = arith.constant 0 : index
    %c0_1 = arith.constant 0 : index
    %0 = vector.load %arg1[%c0, %c0_0, %c0_1] : memref<2x4x128xbf16, #tpu.memory_space<vmem>>, vector<2x4x128xbf16>
    %1 = arith.extf %0 : vector<2x4x128xbf16> to vector<2x4x128xf32>
    %cst = arith.constant dense<0.000000e+00> : vector<2x128xf32>
    %2 = vector.multi_reduction <add>, %1, %cst [1] : vector<2x4x128xf32> to vector<2x128xf32>
    %cst_2 = arith.constant 4.000000e+00 : f32
    %3 = vector.broadcast %cst_2 : f32 to vector<2x128xf32>
    %4 = arith.divf %2, %3 : vector<2x128xf32>
    %5 = arith.truncf %4 : vector<2x128xf32> to vector<2x128xbf16>
    %c0_3 = arith.constant 0 : index
    %c0_4 = arith.constant 0 : index
    %6 = vector.load %arg2[%c0_3, %c0_4] : memref<2x128xbf16, #tpu.memory_space<vmem>>, vector<2x128xbf16>
    tpu.vector_store %arg2[%c0_3, %c0_4], %5 {strides = array<i32>} : memref<2x128xbf16, #tpu.memory_space<vmem>>, vector<2x128xbf16>,
    return
  }
  func.func @transform_0(%arg0: i32) -> (i32, i32, i32) {
    %c0_i32 = arith.constant 0 : i32
    %c0_i32_0 = arith.constant 0 : i32
    %c0_i32_1 = arith.constant 0 : i32
    return %c0_i32, %c0_i32_0, %arg0 : i32, i32, i32
  }
  func.func @transform_1(%arg0: i32) -> (i32, i32) {
    %c0_i32 = arith.constant 0 : i32
    %c0_i32_0 = arith.constant 0 : i32
    return %c0_i32, %arg0 : i32, i32
  }
}

module attributes {stable_mosaic.version = 11 : i64} {
  func.func @_mm_kernel(%arg0: i32, %arg1: i32, %arg2: memref<8x256xbf16, #tpu.memory_space<vmem>>, %arg3: memref<256x32xbf16, #tpu.memory_space<vmem>>, %arg4: memref<1x32xf32, #tpu.memory_space<vmem>>, %arg5: memref<8x32xf32, #tpu.memory_space<vmem>>) attributes {dimension_semantics = [#tpu.dimension_semantics<parallel>, #tpu.dimension_semantics<parallel>], iteration_bounds = array<i64: 1, 1>, scalar_prefetch = 0 : i64, scratch_operands = 0 : i64, tpu.core_type = #tpu.core_type<tc>, window_params = [{transform_indices = @transform_0, window_bounds = array<i64: 8, 256>}, {transform_indices = @transform_1, window_bounds = array<i64: 256, 32>}, {transform_indices = @transform_2, window_bounds = array<i64: 1, 32>}, {transform_indices = @transform_3, window_bounds = array<i64: 8, 32>}]} {
    %c0 = arith.constant 0 : index
    %c0_0 = arith.constant 0 : index
    %0 = vector.load %arg2[%c0, %c0_0] : memref<8x256xbf16, #tpu.memory_space<vmem>>, vector<8x256xbf16>
    %c0_1 = arith.constant 0 : index
    %c0_2 = arith.constant 0 : index
    %1 = vector.load %arg3[%c0_1, %c0_2] : memref<256x32xbf16, #tpu.memory_space<vmem>>, vector<256x32xbf16>
    %cst = arith.constant dense<0.000000e+00> : vector<8x32xf32>
    %2 = tpu.matmul %0, %1, %cst {dimension_numbers = #tpu.dot_dimension_numbers<[1], [0], [0], [1], [0, 0, 1, 1], [], []>} : vector<8x256xbf16>, vector<256x32xbf16>, vector<8x32xf32> -> vector<8x32xf32>
    %c0_3 = arith.constant 0 : index
    %c0_4 = arith.constant 0 : index
    %3 = vector.load %arg4[%c0_3, %c0_4] : memref<1x32xf32, #tpu.memory_space<vmem>>, vector<1x32xf32>
    %4 = vector.broadcast %3 : vector<1x32xf32> to vector<8x32xf32>
    %5 = arith.addf %2, %4 : vector<8x32xf32>
    %c0_5 = arith.constant 0 : index
    %c0_6 = arith.constant 0 : index
    %6 = vector.load %arg5[%c0_5, %c0_6] : memref<8x32xf32, #tpu.memory_space<vmem>>, vector<8x32xf32>
    tpu.vector_store %arg5[%c0_5, %c0_6], %5 {strides = array<i32>} : memref<8x32xf32, #tpu.memory_space<vmem>>, vector<8x32xf32>,
    return
  }
  func.func @transform_0(%arg0: i32, %arg1: i32) -> (i32, i32) {
    %c0_i32 = arith.constant 0 : i32
    %c0_i32_0 = arith.constant 0 : i32
    return %arg0, %c0_i32 : i32, i32
  }
  func.func @transform_1(%arg0: i32, %arg1: i32) -> (i32, i32) {
    %c0_i32 = arith.constant 0 : i32
    %c0_i32_0 = arith.constant 0 : i32
    return %c0_i32, %arg1 : i32, i32
  }
  func.func @transform_2(%arg0: i32, %arg1: i32) -> (i32, i32) {
    %c0_i32 = arith.constant 0 : i32
    %c0_i32_0 = arith.constant 0 : i32
    return %c0_i32, %arg1 : i32, i32
  }
  func.func @transform_3(%arg0: i32, %arg1: i32) -> (i32, i32) {
    %c0_i32 = arith.constant 0 : i32
    return %arg0, %arg1 : i32, i32
  }
}

</mosaic_0001>

<bundles_post_ra>
// kernel: encoder_cnn_forward.56
= control target key start
LH: loop header
LB: loop body
LE: loop exit
PB: predicated region body
PF: predicated region fallthrough
CT: control target
= control target key end

     0   :  { %s1288_s12 = smov 0   ;;  %s1290_s13 = smov 0   ;;  %s1508_s0 = inlined_call_operand.vmem [shape: bf16[2048,147], index: 0, kind: input, shape index: {}]   ;;  %s1509_s1 = inlined_call_operand.vmem [shape: bf16[147,8], index: 1, kind: input, shape index: {}]   ;;  %s1510_s2 = inlined_call_operand.vmem [shape: f32[1,8], index: 2, kind: input, shape index: {}]   ;;  %s1511_s3 = inlined_call_operand.vmem [shape: bf16[2048,8], index: 3, kind: output, shape index: {}]  }
   0x1   :  { %s1292_s14 = smov 0  }
   0x2 LB: > { %s25_s15 = sadd.s32 1, %s1260_s13  ;;  %p1006_p0 = scmp.ge.s32.totalorder %s1264_s14, 1  ;;  %s1264_s14 = sphi %s1292_s14, %s13_s14   ;;  %s1260_s13 = sphi %s1290_s13, %s1513_s13   ;;  %s1256_s12 = sphi %s1288_s12, %s1512_s12  }
   0x3   : > { %p27_p1 = scmp.ge.s32.totalorder %s25_s15, 8  ;;  %p170_p2 = scmp.lt.s32.totalorder %s1264_s14, 9 }
   0x5   : > { %s1515_s15 = smov (%p27_p1, %s25_s15), 0  ;;  %p171_p3 = pnand %p1006_p0, %p170_p2 }
   0x6   : > { %s1007_s22 = sshll.u32 (!%p171_p3), %s1256_s12, 5 }
   0x7   : > { %174 = sbr.rel (%p171_p3) target bundleno = 313 (0x139), region = 32  ;;  %p206_p4 = scmp.lt.s32.totalorder (!%p171_p3), %s1007_s22, 255 }
   0xc   : > { %v1184_v0 = vld [vmem:[%s1509_s1 + $0x38] sm:$0xff]   ;;  %v1266_v1 = vmov 0   ;;  %v1185_v2 = vld [vmem:[%s1509_s1 + $0x30] sm:$0xff]   ;;  %v1186_v3 = vld [vmem:[%s1509_s1 + $0x28] sm:$0xff]   ;;  %s1517_s22 = smov (!%p206_p4, %s1007_s22), 255  ;;  %vm488_vm0 = vcmask 154624  }
   0xd   : > { %544 = vmatprep.subr.bf16.mxu0 %v1266_v1  ;;  %1138 = vmatprep.subr.bf16.mxu1 %v1266_v1  ;;  %v1187_v4 = vld [vmem:[%s1509_s1 + $0x20] sm:$0xff]   ;;  %s1105_s25 = sshll.u32 %s1517_s22, 3  ;;  %v1188_v5 = vld [vmem:[%s1509_s1 + $0x18] sm:$0xff]   ;;  %v1189_v8 = vld [vmem:[%s1509_s1 + $0x10] sm:$0xff]   ;;  %vm537_vm1 = vcmask 1040384   ;;  %vm538_vm2 = vcmask 1041408  }
   0xe   : > { %545 = vmatpush1.bf16.msra.mxu0 %v1184_v0  ;;  %1148 = vmatpush1.bf16.msra.mxu1 %v1184_v0  ;;  %s1324_s28 = scalar_lea.vmem %s1508_s0, %s1105_s25  ;;  %v1190_v9 = vld [vmem:[%s1509_s1 + $0x8] sm:$0xff]   ;;  %v1267_v10 = vmov 65535   ;;  %v1191_v12 = vld [vmem:[%s1509_s1] sm:$0xff]   ;;  %s1011_s19 = sshll.u32 %s1517_s22, 2  ;;  %vm865_vm3 = vcmask 60416  }
   0xf   : > { %546 = vmatprep.subr.bf16.mxu0 %v1266_v1  ;;  %1139 = vmatprep.subr.bf16.mxu1 %v1266_v1  ;;  %v1196_v6 = vld [vmem:[%s1324_s28 + $0x4] ss:$8 sps:$4 sm:$0xff]   ;;  %v539_v11 = vsel %vm537_vm1, 4294967295, %v1267_v10  ;;  %v1192_v13 = vld [vmem:[%s1509_s1 + $0x48] ss:$0 sps:$4 sm:$0x33]   ;;  %s1403_s23 = scalar_lea.vmem %s1511_s3, %s1011_s19 }
  0x10   : > { %v1199_v7 = vld [vmem:[%s1324_s28 + $0x84] ss:$8 sps:$4 sm:$0xff]   ;;  %1055 = vmatprep.mubr.msk.bf16.mxu0 %vm488_vm0, %v1196_v6  ;;  %v540_v14 = vsel %vm538_vm2, %v539_v11, 0  ;;  %v1194_v17 = vld [vmem:[%s1324_s28] ss:$8 sps:$4 sm:$0xff]  }
  0x11   : > { %1063 = vmatprep.mubr.msk.bf16.mxu1 %vm488_vm0, %v1199_v7  ;;  %v542_v15 = vand.u32 %v1192_v13, %v540_v14  ;;  %v1193_v16 = vld [vmem:[%s1509_s1 + $0x40] sm:$0xff]   ;;  %v1200_v19 = vld [vmem:[%s1324_s28 + $0x14] ss:$8 sps:$4 sm:$0xff]   ;;  %v1204_v21 = vld [vmem:[%s1324_s28 + $0x10] ss:$8 sps:$4 sm:$0xff]  }
  0x12   : > { %547 = vmatpush1.bf16.msra.mxu0 %v1185_v2  ;;  %1149 = vmatpush1.bf16.msra.mxu1 %v1185_v2  ;;  %v1197_v18 = vld [vmem:[%s1324_s28 + $0x80] ss:$8 sps:$4 sm:$0xff]   ;;  %v1202_v20 = vld [vmem:[%s1324_s28 + $0x94] ss:$8 sps:$4 sm:$0xff]   ;;  %v1205_v22 = vld [vmem:[%s1324_s28 + $0x90] ss:$8 sps:$4 sm:$0xff]  }
  0x13   : > { %548 = vmatprep.subr.bf16.mxu0 %v1266_v1  ;;  %1140 = vmatprep.subr.bf16.mxu1 %v1266_v1  ;;  %v1206_v23 = vld [vmem:[%s1324_s28 + $0x24] ss:$8 sps:$4 sm:$0xff]   ;;  %v1210_v25 = vld [vmem:[%s1324_s28 + $0x20] ss:$8 sps:$4 sm:$0xff]   ;;  %v1212_v27 = vld [vmem:[%s1324_s28 + $0x34] ss:$8 sps:$4 sm:$0xff]  }
  0x14   : > { %v1208_v24 = vld [vmem:[%s1324_s28 + $0xa4] ss:$8 sps:$4 sm:$0xff]   ;;  %v1211_v26 = vld [vmem:[%s1324_s28 + $0xa0] ss:$8 sps:$4 sm:$0xff]   ;;  %v1214_v28 = vld [vmem:[%s1324_s28 + $0xb4] ss:$8 sps:$4 sm:$0xff]  }
  0x15   : > { %v1216_v29 = vld [vmem:[%s1324_s28 + $0x30] ss:$8 sps:$4 sm:$0xff]   ;;  %v1218_v31 = vld [vmem:[%s1324_s28 + $0x44] ss:$8 sps:$4 sm:$0xff]   ;;  %v1222_v33 = vld [vmem:[%s1324_s28 + $0x40] ss:$8 sps:$4 sm:$0xff]  }
  0x16   : > { %549 = vmatpush1.bf16.msra.mxu0 %v1186_v3  ;;  %1150 = vmatpush1.bf16.msra.mxu1 %v1186_v3  ;;  %v1217_v30 = vld [vmem:[%s1324_s28 + $0xb0] ss:$8 sps:$4 sm:$0xff]   ;;  %v1220_v32 = vld [vmem:[%s1324_s28 + $0xc4] ss:$8 sps:$4 sm:$0xff]   ;;  %v1223_v34 = vld [vmem:[%s1324_s28 + $0xc0] ss:$8 sps:$4 sm:$0xff]  }
  0x17   : > { %550 = vmatprep.subr.bf16.mxu0 %v1266_v1  ;;  %1141 = vmatprep.subr.bf16.mxu1 %v1266_v1  ;;  %v1224_v35 = vld [vmem:[%s1324_s28 + $0x54] ss:$8 sps:$4 sm:$0xff]   ;;  %v1228_v37 = vld [vmem:[%s1324_s28 + $0x50] ss:$8 sps:$4 sm:$0xff]   ;;  %v1230_v39 = vld [vmem:[%s1324_s28 + $0x64] ss:$8 sps:$4 sm:$0xff]  }
  0x18   : > { %v1226_v36 = vld [vmem:[%s1324_s28 + $0xd4] ss:$8 sps:$4 sm:$0xff]   ;;  %v1229_v38 = vld [vmem:[%s1324_s28 + $0xd0] ss:$8 sps:$4 sm:$0xff]   ;;  %v1232_v40 = vld [vmem:[%s1324_s28 + $0xe4] ss:$8 sps:$4 sm:$0xff]  }
  0x19   : > { %v1234_v41 = vld [vmem:[%s1324_s28 + $0x60] ss:$8 sps:$4 sm:$0xff]   ;;  %v1236_v43 = vld [vmem:[%s1324_s28 + $0x74] ss:$8 sps:$4 sm:$0xff]   ;;  %v1240_v45 = vld [vmem:[%s1324_s28 + $0x70] ss:$8 sps:$4 sm:$0xff]  }
  0x1a   : > { %551 = vmatpush1.bf16.msra.mxu0 %v1187_v4  ;;  %1151 = vmatpush1.bf16.msra.mxu1 %v1187_v4  ;;  %v1235_v42 = vld [vmem:[%s1324_s28 + $0xe0] ss:$8 sps:$4 sm:$0xff]   ;;  %v1238_v44 = vld [vmem:[%s1324_s28 + $0xf4] ss:$8 sps:$4 sm:$0xff]   ;;  %v1241_v46 = vld [vmem:[%s1324_s28 + $0xf0] ss:$8 sps:$4 sm:$0xff]  }
  0x1b   : > { %552 = vmatprep.subr.bf16.mxu0 %v1266_v1  ;;  %1142 = vmatprep.subr.bf16.mxu1 %v1266_v1  ;;  %v1395_v47 = vld [vmem:[%s1510_s2] ss:$0 sm:$0xff] }
  0x1e   : > { %553 = vmatpush1.bf16.msra.mxu0 %v1188_v5  ;;  %1152 = vmatpush1.bf16.msra.mxu1 %v1188_v5 }
  0x1f   : > { %554 = vmatprep.subr.bf16.mxu0 %v1266_v1  ;;  %1143 = vmatprep.subr.bf16.mxu1 %v1266_v1 }
  0x22   : > { %555 = vmatpush1.bf16.msra.mxu0 %v1189_v8  ;;  %1153 = vmatpush1.bf16.msra.mxu1 %v1189_v8 }
  0x23   : > { %556 = vmatprep.subr.bf16.mxu0 %v1266_v1  ;;  %1144 = vmatprep.subr.bf16.mxu1 %v1266_v1 }
  0x26   : > { %557 = vmatpush1.bf16.msra.mxu0 %v1190_v9  ;;  %1154 = vmatpush1.bf16.msra.mxu1 %v1190_v9 }
  0x27   : > { %558 = vmatprep.subr.bf16.mxu0 %v1266_v1  ;;  %1145 = vmatprep.subr.bf16.mxu1 %v1266_v1 }
  0x2a   : > { %559 = vmatpush1.bf16.msra.mxu0 %v1191_v12  ;;  %1155 = vmatpush1.bf16.msra.mxu1 %v1191_v12 }
  0x2b   : > { %572 = vmatprep.subr.bf16.mxu0 %v1266_v1  ;;  %1146 = vmatprep.subr.bf16.mxu1 %v1266_v1 }
  0x2e   : > { %573 = vmatpush2.bf16.msra.mxu0 %v542_v15  ;;  %1156 = vmatpush2.bf16.msra.mxu1 %v542_v15 }
  0x2f   : > { %574 = vmatprep.subr.bf16.mxu0 %v1266_v1  ;;  %1147 = vmatprep.subr.bf16.mxu1 %v1266_v1 }
  0x32   : > { %575 = vmatpush2.bf16.msra.mxu0 %v1193_v16  ;;  %1157 = vmatpush2.bf16.msra.mxu1 %v1193_v16 }
  0x35   : > { %577 = vmatmul.mubr.bf16.vlgmr.msra.gmra.mxu0 %v1194_v17  ;;  %641 = vmatmul.mubr.bf16.vlgmr.msra.gmra.mxu1 %v1197_v18 }
  0x36   : > { %1056 = vmatprep.mubr.msk.bf16.mxu0 %vm488_vm0, %v1200_v19  ;;  %1064 = vmatprep.mubr.msk.bf16.mxu1 %vm488_vm0, %v1202_v20 }
  0x3d   : > { %585 = vmatmul.mubr.bf16.gmra.mxu0 %v1204_v21  ;;  %649 = vmatmul.mubr.bf16.gmra.mxu1 %v1205_v22 }
  0x3e   : > { %1057 = vmatprep.mubr.msk.bf16.mxu0 %vm488_vm0, %v1206_v23  ;;  %1065 = vmatprep.mubr.msk.bf16.mxu1 %vm488_vm0, %v1208_v24 }
  0x45   : > { %593 = vmatmul.mubr.bf16.gmra.mxu0 %v1210_v25  ;;  %657 = vmatmul.mubr.bf16.gmra.mxu1 %v1211_v26 }
  0x46   : > { %1058 = vmatprep.mubr.msk.bf16.mxu0 %vm488_vm0, %v1212_v27  ;;  %1066 = vmatprep.mubr.msk.bf16.mxu1 %vm488_vm0, %v1214_v28 }
  0x4d   : > { %601 = vmatmul.mubr.bf16.gmra.mxu0 %v1216_v29  ;;  %665 = vmatmul.mubr.bf16.gmra.mxu1 %v1217_v30 }
  0x4e   : > { %1059 = vmatprep.mubr.msk.bf16.mxu0 %vm488_vm0, %v1218_v31  ;;  %1067 = vmatprep.mubr.msk.bf16.mxu1 %vm488_vm0, %v1220_v32 }
  0x55   : > { %609 = vmatmul.mubr.bf16.gmra.mxu0 %v1222_v33  ;;  %673 = vmatmul.mubr.bf16.gmra.mxu1 %v1223_v34 }
  0x56   : > { %1060 = vmatprep.mubr.msk.bf16.mxu0 %vm488_vm0, %v1224_v35  ;;  %1068 = vmatprep.mubr.msk.bf16.mxu1 %vm488_vm0, %v1226_v36 }
  0x5d   : > { %617 = vmatmul.mubr.bf16.gmra.mxu0 %v1228_v37  ;;  %681 = vmatmul.mubr.bf16.gmra.mxu1 %v1229_v38 }
  0x5e   : > { %1061 = vmatprep.mubr.msk.bf16.mxu0 %vm488_vm0, %v1230_v39  ;;  %1069 = vmatprep.mubr.msk.bf16.mxu1 %vm488_vm0, %v1232_v40 }
  0x65   : > { %625 = vmatmul.mubr.bf16.gmra.mxu0 %v1234_v41  ;;  %689 = vmatmul.mubr.bf16.gmra.mxu1 %v1235_v42 }
  0x66   : > { %1062 = vmatprep.mubr.msk.bf16.mxu0 %vm488_vm0, %v1236_v43  ;;  %1070 = vmatprep.mubr.msk.bf16.mxu1 %vm488_vm0, %v1238_v44 }
  0x6d   : > { %633 = vmatmul.mubr.bf16.gmra.mxu0 %v1240_v45  ;;  %697 = vmatmul.mubr.bf16.gmra.mxu1 %v1241_v46 }
  0xf5   : > { %v578_v48 = vpop.f32.mrf.mxu0  ;;  %v642_v49 = vpop.f32.mrf.mxu1 }
  0xf6   : > { %v579_v50 = vadd.f32 %v1395_v47, %v578_v48  ;;  %v643_v51 = vadd.f32 %v1395_v47, %v642_v49 }
  0xf7   : > { %v580_v52 = vpop.f32.mrf.mxu0  ;;  %v644_v53 = vpop.f32.mrf.mxu1 }
  0xf8   : > { %v705_v54 = vmax.f32 %v579_v50, 0.0  ;;  %v721_v55 = vmax.f32 %v643_v51, 0.0 }
  0xf9   : > { %v581_v56 = vpop.f32.mrf.mxu0  ;;  %v645_v57 = vpop.f32.mrf.mxu1 }
  0xfa   : > { %v1106_v58 = vpack.c.bf16 %v705_v54, %v705_v54  ;;  %v1122_v59 = vpack.c.bf16 %v721_v55, %v721_v55  ;;  %v582_v60 = vadd.f32 %v1395_v47, %v581_v56  ;;  %v646_v61 = vadd.f32 %v1395_v47, %v645_v57 }
  0xfb   : > { %v583_v62 = vpop.f32.mrf.mxu0  ;;  %v647_v63 = vpop.f32.mrf.mxu1 }
  0xfc   : > { %866 = vst.msk [vmem:[%s1403_s23] sm:$0xf] %vm865_vm3, %v1106_v58  ;;  %882 = vst.msk [vmem:[%s1403_s23 + $0x40] sm:$0xf] %vm865_vm3, %v1122_v59  ;;  %v706_v0 = vmax.f32 %v582_v60, 0.0  ;;  %v722_v1 = vmax.f32 %v646_v61, 0.0 }
  0xfd   : > { %v586_v2 = vpop.f32.mrf.mxu0  ;;  %v650_v3 = vpop.f32.mrf.mxu1 }
  0xfe   : > { %v1107_v4 = vpack.c.bf16 %v706_v0, %v706_v0  ;;  %v1123_v5 = vpack.c.bf16 %v722_v1, %v722_v1  ;;  %v587_v6 = vadd.f32 %v1395_v47, %v586_v2  ;;  %v651_v7 = vadd.f32 %v1395_v47, %v650_v3 }
  0xff   : > { %v588_v8 = vpop.f32.mrf.mxu0  ;;  %v652_v9 = vpop.f32.mrf.mxu1 }
 0x100   : > { %867 = vst.msk [vmem:[%s1403_s23 + $0x4] sm:$0xf] %vm865_vm3, %v1107_v4  ;;  %883 = vst.msk [vmem:[%s1403_s23 + $0x44] sm:$0xf] %vm865_vm3, %v1123_v5  ;;  %v707_v10 = vmax.f32 %v587_v6, 0.0  ;;  %v723_v11 = vmax.f32 %v651_v7, 0.0 }
 0x101   : > { %v589_v12 = vpop.f32.mrf.mxu0  ;;  %v653_v13 = vpop.f32.mrf.mxu1 }
 0x102   : > { %v1108_v14 = vpack.c.bf16 %v707_v10, %v707_v10  ;;  %v1124_v15 = vpack.c.bf16 %v723_v11, %v723_v11  ;;  %v590_v16 = vadd.f32 %v1395_v47, %v589_v12  ;;  %v654_v17 = vadd.f32 %v1395_v47, %v653_v13 }
 0x103   : > { %v591_v18 = vpop.f32.mrf.mxu0  ;;  %v655_v19 = vpop.f32.mrf.mxu1 }
 0x104   : > { %868 = vst.msk [vmem:[%s1403_s23 + $0x8] sm:$0xf] %vm865_vm3, %v1108_v14  ;;  %884 = vst.msk [vmem:[%s1403_s23 + $0x48] sm:$0xf] %vm865_vm3, %v1124_v15  ;;  %v708_v20 = vmax.f32 %v590_v16, 0.0  ;;  %v724_v21 = vmax.f32 %v654_v17, 0.0 }
 0x105   : > { %v594_v22 = vpop.f32.mrf.mxu0  ;;  %v658_v23 = vpop.f32.mrf.mxu1 }
 0x106   : > { %v1109_v24 = vpack.c.bf16 %v708_v20, %v708_v20  ;;  %v1125_v25 = vpack.c.bf16 %v724_v21, %v724_v21  ;;  %v595_v26 = vadd.f32 %v1395_v47, %v594_v22  ;;  %v659_v27 = vadd.f32 %v1395_v47, %v658_v23 }
 0x107   : > { %v596_v28 = vpop.f32.mrf.mxu0  ;;  %v660_v29 = vpop.f32.mrf.mxu1 }
 0x108   : > { %869 = vst.msk [vmem:[%s1403_s23 + $0xc] sm:$0xf] %vm865_vm3, %v1109_v24  ;;  %885 = vst.msk [vmem:[%s1403_s23 + $0x4c] sm:$0xf] %vm865_vm3, %v1125_v25  ;;  %v709_v30 = vmax.f32 %v595_v26, 0.0  ;;  %v725_v31 = vmax.f32 %v659_v27, 0.0 }
 0x109   : > { %v597_v32 = vpop.f32.mrf.mxu0  ;;  %v661_v33 = vpop.f32.mrf.mxu1 }
 0x10a   : > { %v1110_v34 = vpack.c.bf16 %v709_v30, %v709_v30  ;;  %v1126_v35 = vpack.c.bf16 %v725_v31, %v725_v31  ;;  %v598_v36 = vadd.f32 %v1395_v47, %v597_v32  ;;  %v662_v37 = vadd.f32 %v1395_v47, %v661_v33 }
 0x10b   : > { %v599_v38 = vpop.f32.mrf.mxu0  ;;  %v663_v39 = vpop.f32.mrf.mxu1 }
 0x10c   : > { %870 = vst.msk [vmem:[%s1403_s23 + $0x10] sm:$0xf] %vm865_vm3, %v1110_v34  ;;  %886 = vst.msk [vmem:[%s1403_s23 + $0x50] sm:$0xf] %vm865_vm3, %v1126_v35  ;;  %v710_v40 = vmax.f32 %v598_v36, 0.0  ;;  %v726_v41 = vmax.f32 %v662_v37, 0.0 }
 0x10d   : > { %v602_v42 = vpop.f32.mrf.mxu0  ;;  %v666_v43 = vpop.f32.mrf.mxu1 }
 0x10e   : > { %v1111_v44 = vpack.c.bf16 %v710_v40, %v710_v40  ;;  %v1127_v45 = vpack.c.bf16 %v726_v41, %v726_v41  ;;  %v603_v46 = vadd.f32 %v1395_v47, %v602_v42  ;;  %v667_v48 = vadd.f32 %v1395_v47, %v666_v43 }
 0x10f   : > { %v604_v49 = vpop.f32.mrf.mxu0  ;;  %v668_v50 = vpop.f32.mrf.mxu1 }
 0x110   : > { %871 = vst.msk [vmem:[%s1403_s23 + $0x14] sm:$0xf] %vm865_vm3, %v1111_v44  ;;  %887 = vst.msk [vmem:[%s1403_s23 + $0x54] sm:$0xf] %vm865_vm3, %v1127_v45  ;;  %v711_v51 = vmax.f32 %v603_v46, 0.0  ;;  %v727_v52 = vmax.f32 %v667_v48, 0.0 }
 0x111   : > { %v605_v53 = vpop.f32.mrf.mxu0  ;;  %v669_v54 = vpop.f32.mrf.mxu1 }
 0x112   : > { %v1112_v55 = vpack.c.bf16 %v711_v51, %v711_v51  ;;  %v1128_v56 = vpack.c.bf16 %v727_v52, %v727_v52  ;;  %v606_v57 = vadd.f32 %v1395_v47, %v605_v53  ;;  %v670_v58 = vadd.f32 %v1395_v47, %v669_v54 }
 0x113   : > { %v607_v59 = vpop.f32.mrf.mxu0  ;;  %v671_v60 = vpop.f32.mrf.mxu1 }
 0x114   : > { %872 = vst.msk [vmem:[%s1403_s23 + $0x18] sm:$0xf] %vm865_vm3, %v1112_v55  ;;  %888 = vst.msk [vmem:[%s1403_s23 + $0x58] sm:$0xf] %vm865_vm3, %v1128_v56  ;;  %v712_v61 = vmax.f32 %v606_v57, 0.0  ;;  %v728_v62 = vmax.f32 %v670_v58, 0.0 }
 0x115   : > { %v610_v63 = vpop.f32.mrf.mxu0  ;;  %v674_v0 = vpop.f32.mrf.mxu1 }
 0x116   : > { %v1113_v1 = vpack.c.bf16 %v712_v61, %v712_v61  ;;  %v1129_v2 = vpack.c.bf16 %v728_v62, %v728_v62  ;;  %v611_v3 = vadd.f32 %v1395_v47, %v610_v63  ;;  %v675_v4 = vadd.f32 %v1395_v47, %v674_v0 }
 0x117   : > { %v612_v5 = vpop.f32.mrf.mxu0  ;;  %v676_v6 = vpop.f32.mrf.mxu1 }
 0x118   : > { %873 = vst.msk [vmem:[%s1403_s23 + $0x1c] sm:$0xf] %vm865_vm3, %v1113_v1  ;;  %889 = vst.msk [vmem:[%s1403_s23 + $0x5c] sm:$0xf] %vm865_vm3, %v1129_v2  ;;  %v713_v7 = vmax.f32 %v611_v3, 0.0  ;;  %v729_v8 = vmax.f32 %v675_v4, 0.0 }
 0x119   : > { %v613_v9 = vpop.f32.mrf.mxu0  ;;  %v677_v10 = vpop.f32.mrf.mxu1 }
 0x11a   : > { %v1114_v11 = vpack.c.bf16 %v713_v7, %v713_v7  ;;  %v1130_v12 = vpack.c.bf16 %v729_v8, %v729_v8  ;;  %v614_v13 = vadd.f32 %v1395_v47, %v613_v9  ;;  %v678_v14 = vadd.f32 %v1395_v47, %v677_v10 }
 0x11b   : > { %v615_v15 = vpop.f32.mrf.mxu0  ;;  %v679_v16 = vpop.f32.mrf.mxu1 }
 0x11c   : > { %874 = vst.msk [vmem:[%s1403_s23 + $0x20] sm:$0xf] %vm865_vm3, %v1114_v11  ;;  %890 = vst.msk [vmem:[%s1403_s23 + $0x60] sm:$0xf] %vm865_vm3, %v1130_v12  ;;  %v714_v17 = vmax.f32 %v614_v13, 0.0  ;;  %v730_v18 = vmax.f32 %v678_v14, 0.0 }
 0x11d   : > { %v618_v19 = vpop.f32.mrf.mxu0  ;;  %v682_v20 = vpop.f32.mrf.mxu1 }
 0x11e   : > { %v1115_v21 = vpack.c.bf16 %v714_v17, %v714_v17  ;;  %v1131_v22 = vpack.c.bf16 %v730_v18, %v730_v18  ;;  %v619_v23 = vadd.f32 %v1395_v47, %v618_v19  ;;  %v683_v24 = vadd.f32 %v1395_v47, %v682_v20 }
 0x11f   : > { %v620_v25 = vpop.f32.mrf.mxu0  ;;  %v684_v26 = vpop.f32.mrf.mxu1 }
 0x120   : > { %875 = vst.msk [vmem:[%s1403_s23 + $0x24] sm:$0xf] %vm865_vm3, %v1115_v21  ;;  %891 = vst.msk [vmem:[%s1403_s23 + $0x64] sm:$0xf] %vm865_vm3, %v1131_v22  ;;  %v715_v27 = vmax.f32 %v619_v23, 0.0  ;;  %v731_v28 = vmax.f32 %v683_v24, 0.0 }
 0x121   : > { %v621_v29 = vpop.f32.mrf.mxu0  ;;  %v685_v30 = vpop.f32.mrf.mxu1 }
 0x122   : > { %v1116_v31 = vpack.c.bf16 %v715_v27, %v715_v27  ;;  %v1132_v32 = vpack.c.bf16 %v731_v28, %v731_v28  ;;  %v622_v33 = vadd.f32 %v1395_v47, %v621_v29  ;;  %v686_v34 = vadd.f32 %v1395_v47, %v685_v30 }
 0x123   : > { %v623_v35 = vpop.f32.mrf.mxu0  ;;  %v687_v36 = vpop.f32.mrf.mxu1 }
 0x124   : > { %876 = vst.msk [vmem:[%s1403_s23 + $0x28] sm:$0xf] %vm865_vm3, %v1116_v31  ;;  %892 = vst.msk [vmem:[%s1403_s23 + $0x68] sm:$0xf] %vm865_vm3, %v1132_v32  ;;  %v716_v37 = vmax.f32 %v622_v33, 0.0  ;;  %v732_v38 = vmax.f32 %v686_v34, 0.0 }
 0x125   : > { %v626_v39 = vpop.f32.mrf.mxu0  ;;  %v690_v40 = vpop.f32.mrf.mxu1 }
 0x126   : > { %v1117_v41 = vpack.c.bf16 %v716_v37, %v716_v37  ;;  %v1133_v42 = vpack.c.bf16 %v732_v38, %v732_v38  ;;  %v627_v43 = vadd.f32 %v1395_v47, %v626_v39  ;;  %v691_v44 = vadd.f32 %v1395_v47, %v690_v40 }
 0x127   : > { %v628_v45 = vpop.f32.mrf.mxu0  ;;  %v692_v46 = vpop.f32.mrf.mxu1 }
 0x128   : > { %877 = vst.msk [vmem:[%s1403_s23 + $0x2c] sm:$0xf] %vm865_vm3, %v1117_v41  ;;  %893 = vst.msk [vmem:[%s1403_s23 + $0x6c] sm:$0xf] %vm865_vm3, %v1133_v42  ;;  %v717_v48 = vmax.f32 %v627_v43, 0.0  ;;  %v733_v49 = vmax.f32 %v691_v44, 0.0 }
 0x129   : > { %v629_v50 = vpop.f32.mrf.mxu0  ;;  %v693_v51 = vpop.f32.mrf.mxu1 }
 0x12a   : > { %v1118_v52 = vpack.c.bf16 %v717_v48, %v717_v48  ;;  %v1134_v53 = vpack.c.bf16 %v733_v49, %v733_v49  ;;  %v630_v54 = vadd.f32 %v1395_v47, %v629_v50  ;;  %v694_v55 = vadd.f32 %v1395_v47, %v693_v51 }
 0x12b   : > { %v631_v56 = vpop.f32.mrf.mxu0  ;;  %v695_v57 = vpop.f32.mrf.mxu1 }
 0x12c   : > { %878 = vst.msk [vmem:[%s1403_s23 + $0x30] sm:$0xf] %vm865_vm3, %v1118_v52  ;;  %894 = vst.msk [vmem:[%s1403_s23 + $0x70] sm:$0xf] %vm865_vm3, %v1134_v53  ;;  %v718_v58 = vmax.f32 %v630_v54, 0.0  ;;  %v734_v59 = vmax.f32 %v694_v55, 0.0 }
 0x12d   : > { %v634_v60 = vpop.f32.mrf.mxu0  ;;  %v698_v61 = vpop.f32.mrf.mxu1 }
 0x12e   : > { %v1119_v62 = vpack.c.bf16 %v718_v58, %v718_v58  ;;  %v1135_v63 = vpack.c.bf16 %v734_v59, %v734_v59  ;;  %v635_v0 = vadd.f32 %v1395_v47, %v634_v60  ;;  %v699_v1 = vadd.f32 %v1395_v47, %v698_v61 }
 0x12f   : > { %v636_v2 = vpop.f32.mrf.mxu0  ;;  %v700_v3 = vpop.f32.mrf.mxu1 }
 0x130   : > { %879 = vst.msk [vmem:[%s1403_s23 + $0x34] sm:$0xf] %vm865_vm3, %v1119_v62  ;;  %895 = vst.msk [vmem:[%s1403_s23 + $0x74] sm:$0xf] %vm865_vm3, %v1135_v63  ;;  %v719_v4 = vmax.f32 %v635_v0, 0.0  ;;  %v735_v5 = vmax.f32 %v699_v1, 0.0 }
 0x131   : > { %v637_v6 = vpop.f32.mrf.mxu0  ;;  %v701_v7 = vpop.f32.mrf.mxu1 }
 0x132   : > { %v1120_v8 = vpack.c.bf16 %v719_v4, %v719_v4  ;;  %v1136_v9 = vpack.c.bf16 %v735_v5, %v735_v5  ;;  %v638_v10 = vadd.f32 %v1395_v47, %v637_v6  ;;  %v702_v11 = vadd.f32 %v1395_v47, %v701_v7 }
 0x133   : > { %v639_v12 = vpop.f32.mrf.mxu0  ;;  %v703_v13 = vpop.f32.mrf.mxu1 }
 0x134   : > { %880 = vst.msk [vmem:[%s1403_s23 + $0x38] sm:$0xf] %vm865_vm3, %v1120_v8  ;;  %896 = vst.msk [vmem:[%s1403_s23 + $0x78] sm:$0xf] %vm865_vm3, %v1136_v9  ;;  %v720_v14 = vmax.f32 %v638_v10, 0.0  ;;  %v736_v15 = vmax.f32 %v702_v11, 0.0 }
 0x136   : > { %v1121_v16 = vpack.c.bf16 %v720_v14, %v720_v14  ;;  %v1137_v17 = vpack.c.bf16 %v736_v15, %v736_v15 }
 0x138   : > { %881 = vst.msk [vmem:[%s1403_s23 + $0x3c] sm:$0xf] %vm865_vm3, %v1121_v16  ;;  %897 = vst.msk [vmem:[%s1403_s23 + $0x7c] sm:$0xf] %vm865_vm3, %v1137_v17 }
 0x139 PF: > { %s13_s14 = sadd.s32 1, %s1264_s14   ;;  %s1512_s12 = smov %s1260_s13 }
 0x13a   : > { %p10_p5 = scmp.ge.s32.totalorder %s13_s14, 10   ;;  %s1513_s13 = smov %s1515_s15 }
 0x13c   :  { %12 = sbr.rel (!%p10_p5) target bundleno = 2 (0x2), region = 68 }

// kernel: encoder_cnn_forward.57
= control target key start
LH: loop header
LB: loop body
LE: loop exit
PB: predicated region body
PF: predicated region fallthrough
CT: control target
= control target key end

     0   :  { %s521_s6 = smov 0   ;;  %s523_s7 = smov 0   ;;  %s615_s0 = inlined_call_operand.vmem [shape: bf16[2,4,17,17,8], index: 0, kind: input, shape index: {}]   ;;  %s616_s1 = inlined_call_operand.vmem [shape: bf16[2,16,16,8], index: 1, kind: output, shape index: {}]  }
   0x1   :  { %s525_s8 = smov 0  }
   0x2 LB: > { %s23_s9 = sadd.s32 1, %s501_s7  ;;  %p418_p0 = scmp.ge.s32.totalorder %s505_s8, 1  ;;  %s505_s8 = sphi %s525_s8, %s11_s8   ;;  %s501_s7 = sphi %s523_s7, %s620_s7   ;;  %s497_s6 = sphi %s521_s6, %s619_s6  }
   0x3   : > { %p25_p1 = scmp.ge.s32.totalorder %s23_s9, 2  ;;  %p101_p2 = scmp.lt.s32.totalorder %s505_s8, 3 }
   0x5   : > { %s622_s9 = smov (%p25_p1, %s23_s9), 0  ;;  %p102_p3 = pnand %p418_p0, %p101_p2 }
   0x6   : > { %p126_p4 = scmp.lt.s32.totalorder (!%p102_p3), %s497_s6, 1  ;;  %s549_s18 = smov (!%p102_p3), 0  }
   0x7   : > { %105 = sbr.rel (%p102_p3) target bundleno = 48 (0x30), region = 24 }
   0xc   : > { %s624_s6 = smov (!%p126_p4, %s497_s6), 1 }
   0xd   : > { %s446_s10 = smul.u32 816, %s624_s6  ;;  %s443_s11 = sshll.u32 %s624_s6, 7 }
   0xe   : > { %s542_s14 = scalar_lea.vmem %s616_s1, %s443_s11 }
   0xf   : > { %s547_s17 = scalar_lea.vmem %s615_s0, %s446_s10 }
  0x10 LB: >> { %s444_s19 = smul.u32 12, %s509_s18  ;;  %vm163_vm0 = vsmask.f32 3328  ;;  %vm164_vm1 = vsmask.f32 7440  ;;  %s445_s21 = sshll.u32 %s509_s18, 3  ;;  %s509_s18 = sphi %s549_s18, %s148_s18  }
  0x11   : >> { %vm572_vm2 = vmor %vm163_vm0, %vm164_vm1  ;;  %s283_s22 = scalar_lea.vmem %s542_s14, %s445_s21  ;;  %vm284_vm3 = vcmask 60416   ;;  %s148_s18 = sadd.s32 1, %s509_s18  }
  0x12   : >> { %s556_s20 = scalar_lea.vmem %s547_s17, %s444_s19  ;;  %p145_p5 = scmp.ge.s32.totalorder %s148_s18, 16  }
  0x13   : >> { %v153_v0 = vld [vmem:[%s556_s20] sm:$0xf]  ;;  %v154_v1 = vld [vmem:[%s556_s20 + $0x4] sm:$0xf]  ;;  %v427_v4 = vld [vmem:[%s556_s20 + $0x198] sm:$0xf] }
  0x14   : >> { %v167_v2 = vshrl.u32 %v153_v0, 16  ;;  %v170_v3 = vshll.u32 %v153_v0, 16  ;;  %v176_v5 = vshll.u32 %v154_v1, 16  ;;  %v562_v6 = vld [vmem:[%s556_s20 + $0x19c] sm:$0xf]  ;;  %v210_v7 = vshrl.u32 %v427_v4, 16 }
  0x15   : >> { %v213_v8 = vshll.u32 %v427_v4, 16  ;;  %v424_v9 = vld [vmem:[%s556_s20 + $0xcc] sm:$0xf]  ;;  %v219_v15 = vshll.u32 %v562_v6, 16  ;;  %v568_v17 = vld [vmem:[%s556_s20 + $0x10] sm:$0xf] }
  0x16   : >> { %v169_v10 = vrot.slane %v167_v2, 4  ;;  %v172_v11 = vrot.slane %v170_v3, 5  ;;  %v433_v12 = vld [vmem:[%s556_s20 + $0xc] sm:$0xf]  ;;  %v212_v13 = vrot.slane %v210_v7, 4  ;;  %v160_v20 = vmax.bf16 %v424_v9, %v153_v0 }
  0x17   : >> { %v215_v14 = vrot.slane %v213_v8, 5  ;;  %v254_v18 = vshrl.u32 %v433_v12, 16  ;;  %v257_v19 = vshll.u32 %v433_v12, 16  ;;  %v178_v22 = vrot.slane %v176_v5, 5  ;;  %v162_v24 = vld [vmem:[%s556_s20 + $0x8] sm:$0x1] }
  0x18   : >> { %v173_v16 = vor.u32 %v172_v11, %v169_v10  ;;  %v180_v25 = vshrl.u32 %v154_v1, 16  ;;  %v186_v29 = vshll.u32 %v162_v24, 16  ;;  %v432_v30 = vld [vmem:[%s556_s20 + $0x1a0] sm:$0x1]  ;;  %v221_v31 = vrot.slane %v219_v15, 5 }
  0x19   : >> { %v216_v23 = vor.u32 %v215_v14, %v212_v13  ;;  %v256_v27 = vrot.slane %v254_v18, 4  ;;  %v259_v28 = vrot.slane %v257_v19, 5  ;;  %v263_v32 = vshll.u32 %v568_v17, 16  ;;  %v425_v33 = vld [vmem:[%s556_s20 + $0xd0] sm:$0xf] }
  0x1a   : >> { %v174_v26 = vrot.slane %v173_v16, 4  ;;  %v182_v34 = vrot.slane %v180_v25, 4  ;;  %v223_v35 = vshrl.u32 %v562_v6, 16  ;;  %v188_v38 = vrot.slane %v186_v29, 5  ;;  %v430_v43 = vld [vmem:[%s556_s20 + $0x264] sm:$0xf] }
  0x1b   : >> { %v217_v37 = vrot.slane %v216_v23, 4  ;;  %v229_v42 = vshll.u32 %v432_v30, 16  ;;  %v260_v44 = vor.u32 %v259_v28, %v256_v27  ;;  %v161_v45 = vmax.bf16 %v425_v33, %v154_v1  ;;  %v438_v52 = vld [vmem:[%s556_s20 + $0x14] sm:$0x1]  ;;  %v431_v61 = vld [vmem:[%s556_s20 + $0x268] sm:$0xf] }
  0x1c   : >> { %v179_v36 = vsel %vm572_vm2, %v174_v26, %v178_v22  ;;  %v183_v40 = vor.u32 %v182_v34, %v178_v22  ;;  %v225_v41 = vrot.slane %v223_v35, 4  ;;  %v267_v46 = vshrl.u32 %v568_v17, 16  ;;  %v436_v0 = vld [vmem:[%s556_s20 + $0xd8] sm:$0xf]  ;;  %v437_v13 = vld [vmem:[%s556_s20 + $0xdc] sm:$0xf] }
  0x1d   : >> { %v192_v39 = vmax.bf16 %v179_v36, %v160_v20  ;;  %v265_v48 = vrot.slane %v263_v32, 5  ;;  %v222_v51 = vsel %vm572_vm2, %v217_v37, %v221_v31  ;;  %v231_v57 = vrot.slane %v229_v42, 5 }
  0x1e   : >> { %v184_v49 = vrot.slane %v183_v40, 4  ;;  %v226_v50 = vor.u32 %v225_v41, %v221_v31  ;;  %v269_v53 = vrot.slane %v267_v46, 4  ;;  %v261_v58 = vrot.slane %v260_v44, 4 }
  0x1f   : >> { %v199_v47 = vmax.bf16 %v427_v4, %v192_v39  ;;  %v273_v63 = vshll.u32 %v438_v52, 16 }
  0x20   : >> { %v189_v55 = vsel %vm572_vm2, %v184_v49, %v188_v38  ;;  %v227_v56 = vrot.slane %v226_v50, 4  ;;  %v270_v62 = vor.u32 %v269_v53, %v265_v48  ;;  %v266_v4 = vsel %vm572_vm2, %v261_v58, %v265_v48 }
  0x21   : >> { %v206_v54 = vmax.bf16 %v430_v43, %v199_v47  ;;  %v193_v59 = vmax.bf16 %v189_v55, %v161_v45  ;;  %v275_v9 = vrot.slane %v273_v63, 5 }
  0x22   : >> { %v232_v3 = vsel %vm572_vm2, %v227_v56, %v231_v57  ;;  %v271_v8 = vrot.slane %v270_v62, 4 }
  0x23   : >> { %v235_v60 = vmax.bf16 %v222_v51, %v206_v54  ;;  %v200_v1 = vmax.bf16 %v562_v6, %v193_v59 }
  0x24   : >> { %v276_v6 = vsel %vm572_vm2, %v271_v8, %v275_v9 }
  0x25   : >> { %v243_v2 = vmax.bf16 %v433_v12, %v235_v60  ;;  %v207_v5 = vmax.bf16 %v431_v61, %v200_v1 }
  0x27   : >> { %v250_v7 = vmax.bf16 %v436_v0, %v243_v2  ;;  %v236_v10 = vmax.bf16 %v232_v3, %v207_v5 }
  0x29   : >> { %v279_v11 = vmax.bf16 %v266_v4, %v250_v7  ;;  %v244_v14 = vmax.bf16 %v568_v17, %v236_v10 }
  0x2b   : >> { %285 = vst.msk [vmem:[%s283_s22] sm:$0xf] %vm284_vm3, %v279_v11  ;;  %v251_v12 = vmax.bf16 %v437_v13, %v244_v14  ;;  %147 = sbr.rel (!%p145_p5) target bundleno = 16 (0x10), region = 68 }
  0x2d   : >> { %v280_v15 = vmax.bf16 %v276_v6, %v251_v12 }
  0x2f   : >> { %286 = vst.msk [vmem:[%s283_s22 + $0x4] sm:$0xf] %vm284_vm3, %v280_v15 }
  0x30 PF: > { %s11_s8 = sadd.s32 1, %s505_s8   ;;  %s619_s6 = smov %s501_s7 }
  0x31   : > { %p8_p6 = scmp.ge.s32.totalorder %s11_s8, 4   ;;  %s620_s7 = smov %s622_s9 }
  0x33   :  { %10 = sbr.rel (!%p8_p6) target bundleno = 2 (0x2), region = 79 }

// kernel: encoder_cnn_forward.58
= control target key start
LH: loop header
LB: loop body
LE: loop exit
PB: predicated region body
PF: predicated region fallthrough
CT: control target
= control target key end

     0   :  { %s1104_s12 = smov 0   ;;  %s1106_s13 = smov 0   ;;  %s1284_s0 = inlined_call_operand.vmem [shape: bf16[512,8], index: 0, kind: input, shape index: {}]   ;;  %s1285_s1 = inlined_call_operand.vmem [shape: bf16[8,8], index: 1, kind: input, shape index: {}]   ;;  %s1286_s2 = inlined_call_operand.vmem [shape: f32[1,8], index: 2, kind: input, shape index: {}]   ;;  %s1287_s3 = inlined_call_operand.vmem [shape: bf16[512,8], index: 3, kind: output, shape index: {}]  }
   0x1   :  { %s1108_s14 = smov 0  }
   0x2 LB: > { %s25_s15 = sadd.s32 1, %s1078_s13  ;;  %p861_p0 = scmp.ge.s32.totalorder %s1082_s14, 1  ;;  %s1082_s14 = sphi %s1108_s14, %s13_s14   ;;  %s1078_s13 = sphi %s1106_s13, %s1289_s13   ;;  %s1074_s12 = sphi %s1104_s12, %s1288_s12  }
   0x3   : > { %p27_p1 = scmp.ge.s32.totalorder %s25_s15, 2  ;;  %p169_p2 = scmp.lt.s32.totalorder %s1082_s14, 3 }
   0x5   : > { %s1291_s15 = smov (%p27_p1, %s25_s15), 0  ;;  %p170_p3 = pnand %p861_p0, %p169_p2 }
   0x6   : > { %s862_s18 = sshll.u32 (!%p170_p3), %s1074_s12, 5 }
   0x7   : > { %173 = sbr.rel (%p170_p3) target bundleno = 248 (0xf8), region = 32  ;;  %p204_p4 = scmp.lt.s32.totalorder (!%p170_p3), %s862_s18, 63 }
   0xc   : > { %v258_v0 = vld [vmem:[%s1285_s1] sm:$0xf]  ;;  %vm395_vm0 = vcmask 1043456   ;;  %s1293_s18 = smov (!%p204_p4, %s862_s18), 63  ;;  %vm346_vm1 = vcmask 64512   ;;  %vm720_vm2 = vcmask 60416  }
   0xd   : > { %1018 = vmatprep.subr.msk.bf16.mxu0 %vm395_vm0, %v258_v0  ;;  %1019 = vmatprep.subr.msk.bf16.mxu1 %vm395_vm0, %v258_v0  ;;  %v397_v1 = vsel %vm395_vm0, %v258_v0, 0  ;;  %s863_s19 = sshll.u32 %s1293_s18, 2  ;;  %v1170_v18 = vld [vmem:[%s1286_s2] ss:$0 sm:$0xff] }
   0xe   : > { %983 = vmatpush3.bf16.msra.mxu0 %v397_v1  ;;  %1017 = vmatpush3.bf16.msra.mxu1 %v397_v1  ;;  %s1133_s22 = scalar_lea.vmem %s1284_s0, %s863_s19  ;;  %s1180_s27 = scalar_lea.vmem %s1287_s3, %s863_s19 }
   0xf   : > { %v1044_v2 = vld [vmem:[%s1133_s22] sm:$0xff]   ;;  %v1046_v4 = vld [vmem:[%s1133_s22 + $0x8] sm:$0xff]   ;;  %v1048_v6 = vld [vmem:[%s1133_s22 + $0x10] sm:$0xff]  }
  0x10   : > { %v1045_v3 = vld [vmem:[%s1133_s22 + $0x40] sm:$0xff]   ;;  %984 = vmatprep.mubr.msk.bf16.mxu0 %vm346_vm1, %v1044_v2  ;;  %v1047_v5 = vld [vmem:[%s1133_s22 + $0x48] sm:$0xff]   ;;  %v1049_v7 = vld [vmem:[%s1133_s22 + $0x50] sm:$0xff]  }
  0x11   : > { %1000 = vmatprep.mubr.msk.bf16.mxu1 %vm346_vm1, %v1045_v3  ;;  %985 = vmatmul.mubr.msk.bf16.vlgmr.msra.gmra.mxu0 %vm346_vm1, %v1046_v4  ;;  %v1050_v8 = vld [vmem:[%s1133_s22 + $0x18] sm:$0xff]   ;;  %v1052_v10 = vld [vmem:[%s1133_s22 + $0x20] sm:$0xff]   ;;  %v1054_v12 = vld [vmem:[%s1133_s22 + $0x28] sm:$0xff]  }
  0x12   : > { %1001 = vmatmul.mubr.msk.bf16.vlgmr.msra.gmra.mxu1 %vm346_vm1, %v1047_v5  ;;  %988 = vmatprep.mubr.msk.bf16.mxu0 %vm346_vm1, %v1048_v6  ;;  %v1051_v9 = vld [vmem:[%s1133_s22 + $0x58] sm:$0xff]   ;;  %v1053_v11 = vld [vmem:[%s1133_s22 + $0x60] sm:$0xff]   ;;  %v1055_v13 = vld [vmem:[%s1133_s22 + $0x68] sm:$0xff]  }
  0x13   : > { %1004 = vmatprep.mubr.msk.bf16.mxu1 %vm346_vm1, %v1049_v7  ;;  %v1056_v14 = vld [vmem:[%s1133_s22 + $0x30] sm:$0xff]   ;;  %v1058_v16 = vld [vmem:[%s1133_s22 + $0x38] sm:$0xff]  }
  0x14   : > { %v1057_v15 = vld [vmem:[%s1133_s22 + $0x70] sm:$0xff]   ;;  %v1059_v17 = vld [vmem:[%s1133_s22 + $0x78] sm:$0xff]  }
  0x19   : > { %989 = vmatmul.mubr.msk.bf16.gmra.mxu0 %vm346_vm1, %v1050_v8 }
  0x1a   : > { %1005 = vmatmul.mubr.msk.bf16.gmra.mxu1 %vm346_vm1, %v1051_v9  ;;  %992 = vmatprep.mubr.msk.bf16.mxu0 %vm346_vm1, %v1052_v10 }
  0x1b   : > { %1008 = vmatprep.mubr.msk.bf16.mxu1 %vm346_vm1, %v1053_v11 }
  0x21   : > { %993 = vmatmul.mubr.msk.bf16.gmra.mxu0 %vm346_vm1, %v1054_v12 }
  0x22   : > { %1009 = vmatmul.mubr.msk.bf16.gmra.mxu1 %vm346_vm1, %v1055_v13  ;;  %996 = vmatprep.mubr.msk.bf16.mxu0 %vm346_vm1, %v1056_v14 }
  0x23   : > { %1012 = vmatprep.mubr.msk.bf16.mxu1 %vm346_vm1, %v1057_v15 }
  0x29   : > { %997 = vmatmul.mubr.msk.bf16.gmra.mxu0 %vm346_vm1, %v1058_v16 }
  0x2a   : > { %1013 = vmatmul.mubr.msk.bf16.gmra.mxu1 %vm346_vm1, %v1059_v17 }
  0xd1   : > { %v986_v19 = vpop.f32.mrf.mxu0 }
  0xd2   : > { %v442_v20 = vadd.f32 %v986_v19, %v1170_v18  ;;  %v1002_v21 = vpop.f32.mrf.mxu1 }
  0xd3   : > { %v506_v22 = vadd.f32 %v1002_v21, %v1170_v18  ;;  %v433_v23 = vpop.f32.mrf.mxu0 }
  0xd4   : > { %v562_v24 = vmax.f32 %v442_v20, 0.0  ;;  %v434_v25 = vadd.f32 %v1170_v18, %v433_v23  ;;  %v497_v26 = vpop.f32.mrf.mxu1 }
  0xd5   : > { %v578_v27 = vmax.f32 %v506_v22, 0.0  ;;  %v498_v28 = vadd.f32 %v1170_v18, %v497_v26  ;;  %v987_v29 = vpop.f32.mrf.mxu0 }
  0xd6   : > { %v935_v30 = vpack.c.bf16 %v562_v24, %v562_v24  ;;  %v560_v31 = vmax.f32 %v434_v25, 0.0  ;;  %v445_v32 = vadd.f32 %v987_v29, %v1170_v18  ;;  %v1003_v33 = vpop.f32.mrf.mxu1 }
  0xd7   : > { %v951_v34 = vpack.c.bf16 %v578_v27, %v578_v27  ;;  %v576_v35 = vmax.f32 %v498_v28, 0.0  ;;  %v509_v36 = vadd.f32 %v1003_v33, %v1170_v18  ;;  %v436_v37 = vpop.f32.mrf.mxu0 }
  0xd8   : > { %723 = vst.msk [vmem:[%s1180_s27 + $0x8] sm:$0xf] %vm720_vm2, %v935_v30  ;;  %v933_v38 = vpack.c.bf16 %v560_v31, %v560_v31  ;;  %v563_v39 = vmax.f32 %v445_v32, 0.0  ;;  %v437_v40 = vadd.f32 %v1170_v18, %v436_v37  ;;  %v500_v41 = vpop.f32.mrf.mxu1 }
  0xd9   : > { %739 = vst.msk [vmem:[%s1180_s27 + $0x48] sm:$0xf] %vm720_vm2, %v951_v34  ;;  %v949_v42 = vpack.c.bf16 %v576_v35, %v576_v35  ;;  %v579_v43 = vmax.f32 %v509_v36, 0.0  ;;  %v501_v44 = vadd.f32 %v1170_v18, %v500_v41  ;;  %v990_v45 = vpop.f32.mrf.mxu0 }
  0xda   : > { %721 = vst.msk [vmem:[%s1180_s27] sm:$0xf] %vm720_vm2, %v933_v38  ;;  %v936_v46 = vpack.c.bf16 %v563_v39, %v563_v39  ;;  %v561_v47 = vmax.f32 %v437_v40, 0.0  ;;  %v458_v48 = vadd.f32 %v990_v45, %v1170_v18  ;;  %v1006_v49 = vpop.f32.mrf.mxu1 }
  0xdb   : > { %737 = vst.msk [vmem:[%s1180_s27 + $0x40] sm:$0xf] %vm720_vm2, %v949_v42  ;;  %v952_v50 = vpack.c.bf16 %v579_v43, %v579_v43  ;;  %v577_v51 = vmax.f32 %v501_v44, 0.0  ;;  %v522_v52 = vadd.f32 %v1006_v49, %v1170_v18  ;;  %v449_v53 = vpop.f32.mrf.mxu0 }
  0xdc   : > { %724 = vst.msk [vmem:[%s1180_s27 + $0xc] sm:$0xf] %vm720_vm2, %v936_v46  ;;  %v934_v54 = vpack.c.bf16 %v561_v47, %v561_v47  ;;  %v566_v55 = vmax.f32 %v458_v48, 0.0  ;;  %v450_v56 = vadd.f32 %v1170_v18, %v449_v53  ;;  %v513_v57 = vpop.f32.mrf.mxu1 }
  0xdd   : > { %740 = vst.msk [vmem:[%s1180_s27 + $0x4c] sm:$0xf] %vm720_vm2, %v952_v50  ;;  %v950_v58 = vpack.c.bf16 %v577_v51, %v577_v51  ;;  %v582_v59 = vmax.f32 %v522_v52, 0.0  ;;  %v514_v60 = vadd.f32 %v1170_v18, %v513_v57  ;;  %v991_v61 = vpop.f32.mrf.mxu0 }
  0xde   : > { %722 = vst.msk [vmem:[%s1180_s27 + $0x4] sm:$0xf] %vm720_vm2, %v934_v54  ;;  %v939_v62 = vpack.c.bf16 %v566_v55, %v566_v55  ;;  %v564_v63 = vmax.f32 %v450_v56, 0.0  ;;  %v461_v0 = vadd.f32 %v991_v61, %v1170_v18  ;;  %v1007_v1 = vpop.f32.mrf.mxu1 }
  0xdf   : > { %738 = vst.msk [vmem:[%s1180_s27 + $0x44] sm:$0xf] %vm720_vm2, %v950_v58  ;;  %v955_v2 = vpack.c.bf16 %v582_v59, %v582_v59  ;;  %v580_v3 = vmax.f32 %v514_v60, 0.0  ;;  %v525_v4 = vadd.f32 %v1007_v1, %v1170_v18  ;;  %v452_v5 = vpop.f32.mrf.mxu0 }
  0xe0   : > { %727 = vst.msk [vmem:[%s1180_s27 + $0x18] sm:$0xf] %vm720_vm2, %v939_v62  ;;  %v937_v6 = vpack.c.bf16 %v564_v63, %v564_v63  ;;  %v567_v7 = vmax.f32 %v461_v0, 0.0  ;;  %v453_v8 = vadd.f32 %v1170_v18, %v452_v5  ;;  %v516_v9 = vpop.f32.mrf.mxu1 }
  0xe1   : > { %743 = vst.msk [vmem:[%s1180_s27 + $0x58] sm:$0xf] %vm720_vm2, %v955_v2  ;;  %v953_v10 = vpack.c.bf16 %v580_v3, %v580_v3  ;;  %v583_v11 = vmax.f32 %v525_v4, 0.0  ;;  %v517_v12 = vadd.f32 %v1170_v18, %v516_v9  ;;  %v994_v13 = vpop.f32.mrf.mxu0 }
  0xe2   : > { %725 = vst.msk [vmem:[%s1180_s27 + $0x10] sm:$0xf] %vm720_vm2, %v937_v6  ;;  %v940_v14 = vpack.c.bf16 %v567_v7, %v567_v7  ;;  %v565_v15 = vmax.f32 %v453_v8, 0.0  ;;  %v474_v16 = vadd.f32 %v994_v13, %v1170_v18  ;;  %v1010_v17 = vpop.f32.mrf.mxu1 }
  0xe3   : > { %741 = vst.msk [vmem:[%s1180_s27 + $0x50] sm:$0xf] %vm720_vm2, %v953_v10  ;;  %v956_v19 = vpack.c.bf16 %v583_v11, %v583_v11  ;;  %v581_v20 = vmax.f32 %v517_v12, 0.0  ;;  %v538_v21 = vadd.f32 %v1010_v17, %v1170_v18  ;;  %v465_v22 = vpop.f32.mrf.mxu0 }
  0xe4   : > { %728 = vst.msk [vmem:[%s1180_s27 + $0x1c] sm:$0xf] %vm720_vm2, %v940_v14  ;;  %v938_v23 = vpack.c.bf16 %v565_v15, %v565_v15  ;;  %v570_v24 = vmax.f32 %v474_v16, 0.0  ;;  %v466_v25 = vadd.f32 %v1170_v18, %v465_v22  ;;  %v529_v26 = vpop.f32.mrf.mxu1 }
  0xe5   : > { %744 = vst.msk [vmem:[%s1180_s27 + $0x5c] sm:$0xf] %vm720_vm2, %v956_v19  ;;  %v954_v27 = vpack.c.bf16 %v581_v20, %v581_v20  ;;  %v586_v28 = vmax.f32 %v538_v21, 0.0  ;;  %v530_v29 = vadd.f32 %v1170_v18, %v529_v26  ;;  %v995_v30 = vpop.f32.mrf.mxu0 }
  0xe6   : > { %726 = vst.msk [vmem:[%s1180_s27 + $0x14] sm:$0xf] %vm720_vm2, %v938_v23  ;;  %v943_v31 = vpack.c.bf16 %v570_v24, %v570_v24  ;;  %v568_v32 = vmax.f32 %v466_v25, 0.0  ;;  %v477_v33 = vadd.f32 %v995_v30, %v1170_v18  ;;  %v1011_v34 = vpop.f32.mrf.mxu1 }
  0xe7   : > { %742 = vst.msk [vmem:[%s1180_s27 + $0x54] sm:$0xf] %vm720_vm2, %v954_v27  ;;  %v959_v35 = vpack.c.bf16 %v586_v28, %v586_v28  ;;  %v584_v36 = vmax.f32 %v530_v29, 0.0  ;;  %v541_v37 = vadd.f32 %v1011_v34, %v1170_v18  ;;  %v468_v38 = vpop.f32.mrf.mxu0 }
  0xe8   : > { %731 = vst.msk [vmem:[%s1180_s27 + $0x28] sm:$0xf] %vm720_vm2, %v943_v31  ;;  %v941_v39 = vpack.c.bf16 %v568_v32, %v568_v32  ;;  %v571_v40 = vmax.f32 %v477_v33, 0.0  ;;  %v469_v41 = vadd.f32 %v1170_v18, %v468_v38  ;;  %v532_v42 = vpop.f32.mrf.mxu1 }
  0xe9   : > { %747 = vst.msk [vmem:[%s1180_s27 + $0x68] sm:$0xf] %vm720_vm2, %v959_v35  ;;  %v957_v43 = vpack.c.bf16 %v584_v36, %v584_v36  ;;  %v587_v44 = vmax.f32 %v541_v37, 0.0  ;;  %v533_v45 = vadd.f32 %v1170_v18, %v532_v42  ;;  %v998_v46 = vpop.f32.mrf.mxu0 }
  0xea   : > { %729 = vst.msk [vmem:[%s1180_s27 + $0x20] sm:$0xf] %vm720_vm2, %v941_v39  ;;  %v944_v47 = vpack.c.bf16 %v571_v40, %v571_v40  ;;  %v569_v48 = vmax.f32 %v469_v41, 0.0  ;;  %v490_v49 = vadd.f32 %v998_v46, %v1170_v18  ;;  %v1014_v50 = vpop.f32.mrf.mxu1 }
  0xeb   : > { %745 = vst.msk [vmem:[%s1180_s27 + $0x60] sm:$0xf] %vm720_vm2, %v957_v43  ;;  %v960_v51 = vpack.c.bf16 %v587_v44, %v587_v44  ;;  %v585_v52 = vmax.f32 %v533_v45, 0.0  ;;  %v554_v53 = vadd.f32 %v1014_v50, %v1170_v18  ;;  %v481_v54 = vpop.f32.mrf.mxu0 }
  0xec   : > { %732 = vst.msk [vmem:[%s1180_s27 + $0x2c] sm:$0xf] %vm720_vm2, %v944_v47  ;;  %v942_v55 = vpack.c.bf16 %v569_v48, %v569_v48  ;;  %v574_v56 = vmax.f32 %v490_v49, 0.0  ;;  %v482_v57 = vadd.f32 %v1170_v18, %v481_v54  ;;  %v545_v58 = vpop.f32.mrf.mxu1 }
  0xed   : > { %748 = vst.msk [vmem:[%s1180_s27 + $0x6c] sm:$0xf] %vm720_vm2, %v960_v51  ;;  %v958_v59 = vpack.c.bf16 %v585_v52, %v585_v52  ;;  %v590_v60 = vmax.f32 %v554_v53, 0.0  ;;  %v546_v61 = vadd.f32 %v1170_v18, %v545_v58  ;;  %v999_v62 = vpop.f32.mrf.mxu0 }
  0xee   : > { %730 = vst.msk [vmem:[%s1180_s27 + $0x24] sm:$0xf] %vm720_vm2, %v942_v55  ;;  %v947_v63 = vpack.c.bf16 %v574_v56, %v574_v56  ;;  %v572_v0 = vmax.f32 %v482_v57, 0.0  ;;  %v493_v1 = vadd.f32 %v999_v62, %v1170_v18  ;;  %v1015_v2 = vpop.f32.mrf.mxu1 }
  0xef   : > { %746 = vst.msk [vmem:[%s1180_s27 + $0x64] sm:$0xf] %vm720_vm2, %v958_v59  ;;  %v963_v3 = vpack.c.bf16 %v590_v60, %v590_v60  ;;  %v588_v4 = vmax.f32 %v546_v61, 0.0  ;;  %v557_v5 = vadd.f32 %v1015_v2, %v1170_v18  ;;  %v484_v6 = vpop.f32.mrf.mxu0 }
  0xf0   : > { %735 = vst.msk [vmem:[%s1180_s27 + $0x38] sm:$0xf] %vm720_vm2, %v947_v63  ;;  %v945_v7 = vpack.c.bf16 %v572_v0, %v572_v0  ;;  %v575_v8 = vmax.f32 %v493_v1, 0.0  ;;  %v485_v9 = vadd.f32 %v1170_v18, %v484_v6  ;;  %v548_v10 = vpop.f32.mrf.mxu1 }
  0xf1   : > { %751 = vst.msk [vmem:[%s1180_s27 + $0x78] sm:$0xf] %vm720_vm2, %v963_v3  ;;  %v961_v11 = vpack.c.bf16 %v588_v4, %v588_v4  ;;  %v591_v12 = vmax.f32 %v557_v5, 0.0  ;;  %v549_v13 = vadd.f32 %v1170_v18, %v548_v10 }
  0xf2   : > { %733 = vst.msk [vmem:[%s1180_s27 + $0x30] sm:$0xf] %vm720_vm2, %v945_v7  ;;  %v948_v14 = vpack.c.bf16 %v575_v8, %v575_v8  ;;  %v573_v15 = vmax.f32 %v485_v9, 0.0 }
  0xf3   : > { %749 = vst.msk [vmem:[%s1180_s27 + $0x70] sm:$0xf] %vm720_vm2, %v961_v11  ;;  %v964_v16 = vpack.c.bf16 %v591_v12, %v591_v12  ;;  %v589_v17 = vmax.f32 %v549_v13, 0.0 }
  0xf4   : > { %736 = vst.msk [vmem:[%s1180_s27 + $0x3c] sm:$0xf] %vm720_vm2, %v948_v14  ;;  %v946_v19 = vpack.c.bf16 %v573_v15, %v573_v15 }
  0xf5   : > { %752 = vst.msk [vmem:[%s1180_s27 + $0x7c] sm:$0xf] %vm720_vm2, %v964_v16  ;;  %v962_v20 = vpack.c.bf16 %v589_v17, %v589_v17 }
  0xf6   : > { %734 = vst.msk [vmem:[%s1180_s27 + $0x34] sm:$0xf] %vm720_vm2, %v946_v19 }
  0xf7   : > { %750 = vst.msk [vmem:[%s1180_s27 + $0x74] sm:$0xf] %vm720_vm2, %v962_v20 }
  0xf8 PF: > { %s13_s14 = sadd.s32 1, %s1082_s14   ;;  %s1288_s12 = smov %s1078_s13 }
  0xf9   : > { %p10_p5 = scmp.ge.s32.totalorder %s13_s14, 4   ;;  %s1289_s13 = smov %s1291_s15 }
  0xfb   :  { %12 = sbr.rel (!%p10_p5) target bundleno = 2 (0x2), region = 68 }

// kernel: encoder_cnn_forward.59
= control target key start
LH: loop header
LB: loop body
LE: loop exit
PB: predicated region body
PF: predicated region fallthrough
CT: control target
= control target key end

     0   :  { %s1225_s12 = smov 0   ;;  %s1227_s13 = smov 0   ;;  %s1376_s0 = inlined_call_operand.vmem [shape: bf16[2,1,18,18,8], index: 0, kind: input, shape index: {}]   ;;  %s1377_s1 = inlined_call_operand.vmem [shape: bf16[72,8], index: 1, kind: input, shape index: {}]   ;;  %s1378_s2 = inlined_call_operand.vmem [shape: f32[1,8], index: 2, kind: input, shape index: {}]   ;;  %s1379_s3 = inlined_call_operand.vmem [shape: bf16[2,16,16,8], index: 3, kind: output, shape index: {}]  }
   0x1   :  { %s1229_s14 = smov 0  }
   0x2 LB: > { %s32_s15 = sadd.s32 1, %s1193_s13  ;;  %p1002_p0 = scmp.ge.s32.totalorder %s1197_s14, 1  ;;  %s1197_s14 = sphi %s1229_s14, %s13_s14   ;;  %s1193_s13 = sphi %s1227_s13, %s1381_s13   ;;  %s1189_s12 = sphi %s1225_s12, %s1380_s12  }
   0x3   : > { %p34_p1 = scmp.ge.s32.totalorder %s32_s15, 2  ;;  %p177_p2 = scmp.lt.s32.totalorder %s1197_s14, 3 }
   0x5   : > { %s1383_s15 = smov (%p34_p1, %s32_s15), 0  ;;  %p178_p3 = pnand %p1002_p0, %p177_p2 }
   0x6   : > { %p216_p4 = scmp.lt.s32.totalorder (!%p178_p3), %s1189_s12, 1  ;;  %s1258_s26 = smov (!%p178_p3), 0  }
   0x7   : > { %181 = sbr.rel (%p178_p3) target bundleno = 260 (0x104), region = 32 }
   0xc   : > { %v1246_v0 = vld [vmem:[%s1378_s2] ss:$0 sm:$0xff]  ;;  %s1385_s12 = smov (!%p216_p4, %s1189_s12), 1 }
   0xd   : > { %s1124_s18 = smul.u32 216, %s1385_s12  ;;  %s1047_s19 = sshll.u32 %s1385_s12, 7 }
   0xe   : > { %s1251_s22 = scalar_lea.vmem %s1379_s3, %s1047_s19 }
   0xf   : > { %s1256_s25 = scalar_lea.vmem %s1376_s0, %s1124_s18 }
  0x10 LB: >> { %v257_v1 = vld [vmem:[%s1377_s1] sm:$0xf]  ;;  %vm273_vm0 = vcmask 1043456   ;;  %v1203_v2 = vmov 0.0   ;;  %vm1204_vm1 = vmmov 0   ;;  %s1048_s4 = smul.u32 12, %s1201_s26  ;;  %s1201_s26 = sphi %s1258_s26, %s250_s26  }
  0x11   : >> { %1070 = vmatprep.subr.bf16.mxu0 %v1203_v2  ;;  %v275_v3 = vsel %vm273_vm0, %v257_v1, 0  ;;  %1072 = vmatprep.mubr.msk.bf16.mxu0 %vm1204_vm1, %v1203_v2  ;;  %v321_v4 = vld [vmem:[%s1377_s1 + $0x4] sm:$0xf]  ;;  %v393_v5 = vld [vmem:[%s1377_s1 + $0x8] sm:$0xf]  ;;  %vm269_vm2 = vcmask 64512  }
  0x12   : >> { %1071 = vmatpush3.bf16.msra.mxu0 %v275_v3  ;;  %1076 = vmatprep.subr.bf16.mxu1 %v1203_v2  ;;  %v347_v6 = vsel %vm273_vm0, %v321_v4, 0  ;;  %s1281_s7 = scalar_lea.vmem %s1256_s25, %s1048_s4  ;;  %v405_v8 = vsel %vm273_vm0, %v393_v5, 0  ;;  %vm397_vm3 = vcmask 1046528   ;;  %v514_v15 = vld [vmem:[%s1377_s1 + $0x10] sm:$0xf]  ;;  %s1051_s24 = sshll.u32 %s1201_s26, 3 }
  0x13   : >> { %1082 = vmatprep.subr.bf16.mxu0 %v1203_v2  ;;  %1077 = vmatpush3.bf16.msra.mxu1 %v347_v6  ;;  %v1159_v7 = vld [vmem:[%s1281_s7] sm:$0xff]   ;;  %v1161_v12 = vld [vmem:[%s1281_s7 + $0x8] ss:$0 sps:$4 sm:$0x11]   ;;  %v1019_v16 = vld [vmem:[%s1281_s7 + $0xc] sm:$0xf]  ;;  %s844_s27 = scalar_lea.vmem %s1251_s22, %s1051_s24 }
  0x14   : >> { %1078 = vmatprep.mubr.msk.bf16.mxu1 %vm1204_vm1, %v1203_v2  ;;  %1088 = vmatprep.subr.bf16.mxu1 %v1203_v2  ;;  %v318_v9 = vld [vmem:[%s1281_s7] sm:$0xf]  ;;  %v319_v10 = vld [vmem:[%s1281_s7 + $0x4] sm:$0xf]  ;;  %v339_v19 = vshll.u32 %v1161_v12, 16  ;;  %v399_v20 = vrot.slane %v1161_v12, 1 }
  0x15   : >> { %1073 = vmatmul.mubr.msk.bf16.vlgmr.msra.gmra.mxu0 %vm269_vm2, %v1159_v7  ;;  %v1010_v11 = vcombine.low %v318_v9, %v319_v10  ;;  %v392_v13 = vld [vmem:[%s1281_s7] sm:$0xe]  ;;  %v1020_v21 = vld [vmem:[%s1281_s7 + $0x10] sm:$0xf]  ;;  %vm330_vm4 = vsmask.f32 7424 }
  0x16   : >> { %1083 = vmatpush3.bf16.msra.mxu0 %v405_v8  ;;  %1084 = vmatprep.mubr.msk.bf16.mxu0 %vm1204_vm1, %v1203_v2  ;;  %v1013_v14 = vcombine.low %v392_v13, %v319_v10  ;;  %v1022_v23 = vcombine.low %v1019_v16, %v1020_v21  ;;  %v1165_v24 = vld [vmem:[%s1281_s7 + $0x14] ss:$0 sps:$4 sm:$0x11]   ;;  %v341_v26 = vrot.slane %v339_v19, 1  ;;  %v456_v27 = vld [vmem:[%s1377_s1 + $0xc] sm:$0xf] }
  0x17   : >> { %v332_v17 = vshrl.u32 %v1010_v11, 16  ;;  %v334_v18 = vshll.u32 %v1010_v11, 16  ;;  %1094 = vmatprep.subr.bf16.mxu0 %v1203_v2  ;;  %v531_v31 = vshll.u32 %v1165_v24, 16  ;;  %v539_v33 = vsel %vm273_vm0, %v514_v15, 0  ;;  %v1025_v39 = vld [vmem:[%s1281_s7 + $0xc] sm:$0xe] }
  0x18   : >> { %v398_v22 = vrot.slane %v1013_v14, 1  ;;  %v524_v29 = vshrl.u32 %v1022_v23, 16  ;;  %v526_v30 = vshll.u32 %v1022_v23, 16  ;;  %v466_v34 = vsel %vm273_vm0, %v456_v27, 0  ;;  %v647_v40 = vld [vmem:[%s1377_s1 + $0x18] sm:$0xf] }
  0x19   : >> { %v336_v25 = vrot.slane %v334_v18, 1  ;;  %v533_v38 = vrot.slane %v531_v31, 1  ;;  %v1032_v41 = vld [vmem:[%s1281_s7 + $0x18] sm:$0xf]  ;;  %v1033_v42 = vld [vmem:[%s1281_s7 + $0x1c] sm:$0xf]  ;;  %v1026_v46 = vcombine.low %v1025_v39, %v1020_v21 }
  0x1a   : >> { %v400_v28 = vsel %vm397_vm3, %v398_v22, %v399_v20  ;;  %v528_v35 = vrot.slane %v526_v30, 1  ;;  %v585_v43 = vld [vmem:[%s1377_s1 + $0x14] sm:$0xf]  ;;  %v1163_v44 = vld [vmem:[%s1281_s7 + $0xc] sm:$0xff]   ;;  %v657_v47 = vsel %vm273_vm0, %v647_v40, 0  ;;  %v1035_v48 = vcombine.low %v1032_v41, %v1033_v42  ;;  %v1167_v57 = vld [vmem:[%s1281_s7 + $0x18] sm:$0xff]  }
  0x1b   : >> { %v337_v32 = vor.u32 %v336_v25, %v332_v17  ;;  %v596_v49 = vsel %vm273_vm0, %v585_v43, 0  ;;  %v589_v50 = vrot.slane %v1026_v46, 1  ;;  %v590_v51 = vrot.slane %v1165_v24, 1  ;;  %v776_v52 = vld [vmem:[%s1377_s1 + $0x20] sm:$0xf]  ;;  %s250_s26 = sadd.s32 1, %s1201_s26  }
  0x1c   : >> { %v529_v37 = vor.u32 %v528_v35, %v524_v29  ;;  %v1169_v53 = vld [vmem:[%s1281_s7 + $0x20] ss:$0 sps:$4 sm:$0x11]   ;;  %v717_v54 = vshll.u32 %v1035_v48, 16  ;;  %v1038_v55 = vld [vmem:[%s1281_s7 + $0x18] sm:$0xe] }
  0x1d   : >> { %v342_v36 = vsel %vm330_vm4, %v337_v32, %v341_v26  ;;  %1085 = vmatmul.mubr.msk.bf16.vlgmr.msra.gmra.mxu0 %vm269_vm2, %v400_v28  ;;  %v705_v56 = vld [vmem:[%s1377_s1 + $0x1c] sm:$0xf]  ;;  %v787_v58 = vsel %vm273_vm0, %v776_v52, 0  ;;  %v1039_v59 = vcombine.low %v1038_v55, %v1033_v42  ;;  %v591_v60 = vsel %vm397_vm3, %v589_v50, %v590_v51  ;;  %p247_p5 = scmp.ge.s32.totalorder %s250_s26, 16  }
  0x1e   : >> { %1079 = vmatmul.mubr.msk.bf16.vlgmr.msra.gmra.mxu1 %vm269_vm2, %v342_v36  ;;  %1095 = vmatpush3.bf16.msra.mxu0 %v539_v33  ;;  %v534_v45 = vsel %vm330_vm4, %v529_v37, %v533_v38  ;;  %v715_v61 = vshrl.u32 %v1035_v48, 16  ;;  %v719_v62 = vrot.slane %v717_v54, 1  ;;  %v722_v63 = vshll.u32 %v1169_v53, 16 }
  0x1f   : >> { %1089 = vmatpush3.bf16.msra.mxu1 %v466_v34  ;;  %1090 = vmatprep.mubr.msk.bf16.mxu1 %vm1204_vm1, %v1203_v2  ;;  %v730_v1 = vsel %vm273_vm0, %v705_v56, 0  ;;  %v780_v3 = vrot.slane %v1039_v59, 1  ;;  %v781_v4 = vrot.slane %v1169_v53, 1  ;;  %vm845_vm5 = vcmask 60416  }
  0x20   : >> { %1100 = vmatprep.subr.bf16.mxu1 %v1203_v2  ;;  %1096 = vmatprep.mubr.msk.bf16.mxu0 %vm1204_vm1, %v1203_v2  ;;  %v720_v5 = vor.u32 %v719_v62, %v715_v61  ;;  %v724_v6 = vrot.slane %v722_v63, 1 }
  0x21   : >> { %1106 = vmatprep.subr.bf16.mxu0 %v1203_v2  ;;  %v782_v7 = vsel %vm397_vm3, %v780_v3, %v781_v4 }
  0x22   : >> { %v725_v8 = vsel %vm330_vm4, %v720_v5, %v724_v6 }
  0x25   : >> { %1097 = vmatmul.mubr.msk.bf16.vlgmr.msra.gmra.mxu0 %vm269_vm2, %v534_v45 }
  0x26   : >> { %1091 = vmatmul.mubr.msk.bf16.vlgmr.msra.gmra.mxu1 %vm269_vm2, %v1163_v44  ;;  %1107 = vmatpush3.bf16.msra.mxu0 %v657_v47 }
  0x27   : >> { %1101 = vmatpush3.bf16.msra.mxu1 %v596_v49  ;;  %1102 = vmatprep.mubr.msk.bf16.mxu1 %vm1204_vm1, %v1203_v2 }
  0x28   : >> { %1112 = vmatprep.subr.bf16.mxu1 %v1203_v2  ;;  %1108 = vmatprep.mubr.msk.bf16.mxu0 %vm1204_vm1, %v1203_v2 }
  0x29   : >> { %1118 = vmatprep.subr.bf16.mxu0 %v1203_v2 }
  0x2d   : >> { %1109 = vmatmul.mubr.msk.bf16.vlgmr.msra.gmra.mxu0 %vm269_vm2, %v1167_v57 }
  0x2e   : >> { %1103 = vmatmul.mubr.msk.bf16.vlgmr.msra.gmra.mxu1 %vm269_vm2, %v591_v60  ;;  %1119 = vmatpush3.bf16.msra.mxu0 %v787_v58 }
  0x2f   : >> { %1113 = vmatpush3.bf16.msra.mxu1 %v730_v1  ;;  %1114 = vmatprep.mubr.msk.bf16.mxu1 %vm1204_vm1, %v1203_v2 }
  0x30   : >> { %1120 = vmatprep.mubr.msk.bf16.mxu0 %vm1204_vm1, %v1203_v2 }
  0x35   : >> { %1121 = vmatmul.mubr.msk.bf16.vlgmr.msra.gmra.mxu0 %vm269_vm2, %v782_v7 }
  0x36   : >> { %1115 = vmatmul.mubr.msk.bf16.vlgmr.msra.gmra.mxu1 %vm269_vm2, %v725_v8 }
  0xd5   : >> { %v311_v9 = vpop.f32.mrf.mxu0 }
  0xd6   : >> { %v312_v2 = vadd.f32 %v1246_v0, %v311_v9 }
  0xd7   : >> { %v1074_v10 = vpop.f32.mrf.mxu0 }
  0xd9   : >> { %v314_v11 = vpop.f32.mrf.mxu0 }
  0xda   : >> { %v315_v24 = vadd.f32 %v1246_v0, %v314_v11 }
  0xdb   : >> { %v1075_v12 = vpop.f32.mrf.mxu0 }
  0xdd   : >> { %v441_v13 = vpop.f32.mrf.mxu0 }
  0xde   : >> { %v383_v14 = vpop.f32.mrf.mxu1 }
  0xdf   : >> { %v1086_v15 = vpop.f32.mrf.mxu0  ;;  %v390_v21 = vadd.f32 %v383_v14, %v312_v2 }
  0xe0   : >> { %v1080_v16 = vpop.f32.mrf.mxu1 }
  0xe1   : >> { %v444_v17 = vpop.f32.mrf.mxu0  ;;  %v448_v27 = vadd.f32 %v441_v13, %v390_v21 }
  0xe2   : >> { %v386_v18 = vpop.f32.mrf.mxu1 }
  0xe3   : >> { %v1087_v19 = vpop.f32.mrf.mxu0  ;;  %v391_v28 = vadd.f32 %v386_v18, %v315_v24 }
  0xe4   : >> { %v1081_v20 = vpop.f32.mrf.mxu1 }
  0xe5   : >> { %v575_v22 = vpop.f32.mrf.mxu0  ;;  %v449_v34 = vadd.f32 %v444_v17, %v391_v28 }
  0xe6   : >> { %v502_v23 = vpop.f32.mrf.mxu1 }
  0xe7   : >> { %v1098_v25 = vpop.f32.mrf.mxu0  ;;  %v509_v31 = vadd.f32 %v502_v23, %v448_v27 }
  0xe8   : >> { %v1092_v26 = vpop.f32.mrf.mxu1 }
  0xe9   : >> { %v578_v29 = vpop.f32.mrf.mxu0  ;;  %v582_v37 = vadd.f32 %v575_v22, %v509_v31 }
  0xea   : >> { %v505_v30 = vpop.f32.mrf.mxu1 }
  0xeb   : >> { %v1099_v32 = vpop.f32.mrf.mxu0  ;;  %v510_v38 = vadd.f32 %v505_v30, %v449_v34 }
  0xec   : >> { %v1093_v33 = vpop.f32.mrf.mxu1 }
  0xed   : >> { %v693_v35 = vpop.f32.mrf.mxu0  ;;  %v583_v44 = vadd.f32 %v578_v29, %v510_v38 }
  0xee   : >> { %v632_v36 = vpop.f32.mrf.mxu1 }
  0xef   : >> { %v1110_v39 = vpop.f32.mrf.mxu0  ;;  %v639_v41 = vadd.f32 %v632_v36, %v582_v37 }
  0xf0   : >> { %v1104_v40 = vpop.f32.mrf.mxu1 }
  0xf1   : >> { %v696_v42 = vpop.f32.mrf.mxu0  ;;  %v700_v47 = vadd.f32 %v693_v35, %v639_v41 }
  0xf2   : >> { %v635_v43 = vpop.f32.mrf.mxu1 }
  0xf3   : >> { %v1111_v45 = vpop.f32.mrf.mxu0  ;;  %v640_v48 = vadd.f32 %v635_v43, %v583_v44 }
  0xf4   : >> { %v1105_v46 = vpop.f32.mrf.mxu1 }
  0xf5   : >> { %v823_v49 = vpop.f32.mrf.mxu0  ;;  %v701_v54 = vadd.f32 %v696_v42, %v640_v48 }
  0xf6   : >> { %v766_v50 = vpop.f32.mrf.mxu1 }
  0xf7   : >> { %v773_v51 = vadd.f32 %v766_v50, %v700_v47  ;;  %v1122_v52 = vpop.f32.mrf.mxu0 }
  0xf8   : >> { %v1116_v53 = vpop.f32.mrf.mxu1 }
  0xf9   : >> { %v830_v55 = vadd.f32 %v823_v49, %v773_v51  ;;  %v826_v56 = vpop.f32.mrf.mxu0 }
  0xfa   : >> { %v769_v57 = vpop.f32.mrf.mxu1 }
  0xfb   : >> { %v832_v58 = vmax.f32 %v830_v55, 0.0  ;;  %v774_v59 = vadd.f32 %v769_v57, %v701_v54  ;;  %v1123_v60 = vpop.f32.mrf.mxu0 }
  0xfc   : >> { %v1117_v61 = vpop.f32.mrf.mxu1 }
  0xfd   : >> { %v1049_v62 = vpack.c.bf16 %v832_v58, %v832_v58  ;;  %v831_v63 = vadd.f32 %v826_v56, %v774_v59 }
  0xff   : >> { %846 = vst.msk [vmem:[%s844_s27] sm:$0xf] %vm845_vm5, %v1049_v62  ;;  %v833_v1 = vmax.f32 %v831_v63, 0.0  ;;  %249 = sbr.rel (!%p247_p5) target bundleno = 16 (0x10), region = 79 }
 0x101   : >> { %v1050_v3 = vpack.c.bf16 %v833_v1, %v833_v1 }
 0x103   : >> { %847 = vst.msk [vmem:[%s844_s27 + $0x4] sm:$0xf] %vm845_vm5, %v1050_v3 }
 0x104 PF: > { %s13_s14 = sadd.s32 1, %s1197_s14   ;;  %s1380_s12 = smov %s1193_s13 }
 0x105   : > { %p10_p6 = scmp.ge.s32.totalorder %s13_s14, 4   ;;  %s1381_s13 = smov %s1383_s15 }
 0x107   :  { %12 = sbr.rel (!%p10_p6) target bundleno = 2 (0x2), region = 90 }

// kernel: encoder_cnn_forward.60
= control target key start
LH: loop header
LB: loop body
LE: loop exit
PB: predicated region body
PF: predicated region fallthrough
CT: control target
= control target key end

     0   :  { %s1072_s12 = smov 0   ;;  %s1074_s13 = smov 0   ;;  %s1252_s0 = inlined_call_operand.vmem [shape: bf16[512,8], index: 0, kind: input, shape index: {}]   ;;  %s1253_s1 = inlined_call_operand.vmem [shape: bf16[8,32], index: 1, kind: input, shape index: {}]   ;;  %s1254_s2 = inlined_call_operand.vmem [shape: f32[1,32], index: 2, kind: input, shape index: {}]   ;;  %s1255_s3 = inlined_call_operand.vmem [shape: bf16[512,32], index: 3, kind: output, shape index: {}]  }
   0x1   :  { %s1076_s14 = smov 0  }
   0x2 LB: > { %s25_s15 = sadd.s32 1, %s1046_s13  ;;  %p829_p0 = scmp.ge.s32.totalorder %s1050_s14, 1  ;;  %s1050_s14 = sphi %s1076_s14, %s13_s14   ;;  %s1046_s13 = sphi %s1074_s13, %s1257_s13   ;;  %s1042_s12 = sphi %s1072_s12, %s1256_s12  }
   0x3   : > { %p27_p1 = scmp.ge.s32.totalorder %s25_s15, 2  ;;  %p169_p2 = scmp.lt.s32.totalorder %s1050_s14, 3 }
   0x5   : > { %s1259_s15 = smov (%p27_p1, %s25_s15), 0  ;;  %p170_p3 = pnand %p829_p0, %p169_p2 }
   0x6   : > { %s830_s18 = sshll.u32 (!%p170_p3), %s1042_s12, 5 }
   0x7   : > { %173 = sbr.rel (%p170_p3) target bundleno = 246 (0xf6), region = 32  ;;  %p204_p4 = scmp.lt.s32.totalorder (!%p170_p3), %s830_s18, 63 }
   0xc   : > { %v258_v0 = vld [vmem:[%s1253_s1] sm:$0xf]  ;;  %vm395_vm0 = vcmask 1043456   ;;  %s1261_s18 = smov (!%p204_p4, %s830_s18), 63  ;;  %vm346_vm1 = vcmask 64512   ;;  %vm688_vm2 = vcmask 257024  }
   0xd   : > { %986 = vmatprep.subr.msk.bf16.mxu0 %vm395_vm0, %v258_v0  ;;  %987 = vmatprep.subr.msk.bf16.mxu1 %vm395_vm0, %v258_v0  ;;  %v397_v1 = vsel %vm395_vm0, %v258_v0, 0  ;;  %s831_s19 = sshll.u32 %s1261_s18, 2  ;;  %v1138_v18 = vld [vmem:[%s1254_s2] ss:$0 sm:$0xff] }
   0xe   : > { %951 = vmatpush3.bf16.msra.mxu0 %v397_v1  ;;  %985 = vmatpush3.bf16.msra.mxu1 %v397_v1  ;;  %s1101_s22 = scalar_lea.vmem %s1252_s0, %s831_s19  ;;  %s1146_s27 = scalar_lea.vmem %s1255_s3, %s831_s19 }
   0xf   : > { %v1012_v2 = vld [vmem:[%s1101_s22] sm:$0xff]   ;;  %v1014_v4 = vld [vmem:[%s1101_s22 + $0x8] sm:$0xff]   ;;  %v1016_v6 = vld [vmem:[%s1101_s22 + $0x10] sm:$0xff]  }
  0x10   : > { %v1013_v3 = vld [vmem:[%s1101_s22 + $0x40] sm:$0xff]   ;;  %952 = vmatprep.mubr.msk.bf16.mxu0 %vm346_vm1, %v1012_v2  ;;  %v1015_v5 = vld [vmem:[%s1101_s22 + $0x48] sm:$0xff]   ;;  %v1017_v7 = vld [vmem:[%s1101_s22 + $0x50] sm:$0xff]  }
  0x11   : > { %968 = vmatprep.mubr.msk.bf16.mxu1 %vm346_vm1, %v1013_v3  ;;  %953 = vmatmul.mubr.msk.bf16.vlgmr.msra.gmra.mxu0 %vm346_vm1, %v1014_v4  ;;  %v1018_v8 = vld [vmem:[%s1101_s22 + $0x18] sm:$0xff]   ;;  %v1020_v10 = vld [vmem:[%s1101_s22 + $0x20] sm:$0xff]   ;;  %v1022_v12 = vld [vmem:[%s1101_s22 + $0x28] sm:$0xff]  }
  0x12   : > { %969 = vmatmul.mubr.msk.bf16.vlgmr.msra.gmra.mxu1 %vm346_vm1, %v1015_v5  ;;  %956 = vmatprep.mubr.msk.bf16.mxu0 %vm346_vm1, %v1016_v6  ;;  %v1019_v9 = vld [vmem:[%s1101_s22 + $0x58] sm:$0xff]   ;;  %v1021_v11 = vld [vmem:[%s1101_s22 + $0x60] sm:$0xff]   ;;  %v1023_v13 = vld [vmem:[%s1101_s22 + $0x68] sm:$0xff]  }
  0x13   : > { %972 = vmatprep.mubr.msk.bf16.mxu1 %vm346_vm1, %v1017_v7  ;;  %v1024_v14 = vld [vmem:[%s1101_s22 + $0x30] sm:$0xff]   ;;  %v1026_v16 = vld [vmem:[%s1101_s22 + $0x38] sm:$0xff]  }
  0x14   : > { %v1025_v15 = vld [vmem:[%s1101_s22 + $0x70] sm:$0xff]   ;;  %v1027_v17 = vld [vmem:[%s1101_s22 + $0x78] sm:$0xff]  }
  0x19   : > { %957 = vmatmul.mubr.msk.bf16.gmra.mxu0 %vm346_vm1, %v1018_v8 }
  0x1a   : > { %973 = vmatmul.mubr.msk.bf16.gmra.mxu1 %vm346_vm1, %v1019_v9  ;;  %960 = vmatprep.mubr.msk.bf16.mxu0 %vm346_vm1, %v1020_v10 }
  0x1b   : > { %976 = vmatprep.mubr.msk.bf16.mxu1 %vm346_vm1, %v1021_v11 }
  0x21   : > { %961 = vmatmul.mubr.msk.bf16.gmra.mxu0 %vm346_vm1, %v1022_v12 }
  0x22   : > { %977 = vmatmul.mubr.msk.bf16.gmra.mxu1 %vm346_vm1, %v1023_v13  ;;  %964 = vmatprep.mubr.msk.bf16.mxu0 %vm346_vm1, %v1024_v14 }
  0x23   : > { %980 = vmatprep.mubr.msk.bf16.mxu1 %vm346_vm1, %v1025_v15 }
  0x29   : > { %965 = vmatmul.mubr.msk.bf16.gmra.mxu0 %vm346_vm1, %v1026_v16 }
  0x2a   : > { %981 = vmatmul.mubr.msk.bf16.gmra.mxu1 %vm346_vm1, %v1027_v17 }
  0xd1   : > { %v954_v19 = vpop.f32.mrf.mxu0 }
  0xd2   : > { %v442_v20 = vadd.f32 %v954_v19, %v1138_v18  ;;  %v970_v21 = vpop.f32.mrf.mxu1 }
  0xd3   : > { %v506_v22 = vadd.f32 %v970_v21, %v1138_v18  ;;  %v433_v23 = vpop.f32.mrf.mxu0 }
  0xd4   : > { %v903_v24 = vpack.c.bf16 %v442_v20, %v442_v20  ;;  %v434_v25 = vadd.f32 %v1138_v18, %v433_v23  ;;  %v497_v26 = vpop.f32.mrf.mxu1 }
  0xd5   : > { %v919_v27 = vpack.c.bf16 %v506_v22, %v506_v22  ;;  %v498_v28 = vadd.f32 %v1138_v18, %v497_v26  ;;  %v955_v29 = vpop.f32.mrf.mxu0 }
  0xd6   : > { %691 = vst.msk [vmem:[%s1146_s27 + $0x8] sm:$0xf] %vm688_vm2, %v903_v24  ;;  %v901_v30 = vpack.c.bf16 %v434_v25, %v434_v25  ;;  %v445_v31 = vadd.f32 %v955_v29, %v1138_v18  ;;  %v971_v32 = vpop.f32.mrf.mxu1 }
  0xd7   : > { %707 = vst.msk [vmem:[%s1146_s27 + $0x48] sm:$0xf] %vm688_vm2, %v919_v27  ;;  %v917_v33 = vpack.c.bf16 %v498_v28, %v498_v28  ;;  %v509_v34 = vadd.f32 %v971_v32, %v1138_v18  ;;  %v436_v35 = vpop.f32.mrf.mxu0 }
  0xd8   : > { %689 = vst.msk [vmem:[%s1146_s27] sm:$0xf] %vm688_vm2, %v901_v30  ;;  %v904_v36 = vpack.c.bf16 %v445_v31, %v445_v31  ;;  %v437_v37 = vadd.f32 %v1138_v18, %v436_v35  ;;  %v500_v38 = vpop.f32.mrf.mxu1 }
  0xd9   : > { %705 = vst.msk [vmem:[%s1146_s27 + $0x40] sm:$0xf] %vm688_vm2, %v917_v33  ;;  %v920_v39 = vpack.c.bf16 %v509_v34, %v509_v34  ;;  %v501_v40 = vadd.f32 %v1138_v18, %v500_v38  ;;  %v958_v41 = vpop.f32.mrf.mxu0 }
  0xda   : > { %692 = vst.msk [vmem:[%s1146_s27 + $0xc] sm:$0xf] %vm688_vm2, %v904_v36  ;;  %v902_v42 = vpack.c.bf16 %v437_v37, %v437_v37  ;;  %v458_v43 = vadd.f32 %v958_v41, %v1138_v18  ;;  %v974_v44 = vpop.f32.mrf.mxu1 }
  0xdb   : > { %708 = vst.msk [vmem:[%s1146_s27 + $0x4c] sm:$0xf] %vm688_vm2, %v920_v39  ;;  %v918_v45 = vpack.c.bf16 %v501_v40, %v501_v40  ;;  %v522_v46 = vadd.f32 %v974_v44, %v1138_v18  ;;  %v449_v47 = vpop.f32.mrf.mxu0 }
  0xdc   : > { %690 = vst.msk [vmem:[%s1146_s27 + $0x4] sm:$0xf] %vm688_vm2, %v902_v42  ;;  %v907_v48 = vpack.c.bf16 %v458_v43, %v458_v43  ;;  %v450_v49 = vadd.f32 %v1138_v18, %v449_v47  ;;  %v513_v50 = vpop.f32.mrf.mxu1 }
  0xdd   : > { %706 = vst.msk [vmem:[%s1146_s27 + $0x44] sm:$0xf] %vm688_vm2, %v918_v45  ;;  %v923_v51 = vpack.c.bf16 %v522_v46, %v522_v46  ;;  %v514_v52 = vadd.f32 %v1138_v18, %v513_v50  ;;  %v959_v53 = vpop.f32.mrf.mxu0 }
  0xde   : > { %695 = vst.msk [vmem:[%s1146_s27 + $0x18] sm:$0xf] %vm688_vm2, %v907_v48  ;;  %v905_v54 = vpack.c.bf16 %v450_v49, %v450_v49  ;;  %v461_v55 = vadd.f32 %v959_v53, %v1138_v18  ;;  %v975_v56 = vpop.f32.mrf.mxu1 }
  0xdf   : > { %711 = vst.msk [vmem:[%s1146_s27 + $0x58] sm:$0xf] %vm688_vm2, %v923_v51  ;;  %v921_v57 = vpack.c.bf16 %v514_v52, %v514_v52  ;;  %v525_v58 = vadd.f32 %v975_v56, %v1138_v18  ;;  %v452_v59 = vpop.f32.mrf.mxu0 }
  0xe0   : > { %693 = vst.msk [vmem:[%s1146_s27 + $0x10] sm:$0xf] %vm688_vm2, %v905_v54  ;;  %v908_v60 = vpack.c.bf16 %v461_v55, %v461_v55  ;;  %v453_v61 = vadd.f32 %v1138_v18, %v452_v59  ;;  %v516_v62 = vpop.f32.mrf.mxu1 }
  0xe1   : > { %709 = vst.msk [vmem:[%s1146_s27 + $0x50] sm:$0xf] %vm688_vm2, %v921_v57  ;;  %v924_v63 = vpack.c.bf16 %v525_v58, %v525_v58  ;;  %v517_v0 = vadd.f32 %v1138_v18, %v516_v62  ;;  %v962_v1 = vpop.f32.mrf.mxu0 }
  0xe2   : > { %696 = vst.msk [vmem:[%s1146_s27 + $0x1c] sm:$0xf] %vm688_vm2, %v908_v60  ;;  %v906_v2 = vpack.c.bf16 %v453_v61, %v453_v61  ;;  %v474_v3 = vadd.f32 %v962_v1, %v1138_v18  ;;  %v978_v4 = vpop.f32.mrf.mxu1 }
  0xe3   : > { %712 = vst.msk [vmem:[%s1146_s27 + $0x5c] sm:$0xf] %vm688_vm2, %v924_v63  ;;  %v922_v5 = vpack.c.bf16 %v517_v0, %v517_v0  ;;  %v538_v6 = vadd.f32 %v978_v4, %v1138_v18  ;;  %v465_v7 = vpop.f32.mrf.mxu0 }
  0xe4   : > { %694 = vst.msk [vmem:[%s1146_s27 + $0x14] sm:$0xf] %vm688_vm2, %v906_v2  ;;  %v911_v8 = vpack.c.bf16 %v474_v3, %v474_v3  ;;  %v466_v9 = vadd.f32 %v1138_v18, %v465_v7  ;;  %v529_v10 = vpop.f32.mrf.mxu1 }
  0xe5   : > { %710 = vst.msk [vmem:[%s1146_s27 + $0x54] sm:$0xf] %vm688_vm2, %v922_v5  ;;  %v927_v11 = vpack.c.bf16 %v538_v6, %v538_v6  ;;  %v530_v12 = vadd.f32 %v1138_v18, %v529_v10  ;;  %v963_v13 = vpop.f32.mrf.mxu0 }
  0xe6   : > { %699 = vst.msk [vmem:[%s1146_s27 + $0x28] sm:$0xf] %vm688_vm2, %v911_v8  ;;  %v909_v14 = vpack.c.bf16 %v466_v9, %v466_v9  ;;  %v477_v15 = vadd.f32 %v963_v13, %v1138_v18  ;;  %v979_v16 = vpop.f32.mrf.mxu1 }
  0xe7   : > { %715 = vst.msk [vmem:[%s1146_s27 + $0x68] sm:$0xf] %vm688_vm2, %v927_v11  ;;  %v925_v17 = vpack.c.bf16 %v530_v12, %v530_v12  ;;  %v541_v19 = vadd.f32 %v979_v16, %v1138_v18  ;;  %v468_v20 = vpop.f32.mrf.mxu0 }
  0xe8   : > { %697 = vst.msk [vmem:[%s1146_s27 + $0x20] sm:$0xf] %vm688_vm2, %v909_v14  ;;  %v912_v21 = vpack.c.bf16 %v477_v15, %v477_v15  ;;  %v469_v22 = vadd.f32 %v1138_v18, %v468_v20  ;;  %v532_v23 = vpop.f32.mrf.mxu1 }
  0xe9   : > { %713 = vst.msk [vmem:[%s1146_s27 + $0x60] sm:$0xf] %vm688_vm2, %v925_v17  ;;  %v928_v24 = vpack.c.bf16 %v541_v19, %v541_v19  ;;  %v533_v25 = vadd.f32 %v1138_v18, %v532_v23  ;;  %v966_v26 = vpop.f32.mrf.mxu0 }
  0xea   : > { %700 = vst.msk [vmem:[%s1146_s27 + $0x2c] sm:$0xf] %vm688_vm2, %v912_v21  ;;  %v910_v27 = vpack.c.bf16 %v469_v22, %v469_v22  ;;  %v490_v28 = vadd.f32 %v966_v26, %v1138_v18  ;;  %v982_v29 = vpop.f32.mrf.mxu1 }
  0xeb   : > { %716 = vst.msk [vmem:[%s1146_s27 + $0x6c] sm:$0xf] %vm688_vm2, %v928_v24  ;;  %v926_v30 = vpack.c.bf16 %v533_v25, %v533_v25  ;;  %v554_v31 = vadd.f32 %v982_v29, %v1138_v18  ;;  %v481_v32 = vpop.f32.mrf.mxu0 }
  0xec   : > { %698 = vst.msk [vmem:[%s1146_s27 + $0x24] sm:$0xf] %vm688_vm2, %v910_v27  ;;  %v915_v33 = vpack.c.bf16 %v490_v28, %v490_v28  ;;  %v482_v34 = vadd.f32 %v1138_v18, %v481_v32  ;;  %v545_v35 = vpop.f32.mrf.mxu1 }
  0xed   : > { %714 = vst.msk [vmem:[%s1146_s27 + $0x64] sm:$0xf] %vm688_vm2, %v926_v30  ;;  %v931_v36 = vpack.c.bf16 %v554_v31, %v554_v31  ;;  %v546_v37 = vadd.f32 %v1138_v18, %v545_v35  ;;  %v967_v38 = vpop.f32.mrf.mxu0 }
  0xee   : > { %703 = vst.msk [vmem:[%s1146_s27 + $0x38] sm:$0xf] %vm688_vm2, %v915_v33  ;;  %v913_v39 = vpack.c.bf16 %v482_v34, %v482_v34  ;;  %v493_v40 = vadd.f32 %v967_v38, %v1138_v18  ;;  %v983_v41 = vpop.f32.mrf.mxu1 }
  0xef   : > { %719 = vst.msk [vmem:[%s1146_s27 + $0x78] sm:$0xf] %vm688_vm2, %v931_v36  ;;  %v929_v42 = vpack.c.bf16 %v546_v37, %v546_v37  ;;  %v557_v43 = vadd.f32 %v983_v41, %v1138_v18  ;;  %v484_v44 = vpop.f32.mrf.mxu0 }
  0xf0   : > { %701 = vst.msk [vmem:[%s1146_s27 + $0x30] sm:$0xf] %vm688_vm2, %v913_v39  ;;  %v916_v45 = vpack.c.bf16 %v493_v40, %v493_v40  ;;  %v485_v46 = vadd.f32 %v1138_v18, %v484_v44  ;;  %v548_v47 = vpop.f32.mrf.mxu1 }
  0xf1   : > { %717 = vst.msk [vmem:[%s1146_s27 + $0x70] sm:$0xf] %vm688_vm2, %v929_v42  ;;  %v932_v48 = vpack.c.bf16 %v557_v43, %v557_v43  ;;  %v549_v49 = vadd.f32 %v1138_v18, %v548_v47 }
  0xf2   : > { %704 = vst.msk [vmem:[%s1146_s27 + $0x3c] sm:$0xf] %vm688_vm2, %v916_v45  ;;  %v914_v50 = vpack.c.bf16 %v485_v46, %v485_v46 }
  0xf3   : > { %720 = vst.msk [vmem:[%s1146_s27 + $0x7c] sm:$0xf] %vm688_vm2, %v932_v48  ;;  %v930_v51 = vpack.c.bf16 %v549_v49, %v549_v49 }
  0xf4   : > { %702 = vst.msk [vmem:[%s1146_s27 + $0x34] sm:$0xf] %vm688_vm2, %v914_v50 }
  0xf5   : > { %718 = vst.msk [vmem:[%s1146_s27 + $0x74] sm:$0xf] %vm688_vm2, %v930_v51 }
  0xf6 PF: > { %s13_s14 = sadd.s32 1, %s1050_s14   ;;  %s1256_s12 = smov %s1046_s13 }
  0xf7   : > { %p10_p5 = scmp.ge.s32.totalorder %s13_s14, 4   ;;  %s1257_s13 = smov %s1259_s15 }
  0xf9   :  { %12 = sbr.rel (!%p10_p5) target bundleno = 2 (0x2), region = 68 }

// kernel: encoder_cnn_forward.61
= control target key start
LH: loop header
LB: loop body
LE: loop exit
PB: predicated region body
PF: predicated region fallthrough
CT: control target
= control target key end

     0   :  { %s1361_s15 = smov 0   ;;  %s1363_s16 = smov 0   ;;  %s1678_s0 = inlined_call_operand.vmem [shape: bf16[512,8], index: 0, kind: input, shape index: {}]   ;;  %s1679_s1 = inlined_call_operand.vmem [shape: bf16[8,32], index: 1, kind: input, shape index: {}]   ;;  %s1680_s2 = inlined_call_operand.vmem [shape: f32[1,32], index: 2, kind: input, shape index: {}]   ;;  %s1681_s3 = inlined_call_operand.vmem [shape: bf16[512,32], index: 3, kind: input, shape index: {}]   ;;  %s1682_s4 = inlined_call_operand.vmem [shape: bf16[512,32], index: 4, kind: output, shape index: {}]  }
   0x1   :  { %s1365_s17 = smov 0  }
   0x2 LB: > { %s26_s18 = sadd.s32 1, %s1330_s16  ;;  %p1032_p0 = scmp.ge.s32.totalorder %s1334_s17, 1  ;;  %s1334_s17 = sphi %s1365_s17, %s14_s17   ;;  %s1330_s16 = sphi %s1363_s16, %s1684_s16   ;;  %s1326_s15 = sphi %s1361_s15, %s1683_s15  }
   0x3   : > { %p28_p1 = scmp.ge.s32.totalorder %s26_s18, 2  ;;  %p210_p2 = scmp.lt.s32.totalorder %s1334_s17, 3 }
   0x5   : > { %s1686_s18 = smov (%p28_p1, %s26_s18), 0  ;;  %p211_p3 = pnand %p1032_p0, %p210_p2 }
   0x6   : > { %s1033_s21 = sshll.u32 (!%p211_p3), %s1326_s15, 5 }
   0x7   : > { %214 = sbr.rel (%p211_p3) target bundleno = 250 (0xfa), region = 36  ;;  %p255_p4 = scmp.lt.s32.totalorder (!%p211_p3), %s1033_s21, 63 }
   0xc   : > { %v318_v0 = vld [vmem:[%s1679_s1] sm:$0xf]  ;;  %vm455_vm0 = vcmask 1043456   ;;  %s1688_s21 = smov (!%p255_p4, %s1033_s21), 63  ;;  %vm406_vm1 = vcmask 64512   ;;  %vm876_vm2 = vcmask 257024  }
   0xd   : > { %1270 = vmatprep.subr.msk.bf16.mxu0 %vm455_vm0, %v318_v0  ;;  %1271 = vmatprep.subr.msk.bf16.mxu1 %vm455_vm0, %v318_v0  ;;  %v457_v1 = vsel %vm455_vm0, %v318_v0, 0  ;;  %s1382_s22 = sshll.u32 %s1688_s21, 2  ;;  %v1475_v38 = vld [vmem:[%s1680_s2] ss:$0 sm:$0xff] }
   0xe   : > { %1235 = vmatpush3.bf16.msra.mxu0 %v457_v1  ;;  %1269 = vmatpush3.bf16.msra.mxu1 %v457_v1  ;;  %s1388_s25 = scalar_lea.vmem %s1678_s0, %s1382_s22  ;;  %s1426_s28 = scalar_lea.vmem %s1681_s3, %s1382_s22 }
   0xf   : > { %v1296_v2 = vld [vmem:[%s1388_s25] sm:$0xff]   ;;  %v1298_v4 = vld [vmem:[%s1388_s25 + $0x8] sm:$0xff]   ;;  %v1300_v6 = vld [vmem:[%s1388_s25 + $0x10] sm:$0xff]   ;;  %s1521_s7 = scalar_lea.vmem %s1682_s4, %s1382_s22 }
  0x10   : > { %v1297_v3 = vld [vmem:[%s1388_s25 + $0x40] sm:$0xff]   ;;  %1236 = vmatprep.mubr.msk.bf16.mxu0 %vm406_vm1, %v1296_v2  ;;  %v1299_v5 = vld [vmem:[%s1388_s25 + $0x48] sm:$0xff]   ;;  %v1301_v7 = vld [vmem:[%s1388_s25 + $0x50] sm:$0xff]  }
  0x11   : > { %1252 = vmatprep.mubr.msk.bf16.mxu1 %vm406_vm1, %v1297_v3  ;;  %1237 = vmatmul.mubr.msk.bf16.vlgmr.msra.gmra.mxu0 %vm406_vm1, %v1298_v4  ;;  %v1302_v8 = vld [vmem:[%s1388_s25 + $0x18] sm:$0xff]   ;;  %v1304_v10 = vld [vmem:[%s1388_s25 + $0x20] sm:$0xff]   ;;  %v1306_v12 = vld [vmem:[%s1388_s25 + $0x28] sm:$0xff]  }
  0x12   : > { %1253 = vmatmul.mubr.msk.bf16.vlgmr.msra.gmra.mxu1 %vm406_vm1, %v1299_v5  ;;  %1240 = vmatprep.mubr.msk.bf16.mxu0 %vm406_vm1, %v1300_v6  ;;  %v1303_v9 = vld [vmem:[%s1388_s25 + $0x58] sm:$0xff]   ;;  %v1305_v11 = vld [vmem:[%s1388_s25 + $0x60] sm:$0xff]   ;;  %v1307_v13 = vld [vmem:[%s1388_s25 + $0x68] sm:$0xff]  }
  0x13   : > { %1256 = vmatprep.mubr.msk.bf16.mxu1 %vm406_vm1, %v1301_v7  ;;  %v1308_v14 = vld [vmem:[%s1388_s25 + $0x30] sm:$0xff]   ;;  %v1310_v16 = vld [vmem:[%s1388_s25 + $0x38] sm:$0xff]   ;;  %v1429_v18 = vld [vmem:[%s1426_s28 + $0x8] sm:$0xff]  }
  0x14   : > { %v1309_v15 = vld [vmem:[%s1388_s25 + $0x70] sm:$0xff]   ;;  %v1311_v17 = vld [vmem:[%s1388_s25 + $0x78] sm:$0xff]   ;;  %v1432_v19 = vld [vmem:[%s1426_s28 + $0x48] sm:$0xff]   ;;  %v1144_v26 = vunpack.c.l.bf16 %v1429_v18  ;;  %v1145_v31 = vunpack.c.h.bf16 %v1429_v18 }
  0x15   : > { %v1435_v20 = vld [vmem:[%s1426_s28] sm:$0xff]   ;;  %v1441_v22 = vld [vmem:[%s1426_s28 + $0x18] sm:$0xff]   ;;  %v1447_v24 = vld [vmem:[%s1426_s28 + $0x10] sm:$0xff]   ;;  %v1176_v27 = vunpack.c.l.bf16 %v1432_v19  ;;  %v1177_v32 = vunpack.c.h.bf16 %v1432_v19 }
  0x16   : > { %v1438_v21 = vld [vmem:[%s1426_s28 + $0x40] sm:$0xff]   ;;  %v1444_v23 = vld [vmem:[%s1426_s28 + $0x58] sm:$0xff]   ;;  %v1450_v25 = vld [vmem:[%s1426_s28 + $0x50] sm:$0xff]   ;;  %v1140_v28 = vunpack.c.l.bf16 %v1435_v20  ;;  %v1141_v33 = vunpack.c.h.bf16 %v1435_v20  ;;  %v1152_v39 = vunpack.c.l.bf16 %v1441_v22  ;;  %v1148_v41 = vunpack.c.l.bf16 %v1447_v24 }
  0x17   : > { %v1172_v29 = vunpack.c.l.bf16 %v1438_v21  ;;  %v1457_v30 = vld [vmem:[%s1426_s28 + $0x28] sm:$0xff]   ;;  %v1173_v34 = vunpack.c.h.bf16 %v1438_v21  ;;  %v1467_v36 = vld [vmem:[%s1426_s28 + $0x20] sm:$0xff]   ;;  %v1184_v40 = vunpack.c.l.bf16 %v1444_v23  ;;  %v1180_v42 = vunpack.c.l.bf16 %v1450_v25  ;;  %v1486_v47 = vld [vmem:[%s1426_s28 + $0x38] sm:$0xff]  }
  0x18   : > { %v1464_v35 = vld [vmem:[%s1426_s28 + $0x68] sm:$0xff]   ;;  %v1470_v37 = vld [vmem:[%s1426_s28 + $0x60] sm:$0xff]   ;;  %v1153_v43 = vunpack.c.h.bf16 %v1441_v22  ;;  %v1185_v44 = vunpack.c.h.bf16 %v1444_v23  ;;  %v1149_v45 = vunpack.c.h.bf16 %v1447_v24  ;;  %v1181_v46 = vunpack.c.h.bf16 %v1450_v25  ;;  %v1489_v48 = vld [vmem:[%s1426_s28 + $0x78] sm:$0xff]  }
  0x19   : > { %1241 = vmatmul.mubr.msk.bf16.gmra.mxu0 %vm406_vm1, %v1302_v8  ;;  %v1160_v50 = vunpack.c.l.bf16 %v1457_v30  ;;  %v1192_v51 = vunpack.c.l.bf16 %v1464_v35  ;;  %v1156_v52 = vunpack.c.l.bf16 %v1467_v36  ;;  %v1188_v53 = vunpack.c.l.bf16 %v1470_v37  ;;  %v1496_v54 = vld [vmem:[%s1426_s28 + $0x30] sm:$0xff]  }
  0x1a   : > { %1257 = vmatmul.mubr.msk.bf16.gmra.mxu1 %vm406_vm1, %v1303_v9  ;;  %1244 = vmatprep.mubr.msk.bf16.mxu0 %vm406_vm1, %v1304_v10  ;;  %v1499_v55 = vld [vmem:[%s1426_s28 + $0x70] sm:$0xff]   ;;  %v1161_v58 = vunpack.c.h.bf16 %v1457_v30  ;;  %v1193_v59 = vunpack.c.h.bf16 %v1464_v35  ;;  %v1157_v60 = vunpack.c.h.bf16 %v1467_v36  ;;  %v1189_v63 = vunpack.c.h.bf16 %v1470_v37 }
  0x1b   : > { %1260 = vmatprep.mubr.msk.bf16.mxu1 %vm406_vm1, %v1305_v11  ;;  %v1168_v0 = vunpack.c.l.bf16 %v1486_v47  ;;  %v1200_v1 = vunpack.c.l.bf16 %v1489_v48  ;;  %v1164_v5 = vunpack.c.l.bf16 %v1496_v54  ;;  %v1196_v6 = vunpack.c.l.bf16 %v1499_v55 }
  0x1c   : > { %v1169_v10 = vunpack.c.h.bf16 %v1486_v47  ;;  %v1201_v11 = vunpack.c.h.bf16 %v1489_v48 }
  0x21   : > { %1245 = vmatmul.mubr.msk.bf16.gmra.mxu0 %vm406_vm1, %v1306_v12 }
  0x22   : > { %1261 = vmatmul.mubr.msk.bf16.gmra.mxu1 %vm406_vm1, %v1307_v13  ;;  %1248 = vmatprep.mubr.msk.bf16.mxu0 %vm406_vm1, %v1308_v14 }
  0x23   : > { %1264 = vmatprep.mubr.msk.bf16.mxu1 %vm406_vm1, %v1309_v15 }
  0x29   : > { %1249 = vmatmul.mubr.msk.bf16.gmra.mxu0 %vm406_vm1, %v1310_v16  ;;  %v1165_v16 = vunpack.c.h.bf16 %v1496_v54 }
  0x2a   : > { %1265 = vmatmul.mubr.msk.bf16.gmra.mxu1 %vm406_vm1, %v1311_v17 }
  0xd1   : > { %v1238_v49 = vpop.f32.mrf.mxu0 }
  0xd2   : > { %v502_v56 = vadd.f32 %v1238_v49, %v1475_v38  ;;  %v1254_v57 = vpop.f32.mrf.mxu1  ;;  %v1197_v49 = vunpack.c.h.bf16 %v1499_v55 }
  0xd3   : > { %v566_v61 = vadd.f32 %v1254_v57, %v1475_v38  ;;  %v493_v62 = vpop.f32.mrf.mxu0 }
  0xd4   : > { %v686_v2 = vadd.f32 %v1144_v26, %v502_v56  ;;  %v494_v3 = vadd.f32 %v1475_v38, %v493_v62  ;;  %v557_v4 = vpop.f32.mrf.mxu1 }
  0xd5   : > { %v702_v7 = vadd.f32 %v1176_v27, %v566_v61  ;;  %v558_v8 = vadd.f32 %v1475_v38, %v557_v4  ;;  %v1239_v9 = vpop.f32.mrf.mxu0 }
  0xd6   : > { %v718_v12 = vmax.f32 %v686_v2, 0.0  ;;  %v684_v13 = vadd.f32 %v1140_v28, %v494_v3  ;;  %v505_v14 = vadd.f32 %v1239_v9, %v1475_v38  ;;  %v1255_v15 = vpop.f32.mrf.mxu1 }
  0xd7   : > { %v734_v17 = vmax.f32 %v702_v7, 0.0  ;;  %v700_v18 = vadd.f32 %v1172_v29, %v558_v8  ;;  %v569_v26 = vadd.f32 %v1255_v15, %v1475_v38  ;;  %v496_v27 = vpop.f32.mrf.mxu0 }
  0xd8   : > { %v1108_v56 = vpack.c.bf16 %v718_v12, %v718_v12  ;;  %v716_v28 = vmax.f32 %v684_v13, 0.0  ;;  %v687_v57 = vadd.f32 %v1145_v31, %v505_v14  ;;  %v497_v61 = vadd.f32 %v1475_v38, %v496_v27  ;;  %v560_v62 = vpop.f32.mrf.mxu1 }
  0xd9   : > { %v1124_v2 = vpack.c.bf16 %v734_v17, %v734_v17  ;;  %v732_v3 = vmax.f32 %v700_v18, 0.0  ;;  %v703_v4 = vadd.f32 %v1177_v32, %v569_v26  ;;  %v561_v29 = vadd.f32 %v1475_v38, %v560_v62  ;;  %v1242_v7 = vpop.f32.mrf.mxu0 }
  0xda   : > { %879 = vst.msk [vmem:[%s1521_s7 + $0x8] sm:$0xf] %vm876_vm2, %v1108_v56  ;;  %v1106_v8 = vpack.c.bf16 %v716_v28, %v716_v28  ;;  %v719_v9 = vmax.f32 %v687_v57, 0.0  ;;  %v685_v31 = vadd.f32 %v1141_v33, %v497_v61  ;;  %v518_v12 = vadd.f32 %v1242_v7, %v1475_v38  ;;  %v1258_v13 = vpop.f32.mrf.mxu1 }
  0xdb   : > { %895 = vst.msk [vmem:[%s1521_s7 + $0x48] sm:$0xf] %vm876_vm2, %v1124_v2  ;;  %v1122_v14 = vpack.c.bf16 %v732_v3, %v732_v3  ;;  %v735_v19 = vmax.f32 %v703_v4, 0.0  ;;  %v701_v32 = vadd.f32 %v1173_v34, %v561_v29  ;;  %v582_v15 = vadd.f32 %v1258_v13, %v1475_v38  ;;  %v509_v17 = vpop.f32.mrf.mxu0 }
  0xdc   : > { %877 = vst.msk [vmem:[%s1521_s7] sm:$0xf] %vm876_vm2, %v1106_v8  ;;  %v1109_v18 = vpack.c.bf16 %v719_v9, %v719_v9  ;;  %v717_v20 = vmax.f32 %v685_v31, 0.0  ;;  %v690_v33 = vadd.f32 %v1152_v39, %v518_v12  ;;  %v510_v26 = vadd.f32 %v1475_v38, %v509_v17  ;;  %v573_v27 = vpop.f32.mrf.mxu1 }
  0xdd   : > { %893 = vst.msk [vmem:[%s1521_s7 + $0x40] sm:$0xf] %vm876_vm2, %v1122_v14  ;;  %v1125_v56 = vpack.c.bf16 %v735_v19, %v735_v19  ;;  %v733_v21 = vmax.f32 %v701_v32, 0.0  ;;  %v706_v34 = vadd.f32 %v1184_v40, %v582_v15  ;;  %v574_v28 = vadd.f32 %v1475_v38, %v573_v27  ;;  %v1243_v57 = vpop.f32.mrf.mxu0 }
  0xde   : > { %880 = vst.msk [vmem:[%s1521_s7 + $0xc] sm:$0xf] %vm876_vm2, %v1109_v18  ;;  %v1107_v61 = vpack.c.bf16 %v717_v20, %v717_v20  ;;  %v722_v62 = vmax.f32 %v690_v33, 0.0  ;;  %v688_v39 = vadd.f32 %v1148_v41, %v510_v26  ;;  %v521_v2 = vadd.f32 %v1243_v57, %v1475_v38  ;;  %v1259_v3 = vpop.f32.mrf.mxu1 }
  0xdf   : > { %896 = vst.msk [vmem:[%s1521_s7 + $0x4c] sm:$0xf] %vm876_vm2, %v1125_v56  ;;  %v1123_v4 = vpack.c.bf16 %v733_v21, %v733_v21  ;;  %v738_v29 = vmax.f32 %v706_v34, 0.0  ;;  %v704_v40 = vadd.f32 %v1180_v42, %v574_v28  ;;  %v585_v7 = vadd.f32 %v1259_v3, %v1475_v38  ;;  %v512_v8 = vpop.f32.mrf.mxu0 }
  0xe0   : > { %878 = vst.msk [vmem:[%s1521_s7 + $0x4] sm:$0xf] %vm876_vm2, %v1107_v61  ;;  %v1112_v9 = vpack.c.bf16 %v722_v62, %v722_v62  ;;  %v720_v31 = vmax.f32 %v688_v39, 0.0  ;;  %v691_v41 = vadd.f32 %v1153_v43, %v521_v2  ;;  %v513_v12 = vadd.f32 %v1475_v38, %v512_v8  ;;  %v576_v13 = vpop.f32.mrf.mxu1 }
  0xe1   : > { %894 = vst.msk [vmem:[%s1521_s7 + $0x44] sm:$0xf] %vm876_vm2, %v1123_v4  ;;  %v1128_v14 = vpack.c.bf16 %v738_v29, %v738_v29  ;;  %v736_v19 = vmax.f32 %v704_v40, 0.0  ;;  %v707_v42 = vadd.f32 %v1185_v44, %v585_v7  ;;  %v577_v32 = vadd.f32 %v1475_v38, %v576_v13  ;;  %v1246_v15 = vpop.f32.mrf.mxu0 }
  0xe2   : > { %883 = vst.msk [vmem:[%s1521_s7 + $0x18] sm:$0xf] %vm876_vm2, %v1112_v9  ;;  %v1110_v17 = vpack.c.bf16 %v720_v31, %v720_v31  ;;  %v723_v22 = vmax.f32 %v691_v41, 0.0  ;;  %v689_v43 = vadd.f32 %v1149_v45, %v513_v12  ;;  %v534_v18 = vadd.f32 %v1246_v15, %v1475_v38  ;;  %v1262_v20 = vpop.f32.mrf.mxu1 }
  0xe3   : > { %899 = vst.msk [vmem:[%s1521_s7 + $0x58] sm:$0xf] %vm876_vm2, %v1128_v14  ;;  %v1126_v33 = vpack.c.bf16 %v736_v19, %v736_v19  ;;  %v739_v23 = vmax.f32 %v707_v42, 0.0  ;;  %v705_v44 = vadd.f32 %v1181_v46, %v577_v32  ;;  %v598_v26 = vadd.f32 %v1262_v20, %v1475_v38  ;;  %v525_v27 = vpop.f32.mrf.mxu0 }
  0xe4   : > { %881 = vst.msk [vmem:[%s1521_s7 + $0x10] sm:$0xf] %vm876_vm2, %v1110_v17  ;;  %v1113_v56 = vpack.c.bf16 %v723_v22, %v723_v22  ;;  %v721_v24 = vmax.f32 %v689_v43, 0.0  ;;  %v694_v45 = vadd.f32 %v1160_v50, %v534_v18  ;;  %v526_v21 = vadd.f32 %v1475_v38, %v525_v27  ;;  %v589_v34 = vpop.f32.mrf.mxu1 }
  0xe5   : > { %897 = vst.msk [vmem:[%s1521_s7 + $0x50] sm:$0xf] %vm876_vm2, %v1126_v33  ;;  %v1129_v28 = vpack.c.bf16 %v739_v23, %v739_v23  ;;  %v737_v25 = vmax.f32 %v705_v44, 0.0  ;;  %v710_v46 = vadd.f32 %v1192_v51, %v598_v26  ;;  %v590_v57 = vadd.f32 %v1475_v38, %v589_v34  ;;  %v1247_v61 = vpop.f32.mrf.mxu0 }
  0xe6   : > { %884 = vst.msk [vmem:[%s1521_s7 + $0x1c] sm:$0xf] %vm876_vm2, %v1113_v56  ;;  %v1111_v62 = vpack.c.bf16 %v721_v24, %v721_v24  ;;  %v726_v39 = vmax.f32 %v694_v45, 0.0  ;;  %v692_v50 = vadd.f32 %v1156_v52, %v526_v21  ;;  %v537_v2 = vadd.f32 %v1247_v61, %v1475_v38  ;;  %v1263_v3 = vpop.f32.mrf.mxu1 }
  0xe7   : > { %900 = vst.msk [vmem:[%s1521_s7 + $0x5c] sm:$0xf] %vm876_vm2, %v1129_v28  ;;  %v1127_v4 = vpack.c.bf16 %v737_v25, %v737_v25  ;;  %v742_v29 = vmax.f32 %v710_v46, 0.0  ;;  %v708_v51 = vadd.f32 %v1188_v53, %v590_v57  ;;  %v601_v40 = vadd.f32 %v1263_v3, %v1475_v38  ;;  %v528_v7 = vpop.f32.mrf.mxu0 }
  0xe8   : > { %882 = vst.msk [vmem:[%s1521_s7 + $0x14] sm:$0xf] %vm876_vm2, %v1111_v62  ;;  %v1116_v8 = vpack.c.bf16 %v726_v39, %v726_v39  ;;  %v724_v9 = vmax.f32 %v692_v50, 0.0  ;;  %v695_v52 = vadd.f32 %v1161_v58, %v537_v2  ;;  %v529_v31 = vadd.f32 %v1475_v38, %v528_v7  ;;  %v592_v41 = vpop.f32.mrf.mxu1 }
  0xe9   : > { %898 = vst.msk [vmem:[%s1521_s7 + $0x54] sm:$0xf] %vm876_vm2, %v1127_v4  ;;  %v1132_v12 = vpack.c.bf16 %v742_v29, %v742_v29  ;;  %v740_v13 = vmax.f32 %v708_v51, 0.0  ;;  %v711_v53 = vadd.f32 %v1193_v59, %v601_v40  ;;  %v593_v14 = vadd.f32 %v1475_v38, %v592_v41  ;;  %v1250_v19 = vpop.f32.mrf.mxu0 }
  0xea   : > { %887 = vst.msk [vmem:[%s1521_s7 + $0x28] sm:$0xf] %vm876_vm2, %v1116_v8  ;;  %v1114_v42 = vpack.c.bf16 %v724_v9, %v724_v9  ;;  %v727_v30 = vmax.f32 %v695_v52, 0.0  ;;  %v693_v58 = vadd.f32 %v1157_v60, %v529_v31  ;;  %v550_v32 = vadd.f32 %v1250_v19, %v1475_v38  ;;  %v1266_v15 = vpop.f32.mrf.mxu1 }
  0xeb   : > { %903 = vst.msk [vmem:[%s1521_s7 + $0x68] sm:$0xf] %vm876_vm2, %v1132_v12  ;;  %v1130_v17 = vpack.c.bf16 %v740_v13, %v740_v13  ;;  %v743_v35 = vmax.f32 %v711_v53, 0.0  ;;  %v709_v59 = vadd.f32 %v1189_v63, %v593_v14  ;;  %v614_v22 = vadd.f32 %v1266_v15, %v1475_v38  ;;  %v541_v43 = vpop.f32.mrf.mxu0 }
  0xec   : > { %885 = vst.msk [vmem:[%s1521_s7 + $0x20] sm:$0xf] %vm876_vm2, %v1114_v42  ;;  %v1117_v18 = vpack.c.bf16 %v727_v30, %v727_v30  ;;  %v725_v36 = vmax.f32 %v693_v58, 0.0  ;;  %v698_v60 = vadd.f32 %v1168_v0, %v550_v32  ;;  %v542_v20 = vadd.f32 %v1475_v38, %v541_v43  ;;  %v605_v33 = vpop.f32.mrf.mxu1 }
  0xed   : > { %901 = vst.msk [vmem:[%s1521_s7 + $0x60] sm:$0xf] %vm876_vm2, %v1130_v17  ;;  %v1133_v23 = vpack.c.bf16 %v743_v35, %v743_v35  ;;  %v741_v37 = vmax.f32 %v709_v59, 0.0  ;;  %v714_v63 = vadd.f32 %v1200_v1, %v614_v22  ;;  %v606_v44 = vadd.f32 %v1475_v38, %v605_v33  ;;  %v1251_v26 = vpop.f32.mrf.mxu0 }
  0xee   : > { %888 = vst.msk [vmem:[%s1521_s7 + $0x2c] sm:$0xf] %vm876_vm2, %v1117_v18  ;;  %v1115_v27 = vpack.c.bf16 %v725_v36, %v725_v36  ;;  %v730_v56 = vmax.f32 %v698_v60, 0.0  ;;  %v696_v0 = vadd.f32 %v1164_v5, %v542_v20  ;;  %v553_v24 = vadd.f32 %v1251_v26, %v1475_v38  ;;  %v1267_v45 = vpop.f32.mrf.mxu1 }
  0xef   : > { %904 = vst.msk [vmem:[%s1521_s7 + $0x6c] sm:$0xf] %vm876_vm2, %v1133_v23  ;;  %v1131_v21 = vpack.c.bf16 %v741_v37, %v741_v37  ;;  %v746_v34 = vmax.f32 %v714_v63, 0.0  ;;  %v712_v1 = vadd.f32 %v1196_v6, %v606_v44  ;;  %v617_v28 = vadd.f32 %v1267_v45, %v1475_v38  ;;  %v544_v25 = vpop.f32.mrf.mxu0 }
  0xf0   : > { %886 = vst.msk [vmem:[%s1521_s7 + $0x24] sm:$0xf] %vm876_vm2, %v1115_v27  ;;  %v1120_v46 = vpack.c.bf16 %v730_v56, %v730_v56  ;;  %v728_v57 = vmax.f32 %v696_v0, 0.0  ;;  %v699_v5 = vadd.f32 %v1169_v10, %v553_v24  ;;  %v545_v61 = vadd.f32 %v1475_v38, %v544_v25  ;;  %v608_v62 = vpop.f32.mrf.mxu1 }
  0xf1   : > { %902 = vst.msk [vmem:[%s1521_s7 + $0x64] sm:$0xf] %vm876_vm2, %v1131_v21  ;;  %v1136_v39 = vpack.c.bf16 %v746_v34, %v746_v34  ;;  %v744_v6 = vmax.f32 %v712_v1, 0.0  ;;  %v715_v50 = vadd.f32 %v1201_v11, %v617_v28  ;;  %v609_v2 = vadd.f32 %v1475_v38, %v608_v62 }
  0xf2   : > { %891 = vst.msk [vmem:[%s1521_s7 + $0x38] sm:$0xf] %vm876_vm2, %v1120_v46  ;;  %v1118_v47 = vpack.c.bf16 %v728_v57, %v728_v57  ;;  %v731_v10 = vmax.f32 %v699_v5, 0.0  ;;  %v697_v3 = vadd.f32 %v1165_v16, %v545_v61 }
  0xf3   : > { %907 = vst.msk [vmem:[%s1521_s7 + $0x78] sm:$0xf] %vm876_vm2, %v1136_v39  ;;  %v1134_v4 = vpack.c.bf16 %v744_v6, %v744_v6  ;;  %v747_v29 = vmax.f32 %v715_v50, 0.0  ;;  %v713_v48 = vadd.f32 %v1197_v49, %v609_v2 }
  0xf4   : > { %889 = vst.msk [vmem:[%s1521_s7 + $0x30] sm:$0xf] %vm876_vm2, %v1118_v47  ;;  %v1121_v38 = vpack.c.bf16 %v731_v10, %v731_v10  ;;  %v729_v11 = vmax.f32 %v697_v3, 0.0 }
  0xf5   : > { %905 = vst.msk [vmem:[%s1521_s7 + $0x70] sm:$0xf] %vm876_vm2, %v1134_v4  ;;  %v1137_v51 = vpack.c.bf16 %v747_v29, %v747_v29  ;;  %v745_v40 = vmax.f32 %v713_v48, 0.0 }
  0xf6   : > { %892 = vst.msk [vmem:[%s1521_s7 + $0x3c] sm:$0xf] %vm876_vm2, %v1121_v38  ;;  %v1119_v54 = vpack.c.bf16 %v729_v11, %v729_v11 }
  0xf7   : > { %908 = vst.msk [vmem:[%s1521_s7 + $0x7c] sm:$0xf] %vm876_vm2, %v1137_v51  ;;  %v1135_v16 = vpack.c.bf16 %v745_v40, %v745_v40 }
  0xf8   : > { %890 = vst.msk [vmem:[%s1521_s7 + $0x34] sm:$0xf] %vm876_vm2, %v1119_v54 }
  0xf9   : > { %906 = vst.msk [vmem:[%s1521_s7 + $0x74] sm:$0xf] %vm876_vm2, %v1135_v16 }
  0xfa PF: > { %s14_s17 = sadd.s32 1, %s1334_s17   ;;  %s1683_s15 = smov %s1330_s16 }
  0xfb   : > { %p11_p5 = scmp.ge.s32.totalorder %s14_s17, 4   ;;  %s1684_s16 = smov %s1686_s18 }
  0xfd   :  { %13 = sbr.rel (!%p11_p5) target bundleno = 2 (0x2), region = 75 }

// kernel: encoder_cnn_forward.62
= control target key start
LH: loop header
LB: loop body
LE: loop exit
PB: predicated region body
PF: predicated region fallthrough
CT: control target
= control target key end

     0   :  { %s1122_s12 = smov 0   ;;  %s1124_s13 = smov 0   ;;  %s1305_s0 = inlined_call_operand.vmem [shape: bf16[512,32], index: 0, kind: input, shape index: {}]   ;;  %s1306_s1 = inlined_call_operand.vmem [shape: bf16[32,8], index: 1, kind: input, shape index: {}]   ;;  %s1307_s2 = inlined_call_operand.vmem [shape: f32[1,8], index: 2, kind: input, shape index: {}]   ;;  %s1308_s3 = inlined_call_operand.vmem [shape: bf16[512,8], index: 3, kind: output, shape index: {}]  }
   0x1   :  { %s1126_s14 = smov 0  }
   0x2 LB: > { %s25_s15 = sadd.s32 1, %s1096_s13  ;;  %p872_p0 = scmp.ge.s32.totalorder %s1100_s14, 1  ;;  %s1100_s14 = sphi %s1126_s14, %s13_s14   ;;  %s1096_s13 = sphi %s1124_s13, %s1310_s13   ;;  %s1092_s12 = sphi %s1122_s12, %s1309_s12  }
   0x3   : > { %p27_p1 = scmp.ge.s32.totalorder %s25_s15, 2  ;;  %p169_p2 = scmp.lt.s32.totalorder %s1100_s14, 3 }
   0x5   : > { %s1312_s15 = smov (%p27_p1, %s25_s15), 0  ;;  %p170_p3 = pnand %p872_p0, %p169_p2 }
   0x6   : > { %s873_s18 = sshll.u32 (!%p170_p3), %s1092_s12, 5 }
   0x7   : > { %173 = sbr.rel (%p170_p3) target bundleno = 251 (0xfb), region = 32  ;;  %p204_p4 = scmp.lt.s32.totalorder (!%p170_p3), %s873_s18, 63 }
   0xc   : > { %v1060_v0 = vld [vmem:[%s1306_s1 + $0x8] sm:$0xff]   ;;  %v1061_v1 = vld [vmem:[%s1306_s1] sm:$0xff]   ;;  %s1314_s18 = smov (!%p204_p4, %s873_s18), 63  ;;  %vm361_vm0 = vcmask 261120   ;;  %vm731_vm1 = vcmask 60416  }
   0xd   : > { %996 = vmatprep.subr.bf16.mxu0 %v1060_v0  ;;  %1032 = vmatprep.subr.bf16.mxu1 %v1060_v0  ;;  %s874_s21 = sshll.u32 %s1314_s18, 2  ;;  %v1191_v18 = vld [vmem:[%s1307_s2] ss:$0 sm:$0xff] }
   0xe   : > { %997 = vmatpush3.bf16.msra.mxu0 %v1060_v0  ;;  %1034 = vmatpush3.bf16.msra.mxu1 %v1060_v0  ;;  %s1154_s24 = scalar_lea.vmem %s1305_s0, %s874_s21  ;;  %s1201_s29 = scalar_lea.vmem %s1308_s3, %s874_s21 }
   0xf   : > { %998 = vmatprep.subr.bf16.mxu0 %v1061_v1  ;;  %1033 = vmatprep.subr.bf16.mxu1 %v1061_v1  ;;  %v1062_v2 = vld [vmem:[%s1154_s24] sm:$0xff]   ;;  %v1064_v4 = vld [vmem:[%s1154_s24 + $0x8] sm:$0xff]   ;;  %v1066_v6 = vld [vmem:[%s1154_s24 + $0x10] sm:$0xff]  }
  0x10   : > { %v1063_v3 = vld [vmem:[%s1154_s24 + $0x40] sm:$0xff]   ;;  %1000 = vmatprep.mubr.msk.bf16.mxu0 %vm361_vm0, %v1062_v2  ;;  %v1065_v5 = vld [vmem:[%s1154_s24 + $0x48] sm:$0xff]   ;;  %v1067_v7 = vld [vmem:[%s1154_s24 + $0x50] sm:$0xff]  }
  0x11   : > { %1016 = vmatprep.mubr.msk.bf16.mxu1 %vm361_vm0, %v1063_v3  ;;  %v1068_v8 = vld [vmem:[%s1154_s24 + $0x18] sm:$0xff]   ;;  %v1070_v10 = vld [vmem:[%s1154_s24 + $0x20] sm:$0xff]   ;;  %v1072_v12 = vld [vmem:[%s1154_s24 + $0x28] sm:$0xff]  }
  0x12   : > { %999 = vmatpush3.bf16.msra.mxu0 %v1061_v1  ;;  %1035 = vmatpush3.bf16.msra.mxu1 %v1061_v1  ;;  %v1069_v9 = vld [vmem:[%s1154_s24 + $0x58] sm:$0xff]   ;;  %v1071_v11 = vld [vmem:[%s1154_s24 + $0x60] sm:$0xff]   ;;  %v1073_v13 = vld [vmem:[%s1154_s24 + $0x68] sm:$0xff]  }
  0x13   : > { %v1074_v14 = vld [vmem:[%s1154_s24 + $0x30] sm:$0xff]   ;;  %v1076_v16 = vld [vmem:[%s1154_s24 + $0x38] sm:$0xff]  }
  0x14   : > { %v1075_v15 = vld [vmem:[%s1154_s24 + $0x70] sm:$0xff]   ;;  %v1077_v17 = vld [vmem:[%s1154_s24 + $0x78] sm:$0xff]  }
  0x15   : > { %1001 = vmatmul.mubr.msk.bf16.vlgmr.msra.gmra.mxu0 %vm361_vm0, %v1064_v4  ;;  %1017 = vmatmul.mubr.msk.bf16.vlgmr.msra.gmra.mxu1 %vm361_vm0, %v1065_v5 }
  0x16   : > { %1004 = vmatprep.mubr.msk.bf16.mxu0 %vm361_vm0, %v1066_v6  ;;  %1020 = vmatprep.mubr.msk.bf16.mxu1 %vm361_vm0, %v1067_v7 }
  0x1d   : > { %1005 = vmatmul.mubr.msk.bf16.gmra.mxu0 %vm361_vm0, %v1068_v8  ;;  %1021 = vmatmul.mubr.msk.bf16.gmra.mxu1 %vm361_vm0, %v1069_v9 }
  0x1e   : > { %1008 = vmatprep.mubr.msk.bf16.mxu0 %vm361_vm0, %v1070_v10  ;;  %1024 = vmatprep.mubr.msk.bf16.mxu1 %vm361_vm0, %v1071_v11 }
  0x25   : > { %1009 = vmatmul.mubr.msk.bf16.gmra.mxu0 %vm361_vm0, %v1072_v12  ;;  %1025 = vmatmul.mubr.msk.bf16.gmra.mxu1 %vm361_vm0, %v1073_v13 }
  0x26   : > { %1012 = vmatprep.mubr.msk.bf16.mxu0 %vm361_vm0, %v1074_v14  ;;  %1028 = vmatprep.mubr.msk.bf16.mxu1 %vm361_vm0, %v1075_v15 }
  0x2d   : > { %1013 = vmatmul.mubr.msk.bf16.gmra.mxu0 %vm361_vm0, %v1076_v16  ;;  %1029 = vmatmul.mubr.msk.bf16.gmra.mxu1 %vm361_vm0, %v1077_v17 }
  0xd5   : > { %v1002_v19 = vpop.f32.mrf.mxu0  ;;  %v1018_v21 = vpop.f32.mrf.mxu1 }
  0xd6   : > { %v453_v20 = vadd.f32 %v1002_v19, %v1191_v18  ;;  %v517_v22 = vadd.f32 %v1018_v21, %v1191_v18 }
  0xd7   : > { %v444_v23 = vpop.f32.mrf.mxu0  ;;  %v508_v26 = vpop.f32.mrf.mxu1 }
  0xd8   : > { %v573_v24 = vmax.f32 %v453_v20, 0.0  ;;  %v445_v25 = vadd.f32 %v1191_v18, %v444_v23  ;;  %v589_v27 = vmax.f32 %v517_v22, 0.0  ;;  %v509_v28 = vadd.f32 %v1191_v18, %v508_v26 }
  0xd9   : > { %v1003_v29 = vpop.f32.mrf.mxu0  ;;  %v1019_v33 = vpop.f32.mrf.mxu1 }
  0xda   : > { %v948_v30 = vpack.c.bf16 %v573_v24, %v573_v24  ;;  %v571_v31 = vmax.f32 %v445_v25, 0.0  ;;  %v456_v32 = vadd.f32 %v1003_v29, %v1191_v18  ;;  %v964_v34 = vpack.c.bf16 %v589_v27, %v589_v27 }
  0xdb   : > { %v587_v35 = vmax.f32 %v509_v28, 0.0  ;;  %v520_v36 = vadd.f32 %v1019_v33, %v1191_v18  ;;  %v447_v37 = vpop.f32.mrf.mxu0  ;;  %v511_v41 = vpop.f32.mrf.mxu1 }
  0xdc   : > { %734 = vst.msk [vmem:[%s1201_s29 + $0x8] sm:$0xf] %vm731_vm1, %v948_v30  ;;  %v946_v38 = vpack.c.bf16 %v571_v31, %v571_v31  ;;  %v574_v39 = vmax.f32 %v456_v32, 0.0  ;;  %v448_v40 = vadd.f32 %v1191_v18, %v447_v37  ;;  %750 = vst.msk [vmem:[%s1201_s29 + $0x48] sm:$0xf] %vm731_vm1, %v964_v34  ;;  %v512_v44 = vadd.f32 %v1191_v18, %v511_v41 }
  0xdd   : > { %v962_v42 = vpack.c.bf16 %v587_v35, %v587_v35  ;;  %v590_v43 = vmax.f32 %v520_v36, 0.0  ;;  %v1006_v45 = vpop.f32.mrf.mxu0  ;;  %v1022_v49 = vpop.f32.mrf.mxu1 }
  0xde   : > { %732 = vst.msk [vmem:[%s1201_s29] sm:$0xf] %vm731_vm1, %v946_v38  ;;  %v949_v46 = vpack.c.bf16 %v574_v39, %v574_v39  ;;  %v572_v47 = vmax.f32 %v448_v40, 0.0  ;;  %v469_v48 = vadd.f32 %v1006_v45, %v1191_v18  ;;  %v588_v51 = vmax.f32 %v512_v44, 0.0 }
  0xdf   : > { %748 = vst.msk [vmem:[%s1201_s29 + $0x40] sm:$0xf] %vm731_vm1, %v962_v42  ;;  %v965_v50 = vpack.c.bf16 %v590_v43, %v590_v43  ;;  %v533_v52 = vadd.f32 %v1022_v49, %v1191_v18  ;;  %v460_v53 = vpop.f32.mrf.mxu0  ;;  %v524_v57 = vpop.f32.mrf.mxu1 }
  0xe0   : > { %735 = vst.msk [vmem:[%s1201_s29 + $0xc] sm:$0xf] %vm731_vm1, %v949_v46  ;;  %v947_v54 = vpack.c.bf16 %v572_v47, %v572_v47  ;;  %v577_v55 = vmax.f32 %v469_v48, 0.0  ;;  %v461_v56 = vadd.f32 %v1191_v18, %v460_v53  ;;  %v963_v58 = vpack.c.bf16 %v588_v51, %v588_v51 }
  0xe1   : > { %751 = vst.msk [vmem:[%s1201_s29 + $0x4c] sm:$0xf] %vm731_vm1, %v965_v50  ;;  %v593_v59 = vmax.f32 %v533_v52, 0.0  ;;  %v525_v60 = vadd.f32 %v1191_v18, %v524_v57  ;;  %v1007_v61 = vpop.f32.mrf.mxu0  ;;  %v1023_v1 = vpop.f32.mrf.mxu1 }
  0xe2   : > { %733 = vst.msk [vmem:[%s1201_s29 + $0x4] sm:$0xf] %vm731_vm1, %v947_v54  ;;  %v952_v62 = vpack.c.bf16 %v577_v55, %v577_v55  ;;  %v575_v63 = vmax.f32 %v461_v56, 0.0  ;;  %v472_v0 = vadd.f32 %v1007_v61, %v1191_v18  ;;  %749 = vst.msk [vmem:[%s1201_s29 + $0x44] sm:$0xf] %vm731_vm1, %v963_v58  ;;  %v536_v4 = vadd.f32 %v1023_v1, %v1191_v18 }
  0xe3   : > { %v968_v2 = vpack.c.bf16 %v593_v59, %v593_v59  ;;  %v591_v3 = vmax.f32 %v525_v60, 0.0  ;;  %v463_v5 = vpop.f32.mrf.mxu0  ;;  %v527_v9 = vpop.f32.mrf.mxu1 }
  0xe4   : > { %738 = vst.msk [vmem:[%s1201_s29 + $0x18] sm:$0xf] %vm731_vm1, %v952_v62  ;;  %v950_v6 = vpack.c.bf16 %v575_v63, %v575_v63  ;;  %v578_v7 = vmax.f32 %v472_v0, 0.0  ;;  %v464_v8 = vadd.f32 %v1191_v18, %v463_v5  ;;  %v594_v11 = vmax.f32 %v536_v4, 0.0 }
  0xe5   : > { %754 = vst.msk [vmem:[%s1201_s29 + $0x58] sm:$0xf] %vm731_vm1, %v968_v2  ;;  %v966_v10 = vpack.c.bf16 %v591_v3, %v591_v3  ;;  %v528_v12 = vadd.f32 %v1191_v18, %v527_v9  ;;  %v1010_v13 = vpop.f32.mrf.mxu0  ;;  %v1026_v17 = vpop.f32.mrf.mxu1 }
  0xe6   : > { %736 = vst.msk [vmem:[%s1201_s29 + $0x10] sm:$0xf] %vm731_vm1, %v950_v6  ;;  %v953_v14 = vpack.c.bf16 %v578_v7, %v578_v7  ;;  %v576_v15 = vmax.f32 %v464_v8, 0.0  ;;  %v485_v16 = vadd.f32 %v1010_v13, %v1191_v18  ;;  %v969_v19 = vpack.c.bf16 %v594_v11, %v594_v11 }
  0xe7   : > { %752 = vst.msk [vmem:[%s1201_s29 + $0x50] sm:$0xf] %vm731_vm1, %v966_v10  ;;  %v592_v20 = vmax.f32 %v528_v12, 0.0  ;;  %v549_v21 = vadd.f32 %v1026_v17, %v1191_v18  ;;  %v476_v22 = vpop.f32.mrf.mxu0  ;;  %v540_v26 = vpop.f32.mrf.mxu1 }
  0xe8   : > { %739 = vst.msk [vmem:[%s1201_s29 + $0x1c] sm:$0xf] %vm731_vm1, %v953_v14  ;;  %v951_v23 = vpack.c.bf16 %v576_v15, %v576_v15  ;;  %v581_v24 = vmax.f32 %v485_v16, 0.0  ;;  %v477_v25 = vadd.f32 %v1191_v18, %v476_v22  ;;  %755 = vst.msk [vmem:[%s1201_s29 + $0x5c] sm:$0xf] %vm731_vm1, %v969_v19  ;;  %v541_v29 = vadd.f32 %v1191_v18, %v540_v26 }
  0xe9   : > { %v967_v27 = vpack.c.bf16 %v592_v20, %v592_v20  ;;  %v597_v28 = vmax.f32 %v549_v21, 0.0  ;;  %v1011_v30 = vpop.f32.mrf.mxu0  ;;  %v1027_v34 = vpop.f32.mrf.mxu1 }
  0xea   : > { %737 = vst.msk [vmem:[%s1201_s29 + $0x14] sm:$0xf] %vm731_vm1, %v951_v23  ;;  %v956_v31 = vpack.c.bf16 %v581_v24, %v581_v24  ;;  %v579_v32 = vmax.f32 %v477_v25, 0.0  ;;  %v488_v33 = vadd.f32 %v1011_v30, %v1191_v18  ;;  %v595_v36 = vmax.f32 %v541_v29, 0.0 }
  0xeb   : > { %753 = vst.msk [vmem:[%s1201_s29 + $0x54] sm:$0xf] %vm731_vm1, %v967_v27  ;;  %v972_v35 = vpack.c.bf16 %v597_v28, %v597_v28  ;;  %v552_v37 = vadd.f32 %v1027_v34, %v1191_v18  ;;  %v479_v38 = vpop.f32.mrf.mxu0  ;;  %v543_v42 = vpop.f32.mrf.mxu1 }
  0xec   : > { %742 = vst.msk [vmem:[%s1201_s29 + $0x28] sm:$0xf] %vm731_vm1, %v956_v31  ;;  %v954_v39 = vpack.c.bf16 %v579_v32, %v579_v32  ;;  %v582_v40 = vmax.f32 %v488_v33, 0.0  ;;  %v480_v41 = vadd.f32 %v1191_v18, %v479_v38  ;;  %v970_v43 = vpack.c.bf16 %v595_v36, %v595_v36 }
  0xed   : > { %758 = vst.msk [vmem:[%s1201_s29 + $0x68] sm:$0xf] %vm731_vm1, %v972_v35  ;;  %v598_v44 = vmax.f32 %v552_v37, 0.0  ;;  %v544_v45 = vadd.f32 %v1191_v18, %v543_v42  ;;  %v1014_v46 = vpop.f32.mrf.mxu0  ;;  %v1030_v50 = vpop.f32.mrf.mxu1 }
  0xee   : > { %740 = vst.msk [vmem:[%s1201_s29 + $0x20] sm:$0xf] %vm731_vm1, %v954_v39  ;;  %v957_v47 = vpack.c.bf16 %v582_v40, %v582_v40  ;;  %v580_v48 = vmax.f32 %v480_v41, 0.0  ;;  %v501_v49 = vadd.f32 %v1014_v46, %v1191_v18  ;;  %756 = vst.msk [vmem:[%s1201_s29 + $0x60] sm:$0xf] %vm731_vm1, %v970_v43  ;;  %v565_v53 = vadd.f32 %v1030_v50, %v1191_v18 }
  0xef   : > { %v973_v51 = vpack.c.bf16 %v598_v44, %v598_v44  ;;  %v596_v52 = vmax.f32 %v544_v45, 0.0  ;;  %v492_v54 = vpop.f32.mrf.mxu0  ;;  %v556_v58 = vpop.f32.mrf.mxu1 }
  0xf0   : > { %743 = vst.msk [vmem:[%s1201_s29 + $0x2c] sm:$0xf] %vm731_vm1, %v957_v47  ;;  %v955_v55 = vpack.c.bf16 %v580_v48, %v580_v48  ;;  %v585_v56 = vmax.f32 %v501_v49, 0.0  ;;  %v493_v57 = vadd.f32 %v1191_v18, %v492_v54  ;;  %v601_v60 = vmax.f32 %v565_v53, 0.0 }
  0xf1   : > { %759 = vst.msk [vmem:[%s1201_s29 + $0x6c] sm:$0xf] %vm731_vm1, %v973_v51  ;;  %v971_v59 = vpack.c.bf16 %v596_v52, %v596_v52  ;;  %v557_v61 = vadd.f32 %v1191_v18, %v556_v58  ;;  %v1015_v62 = vpop.f32.mrf.mxu0  ;;  %v1031_v2 = vpop.f32.mrf.mxu1 }
  0xf2   : > { %741 = vst.msk [vmem:[%s1201_s29 + $0x24] sm:$0xf] %vm731_vm1, %v955_v55  ;;  %v960_v63 = vpack.c.bf16 %v585_v56, %v585_v56  ;;  %v583_v0 = vmax.f32 %v493_v57, 0.0  ;;  %v504_v1 = vadd.f32 %v1015_v62, %v1191_v18  ;;  %v976_v3 = vpack.c.bf16 %v601_v60, %v601_v60 }
  0xf3   : > { %757 = vst.msk [vmem:[%s1201_s29 + $0x64] sm:$0xf] %vm731_vm1, %v971_v59  ;;  %v599_v4 = vmax.f32 %v557_v61, 0.0  ;;  %v568_v5 = vadd.f32 %v1031_v2, %v1191_v18  ;;  %v495_v6 = vpop.f32.mrf.mxu0  ;;  %v559_v10 = vpop.f32.mrf.mxu1 }
  0xf4   : > { %746 = vst.msk [vmem:[%s1201_s29 + $0x38] sm:$0xf] %vm731_vm1, %v960_v63  ;;  %v958_v7 = vpack.c.bf16 %v583_v0, %v583_v0  ;;  %v586_v8 = vmax.f32 %v504_v1, 0.0  ;;  %v496_v9 = vadd.f32 %v1191_v18, %v495_v6  ;;  %762 = vst.msk [vmem:[%s1201_s29 + $0x78] sm:$0xf] %vm731_vm1, %v976_v3  ;;  %v560_v13 = vadd.f32 %v1191_v18, %v559_v10 }
  0xf5   : > { %v974_v11 = vpack.c.bf16 %v599_v4, %v599_v4  ;;  %v602_v12 = vmax.f32 %v568_v5, 0.0 }
  0xf6   : > { %744 = vst.msk [vmem:[%s1201_s29 + $0x30] sm:$0xf] %vm731_vm1, %v958_v7  ;;  %v961_v14 = vpack.c.bf16 %v586_v8, %v586_v8  ;;  %v584_v15 = vmax.f32 %v496_v9, 0.0  ;;  %v600_v17 = vmax.f32 %v560_v13, 0.0 }
  0xf7   : > { %760 = vst.msk [vmem:[%s1201_s29 + $0x70] sm:$0xf] %vm731_vm1, %v974_v11  ;;  %v977_v16 = vpack.c.bf16 %v602_v12, %v602_v12 }
  0xf8   : > { %747 = vst.msk [vmem:[%s1201_s29 + $0x3c] sm:$0xf] %vm731_vm1, %v961_v14  ;;  %v959_v19 = vpack.c.bf16 %v584_v15, %v584_v15  ;;  %v975_v20 = vpack.c.bf16 %v600_v17, %v600_v17 }
  0xf9   : > { %763 = vst.msk [vmem:[%s1201_s29 + $0x7c] sm:$0xf] %vm731_vm1, %v977_v16 }
  0xfa   : > { %745 = vst.msk [vmem:[%s1201_s29 + $0x34] sm:$0xf] %vm731_vm1, %v959_v19  ;;  %761 = vst.msk [vmem:[%s1201_s29 + $0x74] sm:$0xf] %vm731_vm1, %v975_v20 }
  0xfb PF: > { %s13_s14 = sadd.s32 1, %s1100_s14   ;;  %s1309_s12 = smov %s1096_s13 }
  0xfc   : > { %p10_p5 = scmp.ge.s32.totalorder %s13_s14, 4   ;;  %s1310_s13 = smov %s1312_s15 }
  0xfe   :  { %12 = sbr.rel (!%p10_p5) target bundleno = 2 (0x2), region = 68 }

// kernel: encoder_cnn_forward.68
= control target key start
LH: loop header
LB: loop body
LE: loop exit
PB: predicated region body
PF: predicated region fallthrough
CT: control target
= control target key end

     0   :  { %s1122_s12 = smov 0   ;;  %s1124_s13 = smov 0   ;;  %s1305_s0 = inlined_call_operand.vmem [shape: bf16[512,32], index: 0, kind: input, shape index: {}]   ;;  %s1306_s1 = inlined_call_operand.vmem [shape: bf16[32,16], index: 1, kind: input, shape index: {}]   ;;  %s1307_s2 = inlined_call_operand.vmem [shape: f32[1,16], index: 2, kind: input, shape index: {}]   ;;  %s1308_s3 = inlined_call_operand.vmem [shape: bf16[512,16], index: 3, kind: output, shape index: {}]  }
   0x1   :  { %s1126_s14 = smov 0  }
   0x2 LB: > { %s25_s15 = sadd.s32 1, %s1096_s13  ;;  %p872_p0 = scmp.ge.s32.totalorder %s1100_s14, 1  ;;  %s1100_s14 = sphi %s1126_s14, %s13_s14   ;;  %s1096_s13 = sphi %s1124_s13, %s1310_s13   ;;  %s1092_s12 = sphi %s1122_s12, %s1309_s12  }
   0x3   : > { %p27_p1 = scmp.ge.s32.totalorder %s25_s15, 2  ;;  %p169_p2 = scmp.lt.s32.totalorder %s1100_s14, 3 }
   0x5   : > { %s1312_s15 = smov (%p27_p1, %s25_s15), 0  ;;  %p170_p3 = pnand %p872_p0, %p169_p2 }
   0x6   : > { %s873_s18 = sshll.u32 (!%p170_p3), %s1092_s12, 5 }
   0x7   : > { %173 = sbr.rel (%p170_p3) target bundleno = 251 (0xfb), region = 32  ;;  %p204_p4 = scmp.lt.s32.totalorder (!%p170_p3), %s873_s18, 63 }
   0xc   : > { %v1060_v0 = vld [vmem:[%s1306_s1 + $0x8] sm:$0xff]   ;;  %v1061_v1 = vld [vmem:[%s1306_s1] sm:$0xff]   ;;  %s1314_s18 = smov (!%p204_p4, %s873_s18), 63  ;;  %vm361_vm0 = vcmask 261120   ;;  %vm731_vm1 = vcmask 125952  }
   0xd   : > { %996 = vmatprep.subr.bf16.mxu0 %v1060_v0  ;;  %1032 = vmatprep.subr.bf16.mxu1 %v1060_v0  ;;  %s874_s21 = sshll.u32 %s1314_s18, 2  ;;  %v1191_v18 = vld [vmem:[%s1307_s2] ss:$0 sm:$0xff] }
   0xe   : > { %997 = vmatpush3.bf16.msra.mxu0 %v1060_v0  ;;  %1034 = vmatpush3.bf16.msra.mxu1 %v1060_v0  ;;  %s1154_s24 = scalar_lea.vmem %s1305_s0, %s874_s21  ;;  %s1201_s29 = scalar_lea.vmem %s1308_s3, %s874_s21 }
   0xf   : > { %998 = vmatprep.subr.bf16.mxu0 %v1061_v1  ;;  %1033 = vmatprep.subr.bf16.mxu1 %v1061_v1  ;;  %v1062_v2 = vld [vmem:[%s1154_s24] sm:$0xff]   ;;  %v1064_v4 = vld [vmem:[%s1154_s24 + $0x8] sm:$0xff]   ;;  %v1066_v6 = vld [vmem:[%s1154_s24 + $0x10] sm:$0xff]  }
  0x10   : > { %v1063_v3 = vld [vmem:[%s1154_s24 + $0x40] sm:$0xff]   ;;  %1000 = vmatprep.mubr.msk.bf16.mxu0 %vm361_vm0, %v1062_v2  ;;  %v1065_v5 = vld [vmem:[%s1154_s24 + $0x48] sm:$0xff]   ;;  %v1067_v7 = vld [vmem:[%s1154_s24 + $0x50] sm:$0xff]  }
  0x11   : > { %1016 = vmatprep.mubr.msk.bf16.mxu1 %vm361_vm0, %v1063_v3  ;;  %v1068_v8 = vld [vmem:[%s1154_s24 + $0x18] sm:$0xff]   ;;  %v1070_v10 = vld [vmem:[%s1154_s24 + $0x20] sm:$0xff]   ;;  %v1072_v12 = vld [vmem:[%s1154_s24 + $0x28] sm:$0xff]  }
  0x12   : > { %999 = vmatpush3.bf16.msra.mxu0 %v1061_v1  ;;  %1035 = vmatpush3.bf16.msra.mxu1 %v1061_v1  ;;  %v1069_v9 = vld [vmem:[%s1154_s24 + $0x58] sm:$0xff]   ;;  %v1071_v11 = vld [vmem:[%s1154_s24 + $0x60] sm:$0xff]   ;;  %v1073_v13 = vld [vmem:[%s1154_s24 + $0x68] sm:$0xff]  }
  0x13   : > { %v1074_v14 = vld [vmem:[%s1154_s24 + $0x30] sm:$0xff]   ;;  %v1076_v16 = vld [vmem:[%s1154_s24 + $0x38] sm:$0xff]  }
  0x14   : > { %v1075_v15 = vld [vmem:[%s1154_s24 + $0x70] sm:$0xff]   ;;  %v1077_v17 = vld [vmem:[%s1154_s24 + $0x78] sm:$0xff]  }
  0x15   : > { %1001 = vmatmul.mubr.msk.bf16.vlgmr.msra.gmra.mxu0 %vm361_vm0, %v1064_v4  ;;  %1017 = vmatmul.mubr.msk.bf16.vlgmr.msra.gmra.mxu1 %vm361_vm0, %v1065_v5 }
  0x16   : > { %1004 = vmatprep.mubr.msk.bf16.mxu0 %vm361_vm0, %v1066_v6  ;;  %1020 = vmatprep.mubr.msk.bf16.mxu1 %vm361_vm0, %v1067_v7 }
  0x1d   : > { %1005 = vmatmul.mubr.msk.bf16.gmra.mxu0 %vm361_vm0, %v1068_v8  ;;  %1021 = vmatmul.mubr.msk.bf16.gmra.mxu1 %vm361_vm0, %v1069_v9 }
  0x1e   : > { %1008 = vmatprep.mubr.msk.bf16.mxu0 %vm361_vm0, %v1070_v10  ;;  %1024 = vmatprep.mubr.msk.bf16.mxu1 %vm361_vm0, %v1071_v11 }
  0x25   : > { %1009 = vmatmul.mubr.msk.bf16.gmra.mxu0 %vm361_vm0, %v1072_v12  ;;  %1025 = vmatmul.mubr.msk.bf16.gmra.mxu1 %vm361_vm0, %v1073_v13 }
  0x26   : > { %1012 = vmatprep.mubr.msk.bf16.mxu0 %vm361_vm0, %v1074_v14  ;;  %1028 = vmatprep.mubr.msk.bf16.mxu1 %vm361_vm0, %v1075_v15 }
  0x2d   : > { %1013 = vmatmul.mubr.msk.bf16.gmra.mxu0 %vm361_vm0, %v1076_v16  ;;  %1029 = vmatmul.mubr.msk.bf16.gmra.mxu1 %vm361_vm0, %v1077_v17 }
  0xd5   : > { %v1002_v19 = vpop.f32.mrf.mxu0  ;;  %v1018_v21 = vpop.f32.mrf.mxu1 }
  0xd6   : > { %v453_v20 = vadd.f32 %v1002_v19, %v1191_v18  ;;  %v517_v22 = vadd.f32 %v1018_v21, %v1191_v18 }
  0xd7   : > { %v444_v23 = vpop.f32.mrf.mxu0  ;;  %v508_v26 = vpop.f32.mrf.mxu1 }
  0xd8   : > { %v573_v24 = vmax.f32 %v453_v20, 0.0  ;;  %v445_v25 = vadd.f32 %v1191_v18, %v444_v23  ;;  %v589_v27 = vmax.f32 %v517_v22, 0.0  ;;  %v509_v28 = vadd.f32 %v1191_v18, %v508_v26 }
  0xd9   : > { %v1003_v29 = vpop.f32.mrf.mxu0  ;;  %v1019_v33 = vpop.f32.mrf.mxu1 }
  0xda   : > { %v948_v30 = vpack.c.bf16 %v573_v24, %v573_v24  ;;  %v571_v31 = vmax.f32 %v445_v25, 0.0  ;;  %v456_v32 = vadd.f32 %v1003_v29, %v1191_v18  ;;  %v964_v34 = vpack.c.bf16 %v589_v27, %v589_v27 }
  0xdb   : > { %v587_v35 = vmax.f32 %v509_v28, 0.0  ;;  %v520_v36 = vadd.f32 %v1019_v33, %v1191_v18  ;;  %v447_v37 = vpop.f32.mrf.mxu0  ;;  %v511_v41 = vpop.f32.mrf.mxu1 }
  0xdc   : > { %734 = vst.msk [vmem:[%s1201_s29 + $0x8] sm:$0xf] %vm731_vm1, %v948_v30  ;;  %v946_v38 = vpack.c.bf16 %v571_v31, %v571_v31  ;;  %v574_v39 = vmax.f32 %v456_v32, 0.0  ;;  %v448_v40 = vadd.f32 %v1191_v18, %v447_v37  ;;  %750 = vst.msk [vmem:[%s1201_s29 + $0x48] sm:$0xf] %vm731_vm1, %v964_v34  ;;  %v512_v44 = vadd.f32 %v1191_v18, %v511_v41 }
  0xdd   : > { %v962_v42 = vpack.c.bf16 %v587_v35, %v587_v35  ;;  %v590_v43 = vmax.f32 %v520_v36, 0.0  ;;  %v1006_v45 = vpop.f32.mrf.mxu0  ;;  %v1022_v49 = vpop.f32.mrf.mxu1 }
  0xde   : > { %732 = vst.msk [vmem:[%s1201_s29] sm:$0xf] %vm731_vm1, %v946_v38  ;;  %v949_v46 = vpack.c.bf16 %v574_v39, %v574_v39  ;;  %v572_v47 = vmax.f32 %v448_v40, 0.0  ;;  %v469_v48 = vadd.f32 %v1006_v45, %v1191_v18  ;;  %v588_v51 = vmax.f32 %v512_v44, 0.0 }
  0xdf   : > { %748 = vst.msk [vmem:[%s1201_s29 + $0x40] sm:$0xf] %vm731_vm1, %v962_v42  ;;  %v965_v50 = vpack.c.bf16 %v590_v43, %v590_v43  ;;  %v533_v52 = vadd.f32 %v1022_v49, %v1191_v18  ;;  %v460_v53 = vpop.f32.mrf.mxu0  ;;  %v524_v57 = vpop.f32.mrf.mxu1 }
  0xe0   : > { %735 = vst.msk [vmem:[%s1201_s29 + $0xc] sm:$0xf] %vm731_vm1, %v949_v46  ;;  %v947_v54 = vpack.c.bf16 %v572_v47, %v572_v47  ;;  %v577_v55 = vmax.f32 %v469_v48, 0.0  ;;  %v461_v56 = vadd.f32 %v1191_v18, %v460_v53  ;;  %v963_v58 = vpack.c.bf16 %v588_v51, %v588_v51 }
  0xe1   : > { %751 = vst.msk [vmem:[%s1201_s29 + $0x4c] sm:$0xf] %vm731_vm1, %v965_v50  ;;  %v593_v59 = vmax.f32 %v533_v52, 0.0  ;;  %v525_v60 = vadd.f32 %v1191_v18, %v524_v57  ;;  %v1007_v61 = vpop.f32.mrf.mxu0  ;;  %v1023_v1 = vpop.f32.mrf.mxu1 }
  0xe2   : > { %733 = vst.msk [vmem:[%s1201_s29 + $0x4] sm:$0xf] %vm731_vm1, %v947_v54  ;;  %v952_v62 = vpack.c.bf16 %v577_v55, %v577_v55  ;;  %v575_v63 = vmax.f32 %v461_v56, 0.0  ;;  %v472_v0 = vadd.f32 %v1007_v61, %v1191_v18  ;;  %749 = vst.msk [vmem:[%s1201_s29 + $0x44] sm:$0xf] %vm731_vm1, %v963_v58  ;;  %v536_v4 = vadd.f32 %v1023_v1, %v1191_v18 }
  0xe3   : > { %v968_v2 = vpack.c.bf16 %v593_v59, %v593_v59  ;;  %v591_v3 = vmax.f32 %v525_v60, 0.0  ;;  %v463_v5 = vpop.f32.mrf.mxu0  ;;  %v527_v9 = vpop.f32.mrf.mxu1 }
  0xe4   : > { %738 = vst.msk [vmem:[%s1201_s29 + $0x18] sm:$0xf] %vm731_vm1, %v952_v62  ;;  %v950_v6 = vpack.c.bf16 %v575_v63, %v575_v63  ;;  %v578_v7 = vmax.f32 %v472_v0, 0.0  ;;  %v464_v8 = vadd.f32 %v1191_v18, %v463_v5  ;;  %v594_v11 = vmax.f32 %v536_v4, 0.0 }
  0xe5   : > { %754 = vst.msk [vmem:[%s1201_s29 + $0x58] sm:$0xf] %vm731_vm1, %v968_v2  ;;  %v966_v10 = vpack.c.bf16 %v591_v3, %v591_v3  ;;  %v528_v12 = vadd.f32 %v1191_v18, %v527_v9  ;;  %v1010_v13 = vpop.f32.mrf.mxu0  ;;  %v1026_v17 = vpop.f32.mrf.mxu1 }
  0xe6   : > { %736 = vst.msk [vmem:[%s1201_s29 + $0x10] sm:$0xf] %vm731_vm1, %v950_v6  ;;  %v953_v14 = vpack.c.bf16 %v578_v7, %v578_v7  ;;  %v576_v15 = vmax.f32 %v464_v8, 0.0  ;;  %v485_v16 = vadd.f32 %v1010_v13, %v1191_v18  ;;  %v969_v19 = vpack.c.bf16 %v594_v11, %v594_v11 }
  0xe7   : > { %752 = vst.msk [vmem:[%s1201_s29 + $0x50] sm:$0xf] %vm731_vm1, %v966_v10  ;;  %v592_v20 = vmax.f32 %v528_v12, 0.0  ;;  %v549_v21 = vadd.f32 %v1026_v17, %v1191_v18  ;;  %v476_v22 = vpop.f32.mrf.mxu0  ;;  %v540_v26 = vpop.f32.mrf.mxu1 }
  0xe8   : > { %739 = vst.msk [vmem:[%s1201_s29 + $0x1c] sm:$0xf] %vm731_vm1, %v953_v14  ;;  %v951_v23 = vpack.c.bf16 %v576_v15, %v576_v15  ;;  %v581_v24 = vmax.f32 %v485_v16, 0.0  ;;  %v477_v25 = vadd.f32 %v1191_v18, %v476_v22  ;;  %755 = vst.msk [vmem:[%s1201_s29 + $0x5c] sm:$0xf] %vm731_vm1, %v969_v19  ;;  %v541_v29 = vadd.f32 %v1191_v18, %v540_v26 }
  0xe9   : > { %v967_v27 = vpack.c.bf16 %v592_v20, %v592_v20  ;;  %v597_v28 = vmax.f32 %v549_v21, 0.0  ;;  %v1011_v30 = vpop.f32.mrf.mxu0  ;;  %v1027_v34 = vpop.f32.mrf.mxu1 }
  0xea   : > { %737 = vst.msk [vmem:[%s1201_s29 + $0x14] sm:$0xf] %vm731_vm1, %v951_v23  ;;  %v956_v31 = vpack.c.bf16 %v581_v24, %v581_v24  ;;  %v579_v32 = vmax.f32 %v477_v25, 0.0  ;;  %v488_v33 = vadd.f32 %v1011_v30, %v1191_v18  ;;  %v595_v36 = vmax.f32 %v541_v29, 0.0 }
  0xeb   : > { %753 = vst.msk [vmem:[%s1201_s29 + $0x54] sm:$0xf] %vm731_vm1, %v967_v27  ;;  %v972_v35 = vpack.c.bf16 %v597_v28, %v597_v28  ;;  %v552_v37 = vadd.f32 %v1027_v34, %v1191_v18  ;;  %v479_v38 = vpop.f32.mrf.mxu0  ;;  %v543_v42 = vpop.f32.mrf.mxu1 }
  0xec   : > { %742 = vst.msk [vmem:[%s1201_s29 + $0x28] sm:$0xf] %vm731_vm1, %v956_v31  ;;  %v954_v39 = vpack.c.bf16 %v579_v32, %v579_v32  ;;  %v582_v40 = vmax.f32 %v488_v33, 0.0  ;;  %v480_v41 = vadd.f32 %v1191_v18, %v479_v38  ;;  %v970_v43 = vpack.c.bf16 %v595_v36, %v595_v36 }
  0xed   : > { %758 = vst.msk [vmem:[%s1201_s29 + $0x68] sm:$0xf] %vm731_vm1, %v972_v35  ;;  %v598_v44 = vmax.f32 %v552_v37, 0.0  ;;  %v544_v45 = vadd.f32 %v1191_v18, %v543_v42  ;;  %v1014_v46 = vpop.f32.mrf.mxu0  ;;  %v1030_v50 = vpop.f32.mrf.mxu1 }
  0xee   : > { %740 = vst.msk [vmem:[%s1201_s29 + $0x20] sm:$0xf] %vm731_vm1, %v954_v39  ;;  %v957_v47 = vpack.c.bf16 %v582_v40, %v582_v40  ;;  %v580_v48 = vmax.f32 %v480_v41, 0.0  ;;  %v501_v49 = vadd.f32 %v1014_v46, %v1191_v18  ;;  %756 = vst.msk [vmem:[%s1201_s29 + $0x60] sm:$0xf] %vm731_vm1, %v970_v43  ;;  %v565_v53 = vadd.f32 %v1030_v50, %v1191_v18 }
  0xef   : > { %v973_v51 = vpack.c.bf16 %v598_v44, %v598_v44  ;;  %v596_v52 = vmax.f32 %v544_v45, 0.0  ;;  %v492_v54 = vpop.f32.mrf.mxu0  ;;  %v556_v58 = vpop.f32.mrf.mxu1 }
  0xf0   : > { %743 = vst.msk [vmem:[%s1201_s29 + $0x2c] sm:$0xf] %vm731_vm1, %v957_v47  ;;  %v955_v55 = vpack.c.bf16 %v580_v48, %v580_v48  ;;  %v585_v56 = vmax.f32 %v501_v49, 0.0  ;;  %v493_v57 = vadd.f32 %v1191_v18, %v492_v54  ;;  %v601_v60 = vmax.f32 %v565_v53, 0.0 }
  0xf1   : > { %759 = vst.msk [vmem:[%s1201_s29 + $0x6c] sm:$0xf] %vm731_vm1, %v973_v51  ;;  %v971_v59 = vpack.c.bf16 %v596_v52, %v596_v52  ;;  %v557_v61 = vadd.f32 %v1191_v18, %v556_v58  ;;  %v1015_v62 = vpop.f32.mrf.mxu0  ;;  %v1031_v2 = vpop.f32.mrf.mxu1 }
  0xf2   : > { %741 = vst.msk [vmem:[%s1201_s29 + $0x24] sm:$0xf] %vm731_vm1, %v955_v55  ;;  %v960_v63 = vpack.c.bf16 %v585_v56, %v585_v56  ;;  %v583_v0 = vmax.f32 %v493_v57, 0.0  ;;  %v504_v1 = vadd.f32 %v1015_v62, %v1191_v18  ;;  %v976_v3 = vpack.c.bf16 %v601_v60, %v601_v60 }
  0xf3   : > { %757 = vst.msk [vmem:[%s1201_s29 + $0x64] sm:$0xf] %vm731_vm1, %v971_v59  ;;  %v599_v4 = vmax.f32 %v557_v61, 0.0  ;;  %v568_v5 = vadd.f32 %v1031_v2, %v1191_v18  ;;  %v495_v6 = vpop.f32.mrf.mxu0  ;;  %v559_v10 = vpop.f32.mrf.mxu1 }
  0xf4   : > { %746 = vst.msk [vmem:[%s1201_s29 + $0x38] sm:$0xf] %vm731_vm1, %v960_v63  ;;  %v958_v7 = vpack.c.bf16 %v583_v0, %v583_v0  ;;  %v586_v8 = vmax.f32 %v504_v1, 0.0  ;;  %v496_v9 = vadd.f32 %v1191_v18, %v495_v6  ;;  %762 = vst.msk [vmem:[%s1201_s29 + $0x78] sm:$0xf] %vm731_vm1, %v976_v3  ;;  %v560_v13 = vadd.f32 %v1191_v18, %v559_v10 }
  0xf5   : > { %v974_v11 = vpack.c.bf16 %v599_v4, %v599_v4  ;;  %v602_v12 = vmax.f32 %v568_v5, 0.0 }
  0xf6   : > { %744 = vst.msk [vmem:[%s1201_s29 + $0x30] sm:$0xf] %vm731_vm1, %v958_v7  ;;  %v961_v14 = vpack.c.bf16 %v586_v8, %v586_v8  ;;  %v584_v15 = vmax.f32 %v496_v9, 0.0  ;;  %v600_v17 = vmax.f32 %v560_v13, 0.0 }
  0xf7   : > { %760 = vst.msk [vmem:[%s1201_s29 + $0x70] sm:$0xf] %vm731_vm1, %v974_v11  ;;  %v977_v16 = vpack.c.bf16 %v602_v12, %v602_v12 }
  0xf8   : > { %747 = vst.msk [vmem:[%s1201_s29 + $0x3c] sm:$0xf] %vm731_vm1, %v961_v14  ;;  %v959_v19 = vpack.c.bf16 %v584_v15, %v584_v15  ;;  %v975_v20 = vpack.c.bf16 %v600_v17, %v600_v17 }
  0xf9   : > { %763 = vst.msk [vmem:[%s1201_s29 + $0x7c] sm:$0xf] %vm731_vm1, %v977_v16 }
  0xfa   : > { %745 = vst.msk [vmem:[%s1201_s29 + $0x34] sm:$0xf] %vm731_vm1, %v959_v19  ;;  %761 = vst.msk [vmem:[%s1201_s29 + $0x74] sm:$0xf] %vm731_vm1, %v975_v20 }
  0xfb PF: > { %s13_s14 = sadd.s32 1, %s1100_s14   ;;  %s1309_s12 = smov %s1096_s13 }
  0xfc   : > { %p10_p5 = scmp.ge.s32.totalorder %s13_s14, 4   ;;  %s1310_s13 = smov %s1312_s15 }
  0xfe   :  { %12 = sbr.rel (!%p10_p5) target bundleno = 2 (0x2), region = 68 }

// kernel: encoder_cnn_forward.70
= control target key start
LH: loop header
LB: loop body
LE: loop exit
PB: predicated region body
PF: predicated region fallthrough
CT: control target
= control target key end

     0   :  { %s634_s12 = smov 0   ;;  %s636_s13 = smov 0   ;;  %s684_s0 = inlined_call_operand.vmem [shape: bf16[128,32], index: 0, kind: input, shape index: {}]   ;;  %s685_s1 = inlined_call_operand.vmem [shape: bf16[32,64], index: 1, kind: input, shape index: {}]   ;;  %s686_s2 = inlined_call_operand.vmem [shape: f32[1,64], index: 2, kind: input, shape index: {}]   ;;  %s687_s3 = inlined_call_operand.vmem [shape: bf16[128,64], index: 3, kind: output, shape index: {}]  }
   0x1   :  { %s638_s14 = smov 0  }
   0x2 LB: > { %s25_s15 = sadd.s32 1, %s608_s13  ;;  %p504_p0 = scmp.ge.s32.totalorder %s612_s14, 1  ;;  %s612_s14 = sphi %s638_s14, %s13_s14   ;;  %s608_s13 = sphi %s636_s13, %s689_s13   ;;  %s604_s12 = sphi %s634_s12, %s688_s12  }
   0x3   : > { %p27_p1 = scmp.ge.s32.totalorder %s25_s15, 2  ;;  %p169_p2 = scmp.lt.s32.totalorder %s612_s14, 3 }
   0x5   : > { %s691_s15 = smov (%p27_p1, %s25_s15), 0  ;;  %p170_p3 = pnand %p504_p0, %p169_p2 }
   0x6   : > { %s505_s18 = sshll.u32 (!%p170_p3), %s604_s12, 3 }
   0x7   : > { %173 = sbr.rel (%p170_p3) target bundleno = 225 (0xe1), region = 32  ;;  %p204_p4 = scmp.lt.s32.totalorder (!%p170_p3), %s505_s18, 15 }
   0xc   : > { %v584_v0 = vld [vmem:[%s685_s1 + $0x8] sm:$0xff]   ;;  %v585_v1 = vld [vmem:[%s685_s1] sm:$0xff]   ;;  %s693_s18 = smov (!%p204_p4, %s505_s18), 15  ;;  %vm277_vm0 = vcmask 261120   ;;  %vm387_vm1 = vcmask 519168  }
   0xd   : > { %544 = vmatprep.subr.bf16.mxu0 %v584_v0  ;;  %556 = vmatprep.subr.bf16.mxu1 %v584_v0  ;;  %s506_s21 = sshll.u32 %s693_s18, 2  ;;  %v509_v6 = vld [vmem:[%s686_s2] ss:$0 sm:$0xff] }
   0xe   : > { %545 = vmatpush3.bf16.msra.mxu0 %v584_v0  ;;  %558 = vmatpush3.bf16.msra.mxu1 %v584_v0  ;;  %s207_s24 = scalar_lea.vmem %s684_s0, %s506_s21  ;;  %s223_s29 = scalar_lea.vmem %s687_s3, %s506_s21 }
   0xf   : > { %546 = vmatprep.subr.bf16.mxu0 %v585_v1  ;;  %557 = vmatprep.subr.bf16.mxu1 %v585_v1  ;;  %v586_v2 = vld [vmem:[%s207_s24] sm:$0xff]   ;;  %v587_v3 = vld [vmem:[%s207_s24 + $0x10] sm:$0xff]   ;;  %v588_v4 = vld [vmem:[%s207_s24 + $0x8] sm:$0xff]  }
  0x10   : > { %548 = vmatprep.mubr.msk.bf16.mxu0 %vm277_vm0, %v586_v2  ;;  %552 = vmatprep.mubr.msk.bf16.mxu1 %vm277_vm0, %v587_v3  ;;  %v589_v5 = vld [vmem:[%s207_s24 + $0x18] sm:$0xff]  }
  0x12   : > { %547 = vmatpush3.bf16.msra.mxu0 %v585_v1  ;;  %559 = vmatpush3.bf16.msra.mxu1 %v585_v1 }
  0x15   : > { %549 = vmatmul.mubr.msk.bf16.vlgmr.msra.gmra.mxu0 %vm277_vm0, %v588_v4  ;;  %553 = vmatmul.mubr.msk.bf16.vlgmr.msra.gmra.mxu1 %vm277_vm0, %v589_v5 }
  0xd5   : > { %v550_v7 = vpop.f32.mrf.mxu0  ;;  %v554_v9 = vpop.f32.mrf.mxu1 }
  0xd6   : > { %v333_v8 = vadd.f32 %v550_v7, %v509_v6  ;;  %v349_v10 = vadd.f32 %v554_v9, %v509_v6 }
  0xd7   : > { %v324_v11 = vpop.f32.mrf.mxu0  ;;  %v340_v14 = vpop.f32.mrf.mxu1 }
  0xd8   : > { %v532_v12 = vpack.c.bf16 %v333_v8, %v333_v8  ;;  %v325_v13 = vadd.f32 %v509_v6, %v324_v11  ;;  %v536_v15 = vpack.c.bf16 %v349_v10, %v349_v10  ;;  %v341_v16 = vadd.f32 %v509_v6, %v340_v14 }
  0xd9   : > { %v551_v17 = vpop.f32.mrf.mxu0  ;;  %v555_v20 = vpop.f32.mrf.mxu1 }
  0xda   : > { %390 = vst.msk [vmem:[%s223_s29 + $0x8] sm:$0xf] %vm387_vm1, %v532_v12  ;;  %v530_v18 = vpack.c.bf16 %v325_v13, %v325_v13  ;;  %v336_v19 = vadd.f32 %v551_v17, %v509_v6  ;;  %394 = vst.msk [vmem:[%s223_s29 + $0x18] sm:$0xf] %vm387_vm1, %v536_v15  ;;  %v534_v21 = vpack.c.bf16 %v341_v16, %v341_v16 }
  0xdb   : > { %v352_v22 = vadd.f32 %v555_v20, %v509_v6  ;;  %v327_v23 = vpop.f32.mrf.mxu0  ;;  %v343_v26 = vpop.f32.mrf.mxu1 }
  0xdc   : > { %388 = vst.msk [vmem:[%s223_s29] sm:$0xf] %vm387_vm1, %v530_v18  ;;  %v533_v24 = vpack.c.bf16 %v336_v19, %v336_v19  ;;  %v328_v25 = vadd.f32 %v509_v6, %v327_v23  ;;  %392 = vst.msk [vmem:[%s223_s29 + $0x10] sm:$0xf] %vm387_vm1, %v534_v21  ;;  %v344_v28 = vadd.f32 %v509_v6, %v343_v26 }
  0xdd   : > { %v537_v27 = vpack.c.bf16 %v352_v22, %v352_v22 }
  0xde   : > { %391 = vst.msk [vmem:[%s223_s29 + $0xc] sm:$0xf] %vm387_vm1, %v533_v24  ;;  %v531_v29 = vpack.c.bf16 %v328_v25, %v328_v25  ;;  %v535_v30 = vpack.c.bf16 %v344_v28, %v344_v28 }
  0xdf   : > { %395 = vst.msk [vmem:[%s223_s29 + $0x1c] sm:$0xf] %vm387_vm1, %v537_v27 }
  0xe0   : > { %389 = vst.msk [vmem:[%s223_s29 + $0x4] sm:$0xf] %vm387_vm1, %v531_v29  ;;  %393 = vst.msk [vmem:[%s223_s29 + $0x14] sm:$0xf] %vm387_vm1, %v535_v30 }
  0xe1 PF: > { %s13_s14 = sadd.s32 1, %s612_s14   ;;  %s688_s12 = smov %s608_s13 }
  0xe2   : > { %p10_p5 = scmp.ge.s32.totalorder %s13_s14, 4   ;;  %s689_s13 = smov %s691_s15 }
  0xe4   :  { %12 = sbr.rel (!%p10_p5) target bundleno = 2 (0x2), region = 68 }

// kernel: encoder_cnn_forward.69
= control target key start
LH: loop header
LB: loop body
LE: loop exit
PB: predicated region body
PF: predicated region fallthrough
CT: control target
= control target key end

     0   :  { %s1192_s12 = smov 0   ;;  %s1194_s13 = smov 0   ;;  %s1321_s0 = inlined_call_operand.vmem [shape: bf16[2,4,9,9,16], index: 0, kind: input, shape index: {}]   ;;  %s1322_s1 = inlined_call_operand.vmem [shape: bf16[144,16], index: 1, kind: input, shape index: {}]   ;;  %s1323_s2 = inlined_call_operand.vmem [shape: f32[1,16], index: 2, kind: input, shape index: {}]   ;;  %s1324_s3 = inlined_call_operand.vmem [shape: bf16[2,8,8,16], index: 3, kind: output, shape index: {}]  }
   0x1   :  { %s1196_s14 = smov 0  }
   0x2 LB: > { %s32_s15 = sadd.s32 1, %s1160_s13  ;;  %p964_p0 = scmp.ge.s32.totalorder %s1164_s14, 1  ;;  %s1164_s14 = sphi %s1196_s14, %s13_s14   ;;  %s1160_s13 = sphi %s1194_s13, %s1326_s13   ;;  %s1156_s12 = sphi %s1192_s12, %s1325_s12  }
   0x3   : > { %p34_p1 = scmp.ge.s32.totalorder %s32_s15, 2  ;;  %p177_p2 = scmp.lt.s32.totalorder %s1164_s14, 3 }
   0x5   : > { %s1328_s15 = smov (%p34_p1, %s32_s15), 0  ;;  %p178_p3 = pnand %p964_p0, %p177_p2 }
   0x6   : > { %p215_p4 = scmp.lt.s32.totalorder (!%p178_p3), %s1156_s12, 1  ;;  %s1225_s26 = smov (!%p178_p3), 0  }
   0x7   : > { %181 = sbr.rel (%p178_p3) target bundleno = 253 (0xfd), region = 32 }
   0xc   : > { %v1213_v0 = vld [vmem:[%s1323_s2] ss:$0 sm:$0xff]  ;;  %s1330_s12 = smov (!%p215_p4, %s1156_s12), 1 }
   0xd   : > { %s1091_s18 = smul.u32 288, %s1330_s12  ;;  %s1013_s19 = sshll.u32 %s1330_s12, 5 }
   0xe   : > { %s1218_s22 = scalar_lea.vmem %s1324_s3, %s1013_s19 }
   0xf   : > { %s1223_s25 = scalar_lea.vmem %s1321_s0, %s1091_s18 }
  0x10 LB: >> { %v1126_v1 = vld [vmem:[%s1322_s1] sm:$0xff]   ;;  %v1170_v2 = vmov 0.0   ;;  %v1127_v3 = vld [vmem:[%s1322_s1 + $0x8] sm:$0xff]   ;;  %vm1171_vm0 = vmmov 0   ;;  %s1014_s4 = sshll.u32 %s1168_s26, 3  ;;  %vm268_vm1 = vcmask 130048   ;;  %s1168_s26 = sphi %s1225_s26, %s248_s26  }
  0x11   : >> { %1037 = vmatprep.subr.bf16.mxu0 %v1170_v2  ;;  %1043 = vmatprep.subr.bf16.mxu1 %v1170_v2  ;;  %s1242_s5 = scalar_lea.vmem %s1223_s25, %s1014_s4  ;;  %v1128_v4 = vld [vmem:[%s1322_s1 + $0x10] sm:$0xff]   ;;  %v1129_v7 = vld [vmem:[%s1322_s1 + $0x18] sm:$0xff]   ;;  %v1131_v12 = vld [vmem:[%s1322_s1 + $0x20] sm:$0xff]   ;;  %s1010_s24 = sshll.u32 %s1168_s26, 2  ;;  %vm795_vm2 = vcmask 125952  }
  0x12   : >> { %1038 = vmatpush3.bf16.msra.mxu0 %v1126_v1  ;;  %1039 = vmatprep.mubr.msk.bf16.mxu0 %vm1171_vm0, %v1170_v2  ;;  %v253_v5 = vld [vmem:[%s1242_s5] sm:$0xf]  ;;  %v975_v6 = vld [vmem:[%s1242_s5 + $0x48] sm:$0xf]  ;;  %v1133_v13 = vld [vmem:[%s1242_s5 + $0x90] sm:$0x1f]   ;;  %s794_s27 = scalar_lea.vmem %s1218_s22, %s1010_s24 }
  0x13   : >> { %1044 = vmatpush3.bf16.msra.mxu1 %v1127_v3  ;;  %1045 = vmatprep.mubr.msk.bf16.mxu1 %vm1171_vm0, %v1170_v2  ;;  %v1130_v8 = vld [vmem:[%s1242_s5] sm:$0x1f]   ;;  %v983_v15 = vld [vmem:[%s1242_s5 + $0x90] sm:$0xf]  ;;  %v1132_v16 = vld [vmem:[%s1322_s1 + $0x28] sm:$0xff]   ;;  %v558_v17 = vshll.u32 %v1133_v13, 16 }
  0x14   : >> { %1049 = vmatprep.subr.bf16.mxu0 %v1170_v2  ;;  %1055 = vmatprep.subr.bf16.mxu1 %v1170_v2  ;;  %v378_v9 = vshrl.u32 %v1130_v8, 16  ;;  %v380_v10 = vshll.u32 %v1130_v8, 16  ;;  %v556_v18 = vshrl.u32 %v1133_v13, 16  ;;  %v988_v20 = vld [vmem:[%s1242_s5 + $0xd8] sm:$0xf]  ;;  %v1134_v22 = vld [vmem:[%s1322_s1 + $0x30] sm:$0xff]  }
  0x15   : >> { %1040 = vmatmul.mubr.msk.bf16.vlgmr.msra.gmra.mxu0 %vm268_vm1, %v253_v5  ;;  %v560_v19 = vrot.slane %v558_v17, 1  ;;  %v1135_v23 = vld [vmem:[%s1322_s1 + $0x38] sm:$0xff]   ;;  %v1137_v24 = vld [vmem:[%s1242_s5 + $0x8] sm:$0x1f]   ;;  %v1136_v27 = vld [vmem:[%s1322_s1 + $0x40] sm:$0xff]   ;;  %s248_s26 = sadd.s32 1, %s1168_s26  }
  0x16   : >> { %1046 = vmatmul.mubr.msk.bf16.vlgmr.msra.gmra.mxu1 %vm268_vm1, %v975_v6  ;;  %1050 = vmatpush3.bf16.msra.mxu0 %v1128_v4  ;;  %v382_v11 = vrot.slane %v380_v10, 1  ;;  %v737_v25 = vshll.u32 %v1137_v24, 16  ;;  %v997_v26 = vld [vmem:[%s1242_s5 + $0x8] sm:$0xf]  ;;  %v1002_v28 = vld [vmem:[%s1242_s5 + $0x50] sm:$0xf] }
  0x17   : >> { %1056 = vmatpush3.bf16.msra.mxu1 %v1129_v7  ;;  %1051 = vmatprep.mubr.msk.bf16.mxu0 %vm1171_vm0, %v1170_v2  ;;  %v561_v21 = vor.u32 %v560_v19, %v556_v18  ;;  %v735_v29 = vshrl.u32 %v1137_v24, 16  ;;  %p245_p5 = scmp.ge.s32.totalorder %s248_s26, 8  }
  0x18   : >> { %1057 = vmatprep.mubr.msk.bf16.mxu1 %vm1171_vm0, %v1170_v2  ;;  %1061 = vmatprep.subr.bf16.mxu0 %v1170_v2  ;;  %v383_v14 = vor.u32 %v382_v11, %v378_v9  ;;  %v739_v30 = vrot.slane %v737_v25, 1 }
  0x19   : >> { %1067 = vmatprep.subr.bf16.mxu1 %v1170_v2 }
  0x1a   : >> { %v740_v31 = vor.u32 %v739_v30, %v735_v29 }
  0x1d   : >> { %1052 = vmatmul.mubr.msk.bf16.vlgmr.msra.gmra.mxu0 %vm268_vm1, %v383_v14 }
  0x1e   : >> { %1058 = vmatmul.mubr.msk.bf16.vlgmr.msra.gmra.mxu1 %vm268_vm1, %v983_v15  ;;  %1062 = vmatpush3.bf16.msra.mxu0 %v1131_v12 }
  0x1f   : >> { %1068 = vmatpush3.bf16.msra.mxu1 %v1132_v16  ;;  %1063 = vmatprep.mubr.msk.bf16.mxu0 %vm1171_vm0, %v1170_v2 }
  0x20   : >> { %1069 = vmatprep.mubr.msk.bf16.mxu1 %vm1171_vm0, %v1170_v2  ;;  %1073 = vmatprep.subr.bf16.mxu0 %v1170_v2 }
  0x21   : >> { %1079 = vmatprep.subr.bf16.mxu1 %v1170_v2 }
  0x25   : >> { %1064 = vmatmul.mubr.msk.bf16.vlgmr.msra.gmra.mxu0 %vm268_vm1, %v988_v20 }
  0x26   : >> { %1070 = vmatmul.mubr.msk.bf16.vlgmr.msra.gmra.mxu1 %vm268_vm1, %v561_v21  ;;  %1074 = vmatpush3.bf16.msra.mxu0 %v1134_v22 }
  0x27   : >> { %1080 = vmatpush3.bf16.msra.mxu1 %v1135_v23  ;;  %1075 = vmatprep.mubr.msk.bf16.mxu0 %vm1171_vm0, %v1170_v2 }
  0x28   : >> { %1081 = vmatprep.mubr.msk.bf16.mxu1 %vm1171_vm0, %v1170_v2  ;;  %1085 = vmatprep.subr.bf16.mxu0 %v1170_v2 }
  0x2d   : >> { %1076 = vmatmul.mubr.msk.bf16.vlgmr.msra.gmra.mxu0 %vm268_vm1, %v997_v26 }
  0x2e   : >> { %1082 = vmatmul.mubr.msk.bf16.vlgmr.msra.gmra.mxu1 %vm268_vm1, %v1002_v28  ;;  %1086 = vmatpush3.bf16.msra.mxu0 %v1136_v27 }
  0x2f   : >> { %1087 = vmatprep.mubr.msk.bf16.mxu0 %vm1171_vm0, %v1170_v2 }
  0x35   : >> { %1088 = vmatmul.mubr.msk.bf16.vlgmr.msra.gmra.mxu0 %vm268_vm1, %v740_v31 }
  0xd5   : >> { %v306_v32 = vpop.f32.mrf.mxu0 }
  0xd6   : >> { %v361_v33 = vpop.f32.mrf.mxu1  ;;  %v307_v41 = vadd.f32 %v1213_v0, %v306_v32 }
  0xd7   : >> { %v1041_v34 = vpop.f32.mrf.mxu0 }
  0xd8   : >> { %v1047_v35 = vpop.f32.mrf.mxu1  ;;  %v367_v46 = vadd.f32 %v361_v33, %v307_v41 }
  0xd9   : >> { %v309_v36 = vpop.f32.mrf.mxu0 }
  0xda   : >> { %v364_v37 = vpop.f32.mrf.mxu1 }
  0xdb   : >> { %v1042_v38 = vpop.f32.mrf.mxu0 }
  0xdc   : >> { %v1048_v39 = vpop.f32.mrf.mxu1 }
  0xdd   : >> { %v427_v40 = vpop.f32.mrf.mxu0 }
  0xde   : >> { %v483_v42 = vpop.f32.mrf.mxu1  ;;  %v433_v49 = vadd.f32 %v427_v40, %v367_v46 }
  0xdf   : >> { %v1053_v43 = vpop.f32.mrf.mxu0 }
  0xe0   : >> { %v1059_v44 = vpop.f32.mrf.mxu1  ;;  %v489_v54 = vadd.f32 %v483_v42, %v433_v49 }
  0xe1   : >> { %v430_v45 = vpop.f32.mrf.mxu0 }
  0xe2   : >> { %v486_v47 = vpop.f32.mrf.mxu1 }
  0xe3   : >> { %v1054_v48 = vpop.f32.mrf.mxu0 }
  0xe4   : >> { %v1060_v50 = vpop.f32.mrf.mxu1 }
  0xe5   : >> { %v539_v51 = vpop.f32.mrf.mxu0 }
  0xe6   : >> { %v605_v52 = vpop.f32.mrf.mxu1  ;;  %v545_v57 = vadd.f32 %v539_v51, %v489_v54 }
  0xe7   : >> { %v1065_v53 = vpop.f32.mrf.mxu0 }
  0xe8   : >> { %v1071_v55 = vpop.f32.mrf.mxu1  ;;  %v611_v62 = vadd.f32 %v605_v52, %v545_v57 }
  0xe9   : >> { %v542_v56 = vpop.f32.mrf.mxu0 }
  0xea   : >> { %v608_v58 = vpop.f32.mrf.mxu1 }
  0xeb   : >> { %v1066_v59 = vpop.f32.mrf.mxu0 }
  0xec   : >> { %v1072_v60 = vpop.f32.mrf.mxu1 }
  0xed   : >> { %v662_v61 = vpop.f32.mrf.mxu0 }
  0xee   : >> { %v718_v63 = vpop.f32.mrf.mxu1  ;;  %v668_v2 = vadd.f32 %v662_v61, %v611_v62 }
  0xef   : >> { %v1077_v1 = vpop.f32.mrf.mxu0 }
  0xf0   : >> { %v1083_v3 = vpop.f32.mrf.mxu1  ;;  %v724_v7 = vadd.f32 %v718_v63, %v668_v2 }
  0xf1   : >> { %v665_v4 = vpop.f32.mrf.mxu0 }
  0xf2   : >> { %v721_v5 = vpop.f32.mrf.mxu1 }
  0xf3   : >> { %v1078_v6 = vpop.f32.mrf.mxu0 }
  0xf4   : >> { %v1084_v8 = vpop.f32.mrf.mxu1 }
  0xf5   : >> { %v784_v9 = vpop.f32.mrf.mxu0 }
  0xf6   : >> { %v790_v10 = vadd.f32 %v784_v9, %v724_v7 }
  0xf7   : >> { %v1089_v11 = vpop.f32.mrf.mxu0 }
  0xf8   : >> { %v791_v12 = vmax.f32 %v790_v10, 0.0  ;;  %247 = sbr.rel (!%p245_p5) target bundleno = 16 (0x10), region = 82 }
  0xf9   : >> { %v787_v13 = vpop.f32.mrf.mxu0 }
  0xfa   : >> { %v792_v14 = vpack.c.bf16 %v791_v12, %v791_v12 }
  0xfb   : >> { %v1090_v15 = vpop.f32.mrf.mxu0 }
  0xfc   : >> { %796 = vst.msk [vmem:[%s794_s27] sm:$0xf] %vm795_vm2, %v792_v14 }
  0xfd PF: > { %s13_s14 = sadd.s32 1, %s1164_s14   ;;  %s1325_s12 = smov %s1160_s13 }
  0xfe   : > { %p10_p6 = scmp.ge.s32.totalorder %s13_s14, 4   ;;  %s1326_s13 = smov %s1328_s15 }
 0x100   :  { %12 = sbr.rel (!%p10_p6) target bundleno = 2 (0x2), region = 93 }

// kernel: encoder_cnn_forward.71
= control target key start
LH: loop header
LB: loop body
LE: loop exit
PB: predicated region body
PF: predicated region fallthrough
CT: control target
= control target key end

     0   :  { %9 = vsyncpa [#allocation3], 0  ;;  %s803_s15 = smov 0   ;;  %s805_s16 = smov 0   ;;  %s890_s0 = inlined_call_operand.vmem [shape: bf16[128,16], index: 0, kind: input, shape index: {}]   ;;  %s891_s1 = inlined_call_operand.vmem [shape: bf16[16,64], index: 1, kind: input, shape index: {}]   ;;  %s892_s2 = inlined_call_operand.hbm [shape: f32[1,64], index: 2, kind: input, shape index: {}]   ;;  %s893_s3 = inlined_call_operand.vmem [shape: bf16[128,64], index: 3, kind: input, shape index: {}]   ;;  %s894_s4 = inlined_call_operand.vmem [shape: bf16[128,64], index: 4, kind: output, shape index: {}]  }
   0x1   :  { %s807_s17 = smov 0  }
   0x2 LB: > { %s605_s18 = sadd.s32 4294967295, %s775_s17   ;;  %s27_s19 = sadd.s32 1, %s771_s16  ;;  %s775_s17 = sphi %s807_s17, %s15_s17   ;;  %s771_s16 = sphi %s805_s16, %s898_s16   ;;  %s767_s15 = sphi %s803_s15, %s897_s15  }
   0x3   : > { %p29_p0 = scmp.ge.s32.totalorder %s27_s19, 2  ;;  %p607_p1 = scmp.ge.s32.totalorder %s775_s17, 1 }
   0x4   : > { %p166_p2 = scmp.lt.s32.totalorder %s775_s17, 3  ;;  %p828_p4 = scmp.eq.s32.totalorder %s605_s18, 0 }
   0x5   : > { %s900_s19 = smov (%p29_p0, %s27_s19), 0  ;;  %s777_s22 = smov [#allocation2]  }
   0x6   : > { %p824_p3 = pnand %p607_p1, %p166_p2  ;;  %s188_s23 = sshll.u32 %s777_s22, 4  ;;  %s189_s23 = int_to_ptr.vmem [resolvable:$true] %s188_s23 }
   0x7   : > { %s734_s24 = scalar_lea.vmem %s189_s23, 16  ;;  %s741_s25 = scalar_lea.vmem %s189_s23, 32 }
   0x8   : > { %p687_p5 = pneg %p824_p3  ;;  %p735_p8 = scmp.ne.s32.totalorder %s189_s23, %s734_s24 }
   0x9   : > { %p742_p11 = scmp.lt.s32.totalorder %s189_s23, %s189_s23  ;;  %p743_p12 = scmp.lt.s32.totalorder %s741_s25, %s734_s24 }
   0xa   : > { %p688_p6 = pnand %p828_p4, %p687_p5 }
   0xb   : > { %p744_p13 = por %p743_p12, %p742_p11 }
   0xc   : > { %p725_p7 = pneg %p688_p6 }
   0xe   : > { %p737_p9 = pnand %p735_p8, %p725_p7 }
  0x10   : > { %p738_p10 = pneg %p737_p9 }
  0x12   : > { %p745_p0 = pnand %p744_p13, %p738_p10 }
  0x14   : > { %748 = shalt.err (!%p745_p0)
}
  0x15   : > { %690 = dma.hbm_to_vmem [thread:$0]  (!%p688_p6), %s892_s2, 16, %s189_s23, [#allocation3]  }
  0x16   : > { %222 = sbr.rel (%p824_p3) target bundleno = 245 (0xf5), region = 36 }
  0x1b   : > { %762 = dma.done.wait (%p828_p4), [#allocation3], 16  }
  0x1c   : > { %764 = vsyncadd (%p828_p4), [#allocation3], 4294967280  ;;  %s613_s28 = sshll.u32 %s767_s15, 3  ;;  %v718_v0 = vld [vmem:[%s891_s1] sm:$0xff]   ;;  %vm335_vm0 = vcmask 130048   ;;  %vm477_vm1 = vcmask 519168  }
  0x1d   : > { %p264_p1 = scmp.lt.s32.totalorder %s613_s28, 15  ;;  %671 = vmatprep.subr.bf16.mxu0 %v718_v0  ;;  %681 = vmatprep.subr.bf16.mxu1 %v718_v0  ;;  %v619_v7 = vld [vmem:[#allocation2] ss:$0 sm:$0xff] }
  0x1e   : > { %672 = vmatpush3.bf16.msra.mxu0 %v718_v0  ;;  %682 = vmatpush3.bf16.msra.mxu1 %v718_v0 }
  0x1f   : > { %s902_s28 = smov (!%p264_p1, %s613_s28), 15 }
  0x20   : > { %s846_s29 = sshll.u32 %s902_s28, 2 }
  0x21   : > { %s267_s6 = scalar_lea.vmem %s890_s0, %s846_s29  ;;  %s280_s11 = scalar_lea.vmem %s893_s3, %s846_s29 }
  0x22   : > { %v719_v1 = vld [vmem:[%s267_s6] sm:$0xff]   ;;  %v720_v2 = vld [vmem:[%s267_s6 + $0x10] sm:$0xff]   ;;  %v721_v3 = vld [vmem:[%s267_s6 + $0x8] sm:$0xff]   ;;  %s863_s14 = scalar_lea.vmem %s894_s4, %s846_s29 }
  0x23   : > { %673 = vmatprep.mubr.msk.bf16.mxu0 %vm335_vm0, %v719_v1  ;;  %677 = vmatprep.mubr.msk.bf16.mxu1 %vm335_vm0, %v720_v2  ;;  %v722_v4 = vld [vmem:[%s267_s6 + $0x18] sm:$0xff]   ;;  %v663_v5 = vld [vmem:[%s280_s11 + $0x8] sm:$0xff]   ;;  %v648_v8 = vld [vmem:[%s280_s11] sm:$0xff]  }
  0x24   : > { %674 = vmatmul.mubr.msk.bf16.vlgmr.msra.gmra.mxu0 %vm335_vm0, %v721_v3  ;;  %678 = vmatmul.mubr.msk.bf16.vlgmr.msra.gmra.mxu1 %vm335_vm0, %v722_v4  ;;  %v665_v6 = vld [vmem:[%s280_s11 + $0x18] sm:$0xff]   ;;  %v664_v9 = vld [vmem:[%s280_s11 + $0x10] sm:$0xff]   ;;  %v653_v10 = vunpack.c.l.bf16 %v663_v5  ;;  %v649_v16 = vunpack.c.l.bf16 %v648_v8  ;;  %v654_v25 = vunpack.c.h.bf16 %v663_v5  ;;  %v650_v35 = vunpack.c.h.bf16 %v648_v8 }
  0x25   : > { %v661_v11 = vunpack.c.l.bf16 %v665_v6  ;;  %v657_v17 = vunpack.c.l.bf16 %v664_v9  ;;  %v662_v27 = vunpack.c.h.bf16 %v665_v6  ;;  %v658_v37 = vunpack.c.h.bf16 %v664_v9 }
  0xe4   : > { %v675_v12 = vpop.f32.mrf.mxu0  ;;  %v679_v13 = vpop.f32.mrf.mxu1 }
  0xe5   : > { %v391_v14 = vadd.f32 %v675_v12, %v619_v7  ;;  %v407_v15 = vadd.f32 %v679_v13, %v619_v7 }
  0xe6   : > { %v382_v18 = vpop.f32.mrf.mxu0  ;;  %v398_v19 = vpop.f32.mrf.mxu1 }
  0xe7   : > { %v431_v20 = vadd.f32 %v653_v10, %v391_v14  ;;  %v435_v21 = vadd.f32 %v661_v11, %v407_v15  ;;  %v383_v22 = vadd.f32 %v619_v7, %v382_v18  ;;  %v399_v23 = vadd.f32 %v619_v7, %v398_v19 }
  0xe8   : > { %v676_v24 = vpop.f32.mrf.mxu0  ;;  %v680_v26 = vpop.f32.mrf.mxu1 }
  0xe9   : > { %v439_v28 = vmax.f32 %v431_v20, 0.0  ;;  %v443_v29 = vmax.f32 %v435_v21, 0.0  ;;  %v429_v30 = vadd.f32 %v649_v16, %v383_v22  ;;  %v433_v31 = vadd.f32 %v657_v17, %v399_v23 }
  0xea   : > { %v394_v32 = vadd.f32 %v676_v24, %v619_v7  ;;  %v410_v33 = vadd.f32 %v680_v26, %v619_v7  ;;  %v385_v34 = vpop.f32.mrf.mxu0  ;;  %v401_v36 = vpop.f32.mrf.mxu1 }
  0xeb   : > { %v641_v38 = vpack.c.bf16 %v439_v28, %v439_v28  ;;  %v645_v39 = vpack.c.bf16 %v443_v29, %v443_v29  ;;  %v437_v40 = vmax.f32 %v429_v30, 0.0  ;;  %v441_v41 = vmax.f32 %v433_v31, 0.0 }
  0xec   : > { %v432_v42 = vadd.f32 %v654_v25, %v394_v32  ;;  %v436_v43 = vadd.f32 %v662_v27, %v410_v33  ;;  %v386_v44 = vadd.f32 %v619_v7, %v385_v34  ;;  %v402_v45 = vadd.f32 %v619_v7, %v401_v36 }
  0xed   : > { %480 = vst.msk [vmem:[%s863_s14 + $0x8] sm:$0xf] %vm477_vm1, %v641_v38  ;;  %484 = vst.msk [vmem:[%s863_s14 + $0x18] sm:$0xf] %vm477_vm1, %v645_v39  ;;  %v639_v46 = vpack.c.bf16 %v437_v40, %v437_v40  ;;  %v643_v47 = vpack.c.bf16 %v441_v41, %v441_v41 }
  0xee   : > { %v440_v48 = vmax.f32 %v432_v42, 0.0  ;;  %v444_v49 = vmax.f32 %v436_v43, 0.0  ;;  %v430_v50 = vadd.f32 %v650_v35, %v386_v44  ;;  %v434_v51 = vadd.f32 %v658_v37, %v402_v45 }
  0xef   : > { %478 = vst.msk [vmem:[%s863_s14] sm:$0xf] %vm477_vm1, %v639_v46  ;;  %482 = vst.msk [vmem:[%s863_s14 + $0x10] sm:$0xf] %vm477_vm1, %v643_v47 }
  0xf0   : > { %v642_v52 = vpack.c.bf16 %v440_v48, %v440_v48  ;;  %v646_v53 = vpack.c.bf16 %v444_v49, %v444_v49  ;;  %v438_v54 = vmax.f32 %v430_v50, 0.0  ;;  %v442_v55 = vmax.f32 %v434_v51, 0.0 }
  0xf2   : > { %481 = vst.msk [vmem:[%s863_s14 + $0xc] sm:$0xf] %vm477_vm1, %v642_v52  ;;  %485 = vst.msk [vmem:[%s863_s14 + $0x1c] sm:$0xf] %vm477_vm1, %v646_v53  ;;  %v640_v56 = vpack.c.bf16 %v438_v54, %v438_v54  ;;  %v644_v57 = vpack.c.bf16 %v442_v55, %v442_v55 }
  0xf4   : > { %479 = vst.msk [vmem:[%s863_s14 + $0x4] sm:$0xf] %vm477_vm1, %v640_v56  ;;  %483 = vst.msk [vmem:[%s863_s14 + $0x14] sm:$0xf] %vm477_vm1, %v644_v57 }
  0xf5 PF: > { %s15_s17 = sadd.s32 1, %s775_s17   ;;  %s897_s15 = smov %s771_s16 }
  0xf6   : > { %p12_p2 = scmp.ge.s32.totalorder %s15_s17, 4   ;;  %s898_s16 = smov %s900_s19 }
  0xf8   :  { %14 = sbr.rel (!%p12_p2) target bundleno = 2 (0x2), region = 78 }
  0xfd   :  { %514 = vsyncpa [#allocation3], 1 }
  0xfe   :  { %516 = vsyncpa [#allocation3 + $0x1], 1 }

// kernel: encoder_cnn_forward.72
= control target key start
LH: loop header
LB: loop body
LE: loop exit
PB: predicated region body
PF: predicated region fallthrough
CT: control target
= control target key end

     0   :  { %8 = vsyncpa [#allocation3], 0  ;;  %s723_s12 = smov 0   ;;  %s725_s13 = smov 0   ;;  %s822_s0 = inlined_call_operand.vmem [shape: bf16[128,64], index: 0, kind: input, shape index: {}]   ;;  %s823_s1 = inlined_call_operand.vmem [shape: bf16[64,16], index: 1, kind: input, shape index: {}]   ;;  %s824_s2 = inlined_call_operand.hbm [shape: f32[1,16], index: 2, kind: input, shape index: {}]   ;;  %s825_s3 = inlined_call_operand.vmem [shape: bf16[128,16], index: 3, kind: output, shape index: {}]  }
   0x1   :  { %s727_s14 = smov 0  }
   0x2 LB: > { %s530_s15 = sadd.s32 4294967295, %s700_s14   ;;  %s26_s16 = sadd.s32 1, %s696_s13  ;;  %s700_s14 = sphi %s727_s14, %s14_s14   ;;  %s696_s13 = sphi %s725_s13, %s829_s13   ;;  %s692_s12 = sphi %s723_s12, %s828_s12  }
   0x3   : > { %p28_p0 = scmp.ge.s32.totalorder %s26_s16, 2  ;;  %p532_p1 = scmp.ge.s32.totalorder %s700_s14, 1 }
   0x4   : > { %p137_p2 = scmp.lt.s32.totalorder %s700_s14, 3  ;;  %p748_p4 = scmp.eq.s32.totalorder %s530_s15, 0 }
   0x5   : > { %s831_s16 = smov (%p28_p0, %s26_s16), 0  ;;  %s702_s19 = smov [#allocation2]  }
   0x6   : > { %p744_p3 = pnand %p532_p1, %p137_p2  ;;  %s159_s20 = sshll.u32 %s702_s19, 4  ;;  %s160_s20 = int_to_ptr.vmem [resolvable:$true] %s159_s20 }
   0x7   : > { %s659_s21 = scalar_lea.vmem %s160_s20, 16  ;;  %s666_s22 = scalar_lea.vmem %s160_s20, 32 }
   0x8   : > { %p609_p5 = pneg %p744_p3  ;;  %p660_p8 = scmp.ne.s32.totalorder %s160_s20, %s659_s21 }
   0x9   : > { %p667_p11 = scmp.lt.s32.totalorder %s160_s20, %s160_s20  ;;  %p668_p12 = scmp.lt.s32.totalorder %s666_s22, %s659_s21 }
   0xa   : > { %p610_p6 = pnand %p748_p4, %p609_p5 }
   0xb   : > { %p669_p13 = por %p668_p12, %p667_p11 }
   0xc   : > { %p650_p7 = pneg %p610_p6 }
   0xe   : > { %p662_p9 = pnand %p660_p8, %p650_p7 }
  0x10   : > { %p663_p10 = pneg %p662_p9 }
  0x12   : > { %p670_p0 = pnand %p669_p13, %p663_p10 }
  0x14   : > { %673 = shalt.err (!%p670_p0)
}
  0x15   : > { %612 = dma.hbm_to_vmem [thread:$0]  (!%p610_p6), %s824_s2, 16, %s160_s20, [#allocation3]  }
  0x16   : > { %181 = sbr.rel (%p744_p3) target bundleno = 252 (0xfc), region = 32 }
  0x1b   : > { %687 = dma.done.wait (%p748_p4), [#allocation3], 16  }
  0x1c   : > { %689 = vsyncadd (%p748_p4), [#allocation3], 4294967280  ;;  %s538_s25 = sshll.u32 %s692_s12, 3  ;;  %v640_v0 = vld [vmem:[%s823_s1 + $0x18] sm:$0xff]   ;;  %v641_v1 = vld [vmem:[%s823_s1 + $0x10] sm:$0xff]   ;;  %vm299_vm0 = vcmask 523264  }
  0x1d   : > { %p213_p1 = scmp.lt.s32.totalorder %s538_s25, 15  ;;  %581 = vmatprep.subr.bf16.mxu0 %v640_v0  ;;  %597 = vmatprep.subr.bf16.mxu1 %v640_v0  ;;  %v642_v2 = vld [vmem:[%s823_s1 + $0x8] sm:$0xff]   ;;  %v643_v5 = vld [vmem:[%s823_s1] sm:$0xff]   ;;  %vm417_vm1 = vcmask 125952  }
  0x1e   : > { %582 = vmatpush3.bf16.msra.mxu0 %v640_v0  ;;  %601 = vmatpush3.bf16.msra.mxu1 %v640_v0  ;;  %v542_v8 = vld [vmem:[#allocation2] ss:$0 sm:$0xff] }
  0x1f   : > { %s833_s25 = smov (!%p213_p1, %s538_s25), 15  ;;  %583 = vmatprep.subr.bf16.mxu0 %v641_v1  ;;  %598 = vmatprep.subr.bf16.mxu1 %v641_v1 }
  0x20   : > { %s539_s26 = sshll.u32 %s833_s25, 2 }
  0x21   : > { %s216_s6 = scalar_lea.vmem %s822_s0, %s539_s26  ;;  %s795_s15 = scalar_lea.vmem %s825_s3, %s539_s26 }
  0x22   : > { %v644_v3 = vld [vmem:[%s216_s6] sm:$0xff]   ;;  %v645_v4 = vld [vmem:[%s216_s6 + $0x10] sm:$0xff]   ;;  %584 = vmatpush3.bf16.msra.mxu0 %v641_v1  ;;  %602 = vmatpush3.bf16.msra.mxu1 %v641_v1  ;;  %v646_v6 = vld [vmem:[%s216_s6 + $0x8] sm:$0xff]  }
  0x23   : > { %589 = vmatprep.mubr.msk.bf16.mxu0 %vm299_vm0, %v644_v3  ;;  %585 = vmatprep.subr.bf16.mxu0 %v642_v2  ;;  %v647_v7 = vld [vmem:[%s216_s6 + $0x18] sm:$0xff]  }
  0x24   : > { %599 = vmatprep.subr.bf16.mxu1 %v642_v2  ;;  %593 = vmatprep.mubr.msk.bf16.mxu1 %vm299_vm0, %v645_v4 }
  0x26   : > { %586 = vmatpush3.bf16.msra.mxu0 %v642_v2  ;;  %603 = vmatpush3.bf16.msra.mxu1 %v642_v2 }
  0x27   : > { %587 = vmatprep.subr.bf16.mxu0 %v643_v5  ;;  %600 = vmatprep.subr.bf16.mxu1 %v643_v5 }
  0x2a   : > { %588 = vmatpush3.bf16.msra.mxu0 %v643_v5  ;;  %604 = vmatpush3.bf16.msra.mxu1 %v643_v5 }
  0x2d   : > { %590 = vmatmul.mubr.msk.bf16.vlgmr.msra.gmra.mxu0 %vm299_vm0, %v646_v6  ;;  %594 = vmatmul.mubr.msk.bf16.vlgmr.msra.gmra.mxu1 %vm299_vm0, %v647_v7 }
  0xed   : > { %v591_v9 = vpop.f32.mrf.mxu0  ;;  %v595_v10 = vpop.f32.mrf.mxu1 }
  0xee   : > { %v355_v11 = vadd.f32 %v591_v9, %v542_v8  ;;  %v371_v12 = vadd.f32 %v595_v10, %v542_v8 }
  0xef   : > { %v346_v13 = vpop.f32.mrf.mxu0  ;;  %v362_v14 = vpop.f32.mrf.mxu1 }
  0xf0   : > { %v379_v15 = vmax.f32 %v355_v11, 0.0  ;;  %v383_v16 = vmax.f32 %v371_v12, 0.0  ;;  %v347_v17 = vadd.f32 %v542_v8, %v346_v13  ;;  %v363_v18 = vadd.f32 %v542_v8, %v362_v14 }
  0xf1   : > { %v592_v19 = vpop.f32.mrf.mxu0  ;;  %v596_v20 = vpop.f32.mrf.mxu1 }
  0xf2   : > { %v567_v21 = vpack.c.bf16 %v379_v15, %v379_v15  ;;  %v571_v22 = vpack.c.bf16 %v383_v16, %v383_v16  ;;  %v377_v23 = vmax.f32 %v347_v17, 0.0  ;;  %v381_v24 = vmax.f32 %v363_v18, 0.0 }
  0xf3   : > { %v358_v25 = vadd.f32 %v592_v19, %v542_v8  ;;  %v374_v26 = vadd.f32 %v596_v20, %v542_v8  ;;  %v349_v27 = vpop.f32.mrf.mxu0  ;;  %v365_v28 = vpop.f32.mrf.mxu1 }
  0xf4   : > { %420 = vst.msk [vmem:[%s795_s15 + $0x8] sm:$0xf] %vm417_vm1, %v567_v21  ;;  %424 = vst.msk [vmem:[%s795_s15 + $0x18] sm:$0xf] %vm417_vm1, %v571_v22  ;;  %v565_v29 = vpack.c.bf16 %v377_v23, %v377_v23  ;;  %v569_v30 = vpack.c.bf16 %v381_v24, %v381_v24  ;;  %v350_v31 = vadd.f32 %v542_v8, %v349_v27 }
  0xf5   : > { %v366_v32 = vadd.f32 %v542_v8, %v365_v28  ;;  %v380_v33 = vmax.f32 %v358_v25, 0.0  ;;  %v384_v34 = vmax.f32 %v374_v26, 0.0 }
  0xf6   : > { %418 = vst.msk [vmem:[%s795_s15] sm:$0xf] %vm417_vm1, %v565_v29  ;;  %422 = vst.msk [vmem:[%s795_s15 + $0x10] sm:$0xf] %vm417_vm1, %v569_v30  ;;  %v378_v35 = vmax.f32 %v350_v31, 0.0 }
  0xf7   : > { %v382_v36 = vmax.f32 %v366_v32, 0.0  ;;  %v568_v37 = vpack.c.bf16 %v380_v33, %v380_v33  ;;  %v572_v38 = vpack.c.bf16 %v384_v34, %v384_v34 }
  0xf8   : > { %v566_v39 = vpack.c.bf16 %v378_v35, %v378_v35 }
  0xf9   : > { %v570_v40 = vpack.c.bf16 %v382_v36, %v382_v36  ;;  %421 = vst.msk [vmem:[%s795_s15 + $0xc] sm:$0xf] %vm417_vm1, %v568_v37  ;;  %425 = vst.msk [vmem:[%s795_s15 + $0x1c] sm:$0xf] %vm417_vm1, %v572_v38 }
  0xfa   : > { %419 = vst.msk [vmem:[%s795_s15 + $0x4] sm:$0xf] %vm417_vm1, %v566_v39 }
  0xfb   : > { %423 = vst.msk [vmem:[%s795_s15 + $0x14] sm:$0xf] %vm417_vm1, %v570_v40 }
  0xfc PF: > { %s14_s14 = sadd.s32 1, %s700_s14   ;;  %s828_s12 = smov %s696_s13 }
  0xfd   : > { %p11_p2 = scmp.ge.s32.totalorder %s14_s14, 4   ;;  %s829_s13 = smov %s831_s16 }
  0xff   :  { %13 = sbr.rel (!%p11_p2) target bundleno = 2 (0x2), region = 71 }
 0x104   :  { %454 = vsyncpa [#allocation3], 1 }
 0x105   :  { %456 = vsyncpa [#allocation3 + $0x1], 1 }

// kernel: encoder_cnn_forward.80
= control target key start
LH: loop header
LB: loop body
LE: loop exit
PB: predicated region body
PF: predicated region fallthrough
CT: control target
= control target key end

     0   :  { %9 = vsyncpa [#allocation3], 0  ;;  %s958_s0 = inlined_call_operand.vmem [shape: bf16[128,16], index: 0, kind: input, shape index: {}]   ;;  %s959_s1 = inlined_call_operand.hbm [shape: bf16[16,64], index: 1, kind: input, shape index: {}]   ;;  %s960_s2 = inlined_call_operand.hbm [shape: f32[1,64], index: 2, kind: input, shape index: {}]   ;;  %s961_s3 = inlined_call_operand.vmem [shape: bf16[128,64], index: 3, kind: input, shape index: {}]   ;;  %s962_s4 = inlined_call_operand.vmem [shape: bf16[128,64], index: 4, kind: output, shape index: {}]  }
   0x1   :  { %10 = vsyncpa [#allocation5], 0  ;;  %s851_s15 = smov 0   ;;  %s853_s16 = smov 0  }
   0x2   :  { %s855_s17 = smov 0  }
   0x3 LB: > { %s607_s18 = sadd.s32 4294967295, %s820_s17   ;;  %s28_s19 = sadd.s32 1, %s816_s16  ;;  %s820_s17 = sphi %s855_s17, %s16_s17   ;;  %s816_s16 = sphi %s853_s16, %s967_s16   ;;  %s812_s15 = sphi %s851_s15, %s966_s15  }
   0x4   : > { %p30_p0 = scmp.ge.s32.totalorder %s28_s19, 2  ;;  %p609_p1 = scmp.ge.s32.totalorder %s820_s17, 1 }
   0x5   : > { %p167_p2 = scmp.lt.s32.totalorder %s820_s17, 3  ;;  %p876_p4 = scmp.eq.s32.totalorder %s607_s18, 0 }
   0x6   : > { %s969_s19 = smov (%p30_p0, %s28_s19), 0  ;;  %s822_s22 = smov [#allocation2]  }
   0x7   : > { %p872_p3 = pnand %p609_p1, %p167_p2  ;;  %s181_s23 = sshll.u32 %s822_s22, 4  ;;  %s182_s23 = int_to_ptr.vmem [resolvable:$true] %s181_s23 }
   0x8   : > { %s823_s25 = smov [#allocation4]   ;;  %s749_s27 = scalar_lea.vmem %s182_s23, 128 }
   0x9   : > { %p694_p5 = pneg %p872_p3  ;;  %s197_s26 = sshll.u32 %s823_s25, 4  ;;  %s198_s26 = int_to_ptr.vmem [resolvable:$true] %s197_s26 }
   0xa   : > { %p750_p8 = scmp.ne.s32.totalorder %s182_s23, %s749_s27  ;;  %p757_p11 = scmp.lt.s32.totalorder %s182_s23, %s182_s23 }
   0xb   : > { %p884_p6 = pnand %p876_p4, %p694_p5  ;;  %p758_p12 = scmp.lt.s32.totalorder %s749_s27, %s749_s27 }
   0xd   : > { %p740_p7 = pneg %p884_p6  ;;  %p759_p13 = por %p758_p12, %p757_p11 }
   0xf   : > { %p752_p9 = pnand %p750_p8, %p740_p7 }
  0x11   : > { %p753_p10 = pneg %p752_p9 }
  0x13   : > { %p760_p0 = pnand %p759_p13, %p753_p10 }
  0x15   : > { %763 = shalt.err (!%p760_p0)
}
  0x16   : > { %s824_s28 = smov 64   ;;  %s825_s29 = smov 4  }
  0x17   : > { %697 = dma.hbm_to_vmem [thread:$0]  (!%p884_p6), %s959_s1, 128, %s182_s23, [#allocation3], %s824_s28, %s824_s28, %s825_s29  }
  0x18   : > { %s775_s6 = scalar_lea.vmem %s198_s26, 16  ;;  %s782_s7 = scalar_lea.vmem %s198_s26, 32 }
  0x19   : > { %p776_p1 = scmp.ne.s32.totalorder %s198_s26, %s775_s6  ;;  %p783_p8 = scmp.lt.s32.totalorder %s198_s26, %s198_s26 }
  0x1a   : > { %p784_p9 = scmp.lt.s32.totalorder %s782_s7, %s775_s6 }
  0x1b   : > { %p778_p2 = pnand %p776_p1, %p740_p7 }
  0x1c   : > { %p785_p10 = por %p784_p9, %p783_p8 }
  0x1d   : > { %p779_p5 = pneg %p778_p2 }
  0x1f   : > { %p786_p11 = pnand %p785_p10, %p779_p5 }
  0x21   : > { %789 = shalt.err (!%p786_p11)
}
  0x22   : > { %700 = dma.hbm_to_vmem [thread:$0]  (!%p884_p6), %s960_s2, 16, %s198_s26, [#allocation5]  }
  0x23   : > { %231 = sbr.rel (%p872_p3) target bundleno = 260 (0x104), region = 36 }
  0x28   : > { %803 = dma.done.wait (%p876_p4), [#allocation3], 128  }
  0x29   : > { %805 = vsyncadd (%p876_p4), [#allocation3], 4294967168 }
  0x2a   : > { %807 = dma.done.wait (%p876_p4), [#allocation5], 16  }
  0x2b   : > { %809 = vsyncadd (%p876_p4), [#allocation5], 4294967280  ;;  %s616_s10 = sshll.u32 %s812_s15, 3  ;;  %v733_v0 = vld [vmem:[#allocation2] sm:$0xff]   ;;  %vm340_vm0 = vcmask 130048   ;;  %vm482_vm1 = vcmask 519168  }
  0x2c   : > { %p273_p7 = scmp.lt.s32.totalorder %s616_s10, 15  ;;  %674 = vmatprep.subr.bf16.mxu0 %v733_v0  ;;  %684 = vmatprep.subr.bf16.mxu1 %v733_v0  ;;  %v622_v7 = vld [vmem:[#allocation4] ss:$0 sm:$0xff] }
  0x2d   : > { %675 = vmatpush3.bf16.msra.mxu0 %v733_v0  ;;  %685 = vmatpush3.bf16.msra.mxu1 %v733_v0 }
  0x2e   : > { %s971_s10 = smov (!%p273_p7, %s616_s10), 15 }
  0x2f   : > { %s917_s11 = sshll.u32 %s971_s10, 2 }
  0x30   : > { %s276_s14 = scalar_lea.vmem %s958_s0, %s917_s11  ;;  %s285_s20 = scalar_lea.vmem %s961_s3, %s917_s11 }
  0x31   : > { %v734_v1 = vld [vmem:[%s276_s14] sm:$0xff]   ;;  %v735_v2 = vld [vmem:[%s276_s14 + $0x10] sm:$0xff]   ;;  %v736_v3 = vld [vmem:[%s276_s14 + $0x8] sm:$0xff]   ;;  %s931_s23 = scalar_lea.vmem %s962_s4, %s917_s11 }
  0x32   : > { %676 = vmatprep.mubr.msk.bf16.mxu0 %vm340_vm0, %v734_v1  ;;  %680 = vmatprep.mubr.msk.bf16.mxu1 %vm340_vm0, %v735_v2  ;;  %v737_v4 = vld [vmem:[%s276_s14 + $0x18] sm:$0xff]   ;;  %v666_v5 = vld [vmem:[%s285_s20 + $0x8] sm:$0xff]   ;;  %v651_v8 = vld [vmem:[%s285_s20] sm:$0xff]  }
  0x33   : > { %677 = vmatmul.mubr.msk.bf16.vlgmr.msra.gmra.mxu0 %vm340_vm0, %v736_v3  ;;  %681 = vmatmul.mubr.msk.bf16.vlgmr.msra.gmra.mxu1 %vm340_vm0, %v737_v4  ;;  %v668_v6 = vld [vmem:[%s285_s20 + $0x18] sm:$0xff]   ;;  %v667_v9 = vld [vmem:[%s285_s20 + $0x10] sm:$0xff]   ;;  %v656_v10 = vunpack.c.l.bf16 %v666_v5  ;;  %v652_v16 = vunpack.c.l.bf16 %v651_v8  ;;  %v657_v25 = vunpack.c.h.bf16 %v666_v5  ;;  %v653_v35 = vunpack.c.h.bf16 %v651_v8 }
  0x34   : > { %v664_v11 = vunpack.c.l.bf16 %v668_v6  ;;  %v660_v17 = vunpack.c.l.bf16 %v667_v9  ;;  %v665_v27 = vunpack.c.h.bf16 %v668_v6  ;;  %v661_v37 = vunpack.c.h.bf16 %v667_v9 }
  0xf3   : > { %v678_v12 = vpop.f32.mrf.mxu0  ;;  %v682_v13 = vpop.f32.mrf.mxu1 }
  0xf4   : > { %v396_v14 = vadd.f32 %v678_v12, %v622_v7  ;;  %v412_v15 = vadd.f32 %v682_v13, %v622_v7 }
  0xf5   : > { %v387_v18 = vpop.f32.mrf.mxu0  ;;  %v403_v19 = vpop.f32.mrf.mxu1 }
  0xf6   : > { %v436_v20 = vadd.f32 %v656_v10, %v396_v14  ;;  %v440_v21 = vadd.f32 %v664_v11, %v412_v15  ;;  %v388_v22 = vadd.f32 %v622_v7, %v387_v18  ;;  %v404_v23 = vadd.f32 %v622_v7, %v403_v19 }
  0xf7   : > { %v679_v24 = vpop.f32.mrf.mxu0  ;;  %v683_v26 = vpop.f32.mrf.mxu1 }
  0xf8   : > { %v444_v28 = vmax.f32 %v436_v20, 0.0  ;;  %v448_v29 = vmax.f32 %v440_v21, 0.0  ;;  %v434_v30 = vadd.f32 %v652_v16, %v388_v22  ;;  %v438_v31 = vadd.f32 %v660_v17, %v404_v23 }
  0xf9   : > { %v399_v32 = vadd.f32 %v679_v24, %v622_v7  ;;  %v415_v33 = vadd.f32 %v683_v26, %v622_v7  ;;  %v390_v34 = vpop.f32.mrf.mxu0  ;;  %v406_v36 = vpop.f32.mrf.mxu1 }
  0xfa   : > { %v644_v38 = vpack.c.bf16 %v444_v28, %v444_v28  ;;  %v648_v39 = vpack.c.bf16 %v448_v29, %v448_v29  ;;  %v442_v40 = vmax.f32 %v434_v30, 0.0  ;;  %v446_v41 = vmax.f32 %v438_v31, 0.0 }
  0xfb   : > { %v437_v42 = vadd.f32 %v657_v25, %v399_v32  ;;  %v441_v43 = vadd.f32 %v665_v27, %v415_v33  ;;  %v391_v44 = vadd.f32 %v622_v7, %v390_v34  ;;  %v407_v45 = vadd.f32 %v622_v7, %v406_v36 }
  0xfc   : > { %485 = vst.msk [vmem:[%s931_s23 + $0x8] sm:$0xf] %vm482_vm1, %v644_v38  ;;  %489 = vst.msk [vmem:[%s931_s23 + $0x18] sm:$0xf] %vm482_vm1, %v648_v39  ;;  %v642_v46 = vpack.c.bf16 %v442_v40, %v442_v40  ;;  %v646_v47 = vpack.c.bf16 %v446_v41, %v446_v41 }
  0xfd   : > { %v445_v48 = vmax.f32 %v437_v42, 0.0  ;;  %v449_v49 = vmax.f32 %v441_v43, 0.0  ;;  %v435_v50 = vadd.f32 %v653_v35, %v391_v44  ;;  %v439_v51 = vadd.f32 %v661_v37, %v407_v45 }
  0xfe   : > { %483 = vst.msk [vmem:[%s931_s23] sm:$0xf] %vm482_vm1, %v642_v46  ;;  %487 = vst.msk [vmem:[%s931_s23 + $0x10] sm:$0xf] %vm482_vm1, %v646_v47 }
  0xff   : > { %v645_v52 = vpack.c.bf16 %v445_v48, %v445_v48  ;;  %v649_v53 = vpack.c.bf16 %v449_v49, %v449_v49  ;;  %v443_v54 = vmax.f32 %v435_v50, 0.0  ;;  %v447_v55 = vmax.f32 %v439_v51, 0.0 }
 0x101   : > { %486 = vst.msk [vmem:[%s931_s23 + $0xc] sm:$0xf] %vm482_vm1, %v645_v52  ;;  %490 = vst.msk [vmem:[%s931_s23 + $0x1c] sm:$0xf] %vm482_vm1, %v649_v53  ;;  %v643_v56 = vpack.c.bf16 %v443_v54, %v443_v54  ;;  %v647_v57 = vpack.c.bf16 %v447_v55, %v447_v55 }
 0x103   : > { %484 = vst.msk [vmem:[%s931_s23 + $0x4] sm:$0xf] %vm482_vm1, %v643_v56  ;;  %488 = vst.msk [vmem:[%s931_s23 + $0x14] sm:$0xf] %vm482_vm1, %v647_v57 }
 0x104 PF: > { %s16_s17 = sadd.s32 1, %s820_s17   ;;  %s966_s15 = smov %s816_s16 }
 0x105   : > { %p13_p3 = scmp.ge.s32.totalorder %s16_s17, 4   ;;  %s967_s16 = smov %s969_s19 }
 0x107   :  { %15 = sbr.rel (!%p13_p3) target bundleno = 3 (0x3), region = 80 }
 0x10c   :  { %519 = vsyncpa [#allocation3], 1 }
 0x10d   :  { %521 = vsyncpa [#allocation3 + $0x1], 1 }
 0x10e   :  { %522 = vsyncpa [#allocation5], 1 }

// kernel: encoder_cnn_forward.73
= control target key start
LH: loop header
LB: loop body
LE: loop exit
PB: predicated region body
PF: predicated region fallthrough
CT: control target
= control target key end

     0   :  { %8 = vsyncpa [#allocation3], 0  ;;  %s1222_s12 = smov 0   ;;  %s1224_s13 = smov 0   ;;  %s1377_s0 = inlined_call_operand.vmem [shape: bf16[2,1,10,10,16], index: 0, kind: input, shape index: {}]   ;;  %s1378_s1 = inlined_call_operand.vmem [shape: bf16[144,16], index: 1, kind: input, shape index: {}]   ;;  %s1379_s2 = inlined_call_operand.hbm [shape: f32[1,16], index: 2, kind: input, shape index: {}]   ;;  %s1380_s3 = inlined_call_operand.vmem [shape: bf16[2,8,8,16], index: 3, kind: output, shape index: {}]  }
   0x1   :  { %s1226_s14 = smov 0  }
   0x2 LB: > { %s951_s15 = sadd.s32 4294967295, %s1193_s14   ;;  %s33_s16 = sadd.s32 1, %s1189_s13  ;;  %s1193_s14 = sphi %s1226_s14, %s14_s14   ;;  %s1189_s13 = sphi %s1224_s13, %s1384_s13   ;;  %s1185_s12 = sphi %s1222_s12, %s1383_s12  }
   0x3   : > { %p35_p0 = scmp.ge.s32.totalorder %s33_s16, 2  ;;  %p953_p1 = scmp.ge.s32.totalorder %s1193_s14, 1 }
   0x4   : > { %p146_p2 = scmp.lt.s32.totalorder %s1193_s14, 3  ;;  %p1247_p4 = scmp.eq.s32.totalorder %s951_s15, 0 }
   0x5   : > { %s1386_s16 = smov (%p35_p0, %s33_s16), 0  ;;  %s1199_s19 = smov [#allocation2]  }
   0x6   : > { %p1243_p3 = pnand %p953_p1, %p146_p2  ;;  %s168_s20 = sshll.u32 %s1199_s19, 4  ;;  %s169_s20 = int_to_ptr.vmem [resolvable:$true] %s168_s20 }
   0x7   : > { %s1148_s21 = scalar_lea.vmem %s169_s20, 16  ;;  %s1155_s22 = scalar_lea.vmem %s169_s20, 32 }
   0x8   : > { %p1081_p5 = pneg %p1243_p3  ;;  %p1149_p8 = scmp.ne.s32.totalorder %s169_s20, %s1148_s21 }
   0x9   : > { %p1156_p11 = scmp.lt.s32.totalorder %s169_s20, %s169_s20  ;;  %p1157_p12 = scmp.lt.s32.totalorder %s1155_s22, %s1148_s21 }
   0xa   : > { %p1082_p6 = pnand %p1247_p4, %p1081_p5 }
   0xb   : > { %p1158_p13 = por %p1157_p12, %p1156_p11 }
   0xc   : > { %p1139_p7 = pneg %p1082_p6 }
   0xe   : > { %p1151_p9 = pnand %p1149_p8, %p1139_p7 }
  0x10   : > { %p1152_p10 = pneg %p1151_p9 }
  0x12   : > { %p1159_p0 = pnand %p1158_p13, %p1152_p10 }
  0x14   : > { %1162 = shalt.err (!%p1159_p0)
}
  0x15   : > { %1084 = dma.hbm_to_vmem [thread:$0]  (!%p1082_p6), %s1379_s2, 16, %s169_s20, [#allocation3]  }
  0x16   : > { %189 = sbr.rel (%p1243_p3) target bundleno = 272 (0x110), region = 32 }
  0x1b   : > { %1180 = dma.done.wait (%p1247_p4), [#allocation3], 16  }
  0x1c   : > { %1182 = vsyncadd (%p1247_p4), [#allocation3], 4294967280  ;;  %p224_p1 = scmp.lt.s32.totalorder %s1185_s12, 1  ;;  %v1276_v0 = vld [vmem:[#allocation2] ss:$0 sm:$0xff]  ;;  %s1278_s6 = smov 0  }
  0x1e   : > { %s1388_s12 = smov (!%p224_p1, %s1185_s12), 1 }
  0x1f   : > { %s1076_s25 = smul.u32 80, %s1388_s12  ;;  %s1002_s26 = sshll.u32 %s1388_s12, 5 }
  0x20   : > { %s1269_s29 = scalar_lea.vmem %s1380_s3, %s1002_s26 }
  0x21   : > { %s1274_s5 = scalar_lea.vmem %s1377_s0, %s1076_s25 }
  0x22 LB: >> { %v1122_v1 = vld [vmem:[%s1378_s1] sm:$0xff]   ;;  %v1200_v2 = vmov 0.0   ;;  %vm274_vm0 = vcmask 130048   ;;  %vm1201_vm1 = vmmov 0   ;;  %s1003_s9 = sshll.u32 %s1197_s6, 3  ;;  %v1123_v3 = vld [vmem:[%s1378_s1 + $0x10] sm:$0xff]   ;;  %s1197_s6 = sphi %s1278_s6, %s254_s6  }
  0x23   : >> { %1022 = vmatprep.subr.bf16.mxu0 %v1200_v2  ;;  %1028 = vmatprep.subr.bf16.mxu1 %v1200_v2  ;;  %s1295_s12 = scalar_lea.vmem %s1274_s5, %s1003_s9  ;;  %v1124_v4 = vld [vmem:[%s1378_s1 + $0x8] sm:$0xff]   ;;  %v1126_v13 = vld [vmem:[%s1378_s1 + $0x18] sm:$0xff]   ;;  %v1128_v19 = vld [vmem:[%s1378_s1 + $0x20] sm:$0xff]   ;;  %s999_s4 = sshll.u32 %s1197_s6, 2  ;;  %vm805_vm2 = vcmask 125952  }
  0x24   : >> { %1023 = vmatpush3.bf16.msra.mxu0 %v1122_v1  ;;  %1024 = vmatprep.mubr.msk.bf16.mxu0 %vm1201_vm1, %v1200_v2  ;;  %v259_v5 = vld [vmem:[%s1295_s12] sm:$0xf]  ;;  %v319_v7 = vld [vmem:[%s1295_s12 + $0x4] sm:$0x1]  ;;  %v977_v14 = vld [vmem:[%s1295_s12 + $0x8] sm:$0xf]  ;;  %s804_s7 = scalar_lea.vmem %s1269_s29, %s999_s4 }
  0x25   : >> { %1034 = vmatprep.subr.bf16.mxu0 %v1200_v2  ;;  %1030 = vmatprep.mubr.msk.bf16.mxu1 %vm1201_vm1, %v1200_v2  ;;  %v318_v6 = vld [vmem:[%s1295_s12] sm:$0xf]  ;;  %v978_v15 = vld [vmem:[%s1295_s12 + $0xc] sm:$0x1]  ;;  %v974_v24 = vld [vmem:[%s1295_s12 + $0x8] sm:$0xf] }
  0x26   : >> { %1029 = vmatpush3.bf16.msra.mxu1 %v1124_v4  ;;  %v967_v8 = vcombine.low %v318_v6, %v319_v7  ;;  %v384_v9 = vld [vmem:[%s1295_s12] sm:$0xe]  ;;  %v979_v18 = vcombine.low %v977_v14, %v978_v15  ;;  %v1129_v25 = vld [vmem:[%s1378_s1 + $0x28] sm:$0xff]   ;;  %v1131_v27 = vld [vmem:[%s1378_s1 + $0x30] sm:$0xff]   ;;  %s254_s6 = sadd.s32 1, %s1197_s6  }
  0x27   : >> { %1025 = vmatmul.mubr.msk.bf16.vlgmr.msra.gmra.mxu0 %vm274_vm0, %v259_v5  ;;  %1040 = vmatprep.subr.bf16.mxu1 %v1200_v2  ;;  %v970_v10 = vcombine.low %v384_v9, %v319_v7  ;;  %v982_v28 = vld [vmem:[%s1295_s12 + $0x8] sm:$0xe]  ;;  %v990_v29 = vld [vmem:[%s1295_s12 + $0x10] sm:$0xf]  ;;  %v991_v30 = vld [vmem:[%s1295_s12 + $0x14] sm:$0x1] }
  0x28   : >> { %1035 = vmatpush3.bf16.msra.mxu0 %v1123_v3  ;;  %v328_v11 = vshrl.u32 %v967_v8, 16  ;;  %v330_v12 = vshll.u32 %v967_v8, 16  ;;  %1036 = vmatprep.mubr.msk.bf16.mxu0 %vm1201_vm1, %v1200_v2  ;;  %v510_v21 = vshll.u32 %v979_v18, 16  ;;  %v508_v22 = vshrl.u32 %v979_v18, 16  ;;  %v1133_v34 = vld [vmem:[%s1378_s1 + $0x38] sm:$0xff]   ;;  %v1134_v37 = vld [vmem:[%s1378_s1 + $0x40] sm:$0xff]  }
  0x29   : >> { %1046 = vmatprep.subr.bf16.mxu0 %v1200_v2  ;;  %v390_v17 = vrot.slane %v970_v10, 1  ;;  %v983_v31 = vcombine.low %v982_v28, %v978_v15  ;;  %v992_v32 = vcombine.low %v990_v29, %v991_v30  ;;  %v987_v36 = vld [vmem:[%s1295_s12 + $0x10] sm:$0xf]  ;;  %p251_p2 = scmp.ge.s32.totalorder %s254_s6, 8  }
  0x2a   : >> { %v332_v16 = vrot.slane %v330_v12, 1  ;;  %v512_v23 = vrot.slane %v510_v21, 1  ;;  %v995_v38 = vld [vmem:[%s1295_s12 + $0x10] sm:$0xe] }
  0x2b   : >> { %v570_v33 = vrot.slane %v983_v31, 1  ;;  %v690_v35 = vshll.u32 %v992_v32, 16  ;;  %v688_v39 = vshrl.u32 %v992_v32, 16  ;;  %v996_v41 = vcombine.low %v995_v38, %v991_v30 }
  0x2c   : >> { %v333_v20 = vor.u32 %v332_v16, %v328_v11  ;;  %v513_v26 = vor.u32 %v512_v23, %v508_v22 }
  0x2d   : >> { %v692_v40 = vrot.slane %v690_v35, 1  ;;  %v750_v43 = vrot.slane %v996_v41, 1 }
  0x2e   : >> { %1031 = vmatmul.mubr.msk.bf16.vlgmr.msra.gmra.mxu1 %vm274_vm0, %v333_v20 }
  0x2f   : >> { %1037 = vmatmul.mubr.msk.bf16.vlgmr.msra.gmra.mxu0 %vm274_vm0, %v390_v17  ;;  %1041 = vmatpush3.bf16.msra.mxu1 %v1126_v13  ;;  %v693_v42 = vor.u32 %v692_v40, %v688_v39 }
  0x30   : >> { %1047 = vmatpush3.bf16.msra.mxu0 %v1128_v19  ;;  %1042 = vmatprep.mubr.msk.bf16.mxu1 %vm1201_vm1, %v1200_v2 }
  0x31   : >> { %1052 = vmatprep.subr.bf16.mxu1 %v1200_v2  ;;  %1048 = vmatprep.mubr.msk.bf16.mxu0 %vm1201_vm1, %v1200_v2 }
  0x32   : >> { %1058 = vmatprep.subr.bf16.mxu0 %v1200_v2 }
  0x36   : >> { %1043 = vmatmul.mubr.msk.bf16.vlgmr.msra.gmra.mxu1 %vm274_vm0, %v974_v24 }
  0x37   : >> { %1049 = vmatmul.mubr.msk.bf16.vlgmr.msra.gmra.mxu0 %vm274_vm0, %v513_v26  ;;  %1053 = vmatpush3.bf16.msra.mxu1 %v1129_v25 }
  0x38   : >> { %1059 = vmatpush3.bf16.msra.mxu0 %v1131_v27  ;;  %1054 = vmatprep.mubr.msk.bf16.mxu1 %vm1201_vm1, %v1200_v2 }
  0x39   : >> { %1064 = vmatprep.subr.bf16.mxu1 %v1200_v2  ;;  %1060 = vmatprep.mubr.msk.bf16.mxu0 %vm1201_vm1, %v1200_v2 }
  0x3a   : >> { %1070 = vmatprep.subr.bf16.mxu0 %v1200_v2 }
  0x3e   : >> { %1055 = vmatmul.mubr.msk.bf16.vlgmr.msra.gmra.mxu1 %vm274_vm0, %v570_v33 }
  0x3f   : >> { %1061 = vmatmul.mubr.msk.bf16.vlgmr.msra.gmra.mxu0 %vm274_vm0, %v987_v36  ;;  %1065 = vmatpush3.bf16.msra.mxu1 %v1133_v34 }
  0x40   : >> { %1071 = vmatpush3.bf16.msra.mxu0 %v1134_v37  ;;  %1066 = vmatprep.mubr.msk.bf16.mxu1 %vm1201_vm1, %v1200_v2 }
  0x41   : >> { %1072 = vmatprep.mubr.msk.bf16.mxu0 %vm1201_vm1, %v1200_v2 }
  0x46   : >> { %1067 = vmatmul.mubr.msk.bf16.vlgmr.msra.gmra.mxu1 %vm274_vm0, %v693_v42 }
  0x47   : >> { %1073 = vmatmul.mubr.msk.bf16.vlgmr.msra.gmra.mxu0 %vm274_vm0, %v750_v43 }
  0xe7   : >> { %v312_v44 = vpop.f32.mrf.mxu0 }
  0xe8   : >> { %v313_v54 = vadd.f32 %v1276_v0, %v312_v44 }
  0xe9   : >> { %v1026_v45 = vpop.f32.mrf.mxu0 }
  0xeb   : >> { %v315_v46 = vpop.f32.mrf.mxu0 }
  0xed   : >> { %v1027_v47 = vpop.f32.mrf.mxu0 }
  0xee   : >> { %v377_v48 = vpop.f32.mrf.mxu1 }
  0xef   : >> { %v434_v49 = vpop.f32.mrf.mxu0  ;;  %v383_v57 = vadd.f32 %v377_v48, %v313_v54 }
  0xf0   : >> { %v1032_v50 = vpop.f32.mrf.mxu1 }
  0xf1   : >> { %v1038_v51 = vpop.f32.mrf.mxu0  ;;  %v440_v62 = vadd.f32 %v434_v49, %v383_v57 }
  0xf2   : >> { %v380_v52 = vpop.f32.mrf.mxu1 }
  0xf3   : >> { %v437_v53 = vpop.f32.mrf.mxu0 }
  0xf4   : >> { %v1033_v55 = vpop.f32.mrf.mxu1 }
  0xf5   : >> { %v1039_v56 = vpop.f32.mrf.mxu0 }
  0xf6   : >> { %v491_v58 = vpop.f32.mrf.mxu1 }
  0xf7   : >> { %v557_v59 = vpop.f32.mrf.mxu0  ;;  %v497_v2 = vadd.f32 %v491_v58, %v440_v62 }
  0xf8   : >> { %v1044_v60 = vpop.f32.mrf.mxu1 }
  0xf9   : >> { %v1050_v61 = vpop.f32.mrf.mxu0  ;;  %v563_v7 = vadd.f32 %v557_v59, %v497_v2 }
  0xfa   : >> { %v494_v63 = vpop.f32.mrf.mxu1 }
  0xfb   : >> { %v560_v1 = vpop.f32.mrf.mxu0 }
  0xfc   : >> { %v1045_v3 = vpop.f32.mrf.mxu1 }
  0xfd   : >> { %v1051_v4 = vpop.f32.mrf.mxu0 }
  0xfe   : >> { %v614_v5 = vpop.f32.mrf.mxu1 }
  0xff   : >> { %v671_v6 = vpop.f32.mrf.mxu0  ;;  %v620_v10 = vadd.f32 %v614_v5, %v563_v7 }
 0x100   : >> { %v1056_v8 = vpop.f32.mrf.mxu1 }
 0x101   : >> { %v1062_v9 = vpop.f32.mrf.mxu0  ;;  %v677_v15 = vadd.f32 %v671_v6, %v620_v10 }
 0x102   : >> { %v617_v11 = vpop.f32.mrf.mxu1 }
 0x103   : >> { %v674_v12 = vpop.f32.mrf.mxu0 }
 0x104   : >> { %v1057_v13 = vpop.f32.mrf.mxu1 }
 0x105   : >> { %v1063_v14 = vpop.f32.mrf.mxu0 }
 0x106   : >> { %v737_v16 = vpop.f32.mrf.mxu1 }
 0x107   : >> { %v794_v17 = vpop.f32.mrf.mxu0  ;;  %v743_v18 = vadd.f32 %v737_v16, %v677_v15 }
 0x108   : >> { %v1068_v19 = vpop.f32.mrf.mxu1 }
 0x109   : >> { %v1074_v20 = vpop.f32.mrf.mxu0  ;;  %v800_v21 = vadd.f32 %v794_v17, %v743_v18 }
 0x10a   : >> { %v740_v22 = vpop.f32.mrf.mxu1 }
 0x10b   : >> { %v797_v23 = vpop.f32.mrf.mxu0  ;;  %v801_v24 = vmax.f32 %v800_v21, 0.0  ;;  %253 = sbr.rel (!%p251_p2) target bundleno = 34 (0x22), region = 82 }
 0x10c   : >> { %v1069_v25 = vpop.f32.mrf.mxu1 }
 0x10d   : >> { %v1075_v26 = vpop.f32.mrf.mxu0  ;;  %v802_v27 = vpack.c.bf16 %v801_v24, %v801_v24 }
 0x10f   : >> { %806 = vst.msk [vmem:[%s804_s7] sm:$0xf] %vm805_vm2, %v802_v27 }
 0x110 PF: > { %s14_s14 = sadd.s32 1, %s1193_s14   ;;  %s1383_s12 = smov %s1189_s13 }
 0x111   : > { %p11_p3 = scmp.ge.s32.totalorder %s14_s14, 4   ;;  %s1384_s13 = smov %s1386_s16 }
 0x113   :  { %13 = sbr.rel (!%p11_p3) target bundleno = 2 (0x2), region = 93 }
 0x118   :  { %843 = vsyncpa [#allocation3], 1 }
 0x119   :  { %845 = vsyncpa [#allocation3 + $0x1], 1 }

// kernel: encoder_cnn_forward.81
= control target key start
LH: loop header
LB: loop body
LE: loop exit
PB: predicated region body
PF: predicated region fallthrough
CT: control target
= control target key end

     0   :  { %8 = vsyncpa [#allocation3], 0  ;;  %s723_s12 = smov 0   ;;  %s725_s13 = smov 0   ;;  %s822_s0 = inlined_call_operand.vmem [shape: bf16[128,64], index: 0, kind: input, shape index: {}]   ;;  %s823_s1 = inlined_call_operand.vmem [shape: bf16[64,32], index: 1, kind: input, shape index: {}]   ;;  %s824_s2 = inlined_call_operand.hbm [shape: f32[1,32], index: 2, kind: input, shape index: {}]   ;;  %s825_s3 = inlined_call_operand.vmem [shape: bf16[128,32], index: 3, kind: output, shape index: {}]  }
   0x1   :  { %s727_s14 = smov 0  }
   0x2 LB: > { %s530_s15 = sadd.s32 4294967295, %s700_s14   ;;  %s26_s16 = sadd.s32 1, %s696_s13  ;;  %s700_s14 = sphi %s727_s14, %s14_s14   ;;  %s696_s13 = sphi %s725_s13, %s829_s13   ;;  %s692_s12 = sphi %s723_s12, %s828_s12  }
   0x3   : > { %p28_p0 = scmp.ge.s32.totalorder %s26_s16, 2  ;;  %p532_p1 = scmp.ge.s32.totalorder %s700_s14, 1 }
   0x4   : > { %p137_p2 = scmp.lt.s32.totalorder %s700_s14, 3  ;;  %p748_p4 = scmp.eq.s32.totalorder %s530_s15, 0 }
   0x5   : > { %s831_s16 = smov (%p28_p0, %s26_s16), 0  ;;  %s702_s19 = smov [#allocation2]  }
   0x6   : > { %p744_p3 = pnand %p532_p1, %p137_p2  ;;  %s159_s20 = sshll.u32 %s702_s19, 4  ;;  %s160_s20 = int_to_ptr.vmem [resolvable:$true] %s159_s20 }
   0x7   : > { %s659_s21 = scalar_lea.vmem %s160_s20, 16  ;;  %s666_s22 = scalar_lea.vmem %s160_s20, 32 }
   0x8   : > { %p609_p5 = pneg %p744_p3  ;;  %p660_p8 = scmp.ne.s32.totalorder %s160_s20, %s659_s21 }
   0x9   : > { %p667_p11 = scmp.lt.s32.totalorder %s160_s20, %s160_s20  ;;  %p668_p12 = scmp.lt.s32.totalorder %s666_s22, %s659_s21 }
   0xa   : > { %p610_p6 = pnand %p748_p4, %p609_p5 }
   0xb   : > { %p669_p13 = por %p668_p12, %p667_p11 }
   0xc   : > { %p650_p7 = pneg %p610_p6 }
   0xe   : > { %p662_p9 = pnand %p660_p8, %p650_p7 }
  0x10   : > { %p663_p10 = pneg %p662_p9 }
  0x12   : > { %p670_p0 = pnand %p669_p13, %p663_p10 }
  0x14   : > { %673 = shalt.err (!%p670_p0)
}
  0x15   : > { %612 = dma.hbm_to_vmem [thread:$0]  (!%p610_p6), %s824_s2, 16, %s160_s20, [#allocation3]  }
  0x16   : > { %181 = sbr.rel (%p744_p3) target bundleno = 252 (0xfc), region = 32 }
  0x1b   : > { %687 = dma.done.wait (%p748_p4), [#allocation3], 16  }
  0x1c   : > { %689 = vsyncadd (%p748_p4), [#allocation3], 4294967280  ;;  %s538_s25 = sshll.u32 %s692_s12, 3  ;;  %v640_v0 = vld [vmem:[%s823_s1 + $0x18] sm:$0xff]   ;;  %v641_v1 = vld [vmem:[%s823_s1 + $0x10] sm:$0xff]   ;;  %vm299_vm0 = vcmask 523264  }
  0x1d   : > { %p213_p1 = scmp.lt.s32.totalorder %s538_s25, 15  ;;  %581 = vmatprep.subr.bf16.mxu0 %v640_v0  ;;  %597 = vmatprep.subr.bf16.mxu1 %v640_v0  ;;  %v642_v2 = vld [vmem:[%s823_s1 + $0x8] sm:$0xff]   ;;  %v643_v5 = vld [vmem:[%s823_s1] sm:$0xff]   ;;  %vm417_vm1 = vcmask 257024  }
  0x1e   : > { %582 = vmatpush3.bf16.msra.mxu0 %v640_v0  ;;  %601 = vmatpush3.bf16.msra.mxu1 %v640_v0  ;;  %v542_v8 = vld [vmem:[#allocation2] ss:$0 sm:$0xff] }
  0x1f   : > { %s833_s25 = smov (!%p213_p1, %s538_s25), 15  ;;  %583 = vmatprep.subr.bf16.mxu0 %v641_v1  ;;  %598 = vmatprep.subr.bf16.mxu1 %v641_v1 }
  0x20   : > { %s539_s26 = sshll.u32 %s833_s25, 2 }
  0x21   : > { %s216_s6 = scalar_lea.vmem %s822_s0, %s539_s26  ;;  %s795_s15 = scalar_lea.vmem %s825_s3, %s539_s26 }
  0x22   : > { %v644_v3 = vld [vmem:[%s216_s6] sm:$0xff]   ;;  %v645_v4 = vld [vmem:[%s216_s6 + $0x10] sm:$0xff]   ;;  %584 = vmatpush3.bf16.msra.mxu0 %v641_v1  ;;  %602 = vmatpush3.bf16.msra.mxu1 %v641_v1  ;;  %v646_v6 = vld [vmem:[%s216_s6 + $0x8] sm:$0xff]  }
  0x23   : > { %589 = vmatprep.mubr.msk.bf16.mxu0 %vm299_vm0, %v644_v3  ;;  %585 = vmatprep.subr.bf16.mxu0 %v642_v2  ;;  %v647_v7 = vld [vmem:[%s216_s6 + $0x18] sm:$0xff]  }
  0x24   : > { %599 = vmatprep.subr.bf16.mxu1 %v642_v2  ;;  %593 = vmatprep.mubr.msk.bf16.mxu1 %vm299_vm0, %v645_v4 }
  0x26   : > { %586 = vmatpush3.bf16.msra.mxu0 %v642_v2  ;;  %603 = vmatpush3.bf16.msra.mxu1 %v642_v2 }
  0x27   : > { %587 = vmatprep.subr.bf16.mxu0 %v643_v5  ;;  %600 = vmatprep.subr.bf16.mxu1 %v643_v5 }
  0x2a   : > { %588 = vmatpush3.bf16.msra.mxu0 %v643_v5  ;;  %604 = vmatpush3.bf16.msra.mxu1 %v643_v5 }
  0x2d   : > { %590 = vmatmul.mubr.msk.bf16.vlgmr.msra.gmra.mxu0 %vm299_vm0, %v646_v6  ;;  %594 = vmatmul.mubr.msk.bf16.vlgmr.msra.gmra.mxu1 %vm299_vm0, %v647_v7 }
  0xed   : > { %v591_v9 = vpop.f32.mrf.mxu0  ;;  %v595_v10 = vpop.f32.mrf.mxu1 }
  0xee   : > { %v355_v11 = vadd.f32 %v591_v9, %v542_v8  ;;  %v371_v12 = vadd.f32 %v595_v10, %v542_v8 }
  0xef   : > { %v346_v13 = vpop.f32.mrf.mxu0  ;;  %v362_v14 = vpop.f32.mrf.mxu1 }
  0xf0   : > { %v379_v15 = vmax.f32 %v355_v11, 0.0  ;;  %v383_v16 = vmax.f32 %v371_v12, 0.0  ;;  %v347_v17 = vadd.f32 %v542_v8, %v346_v13  ;;  %v363_v18 = vadd.f32 %v542_v8, %v362_v14 }
  0xf1   : > { %v592_v19 = vpop.f32.mrf.mxu0  ;;  %v596_v20 = vpop.f32.mrf.mxu1 }
  0xf2   : > { %v567_v21 = vpack.c.bf16 %v379_v15, %v379_v15  ;;  %v571_v22 = vpack.c.bf16 %v383_v16, %v383_v16  ;;  %v377_v23 = vmax.f32 %v347_v17, 0.0  ;;  %v381_v24 = vmax.f32 %v363_v18, 0.0 }
  0xf3   : > { %v358_v25 = vadd.f32 %v592_v19, %v542_v8  ;;  %v374_v26 = vadd.f32 %v596_v20, %v542_v8  ;;  %v349_v27 = vpop.f32.mrf.mxu0  ;;  %v365_v28 = vpop.f32.mrf.mxu1 }
  0xf4   : > { %420 = vst.msk [vmem:[%s795_s15 + $0x8] sm:$0xf] %vm417_vm1, %v567_v21  ;;  %424 = vst.msk [vmem:[%s795_s15 + $0x18] sm:$0xf] %vm417_vm1, %v571_v22  ;;  %v565_v29 = vpack.c.bf16 %v377_v23, %v377_v23  ;;  %v569_v30 = vpack.c.bf16 %v381_v24, %v381_v24  ;;  %v350_v31 = vadd.f32 %v542_v8, %v349_v27 }
  0xf5   : > { %v366_v32 = vadd.f32 %v542_v8, %v365_v28  ;;  %v380_v33 = vmax.f32 %v358_v25, 0.0  ;;  %v384_v34 = vmax.f32 %v374_v26, 0.0 }
  0xf6   : > { %418 = vst.msk [vmem:[%s795_s15] sm:$0xf] %vm417_vm1, %v565_v29  ;;  %422 = vst.msk [vmem:[%s795_s15 + $0x10] sm:$0xf] %vm417_vm1, %v569_v30  ;;  %v378_v35 = vmax.f32 %v350_v31, 0.0 }
  0xf7   : > { %v382_v36 = vmax.f32 %v366_v32, 0.0  ;;  %v568_v37 = vpack.c.bf16 %v380_v33, %v380_v33  ;;  %v572_v38 = vpack.c.bf16 %v384_v34, %v384_v34 }
  0xf8   : > { %v566_v39 = vpack.c.bf16 %v378_v35, %v378_v35 }
  0xf9   : > { %v570_v40 = vpack.c.bf16 %v382_v36, %v382_v36  ;;  %421 = vst.msk [vmem:[%s795_s15 + $0xc] sm:$0xf] %vm417_vm1, %v568_v37  ;;  %425 = vst.msk [vmem:[%s795_s15 + $0x1c] sm:$0xf] %vm417_vm1, %v572_v38 }
  0xfa   : > { %419 = vst.msk [vmem:[%s795_s15 + $0x4] sm:$0xf] %vm417_vm1, %v566_v39 }
  0xfb   : > { %423 = vst.msk [vmem:[%s795_s15 + $0x14] sm:$0xf] %vm417_vm1, %v570_v40 }
  0xfc PF: > { %s14_s14 = sadd.s32 1, %s700_s14   ;;  %s828_s12 = smov %s696_s13 }
  0xfd   : > { %p11_p2 = scmp.ge.s32.totalorder %s14_s14, 4   ;;  %s829_s13 = smov %s831_s16 }
  0xff   :  { %13 = sbr.rel (!%p11_p2) target bundleno = 2 (0x2), region = 71 }
 0x104   :  { %454 = vsyncpa [#allocation3], 1 }
 0x105   :  { %456 = vsyncpa [#allocation3 + $0x1], 1 }

// kernel: encoder_cnn_forward.83
= control target key start
LH: loop header
LB: loop body
LE: loop exit
PB: predicated region body
PF: predicated region fallthrough
CT: control target
= control target key end

     0   :  { %8 = vsyncpa [#allocation3], 0  ;;  %s603_s12 = smov 0   ;;  %s605_s13 = smov 0   ;;  %s673_s0 = inlined_call_operand.vmem [shape: bf16[32,64], index: 0, kind: input, shape index: {}]   ;;  %s674_s1 = inlined_call_operand.vmem [shape: bf16[64,128], index: 1, kind: input, shape index: {}]   ;;  %s675_s2 = inlined_call_operand.hbm [shape: f32[1,128], index: 2, kind: input, shape index: {}]   ;;  %s676_s3 = inlined_call_operand.vmem [shape: bf16[32,128], index: 3, kind: output, shape index: {}]  }
   0x1   :  { %s607_s14 = smov 0  }
   0x2 LB: > { %s437_s15 = sadd.s32 4294967295, %s578_s14   ;;  %s26_s16 = sadd.s32 1, %s574_s13  ;;  %s578_s14 = sphi %s607_s14, %s14_s14   ;;  %s574_s13 = sphi %s605_s13, %s680_s13   ;;  %s570_s12 = sphi %s603_s12, %s679_s12  }
   0x3   : > { %p28_p0 = scmp.ge.s32.totalorder %s26_s16, 2  ;;  %p439_p1 = scmp.ge.s32.totalorder %s578_s14, 1 }
   0x4   : > { %p137_p2 = scmp.lt.s32.totalorder %s578_s14, 3  ;;  %p628_p4 = scmp.eq.s32.totalorder %s437_s15, 0 }
   0x5   : > { %s682_s16 = smov (%p28_p0, %s26_s16), 0  ;;  %s580_s19 = smov [#allocation2]  }
   0x6   : > { %p624_p3 = pnand %p439_p1, %p137_p2  ;;  %s159_s20 = sshll.u32 %s580_s19, 4  ;;  %s160_s20 = int_to_ptr.vmem [resolvable:$true] %s159_s20 }
   0x7   : > { %s537_s21 = scalar_lea.vmem %s160_s20, 16  ;;  %s544_s22 = scalar_lea.vmem %s160_s20, 32 }
   0x8   : > { %p488_p5 = pneg %p624_p3  ;;  %p538_p8 = scmp.ne.s32.totalorder %s160_s20, %s537_s21 }
   0x9   : > { %p545_p11 = scmp.lt.s32.totalorder %s160_s20, %s160_s20  ;;  %p546_p12 = scmp.lt.s32.totalorder %s544_s22, %s537_s21 }
   0xa   : > { %p489_p6 = pnand %p628_p4, %p488_p5 }
   0xb   : > { %p547_p13 = por %p546_p12, %p545_p11 }
   0xc   : > { %p528_p7 = pneg %p489_p6 }
   0xe   : > { %p540_p9 = pnand %p538_p8, %p528_p7 }
  0x10   : > { %p541_p10 = pneg %p540_p9 }
  0x12   : > { %p548_p0 = pnand %p547_p13, %p541_p10 }
  0x14   : > { %551 = shalt.err (!%p548_p0)
}
  0x15   : > { %491 = dma.hbm_to_vmem [thread:$0]  (!%p489_p6), %s675_s2, 16, %s160_s20, [#allocation3]  }
  0x16   : > { %181 = sbr.rel (%p624_p3) target bundleno = 247 (0xf7), region = 32 }
  0x1b   : > { %565 = dma.done.wait (%p628_p4), [#allocation3], 16  }
  0x1c   : > { %567 = vsyncadd (%p628_p4), [#allocation3], 4294967280  ;;  %s445_s25 = sshll.u32 %s570_s12, 1  ;;  %v581_v0 = vmov 0.0   ;;  %vm582_vm0 = vmmov 0   ;;  %v521_v1 = vld [vmem:[%s674_s1 + $0x18] sm:$0xff]  }
  0x1d   : > { %472 = vmatprep.subr.bf16.mxu0 %v581_v0  ;;  %480 = vmatprep.mubr.msk.bf16.mxu0 %vm582_vm0, %v581_v0  ;;  %p213_p1 = scmp.lt.s32.totalorder %s445_s25, 3  ;;  %v522_v2 = vld [vmem:[%s674_s1 + $0x10] sm:$0xff]   ;;  %v523_v3 = vld [vmem:[%s674_s1 + $0x8] sm:$0xff]   ;;  %v524_v4 = vld [vmem:[%s674_s1] sm:$0xff]   ;;  %vm278_vm1 = vcmask 523264  }
  0x1e   : > { %473 = vmatpush3.bf16.msra.mxu0 %v521_v1  ;;  %v449_v7 = vld [vmem:[#allocation2] ss:$0 sm:$0xff] }
  0x1f   : > { %s684_s25 = smov (!%p213_p1, %s445_s25), 3  ;;  %474 = vmatprep.subr.bf16.mxu0 %v581_v0 }
  0x20   : > { %s446_s28 = sshll.u32 %s684_s25, 2 }
  0x21   : > { %s216_s6 = scalar_lea.vmem %s673_s0, %s446_s28  ;;  %s229_s15 = scalar_lea.vmem %s676_s3, %s446_s28 }
  0x22   : > { %475 = vmatpush3.bf16.msra.mxu0 %v522_v2  ;;  %v525_v5 = vld [vmem:[%s216_s6] sm:$0xff]  }
  0x23   : > { %476 = vmatprep.subr.bf16.mxu0 %v581_v0 }
  0x26   : > { %477 = vmatpush3.bf16.msra.mxu0 %v523_v3 }
  0x27   : > { %478 = vmatprep.subr.bf16.mxu0 %v581_v0 }
  0x2a   : > { %479 = vmatpush3.bf16.msra.mxu0 %v524_v4 }
  0x2d   : > { %481 = vmatmul.mubr.msk.bf16.vlgmr.msra.gmra.mxu0 %vm278_vm1, %v525_v5 }
  0xed   : > { %v316_v6 = vpop.f32.mrf.mxu0 }
  0xee   : > { %v317_v10 = vadd.f32 %v449_v7, %v316_v6 }
  0xef   : > { %v482_v8 = vpop.f32.mrf.mxu0 }
  0xf1   : > { %v319_v9 = vpop.f32.mrf.mxu0 }
  0xf2   : > { %v320_v11 = vadd.f32 %v449_v7, %v319_v9 }
  0xf3   : > { %v483_v12 = vpop.f32.mrf.mxu0 }
  0xf4   : > { %v465_v13 = vpack.c.bf16 %v320_v11, %v317_v10 }
  0xf6   : > { %466 = vst [vmem:[%s229_s15] sm:$0xff] %v465_v13  }
  0xf7 PF: > { %s14_s14 = sadd.s32 1, %s578_s14   ;;  %s679_s12 = smov %s574_s13 }
  0xf8   : > { %p11_p2 = scmp.ge.s32.totalorder %s14_s14, 4   ;;  %s680_s13 = smov %s682_s16 }
  0xfa   :  { %13 = sbr.rel (!%p11_p2) target bundleno = 2 (0x2), region = 71 }
  0xff   :  { %361 = vsyncpa [#allocation3], 1 }
 0x100   :  { %363 = vsyncpa [#allocation3 + $0x1], 1 }

// kernel: encoder_cnn_forward.82
= control target key start
LH: loop header
LB: loop body
LE: loop exit
PB: predicated region body
PF: predicated region fallthrough
CT: control target
= control target key end

     0   :  { %8 = vsyncpa [#allocation3], 0  ;;  %s1333_s12 = smov 0   ;;  %s1335_s13 = smov 0   ;;  %s1521_s0 = inlined_call_operand.vmem [shape: bf16[2,4,5,5,32], index: 0, kind: input, shape index: {}]   ;;  %s1522_s1 = inlined_call_operand.vmem [shape: bf16[288,32], index: 1, kind: input, shape index: {}]   ;;  %s1523_s2 = inlined_call_operand.hbm [shape: f32[1,32], index: 2, kind: input, shape index: {}]   ;;  %s1524_s3 = inlined_call_operand.vmem [shape: bf16[2,4,4,32], index: 3, kind: output, shape index: {}]  }
   0x1   :  { %s1337_s14 = smov 0  }
   0x2 LB: > { %s1023_s15 = sadd.s32 4294967295, %s1304_s14   ;;  %s33_s16 = sadd.s32 1, %s1300_s13  ;;  %s1304_s14 = sphi %s1337_s14, %s14_s14   ;;  %s1300_s13 = sphi %s1335_s13, %s1528_s13   ;;  %s1296_s12 = sphi %s1333_s12, %s1527_s12  }
   0x3   : > { %p35_p0 = scmp.ge.s32.totalorder %s33_s16, 2  ;;  %p1025_p1 = scmp.ge.s32.totalorder %s1304_s14, 1 }
   0x4   : > { %p146_p2 = scmp.lt.s32.totalorder %s1304_s14, 3  ;;  %p1358_p4 = scmp.eq.s32.totalorder %s1023_s15, 0 }
   0x5   : > { %s1530_s16 = smov (%p35_p0, %s33_s16), 0  ;;  %s1310_s19 = smov [#allocation2]  }
   0x6   : > { %p1354_p3 = pnand %p1025_p1, %p146_p2  ;;  %s168_s20 = sshll.u32 %s1310_s19, 4  ;;  %s169_s20 = int_to_ptr.vmem [resolvable:$true] %s168_s20 }
   0x7   : > { %s1259_s21 = scalar_lea.vmem %s169_s20, 16  ;;  %s1266_s22 = scalar_lea.vmem %s169_s20, 32 }
   0x8   : > { %p1186_p5 = pneg %p1354_p3  ;;  %p1260_p8 = scmp.ne.s32.totalorder %s169_s20, %s1259_s21 }
   0x9   : > { %p1267_p11 = scmp.lt.s32.totalorder %s169_s20, %s169_s20  ;;  %p1268_p12 = scmp.lt.s32.totalorder %s1266_s22, %s1259_s21 }
   0xa   : > { %p1187_p6 = pnand %p1358_p4, %p1186_p5 }
   0xb   : > { %p1269_p13 = por %p1268_p12, %p1267_p11 }
   0xc   : > { %p1250_p7 = pneg %p1187_p6 }
   0xe   : > { %p1262_p9 = pnand %p1260_p8, %p1250_p7 }
  0x10   : > { %p1263_p10 = pneg %p1262_p9 }
  0x12   : > { %p1270_p0 = pnand %p1269_p13, %p1263_p10 }
  0x14   : > { %1273 = shalt.err (!%p1270_p0)
}
  0x15   : > { %1189 = dma.hbm_to_vmem [thread:$0]  (!%p1187_p6), %s1523_s2, 16, %s169_s20, [#allocation3]  }
  0x16   : > { %189 = sbr.rel (%p1354_p3) target bundleno = 275 (0x113), region = 32 }
  0x1b   : > { %1291 = dma.done.wait (%p1358_p4), [#allocation3], 16  }
  0x1c   : > { %1293 = vsyncadd (%p1358_p4), [#allocation3], 4294967280  ;;  %p224_p1 = scmp.lt.s32.totalorder %s1296_s12, 1  ;;  %v1387_v0 = vld [vmem:[#allocation2] ss:$0 sm:$0xff]  ;;  %s1389_s6 = smov 0  }
  0x1e   : > { %s1532_s12 = smov (!%p224_p1, %s1296_s12), 1 }
  0x1f   : > { %s1181_s25 = smul.u32 80, %s1532_s12  ;;  %s1081_s26 = sshll.u32 %s1532_s12, 3 }
  0x20   : > { %s1380_s29 = scalar_lea.vmem %s1524_s3, %s1081_s26 }
  0x21   : > { %s1385_s5 = scalar_lea.vmem %s1521_s0, %s1181_s25 }
  0x22 LB: >> { %v1227_v1 = vld [vmem:[%s1522_s1 + $0x8] sm:$0xff]   ;;  %v1311_v2 = vmov 0.0   ;;  %v1228_v3 = vld [vmem:[%s1522_s1 + $0x18] sm:$0xff]   ;;  %v1229_v4 = vld [vmem:[%s1522_s1] sm:$0xff]   ;;  %vm1312_vm0 = vmmov 0   ;;  %s1034_s15 = sshll.u32 %s1308_s6, 2  ;;  %s1308_s6 = sphi %s1389_s6, %s254_s6  }
  0x23   : >> { %1109 = vmatprep.subr.bf16.mxu0 %v1311_v2  ;;  %1117 = vmatprep.subr.bf16.mxu1 %v1311_v2  ;;  %v1230_v5 = vld [vmem:[%s1522_s1 + $0x10] sm:$0xff]   ;;  %s1413_s19 = scalar_lea.vmem %s1385_s5, %s1034_s15  ;;  %vm281_vm1 = vcmask 261120   ;;  %v1231_v8 = vld [vmem:[%s1522_s1 + $0x28] sm:$0xff]   ;;  %v1232_v9 = vld [vmem:[%s1522_s1 + $0x38] sm:$0xff]   ;;  %vm862_vm2 = vcmask 254976  }
  0x24   : >> { %1110 = vmatpush3.bf16.msra.mxu0 %v1227_v1  ;;  %1113 = vmatprep.mubr.msk.bf16.mxu0 %vm1312_vm0, %v1311_v2  ;;  %v258_v6 = vld [vmem:[%s1413_s19] sm:$0x3]  ;;  %v1040_v7 = vld [vmem:[%s1413_s19 + $0x14] sm:$0x3]  ;;  %v1049_v16 = vld [vmem:[%s1413_s19 + $0x28] sm:$0x3] }
  0x25   : >> { %1118 = vmatpush3.bf16.msra.mxu1 %v1228_v3  ;;  %1111 = vmatprep.subr.bf16.mxu0 %v1311_v2  ;;  %v1233_v10 = vld [vmem:[%s1522_s1 + $0x20] sm:$0xff]   ;;  %v1234_v12 = vld [vmem:[%s1522_s1 + $0x30] sm:$0xff]   ;;  %v1236_v17 = vld [vmem:[%s1522_s1 + $0x48] sm:$0xff]  }
  0x26   : >> { %1119 = vmatprep.subr.bf16.mxu1 %v1311_v2  ;;  %1121 = vmatprep.mubr.msk.bf16.mxu1 %vm1312_vm0, %v1311_v2  ;;  %v1235_v11 = vld [vmem:[%s1413_s19] ss:$0 sps:$4 sm:$0x77]   ;;  %v1237_v18 = vld [vmem:[%s1522_s1 + $0x58] sm:$0xff]   ;;  %v1239_v25 = vld [vmem:[%s1522_s1 + $0x50] sm:$0xff]  }
  0x27   : >> { %v398_v13 = vshrl.u32 %v1235_v11, 16  ;;  %v400_v14 = vshll.u32 %v1235_v11, 16  ;;  %v1240_v19 = vld [vmem:[%s1413_s19 + $0x28] ss:$0 sps:$4 sm:$0x77]   ;;  %v1238_v22 = vld [vmem:[%s1522_s1 + $0x40] sm:$0xff]  }
  0x28   : >> { %1112 = vmatpush3.bf16.msra.mxu0 %v1229_v4  ;;  %v599_v21 = vshll.u32 %v1240_v19, 16  ;;  %v597_v23 = vshrl.u32 %v1240_v19, 16  ;;  %v1054_v26 = vld [vmem:[%s1413_s19 + $0x3c] sm:$0x3]  ;;  %v1241_v28 = vld [vmem:[%s1522_s1 + $0x68] sm:$0xff]   ;;  %v1243_v31 = vld [vmem:[%s1522_s1 + $0x60] sm:$0xff]  }
  0x29   : >> { %1120 = vmatpush3.bf16.msra.mxu1 %v1230_v5  ;;  %1125 = vmatprep.subr.bf16.mxu0 %v1311_v2  ;;  %v402_v15 = vrot.slane %v400_v14, 1  ;;  %v1242_v29 = vld [vmem:[%s1522_s1 + $0x78] sm:$0xff]   ;;  %v1247_v30 = vld [vmem:[%s1413_s19 + $0x4] ss:$0 sps:$4 sm:$0x77]   ;;  %v1244_v32 = vld [vmem:[%s1522_s1 + $0x70] sm:$0xff]  }
  0x2a   : >> { %1133 = vmatprep.subr.bf16.mxu1 %v1311_v2  ;;  %v601_v24 = vrot.slane %v599_v21, 1  ;;  %v798_v33 = vshll.u32 %v1247_v30, 16  ;;  %v1064_v34 = vld [vmem:[%s1413_s19 + $0x4] sm:$0x3]  ;;  %v1245_v35 = vld [vmem:[%s1522_s1 + $0x88] sm:$0xff]   ;;  %v796_v37 = vshrl.u32 %v1247_v30, 16 }
  0x2b   : >> { %1114 = vmatmul.mubr.msk.bf16.vlgmr.msra.gmra.mxu0 %vm281_vm1, %v258_v6  ;;  %v403_v20 = vor.u32 %v402_v15, %v398_v13  ;;  %v1069_v36 = vld [vmem:[%s1413_s19 + $0x18] sm:$0x3]  ;;  %v1246_v39 = vld [vmem:[%s1522_s1 + $0x80] sm:$0xff]   ;;  %s1078_s19 = sshll.u32 %s1308_s6, 1  ;;  %s254_s6 = sadd.s32 1, %s1308_s6  }
  0x2c   : >> { %1122 = vmatmul.mubr.msk.bf16.vlgmr.msra.gmra.mxu1 %vm281_vm1, %v1040_v7  ;;  %1126 = vmatpush3.bf16.msra.mxu0 %v1231_v8  ;;  %v602_v27 = vor.u32 %v601_v24, %v597_v23  ;;  %v800_v38 = vrot.slane %v798_v33, 1  ;;  %s861_s28 = scalar_lea.vmem %s1380_s29, %s1078_s19  ;;  %p251_p2 = scmp.ge.s32.totalorder %s254_s6, 4  }
  0x2d   : >> { %1134 = vmatpush3.bf16.msra.mxu1 %v1232_v9  ;;  %1127 = vmatprep.subr.bf16.mxu0 %v1311_v2 }
  0x2e   : >> { %1135 = vmatprep.subr.bf16.mxu1 %v1311_v2  ;;  %1129 = vmatprep.mubr.msk.bf16.mxu0 %vm1312_vm0, %v1311_v2  ;;  %v801_v40 = vor.u32 %v800_v38, %v796_v37 }
  0x2f   : >> { %1137 = vmatprep.mubr.msk.bf16.mxu1 %vm1312_vm0, %v1311_v2 }
  0x30   : >> { %1128 = vmatpush3.bf16.msra.mxu0 %v1233_v10 }
  0x31   : >> { %1136 = vmatpush3.bf16.msra.mxu1 %v1234_v12  ;;  %1141 = vmatprep.subr.bf16.mxu0 %v1311_v2 }
  0x32   : >> { %1149 = vmatprep.subr.bf16.mxu1 %v1311_v2 }
  0x33   : >> { %1130 = vmatmul.mubr.msk.bf16.vlgmr.msra.gmra.mxu0 %vm281_vm1, %v403_v20 }
  0x34   : >> { %1138 = vmatmul.mubr.msk.bf16.vlgmr.msra.gmra.mxu1 %vm281_vm1, %v1049_v16  ;;  %1142 = vmatpush3.bf16.msra.mxu0 %v1236_v17 }
  0x35   : >> { %1150 = vmatpush3.bf16.msra.mxu1 %v1237_v18  ;;  %1143 = vmatprep.subr.bf16.mxu0 %v1311_v2 }
  0x36   : >> { %1151 = vmatprep.subr.bf16.mxu1 %v1311_v2  ;;  %1145 = vmatprep.mubr.msk.bf16.mxu0 %vm1312_vm0, %v1311_v2 }
  0x37   : >> { %1153 = vmatprep.mubr.msk.bf16.mxu1 %vm1312_vm0, %v1311_v2 }
  0x38   : >> { %1144 = vmatpush3.bf16.msra.mxu0 %v1238_v22 }
  0x39   : >> { %1152 = vmatpush3.bf16.msra.mxu1 %v1239_v25  ;;  %1157 = vmatprep.subr.bf16.mxu0 %v1311_v2 }
  0x3a   : >> { %1165 = vmatprep.subr.bf16.mxu1 %v1311_v2 }
  0x3b   : >> { %1146 = vmatmul.mubr.msk.bf16.vlgmr.msra.gmra.mxu0 %vm281_vm1, %v1054_v26 }
  0x3c   : >> { %1154 = vmatmul.mubr.msk.bf16.vlgmr.msra.gmra.mxu1 %vm281_vm1, %v602_v27  ;;  %1158 = vmatpush3.bf16.msra.mxu0 %v1241_v28 }
  0x3d   : >> { %1166 = vmatpush3.bf16.msra.mxu1 %v1242_v29  ;;  %1159 = vmatprep.subr.bf16.mxu0 %v1311_v2 }
  0x3e   : >> { %1167 = vmatprep.subr.bf16.mxu1 %v1311_v2  ;;  %1161 = vmatprep.mubr.msk.bf16.mxu0 %vm1312_vm0, %v1311_v2 }
  0x3f   : >> { %1169 = vmatprep.mubr.msk.bf16.mxu1 %vm1312_vm0, %v1311_v2 }
  0x40   : >> { %1160 = vmatpush3.bf16.msra.mxu0 %v1243_v31 }
  0x41   : >> { %1168 = vmatpush3.bf16.msra.mxu1 %v1244_v32  ;;  %1173 = vmatprep.subr.bf16.mxu0 %v1311_v2 }
  0x43   : >> { %1162 = vmatmul.mubr.msk.bf16.vlgmr.msra.gmra.mxu0 %vm281_vm1, %v1064_v34 }
  0x44   : >> { %1170 = vmatmul.mubr.msk.bf16.vlgmr.msra.gmra.mxu1 %vm281_vm1, %v1069_v36  ;;  %1174 = vmatpush3.bf16.msra.mxu0 %v1245_v35 }
  0x45   : >> { %1175 = vmatprep.subr.bf16.mxu0 %v1311_v2  ;;  %1177 = vmatprep.mubr.msk.bf16.mxu0 %vm1312_vm0, %v1311_v2 }
  0x48   : >> { %1176 = vmatpush3.bf16.msra.mxu0 %v1246_v39 }
  0x4b   : >> { %1178 = vmatmul.mubr.msk.bf16.vlgmr.msra.gmra.mxu0 %vm281_vm1, %v801_v40 }
  0xeb   : >> { %v319_v41 = vpop.f32.mrf.mxu0 }
  0xec   : >> { %v382_v42 = vpop.f32.mrf.mxu1  ;;  %v320_v50 = vadd.f32 %v1387_v0, %v319_v41 }
  0xed   : >> { %v1115_v43 = vpop.f32.mrf.mxu0 }
  0xee   : >> { %v1123_v44 = vpop.f32.mrf.mxu1  ;;  %v388_v55 = vadd.f32 %v382_v42, %v320_v50 }
  0xef   : >> { %v322_v45 = vpop.f32.mrf.mxu0 }
  0xf0   : >> { %v385_v46 = vpop.f32.mrf.mxu1 }
  0xf1   : >> { %v1116_v47 = vpop.f32.mrf.mxu0 }
  0xf2   : >> { %v1124_v48 = vpop.f32.mrf.mxu1 }
  0xf3   : >> { %v453_v49 = vpop.f32.mrf.mxu0 }
  0xf4   : >> { %v517_v51 = vpop.f32.mrf.mxu1  ;;  %v459_v58 = vadd.f32 %v453_v49, %v388_v55 }
  0xf5   : >> { %v1131_v52 = vpop.f32.mrf.mxu0 }
  0xf6   : >> { %v1139_v53 = vpop.f32.mrf.mxu1  ;;  %v523_v63 = vadd.f32 %v517_v51, %v459_v58 }
  0xf7   : >> { %v456_v54 = vpop.f32.mrf.mxu0 }
  0xf8   : >> { %v520_v56 = vpop.f32.mrf.mxu1 }
  0xf9   : >> { %v1132_v57 = vpop.f32.mrf.mxu0 }
  0xfa   : >> { %v1140_v59 = vpop.f32.mrf.mxu1 }
  0xfb   : >> { %v581_v60 = vpop.f32.mrf.mxu0 }
  0xfc   : >> { %v652_v61 = vpop.f32.mrf.mxu1  ;;  %v587_v3 = vadd.f32 %v581_v60, %v523_v63 }
  0xfd   : >> { %v1147_v62 = vpop.f32.mrf.mxu0 }
  0xfe   : >> { %v1155_v1 = vpop.f32.mrf.mxu1  ;;  %v658_v8 = vadd.f32 %v652_v61, %v587_v3 }
  0xff   : >> { %v584_v2 = vpop.f32.mrf.mxu0 }
 0x100   : >> { %v655_v4 = vpop.f32.mrf.mxu1 }
 0x101   : >> { %v1148_v5 = vpop.f32.mrf.mxu0 }
 0x102   : >> { %v1156_v6 = vpop.f32.mrf.mxu1 }
 0x103   : >> { %v716_v7 = vpop.f32.mrf.mxu0 }
 0x104   : >> { %v780_v9 = vpop.f32.mrf.mxu1  ;;  %v722_v11 = vadd.f32 %v716_v7, %v658_v8 }
 0x105   : >> { %v1163_v10 = vpop.f32.mrf.mxu0 }
 0x106   : >> { %v1171_v12 = vpop.f32.mrf.mxu1  ;;  %v786_v16 = vadd.f32 %v780_v9, %v722_v11 }
 0x107   : >> { %v719_v13 = vpop.f32.mrf.mxu0 }
 0x108   : >> { %v783_v14 = vpop.f32.mrf.mxu1 }
 0x109   : >> { %v1164_v15 = vpop.f32.mrf.mxu0 }
 0x10a   : >> { %v1172_v17 = vpop.f32.mrf.mxu1 }
 0x10b   : >> { %v851_v18 = vpop.f32.mrf.mxu0 }
 0x10c   : >> { %v857_v19 = vadd.f32 %v851_v18, %v786_v16 }
 0x10d   : >> { %v1179_v20 = vpop.f32.mrf.mxu0 }
 0x10e   : >> { %v858_v21 = vmax.f32 %v857_v19, 0.0  ;;  %253 = sbr.rel (!%p251_p2) target bundleno = 34 (0x22), region = 85 }
 0x10f   : >> { %v854_v22 = vpop.f32.mrf.mxu0 }
 0x110   : >> { %v859_v23 = vpack.c.bf16 %v858_v21, %v858_v21 }
 0x111   : >> { %v1180_v24 = vpop.f32.mrf.mxu0 }
 0x112   : >> { %863 = vst.msk [vmem:[%s861_s28] sm:$0x3] %vm862_vm2, %v859_v23 }
 0x113 PF: > { %s14_s14 = sadd.s32 1, %s1304_s14   ;;  %s1527_s12 = smov %s1300_s13 }
 0x114   : > { %p11_p3 = scmp.ge.s32.totalorder %s14_s14, 4   ;;  %s1528_s13 = smov %s1530_s16 }
 0x116   :  { %13 = sbr.rel (!%p11_p3) target bundleno = 2 (0x2), region = 96 }
 0x11b   :  { %900 = vsyncpa [#allocation3], 1 }
 0x11c   :  { %902 = vsyncpa [#allocation3 + $0x1], 1 }

// kernel: encoder_cnn_forward.84
= control target key start
LH: loop header
LB: loop body
LE: loop exit
PB: predicated region body
PF: predicated region fallthrough
CT: control target
= control target key end

     0   :  { %9 = vsyncpa [#allocation3], 0  ;;  %s671_s15 = smov 0   ;;  %s673_s16 = smov 0   ;;  %s738_s0 = inlined_call_operand.vmem [shape: bf16[32,32], index: 0, kind: input, shape index: {}]   ;;  %s739_s1 = inlined_call_operand.vmem [shape: bf16[32,128], index: 1, kind: input, shape index: {}]   ;;  %s740_s2 = inlined_call_operand.hbm [shape: f32[1,128], index: 2, kind: input, shape index: {}]   ;;  %s741_s3 = inlined_call_operand.vmem [shape: bf16[32,128], index: 3, kind: input, shape index: {}]   ;;  %s742_s4 = inlined_call_operand.vmem [shape: bf16[32,128], index: 4, kind: output, shape index: {}]  }
   0x1   :  { %s675_s17 = smov 0  }
   0x2 LB: > { %s504_s18 = sadd.s32 4294967295, %s641_s17   ;;  %s27_s19 = sadd.s32 1, %s637_s16  ;;  %s641_s17 = sphi %s675_s17, %s15_s17   ;;  %s637_s16 = sphi %s673_s16, %s746_s16   ;;  %s633_s15 = sphi %s671_s15, %s745_s15  }
   0x3   : > { %p29_p0 = scmp.ge.s32.totalorder %s27_s19, 2  ;;  %p506_p1 = scmp.ge.s32.totalorder %s641_s17, 1 }
   0x4   : > { %p166_p2 = scmp.lt.s32.totalorder %s641_s17, 3  ;;  %p696_p4 = scmp.eq.s32.totalorder %s504_s18, 0 }
   0x5   : > { %s748_s19 = smov (%p29_p0, %s27_s19), 0  ;;  %s643_s22 = smov [#allocation2]  }
   0x6   : > { %p692_p3 = pnand %p506_p1, %p166_p2  ;;  %s188_s23 = sshll.u32 %s643_s22, 4  ;;  %s189_s23 = int_to_ptr.vmem [resolvable:$true] %s188_s23 }
   0x7   : > { %s600_s24 = scalar_lea.vmem %s189_s23, 16  ;;  %s607_s25 = scalar_lea.vmem %s189_s23, 32 }
   0x8   : > { %p553_p5 = pneg %p692_p3  ;;  %p601_p8 = scmp.ne.s32.totalorder %s189_s23, %s600_s24 }
   0x9   : > { %p608_p11 = scmp.lt.s32.totalorder %s189_s23, %s189_s23  ;;  %p609_p12 = scmp.lt.s32.totalorder %s607_s25, %s600_s24 }
   0xa   : > { %p554_p6 = pnand %p696_p4, %p553_p5 }
   0xb   : > { %p610_p13 = por %p609_p12, %p608_p11 }
   0xc   : > { %p591_p7 = pneg %p554_p6 }
   0xe   : > { %p603_p9 = pnand %p601_p8, %p591_p7 }
  0x10   : > { %p604_p10 = pneg %p603_p9 }
  0x12   : > { %p611_p0 = pnand %p610_p13, %p604_p10 }
  0x14   : > { %614 = shalt.err (!%p611_p0)
}
  0x15   : > { %556 = dma.hbm_to_vmem [thread:$0]  (!%p554_p6), %s740_s2, 16, %s189_s23, [#allocation3]  }
  0x16   : > { %222 = sbr.rel (%p692_p3) target bundleno = 243 (0xf3), region = 36 }
  0x1b   : > { %628 = dma.done.wait (%p696_p4), [#allocation3], 16  }
  0x1c   : > { %630 = vsyncadd (%p696_p4), [#allocation3], 4294967280  ;;  %s512_s28 = sshll.u32 %s633_s15, 1  ;;  %v644_v0 = vmov 0.0   ;;  %vm645_vm0 = vmmov 0   ;;  %v586_v1 = vld [vmem:[%s739_s1 + $0x8] sm:$0xff]  }
  0x1d   : > { %541 = vmatprep.subr.bf16.mxu0 %v644_v0  ;;  %545 = vmatprep.mubr.msk.bf16.mxu0 %vm645_vm0, %v644_v0  ;;  %p264_p1 = scmp.lt.s32.totalorder %s512_s28, 3  ;;  %v587_v2 = vld [vmem:[%s739_s1] sm:$0xff]   ;;  %vm322_vm1 = vcmask 261120  }
  0x1e   : > { %542 = vmatpush3.bf16.msra.mxu0 %v586_v1  ;;  %v518_v4 = vld [vmem:[#allocation2] ss:$0 sm:$0xff] }
  0x1f   : > { %s750_s28 = smov (!%p264_p1, %s512_s28), 3  ;;  %543 = vmatprep.subr.bf16.mxu0 %v644_v0 }
  0x20   : > { %s513_s29 = sshll.u32 %s750_s28, 2 }
  0x21   : > { %s267_s8 = scalar_lea.vmem %s738_s0, %s513_s29  ;;  %s280_s13 = scalar_lea.vmem %s741_s3, %s513_s29 }
  0x22   : > { %v588_v3 = vld [vmem:[%s267_s8] sm:$0xff]   ;;  %544 = vmatpush3.bf16.msra.mxu0 %v587_v2  ;;  %s289_s18 = scalar_lea.vmem %s742_s4, %s513_s29 }
  0x23   : > { %v530_v5 = vld [vmem:[%s280_s13] sm:$0xff]  }
  0x24   : > { %v531_v8 = vunpack.c.l.bf16 %v530_v5  ;;  %v532_v10 = vunpack.c.h.bf16 %v530_v5 }
  0x25   : > { %546 = vmatmul.mubr.msk.bf16.vlgmr.msra.gmra.mxu0 %vm322_vm1, %v588_v3 }
  0xe5   : > { %v360_v6 = vpop.f32.mrf.mxu0 }
  0xe6   : > { %v361_v7 = vadd.f32 %v518_v4, %v360_v6 }
  0xe7   : > { %v547_v9 = vpop.f32.mrf.mxu0 }
  0xe8   : > { %v371_v12 = vadd.f32 %v531_v8, %v361_v7 }
  0xe9   : > { %v363_v11 = vpop.f32.mrf.mxu0 }
  0xea   : > { %v364_v13 = vadd.f32 %v518_v4, %v363_v11  ;;  %v373_v16 = vmax.f32 %v371_v12, 0.0 }
  0xeb   : > { %v548_v14 = vpop.f32.mrf.mxu0 }
  0xec   : > { %v372_v15 = vadd.f32 %v532_v10, %v364_v13 }
  0xee   : > { %v374_v17 = vmax.f32 %v372_v15, 0.0 }
  0xf0   : > { %v536_v18 = vpack.c.bf16 %v374_v17, %v373_v16 }
  0xf2   : > { %537 = vst [vmem:[%s289_s18] sm:$0xff] %v536_v18  }
  0xf3 PF: > { %s15_s17 = sadd.s32 1, %s641_s17   ;;  %s745_s15 = smov %s637_s16 }
  0xf4   : > { %p12_p2 = scmp.ge.s32.totalorder %s15_s17, 4   ;;  %s746_s16 = smov %s748_s19 }
  0xf6   :  { %14 = sbr.rel (!%p12_p2) target bundleno = 2 (0x2), region = 78 }
  0xfb   :  { %413 = vsyncpa [#allocation3], 1 }
  0xfc   :  { %415 = vsyncpa [#allocation3 + $0x1], 1 }

// kernel: encoder_cnn_forward.85
= control target key start
LH: loop header
LB: loop body
LE: loop exit
PB: predicated region body
PF: predicated region fallthrough
CT: control target
= control target key end

     0   :  { %8 = vsyncpa [#allocation3], 0  ;;  %s649_s12 = smov 0   ;;  %s651_s13 = smov 0   ;;  %s734_s0 = inlined_call_operand.vmem [shape: bf16[32,128], index: 0, kind: input, shape index: {}]   ;;  %s735_s1 = inlined_call_operand.vmem [shape: bf16[128,32], index: 1, kind: input, shape index: {}]   ;;  %s736_s2 = inlined_call_operand.hbm [shape: f32[1,32], index: 2, kind: input, shape index: {}]   ;;  %s737_s3 = inlined_call_operand.vmem [shape: bf16[32,32], index: 3, kind: output, shape index: {}]  }
   0x1   :  { %s653_s14 = smov 0  }
   0x2 LB: > { %s469_s15 = sadd.s32 4294967295, %s624_s14   ;;  %s26_s16 = sadd.s32 1, %s620_s13  ;;  %s624_s14 = sphi %s653_s14, %s14_s14   ;;  %s620_s13 = sphi %s651_s13, %s741_s13   ;;  %s616_s12 = sphi %s649_s12, %s740_s12  }
   0x3   : > { %p28_p0 = scmp.ge.s32.totalorder %s26_s16, 2  ;;  %p471_p1 = scmp.ge.s32.totalorder %s624_s14, 1 }
   0x4   : > { %p137_p2 = scmp.lt.s32.totalorder %s624_s14, 3  ;;  %p674_p4 = scmp.eq.s32.totalorder %s469_s15, 0 }
   0x5   : > { %s743_s16 = smov (%p28_p0, %s26_s16), 0  ;;  %s626_s19 = smov [#allocation2]  }
   0x6   : > { %p670_p3 = pnand %p471_p1, %p137_p2  ;;  %s159_s20 = sshll.u32 %s626_s19, 4  ;;  %s160_s20 = int_to_ptr.vmem [resolvable:$true] %s159_s20 }
   0x7   : > { %s583_s21 = scalar_lea.vmem %s160_s20, 16  ;;  %s590_s22 = scalar_lea.vmem %s160_s20, 32 }
   0x8   : > { %p530_p5 = pneg %p670_p3  ;;  %p584_p8 = scmp.ne.s32.totalorder %s160_s20, %s583_s21 }
   0x9   : > { %p591_p11 = scmp.lt.s32.totalorder %s160_s20, %s160_s20  ;;  %p592_p12 = scmp.lt.s32.totalorder %s590_s22, %s583_s21 }
   0xa   : > { %p531_p6 = pnand %p674_p4, %p530_p5 }
   0xb   : > { %p593_p13 = por %p592_p12, %p591_p11 }
   0xc   : > { %p574_p7 = pneg %p531_p6 }
   0xe   : > { %p586_p9 = pnand %p584_p8, %p574_p7 }
  0x10   : > { %p587_p10 = pneg %p586_p9 }
  0x12   : > { %p594_p0 = pnand %p593_p13, %p587_p10 }
  0x14   : > { %597 = shalt.err (!%p594_p0)
}
  0x15   : > { %533 = dma.hbm_to_vmem [thread:$0]  (!%p531_p6), %s736_s2, 16, %s160_s20, [#allocation3]  }
  0x16   : > { %181 = sbr.rel (%p670_p3) target bundleno = 265 (0x109), region = 32 }
  0x1b   : > { %611 = dma.done.wait (%p674_p4), [#allocation3], 16  }
  0x1c   : > { %613 = vsyncadd (%p674_p4), [#allocation3], 4294967280  ;;  %s477_s25 = sshll.u32 %s616_s12, 1  ;;  %v627_v0 = vmov 0.0   ;;  %vm628_vm0 = vmmov 0   ;;  %v563_v1 = vld [vmem:[%s735_s1 + $0x38] sm:$0xff]  }
  0x1d   : > { %506 = vmatprep.subr.bf16.mxu0 %v627_v0  ;;  %522 = vmatprep.mubr.msk.bf16.mxu0 %vm628_vm0, %v627_v0  ;;  %p213_p1 = scmp.lt.s32.totalorder %s477_s25, 3  ;;  %v564_v2 = vld [vmem:[%s735_s1 + $0x30] sm:$0xff]   ;;  %v565_v3 = vld [vmem:[%s735_s1 + $0x28] sm:$0xff]   ;;  %v566_v4 = vld [vmem:[%s735_s1 + $0x20] sm:$0xff]   ;;  %vm362_vm1 = vcmask 257024  }
  0x1e   : > { %507 = vmatpush3.bf16.msra.mxu0 %v563_v1  ;;  %v567_v5 = vld [vmem:[%s735_s1 + $0x18] sm:$0xff]   ;;  %v568_v6 = vld [vmem:[%s735_s1 + $0x10] sm:$0xff]   ;;  %v569_v7 = vld [vmem:[%s735_s1 + $0x8] sm:$0xff]  }
  0x1f   : > { %s745_s25 = smov (!%p213_p1, %s477_s25), 3  ;;  %508 = vmatprep.subr.bf16.mxu0 %v627_v0  ;;  %v570_v8 = vld [vmem:[%s735_s1] sm:$0xff]  }
  0x20   : > { %s478_s30 = sshll.u32 %s745_s25, 2  ;;  %v481_v10 = vld [vmem:[#allocation2] ss:$0 sm:$0xff] }
  0x21   : > { %s216_s8 = scalar_lea.vmem %s734_s0, %s478_s30  ;;  %s229_s24 = scalar_lea.vmem %s737_s3, %s478_s30 }
  0x22   : > { %509 = vmatpush3.bf16.msra.mxu0 %v564_v2  ;;  %v571_v9 = vld [vmem:[%s216_s8] sm:$0xff]  }
  0x23   : > { %510 = vmatprep.subr.bf16.mxu0 %v627_v0 }
  0x26   : > { %511 = vmatpush3.bf16.msra.mxu0 %v565_v3 }
  0x27   : > { %512 = vmatprep.subr.bf16.mxu0 %v627_v0 }
  0x2a   : > { %513 = vmatpush3.bf16.msra.mxu0 %v566_v4 }
  0x2b   : > { %514 = vmatprep.subr.bf16.mxu0 %v627_v0 }
  0x2e   : > { %515 = vmatpush3.bf16.msra.mxu0 %v567_v5 }
  0x2f   : > { %516 = vmatprep.subr.bf16.mxu0 %v627_v0 }
  0x32   : > { %517 = vmatpush3.bf16.msra.mxu0 %v568_v6 }
  0x33   : > { %518 = vmatprep.subr.bf16.mxu0 %v627_v0 }
  0x36   : > { %519 = vmatpush3.bf16.msra.mxu0 %v569_v7 }
  0x37   : > { %520 = vmatprep.subr.bf16.mxu0 %v627_v0 }
  0x3a   : > { %521 = vmatpush3.bf16.msra.mxu0 %v570_v8 }
  0x3d   : > { %523 = vmatmul.mubr.bf16.vlgmr.msra.gmra.mxu0 %v571_v9 }
  0xfd   : > { %v345_v11 = vpop.f32.mrf.mxu0 }
  0xfe   : > { %v346_v12 = vadd.f32 %v481_v10, %v345_v11 }
  0xff   : > { %v524_v13 = vpop.f32.mrf.mxu0 }
 0x100   : > { %v352_v14 = vmax.f32 %v346_v12, 0.0 }
 0x101   : > { %v348_v15 = vpop.f32.mrf.mxu0 }
 0x102   : > { %v495_v16 = vpack.c.bf16 %v352_v14, %v352_v14  ;;  %v349_v17 = vadd.f32 %v481_v10, %v348_v15 }
 0x103   : > { %v525_v18 = vpop.f32.mrf.mxu0 }
 0x104   : > { %363 = vst.msk [vmem:[%s229_s24] sm:$0xf] %vm362_vm1, %v495_v16  ;;  %v353_v19 = vmax.f32 %v349_v17, 0.0 }
 0x106   : > { %v496_v20 = vpack.c.bf16 %v353_v19, %v353_v19 }
 0x108   : > { %364 = vst.msk [vmem:[%s229_s24 + $0x4] sm:$0xf] %vm362_vm1, %v496_v20 }
 0x109 PF: > { %s14_s14 = sadd.s32 1, %s624_s14   ;;  %s740_s12 = smov %s620_s13 }
 0x10a   : > { %p11_p2 = scmp.ge.s32.totalorder %s14_s14, 4   ;;  %s741_s13 = smov %s743_s16 }
 0x10c   :  { %13 = sbr.rel (!%p11_p2) target bundleno = 2 (0x2), region = 71 }
 0x111   :  { %393 = vsyncpa [#allocation3], 1 }
 0x112   :  { %395 = vsyncpa [#allocation3 + $0x1], 1 }

// kernel: encoder_cnn_forward.99
= control target key start
LH: loop header
LB: loop body
LE: loop exit
PB: predicated region body
PF: predicated region fallthrough
CT: control target
= control target key end

     0   :  { %s620_s15 = smov 0   ;;  %s622_s16 = smov 0   ;;  %s665_s0 = inlined_call_operand.vmem [shape: bf16[32,32], index: 0, kind: input, shape index: {}]   ;;  %s666_s1 = inlined_call_operand.vmem [shape: bf16[32,128], index: 1, kind: input, shape index: {}]   ;;  %s667_s2 = inlined_call_operand.vmem [shape: f32[1,128], index: 2, kind: input, shape index: {}]   ;;  %s668_s3 = inlined_call_operand.vmem [shape: bf16[32,128], index: 3, kind: input, shape index: {}]   ;;  %s669_s4 = inlined_call_operand.vmem [shape: bf16[32,128], index: 4, kind: output, shape index: {}]  }
   0x1   :  { %s624_s17 = smov 0  }
   0x2 LB: > { %s26_s18 = sadd.s32 1, %s587_s16  ;;  %p502_p0 = scmp.ge.s32.totalorder %s591_s17, 1  ;;  %s591_s17 = sphi %s624_s17, %s14_s17   ;;  %s587_s16 = sphi %s622_s16, %s671_s16   ;;  %s583_s15 = sphi %s620_s15, %s670_s15  }
   0x3   : > { %p28_p1 = scmp.ge.s32.totalorder %s26_s18, 2  ;;  %p210_p2 = scmp.lt.s32.totalorder %s591_s17, 3 }
   0x5   : > { %s673_s18 = smov (%p28_p1, %s26_s18), 0  ;;  %p211_p3 = pnand %p502_p0, %p210_p2 }
   0x6   : > { %s503_s23 = sshll.u32 (!%p211_p3), %s583_s15, 1 }
   0x7   : > { %214 = sbr.rel (%p211_p3) target bundleno = 227 (0xe3), region = 36  ;;  %p255_p4 = scmp.lt.s32.totalorder (!%p211_p3), %s503_s23, 3 }
   0xc   : > { %v566_v0 = vld [vmem:[%s666_s1 + $0x8] sm:$0xff]   ;;  %v593_v1 = vmov 0.0   ;;  %v567_v2 = vld [vmem:[%s666_s1] sm:$0xff]   ;;  %vm594_vm0 = vmmov 0   ;;  %s675_s23 = smov (!%p255_p4, %s503_s23), 3  ;;  %vm316_vm1 = vcmask 261120  }
   0xd   : > { %532 = vmatprep.subr.bf16.mxu0 %v593_v1  ;;  %536 = vmatprep.mubr.msk.bf16.mxu0 %vm594_vm0, %v593_v1  ;;  %s504_s24 = sshll.u32 %s675_s23, 2  ;;  %v509_v4 = vld [vmem:[%s667_s2] ss:$0 sm:$0xff] }
   0xe   : > { %533 = vmatpush3.bf16.msra.mxu0 %v566_v0  ;;  %s258_s27 = scalar_lea.vmem %s665_s0, %s504_s24  ;;  %s274_s30 = scalar_lea.vmem %s668_s3, %s504_s24 }
   0xf   : > { %534 = vmatprep.subr.bf16.mxu0 %v593_v1  ;;  %v568_v3 = vld [vmem:[%s258_s27] sm:$0xff]   ;;  %s283_s9 = scalar_lea.vmem %s669_s4, %s504_s24 }
  0x10   : > { %v521_v5 = vld [vmem:[%s274_s30] sm:$0xff]  }
  0x11   : > { %v522_v8 = vunpack.c.l.bf16 %v521_v5  ;;  %v523_v10 = vunpack.c.h.bf16 %v521_v5 }
  0x12   : > { %535 = vmatpush3.bf16.msra.mxu0 %v567_v2 }
  0x15   : > { %537 = vmatmul.mubr.msk.bf16.vlgmr.msra.gmra.mxu0 %vm316_vm1, %v568_v3 }
  0xd5   : > { %v354_v6 = vpop.f32.mrf.mxu0 }
  0xd6   : > { %v355_v7 = vadd.f32 %v509_v4, %v354_v6 }
  0xd7   : > { %v538_v9 = vpop.f32.mrf.mxu0 }
  0xd8   : > { %v365_v12 = vadd.f32 %v522_v8, %v355_v7 }
  0xd9   : > { %v357_v11 = vpop.f32.mrf.mxu0 }
  0xda   : > { %v358_v13 = vadd.f32 %v509_v4, %v357_v11  ;;  %v367_v16 = vmax.f32 %v365_v12, 0.0 }
  0xdb   : > { %v539_v14 = vpop.f32.mrf.mxu0 }
  0xdc   : > { %v366_v15 = vadd.f32 %v523_v10, %v358_v13 }
  0xde   : > { %v368_v17 = vmax.f32 %v366_v15, 0.0 }
  0xe0   : > { %v527_v18 = vpack.c.bf16 %v368_v17, %v367_v16 }
  0xe2   : > { %528 = vst [vmem:[%s283_s9] sm:$0xff] %v527_v18  }
  0xe3 PF: > { %s14_s17 = sadd.s32 1, %s591_s17   ;;  %s670_s15 = smov %s587_s16 }
  0xe4   : > { %p11_p5 = scmp.ge.s32.totalorder %s14_s17, 4   ;;  %s671_s16 = smov %s673_s18 }
  0xe6   :  { %13 = sbr.rel (!%p11_p5) target bundleno = 2 (0x2), region = 75 }

// kernel: encoder_cnn_forward.91
= control target key start
LH: loop header
LB: loop body
LE: loop exit
PB: predicated region body
PF: predicated region fallthrough
CT: control target
= control target key end

     0   :  { %s598_s12 = smov 0   ;;  %s600_s13 = smov 0   ;;  %s661_s0 = inlined_call_operand.vmem [shape: bf16[32,128], index: 0, kind: input, shape index: {}]   ;;  %s662_s1 = inlined_call_operand.vmem [shape: bf16[128,32], index: 1, kind: input, shape index: {}]   ;;  %s663_s2 = inlined_call_operand.vmem [shape: f32[1,32], index: 2, kind: input, shape index: {}]   ;;  %s664_s3 = inlined_call_operand.vmem [shape: bf16[32,32], index: 3, kind: output, shape index: {}]  }
   0x1   :  { %s602_s14 = smov 0  }
   0x2 LB: > { %s25_s15 = sadd.s32 1, %s570_s13  ;;  %p467_p0 = scmp.ge.s32.totalorder %s574_s14, 1  ;;  %s574_s14 = sphi %s602_s14, %s13_s14   ;;  %s570_s13 = sphi %s600_s13, %s666_s13   ;;  %s566_s12 = sphi %s598_s12, %s665_s12  }
   0x3   : > { %p27_p1 = scmp.ge.s32.totalorder %s25_s15, 2  ;;  %p169_p2 = scmp.lt.s32.totalorder %s574_s14, 3 }
   0x5   : > { %s668_s15 = smov (%p27_p1, %s25_s15), 0  ;;  %p170_p3 = pnand %p467_p0, %p169_p2 }
   0x6   : > { %s468_s20 = sshll.u32 (!%p170_p3), %s566_s12, 1 }
   0x7   : > { %173 = sbr.rel (%p170_p3) target bundleno = 249 (0xf9), region = 32  ;;  %p204_p4 = scmp.lt.s32.totalorder (!%p170_p3), %s468_s20, 3 }
   0xc   : > { %v543_v0 = vld [vmem:[%s662_s1 + $0x38] sm:$0xff]   ;;  %v576_v1 = vmov 0.0   ;;  %v544_v2 = vld [vmem:[%s662_s1 + $0x30] sm:$0xff]   ;;  %vm577_vm0 = vmmov 0   ;;  %s670_s20 = smov (!%p204_p4, %s468_s20), 3  ;;  %v545_v3 = vld [vmem:[%s662_s1 + $0x28] sm:$0xff]  }
   0xd   : > { %497 = vmatprep.subr.bf16.mxu0 %v576_v1  ;;  %513 = vmatprep.mubr.msk.bf16.mxu0 %vm577_vm0, %v576_v1  ;;  %s469_s23 = sshll.u32 %s670_s20, 2  ;;  %v546_v4 = vld [vmem:[%s662_s1 + $0x20] sm:$0xff]   ;;  %v547_v5 = vld [vmem:[%s662_s1 + $0x18] sm:$0xff]   ;;  %v548_v6 = vld [vmem:[%s662_s1 + $0x10] sm:$0xff]   ;;  %vm356_vm1 = vcmask 257024  }
   0xe   : > { %498 = vmatpush3.bf16.msra.mxu0 %v543_v0  ;;  %s207_s26 = scalar_lea.vmem %s661_s0, %s469_s23  ;;  %v549_v7 = vld [vmem:[%s662_s1 + $0x8] sm:$0xff]   ;;  %v550_v8 = vld [vmem:[%s662_s1] sm:$0xff]   ;;  %s223_s17 = scalar_lea.vmem %s664_s3, %s469_s23 }
   0xf   : > { %499 = vmatprep.subr.bf16.mxu0 %v576_v1  ;;  %v551_v9 = vld [vmem:[%s207_s26] sm:$0xff]  }
  0x10   : > { %v472_v10 = vld [vmem:[%s663_s2] ss:$0 sm:$0xff] }
  0x12   : > { %500 = vmatpush3.bf16.msra.mxu0 %v544_v2 }
  0x13   : > { %501 = vmatprep.subr.bf16.mxu0 %v576_v1 }
  0x16   : > { %502 = vmatpush3.bf16.msra.mxu0 %v545_v3 }
  0x17   : > { %503 = vmatprep.subr.bf16.mxu0 %v576_v1 }
  0x1a   : > { %504 = vmatpush3.bf16.msra.mxu0 %v546_v4 }
  0x1b   : > { %505 = vmatprep.subr.bf16.mxu0 %v576_v1 }
  0x1e   : > { %506 = vmatpush3.bf16.msra.mxu0 %v547_v5 }
  0x1f   : > { %507 = vmatprep.subr.bf16.mxu0 %v576_v1 }
  0x22   : > { %508 = vmatpush3.bf16.msra.mxu0 %v548_v6 }
  0x23   : > { %509 = vmatprep.subr.bf16.mxu0 %v576_v1 }
  0x26   : > { %510 = vmatpush3.bf16.msra.mxu0 %v549_v7 }
  0x27   : > { %511 = vmatprep.subr.bf16.mxu0 %v576_v1 }
  0x2a   : > { %512 = vmatpush3.bf16.msra.mxu0 %v550_v8 }
  0x2d   : > { %514 = vmatmul.mubr.bf16.vlgmr.msra.gmra.mxu0 %v551_v9 }
  0xed   : > { %v339_v11 = vpop.f32.mrf.mxu0 }
  0xee   : > { %v340_v12 = vadd.f32 %v472_v10, %v339_v11 }
  0xef   : > { %v515_v13 = vpop.f32.mrf.mxu0 }
  0xf0   : > { %v346_v14 = vmax.f32 %v340_v12, 0.0 }
  0xf1   : > { %v342_v15 = vpop.f32.mrf.mxu0 }
  0xf2   : > { %v486_v16 = vpack.c.bf16 %v346_v14, %v346_v14  ;;  %v343_v17 = vadd.f32 %v472_v10, %v342_v15 }
  0xf3   : > { %v516_v18 = vpop.f32.mrf.mxu0 }
  0xf4   : > { %357 = vst.msk [vmem:[%s223_s17] sm:$0xf] %vm356_vm1, %v486_v16  ;;  %v347_v19 = vmax.f32 %v343_v17, 0.0 }
  0xf6   : > { %v487_v20 = vpack.c.bf16 %v347_v19, %v347_v19 }
  0xf8   : > { %358 = vst.msk [vmem:[%s223_s17 + $0x4] sm:$0xf] %vm356_vm1, %v487_v20 }
  0xf9 PF: > { %s13_s14 = sadd.s32 1, %s574_s14   ;;  %s665_s12 = smov %s570_s13 }
  0xfa   : > { %p10_p5 = scmp.ge.s32.totalorder %s13_s14, 4   ;;  %s666_s13 = smov %s668_s15 }
  0xfc   :  { %12 = sbr.rel (!%p10_p5) target bundleno = 2 (0x2), region = 68 }

// kernel: encoder_cnn_forward.100
= control target key start
LH: loop header
LB: loop body
LE: loop exit
PB: predicated region body
PF: predicated region fallthrough
CT: control target
= control target key end

     0   :  { %s598_s12 = smov 0   ;;  %s600_s13 = smov 0   ;;  %s661_s0 = inlined_call_operand.vmem [shape: bf16[32,128], index: 0, kind: input, shape index: {}]   ;;  %s662_s1 = inlined_call_operand.vmem [shape: bf16[128,64], index: 1, kind: input, shape index: {}]   ;;  %s663_s2 = inlined_call_operand.vmem [shape: f32[1,64], index: 2, kind: input, shape index: {}]   ;;  %s664_s3 = inlined_call_operand.vmem [shape: bf16[32,64], index: 3, kind: output, shape index: {}]  }
   0x1   :  { %s602_s14 = smov 0  }
   0x2 LB: > { %s25_s15 = sadd.s32 1, %s570_s13  ;;  %p467_p0 = scmp.ge.s32.totalorder %s574_s14, 1  ;;  %s574_s14 = sphi %s602_s14, %s13_s14   ;;  %s570_s13 = sphi %s600_s13, %s666_s13   ;;  %s566_s12 = sphi %s598_s12, %s665_s12  }
   0x3   : > { %p27_p1 = scmp.ge.s32.totalorder %s25_s15, 2  ;;  %p169_p2 = scmp.lt.s32.totalorder %s574_s14, 3 }
   0x5   : > { %s668_s15 = smov (%p27_p1, %s25_s15), 0  ;;  %p170_p3 = pnand %p467_p0, %p169_p2 }
   0x6   : > { %s468_s20 = sshll.u32 (!%p170_p3), %s566_s12, 1 }
   0x7   : > { %173 = sbr.rel (%p170_p3) target bundleno = 249 (0xf9), region = 32  ;;  %p204_p4 = scmp.lt.s32.totalorder (!%p170_p3), %s468_s20, 3 }
   0xc   : > { %v543_v0 = vld [vmem:[%s662_s1 + $0x38] sm:$0xff]   ;;  %v576_v1 = vmov 0.0   ;;  %v544_v2 = vld [vmem:[%s662_s1 + $0x30] sm:$0xff]   ;;  %vm577_vm0 = vmmov 0   ;;  %s670_s20 = smov (!%p204_p4, %s468_s20), 3  ;;  %v545_v3 = vld [vmem:[%s662_s1 + $0x28] sm:$0xff]  }
   0xd   : > { %497 = vmatprep.subr.bf16.mxu0 %v576_v1  ;;  %513 = vmatprep.mubr.msk.bf16.mxu0 %vm577_vm0, %v576_v1  ;;  %s469_s23 = sshll.u32 %s670_s20, 2  ;;  %v546_v4 = vld [vmem:[%s662_s1 + $0x20] sm:$0xff]   ;;  %v547_v5 = vld [vmem:[%s662_s1 + $0x18] sm:$0xff]   ;;  %v548_v6 = vld [vmem:[%s662_s1 + $0x10] sm:$0xff]   ;;  %vm356_vm1 = vcmask 519168  }
   0xe   : > { %498 = vmatpush3.bf16.msra.mxu0 %v543_v0  ;;  %s207_s26 = scalar_lea.vmem %s661_s0, %s469_s23  ;;  %v549_v7 = vld [vmem:[%s662_s1 + $0x8] sm:$0xff]   ;;  %v550_v8 = vld [vmem:[%s662_s1] sm:$0xff]   ;;  %s223_s17 = scalar_lea.vmem %s664_s3, %s469_s23 }
   0xf   : > { %499 = vmatprep.subr.bf16.mxu0 %v576_v1  ;;  %v551_v9 = vld [vmem:[%s207_s26] sm:$0xff]  }
  0x10   : > { %v472_v10 = vld [vmem:[%s663_s2] ss:$0 sm:$0xff] }
  0x12   : > { %500 = vmatpush3.bf16.msra.mxu0 %v544_v2 }
  0x13   : > { %501 = vmatprep.subr.bf16.mxu0 %v576_v1 }
  0x16   : > { %502 = vmatpush3.bf16.msra.mxu0 %v545_v3 }
  0x17   : > { %503 = vmatprep.subr.bf16.mxu0 %v576_v1 }
  0x1a   : > { %504 = vmatpush3.bf16.msra.mxu0 %v546_v4 }
  0x1b   : > { %505 = vmatprep.subr.bf16.mxu0 %v576_v1 }
  0x1e   : > { %506 = vmatpush3.bf16.msra.mxu0 %v547_v5 }
  0x1f   : > { %507 = vmatprep.subr.bf16.mxu0 %v576_v1 }
  0x22   : > { %508 = vmatpush3.bf16.msra.mxu0 %v548_v6 }
  0x23   : > { %509 = vmatprep.subr.bf16.mxu0 %v576_v1 }
  0x26   : > { %510 = vmatpush3.bf16.msra.mxu0 %v549_v7 }
  0x27   : > { %511 = vmatprep.subr.bf16.mxu0 %v576_v1 }
  0x2a   : > { %512 = vmatpush3.bf16.msra.mxu0 %v550_v8 }
  0x2d   : > { %514 = vmatmul.mubr.bf16.vlgmr.msra.gmra.mxu0 %v551_v9 }
  0xed   : > { %v339_v11 = vpop.f32.mrf.mxu0 }
  0xee   : > { %v340_v12 = vadd.f32 %v472_v10, %v339_v11 }
  0xef   : > { %v515_v13 = vpop.f32.mrf.mxu0 }
  0xf0   : > { %v346_v14 = vmax.f32 %v340_v12, 0.0 }
  0xf1   : > { %v342_v15 = vpop.f32.mrf.mxu0 }
  0xf2   : > { %v486_v16 = vpack.c.bf16 %v346_v14, %v346_v14  ;;  %v343_v17 = vadd.f32 %v472_v10, %v342_v15 }
  0xf3   : > { %v516_v18 = vpop.f32.mrf.mxu0 }
  0xf4   : > { %357 = vst.msk [vmem:[%s223_s17] sm:$0xf] %vm356_vm1, %v486_v16  ;;  %v347_v19 = vmax.f32 %v343_v17, 0.0 }
  0xf6   : > { %v487_v20 = vpack.c.bf16 %v347_v19, %v347_v19 }
  0xf8   : > { %358 = vst.msk [vmem:[%s223_s17 + $0x4] sm:$0xf] %vm356_vm1, %v487_v20 }
  0xf9 PF: > { %s13_s14 = sadd.s32 1, %s574_s14   ;;  %s665_s12 = smov %s570_s13 }
  0xfa   : > { %p10_p5 = scmp.ge.s32.totalorder %s13_s14, 4   ;;  %s666_s13 = smov %s668_s15 }
  0xfc   :  { %12 = sbr.rel (!%p10_p5) target bundleno = 2 (0x2), region = 68 }

// kernel: encoder_cnn_forward.86
= control target key start
LH: loop header
LB: loop body
LE: loop exit
PB: predicated region body
PF: predicated region fallthrough
CT: control target
= control target key end

     0   :  { %8 = vsyncpa [#allocation3], 0  ;;  %s1323_s12 = smov 0   ;;  %s1325_s13 = smov 0   ;;  %s1511_s0 = inlined_call_operand.vmem [shape: bf16[2,1,6,6,32], index: 0, kind: input, shape index: {}]   ;;  %s1512_s1 = inlined_call_operand.vmem [shape: bf16[288,32], index: 1, kind: input, shape index: {}]   ;;  %s1513_s2 = inlined_call_operand.hbm [shape: f32[1,32], index: 2, kind: input, shape index: {}]   ;;  %s1514_s3 = inlined_call_operand.vmem [shape: bf16[2,4,4,32], index: 3, kind: output, shape index: {}]  }
   0x1   :  { %s1327_s14 = smov 0  }
   0x2 LB: > { %s1011_s15 = sadd.s32 4294967295, %s1294_s14   ;;  %s33_s16 = sadd.s32 1, %s1290_s13  ;;  %s1294_s14 = sphi %s1327_s14, %s14_s14   ;;  %s1290_s13 = sphi %s1325_s13, %s1518_s13   ;;  %s1286_s12 = sphi %s1323_s12, %s1517_s12  }
   0x3   : > { %p35_p0 = scmp.ge.s32.totalorder %s33_s16, 2  ;;  %p1013_p1 = scmp.ge.s32.totalorder %s1294_s14, 1 }
   0x4   : > { %p146_p2 = scmp.lt.s32.totalorder %s1294_s14, 3  ;;  %p1348_p4 = scmp.eq.s32.totalorder %s1011_s15, 0 }
   0x5   : > { %s1520_s16 = smov (%p35_p0, %s33_s16), 0  ;;  %s1300_s19 = smov [#allocation2]  }
   0x6   : > { %p1344_p3 = pnand %p1013_p1, %p146_p2  ;;  %s168_s20 = sshll.u32 %s1300_s19, 4  ;;  %s169_s20 = int_to_ptr.vmem [resolvable:$true] %s168_s20 }
   0x7   : > { %s1249_s21 = scalar_lea.vmem %s169_s20, 16  ;;  %s1256_s22 = scalar_lea.vmem %s169_s20, 32 }
   0x8   : > { %p1173_p5 = pneg %p1344_p3  ;;  %p1250_p8 = scmp.ne.s32.totalorder %s169_s20, %s1249_s21 }
   0x9   : > { %p1257_p11 = scmp.lt.s32.totalorder %s169_s20, %s169_s20  ;;  %p1258_p12 = scmp.lt.s32.totalorder %s1256_s22, %s1249_s21 }
   0xa   : > { %p1174_p6 = pnand %p1348_p4, %p1173_p5 }
   0xb   : > { %p1259_p13 = por %p1258_p12, %p1257_p11 }
   0xc   : > { %p1240_p7 = pneg %p1174_p6 }
   0xe   : > { %p1252_p9 = pnand %p1250_p8, %p1240_p7 }
  0x10   : > { %p1253_p10 = pneg %p1252_p9 }
  0x12   : > { %p1260_p0 = pnand %p1259_p13, %p1253_p10 }
  0x14   : > { %1263 = shalt.err (!%p1260_p0)
}
  0x15   : > { %1176 = dma.hbm_to_vmem [thread:$0]  (!%p1174_p6), %s1513_s2, 16, %s169_s20, [#allocation3]  }
  0x16   : > { %189 = sbr.rel (%p1344_p3) target bundleno = 275 (0x113), region = 32 }
  0x1b   : > { %1281 = dma.done.wait (%p1348_p4), [#allocation3], 16  }
  0x1c   : > { %1283 = vsyncadd (%p1348_p4), [#allocation3], 4294967280  ;;  %p224_p1 = scmp.lt.s32.totalorder %s1286_s12, 1  ;;  %v1377_v0 = vld [vmem:[#allocation2] ss:$0 sm:$0xff]  ;;  %s1379_s6 = smov 0  }
  0x1e   : > { %s1522_s12 = smov (!%p224_p1, %s1286_s12), 1 }
  0x1f   : > { %s1168_s25 = smul.u32 24, %s1522_s12  ;;  %s1068_s26 = sshll.u32 %s1522_s12, 3 }
  0x20   : > { %s1370_s29 = scalar_lea.vmem %s1514_s3, %s1068_s26 }
  0x21   : > { %s1375_s5 = scalar_lea.vmem %s1511_s0, %s1168_s25 }
  0x22 LB: >> { %v1214_v1 = vld [vmem:[%s1512_s1 + $0x8] sm:$0xff]   ;;  %v1301_v2 = vmov 0.0   ;;  %v1215_v3 = vld [vmem:[%s1512_s1 + $0x18] sm:$0xff]   ;;  %v1216_v4 = vld [vmem:[%s1512_s1] sm:$0xff]   ;;  %vm1302_vm0 = vmmov 0   ;;  %s1022_s15 = sshll.u32 %s1298_s6, 2  ;;  %s1298_s6 = sphi %s1379_s6, %s254_s6  }
  0x23   : >> { %1096 = vmatprep.subr.bf16.mxu0 %v1301_v2  ;;  %1104 = vmatprep.subr.bf16.mxu1 %v1301_v2  ;;  %s1400_s17 = scalar_lea.vmem %s1375_s5, %s1022_s15  ;;  %v1217_v5 = vld [vmem:[%s1512_s1 + $0x10] sm:$0xff]   ;;  %vm281_vm1 = vcmask 261120   ;;  %v1218_v8 = vld [vmem:[%s1512_s1 + $0x28] sm:$0xff]   ;;  %v1220_v13 = vld [vmem:[%s1512_s1 + $0x38] sm:$0xff]   ;;  %vm865_vm2 = vcmask 254976  }
  0x24   : >> { %1097 = vmatpush3.bf16.msra.mxu0 %v1214_v1  ;;  %1100 = vmatprep.mubr.msk.bf16.mxu0 %vm1302_vm0, %v1301_v2  ;;  %v258_v6 = vld [vmem:[%s1400_s17] sm:$0x3]  ;;  %v1223_v16 = vld [vmem:[%s1512_s1 + $0x30] sm:$0xff]   ;;  %v1227_v18 = vld [vmem:[%s1400_s17 + $0x4] ss:$0 sps:$4 sm:$0x77]  }
  0x25   : >> { %1098 = vmatprep.subr.bf16.mxu0 %v1301_v2  ;;  %1105 = vmatpush3.bf16.msra.mxu1 %v1215_v3  ;;  %v1219_v7 = vld [vmem:[%s1400_s17] ss:$0 sps:$4 sm:$0x77]   ;;  %v1224_v19 = vld [vmem:[%s1512_s1 + $0x48] sm:$0xff]   ;;  %v536_v20 = vshll.u32 %v1227_v18, 16  ;;  %v1225_v22 = vld [vmem:[%s1512_s1 + $0x58] sm:$0xff]  }
  0x26   : >> { %1106 = vmatprep.subr.bf16.mxu1 %v1301_v2  ;;  %1108 = vmatprep.mubr.msk.bf16.mxu1 %vm1302_vm0, %v1301_v2  ;;  %v334_v9 = vshrl.u32 %v1219_v7, 16  ;;  %v336_v10 = vshll.u32 %v1219_v7, 16  ;;  %v1222_v11 = vld [vmem:[%s1400_s17] ss:$0 sps:$4 sm:$0x66]   ;;  %v534_v23 = vshrl.u32 %v1227_v18, 16 }
  0x27   : >> { %v1221_v14 = vld [vmem:[%s1512_s1 + $0x20] sm:$0xff]   ;;  %v404_v17 = vrot.slane %v1222_v11, 1  ;;  %v538_v24 = vrot.slane %v536_v20, 1  ;;  %v1228_v28 = vld [vmem:[%s1512_s1 + $0x50] sm:$0xff]   ;;  %v1229_v30 = vld [vmem:[%s1512_s1 + $0x68] sm:$0xff]  }
  0x28   : >> { %1099 = vmatpush3.bf16.msra.mxu0 %v1216_v4  ;;  %v338_v12 = vrot.slane %v336_v10, 1  ;;  %v1036_v21 = vld [vmem:[%s1400_s17 + $0x4] sm:$0x3]  ;;  %v1235_v29 = vld [vmem:[%s1400_s17 + $0x8] ss:$0 sps:$4 sm:$0x77]  }
  0x29   : >> { %1107 = vmatpush3.bf16.msra.mxu1 %v1217_v5  ;;  %1112 = vmatprep.subr.bf16.mxu0 %v1301_v2  ;;  %v1226_v25 = vld [vmem:[%s1512_s1 + $0x40] sm:$0xff]   ;;  %v539_v27 = vor.u32 %v538_v24, %v534_v23  ;;  %v736_v32 = vshll.u32 %v1235_v29, 16  ;;  %v1231_v33 = vld [vmem:[%s1512_s1 + $0x78] sm:$0xff]   ;;  %v734_v35 = vshrl.u32 %v1235_v29, 16  ;;  %v1051_v37 = vld [vmem:[%s1400_s17 + $0x8] sm:$0x3] }
  0x2a   : >> { %1120 = vmatprep.subr.bf16.mxu1 %v1301_v2  ;;  %v339_v15 = vor.u32 %v338_v12, %v334_v9  ;;  %v1230_v26 = vld [vmem:[%s1400_s17 + $0x4] ss:$0 sps:$4 sm:$0x66]   ;;  %v1233_v38 = vld [vmem:[%s1512_s1 + $0x70] sm:$0xff]   ;;  %v1234_v39 = vld [vmem:[%s1512_s1 + $0x88] sm:$0xff]  }
  0x2b   : >> { %1101 = vmatmul.mubr.msk.bf16.vlgmr.msra.gmra.mxu0 %vm281_vm1, %v258_v6  ;;  %v604_v31 = vrot.slane %v1230_v26, 1  ;;  %v1232_v34 = vld [vmem:[%s1512_s1 + $0x60] sm:$0xff]   ;;  %v738_v36 = vrot.slane %v736_v32, 1  ;;  %v1237_v41 = vld [vmem:[%s1400_s17 + $0x8] ss:$0 sps:$4 sm:$0x66]  }
  0x2c   : >> { %1113 = vmatpush3.bf16.msra.mxu0 %v1218_v8  ;;  %1116 = vmatprep.mubr.msk.bf16.mxu0 %vm1302_vm0, %v1301_v2  ;;  %v1236_v42 = vld [vmem:[%s1512_s1 + $0x80] sm:$0xff]   ;;  %v804_v43 = vrot.slane %v1237_v41, 1  ;;  %s1065_s17 = sshll.u32 %s1298_s6, 1  ;;  %s254_s6 = sadd.s32 1, %s1298_s6  }
  0x2d   : >> { %1114 = vmatprep.subr.bf16.mxu0 %v1301_v2  ;;  %1109 = vmatmul.mubr.msk.bf16.vlgmr.msra.gmra.mxu1 %vm281_vm1, %v339_v15  ;;  %v739_v40 = vor.u32 %v738_v36, %v734_v35  ;;  %s864_s28 = scalar_lea.vmem %s1370_s29, %s1065_s17  ;;  %p251_p2 = scmp.ge.s32.totalorder %s254_s6, 4  }
  0x2e   : >> { %1121 = vmatpush3.bf16.msra.mxu1 %v1220_v13  ;;  %1124 = vmatprep.mubr.msk.bf16.mxu1 %vm1302_vm0, %v1301_v2 }
  0x2f   : >> { %1122 = vmatprep.subr.bf16.mxu1 %v1301_v2 }
  0x30   : >> { %1115 = vmatpush3.bf16.msra.mxu0 %v1221_v14 }
  0x31   : >> { %1128 = vmatprep.subr.bf16.mxu0 %v1301_v2 }
  0x32   : >> { %1123 = vmatpush3.bf16.msra.mxu1 %v1223_v16 }
  0x33   : >> { %1117 = vmatmul.mubr.msk.bf16.vlgmr.msra.gmra.mxu0 %vm281_vm1, %v404_v17  ;;  %1136 = vmatprep.subr.bf16.mxu1 %v1301_v2 }
  0x34   : >> { %1129 = vmatpush3.bf16.msra.mxu0 %v1224_v19  ;;  %1132 = vmatprep.mubr.msk.bf16.mxu0 %vm1302_vm0, %v1301_v2 }
  0x35   : >> { %1130 = vmatprep.subr.bf16.mxu0 %v1301_v2  ;;  %1125 = vmatmul.mubr.msk.bf16.vlgmr.msra.gmra.mxu1 %vm281_vm1, %v1036_v21 }
  0x36   : >> { %1137 = vmatpush3.bf16.msra.mxu1 %v1225_v22  ;;  %1140 = vmatprep.mubr.msk.bf16.mxu1 %vm1302_vm0, %v1301_v2 }
  0x37   : >> { %1138 = vmatprep.subr.bf16.mxu1 %v1301_v2 }
  0x38   : >> { %1131 = vmatpush3.bf16.msra.mxu0 %v1226_v25 }
  0x39   : >> { %1144 = vmatprep.subr.bf16.mxu0 %v1301_v2 }
  0x3a   : >> { %1139 = vmatpush3.bf16.msra.mxu1 %v1228_v28 }
  0x3b   : >> { %1133 = vmatmul.mubr.msk.bf16.vlgmr.msra.gmra.mxu0 %vm281_vm1, %v539_v27  ;;  %1152 = vmatprep.subr.bf16.mxu1 %v1301_v2 }
  0x3c   : >> { %1145 = vmatpush3.bf16.msra.mxu0 %v1229_v30  ;;  %1148 = vmatprep.mubr.msk.bf16.mxu0 %vm1302_vm0, %v1301_v2 }
  0x3d   : >> { %1146 = vmatprep.subr.bf16.mxu0 %v1301_v2  ;;  %1141 = vmatmul.mubr.msk.bf16.vlgmr.msra.gmra.mxu1 %vm281_vm1, %v604_v31 }
  0x3e   : >> { %1153 = vmatpush3.bf16.msra.mxu1 %v1231_v33  ;;  %1156 = vmatprep.mubr.msk.bf16.mxu1 %vm1302_vm0, %v1301_v2 }
  0x3f   : >> { %1154 = vmatprep.subr.bf16.mxu1 %v1301_v2 }
  0x40   : >> { %1147 = vmatpush3.bf16.msra.mxu0 %v1232_v34 }
  0x41   : >> { %1160 = vmatprep.subr.bf16.mxu0 %v1301_v2 }
  0x42   : >> { %1155 = vmatpush3.bf16.msra.mxu1 %v1233_v38 }
  0x43   : >> { %1149 = vmatmul.mubr.msk.bf16.vlgmr.msra.gmra.mxu0 %vm281_vm1, %v1051_v37 }
  0x44   : >> { %1161 = vmatpush3.bf16.msra.mxu0 %v1234_v39  ;;  %1164 = vmatprep.mubr.msk.bf16.mxu0 %vm1302_vm0, %v1301_v2 }
  0x45   : >> { %1162 = vmatprep.subr.bf16.mxu0 %v1301_v2  ;;  %1157 = vmatmul.mubr.msk.bf16.vlgmr.msra.gmra.mxu1 %vm281_vm1, %v739_v40 }
  0x48   : >> { %1163 = vmatpush3.bf16.msra.mxu0 %v1236_v42 }
  0x4b   : >> { %1165 = vmatmul.mubr.msk.bf16.vlgmr.msra.gmra.mxu0 %vm281_vm1, %v804_v43 }
  0xeb   : >> { %v319_v44 = vpop.f32.mrf.mxu0 }
  0xec   : >> { %v320_v52 = vadd.f32 %v1377_v0, %v319_v44 }
  0xed   : >> { %v1102_v45 = vpop.f32.mrf.mxu0  ;;  %v389_v46 = vpop.f32.mrf.mxu1 }
  0xee   : >> { %v395_v57 = vadd.f32 %v389_v46, %v320_v52 }
  0xef   : >> { %v322_v47 = vpop.f32.mrf.mxu0  ;;  %v1110_v48 = vpop.f32.mrf.mxu1 }
  0xf1   : >> { %v1103_v49 = vpop.f32.mrf.mxu0  ;;  %v392_v50 = vpop.f32.mrf.mxu1 }
  0xf3   : >> { %v454_v51 = vpop.f32.mrf.mxu0  ;;  %v1111_v53 = vpop.f32.mrf.mxu1 }
  0xf4   : >> { %v460_v60 = vadd.f32 %v454_v51, %v395_v57 }
  0xf5   : >> { %v1118_v54 = vpop.f32.mrf.mxu0  ;;  %v518_v55 = vpop.f32.mrf.mxu1 }
  0xf6   : >> { %v524_v2 = vadd.f32 %v518_v55, %v460_v60 }
  0xf7   : >> { %v457_v56 = vpop.f32.mrf.mxu0  ;;  %v1126_v58 = vpop.f32.mrf.mxu1 }
  0xf9   : >> { %v1119_v59 = vpop.f32.mrf.mxu0  ;;  %v521_v61 = vpop.f32.mrf.mxu1 }
  0xfb   : >> { %v589_v62 = vpop.f32.mrf.mxu0  ;;  %v1127_v63 = vpop.f32.mrf.mxu1 }
  0xfc   : >> { %v595_v5 = vadd.f32 %v589_v62, %v524_v2 }
  0xfd   : >> { %v1134_v1 = vpop.f32.mrf.mxu0  ;;  %v654_v3 = vpop.f32.mrf.mxu1 }
  0xfe   : >> { %v660_v10 = vadd.f32 %v654_v3, %v595_v5 }
  0xff   : >> { %v592_v4 = vpop.f32.mrf.mxu0  ;;  %v1142_v6 = vpop.f32.mrf.mxu1 }
 0x101   : >> { %v1135_v7 = vpop.f32.mrf.mxu0  ;;  %v657_v8 = vpop.f32.mrf.mxu1 }
 0x103   : >> { %v718_v9 = vpop.f32.mrf.mxu0  ;;  %v1143_v11 = vpop.f32.mrf.mxu1 }
 0x104   : >> { %v724_v13 = vadd.f32 %v718_v9, %v660_v10 }
 0x105   : >> { %v1150_v12 = vpop.f32.mrf.mxu0  ;;  %v789_v14 = vpop.f32.mrf.mxu1 }
 0x106   : >> { %v795_v18 = vadd.f32 %v789_v14, %v724_v13 }
 0x107   : >> { %v721_v15 = vpop.f32.mrf.mxu0  ;;  %v1158_v16 = vpop.f32.mrf.mxu1 }
 0x109   : >> { %v1151_v17 = vpop.f32.mrf.mxu0  ;;  %v792_v19 = vpop.f32.mrf.mxu1 }
 0x10b   : >> { %v854_v20 = vpop.f32.mrf.mxu0  ;;  %v1159_v22 = vpop.f32.mrf.mxu1 }
 0x10c   : >> { %v860_v21 = vadd.f32 %v854_v20, %v795_v18 }
 0x10d   : >> { %v1166_v23 = vpop.f32.mrf.mxu0 }
 0x10e   : >> { %v861_v24 = vmax.f32 %v860_v21, 0.0  ;;  %253 = sbr.rel (!%p251_p2) target bundleno = 34 (0x22), region = 82 }
 0x10f   : >> { %v857_v25 = vpop.f32.mrf.mxu0 }
 0x110   : >> { %v862_v26 = vpack.c.bf16 %v861_v24, %v861_v24 }
 0x111   : >> { %v1167_v27 = vpop.f32.mrf.mxu0 }
 0x112   : >> { %866 = vst.msk [vmem:[%s864_s28] sm:$0x3] %vm865_vm2, %v862_v26 }
 0x113 PF: > { %s14_s14 = sadd.s32 1, %s1294_s14   ;;  %s1517_s12 = smov %s1290_s13 }
 0x114   : > { %p11_p3 = scmp.ge.s32.totalorder %s14_s14, 4   ;;  %s1518_s13 = smov %s1520_s16 }
 0x116   :  { %13 = sbr.rel (!%p11_p3) target bundleno = 2 (0x2), region = 93 }
 0x11b   :  { %903 = vsyncpa [#allocation3], 1 }
 0x11c   :  { %905 = vsyncpa [#allocation3 + $0x1], 1 }

// kernel: encoder_cnn_forward.102
= control target key start
LH: loop header
LB: loop body
LE: loop exit
PB: predicated region body
PF: predicated region fallthrough
CT: control target
= control target key end

     0   :  { %s710_s12 = smov 0   ;;  %s712_s13 = smov 0   ;;  %s800_s0 = inlined_call_operand.vmem [shape: bf16[8,128], index: 0, kind: input, shape index: {}]   ;;  %s801_s1 = inlined_call_operand.vmem [shape: bf16[128,256], index: 1, kind: input, shape index: {}]   ;;  %s802_s2 = inlined_call_operand.vmem [shape: f32[1,256], index: 2, kind: input, shape index: {}]   ;;  %s803_s3 = inlined_call_operand.vmem [shape: bf16[8,256], index: 3, kind: output, shape index: {}]  }
   0x1   :  { %s714_s14 = smov 0   ;;  %s716_s15 = smov 0  }
   0x2   :  { %s718_s16 = smov 0  }
   0x3 LB: > { %s22_s17 = sadd.s32 1, %s682_s15  ;;  %p65_p1 = scmp.ne.s32.totalorder %s674_s13, %s670_s12  ;;  %s686_s16 = sphi %s718_s16, %s13_s16   ;;  %s682_s15 = sphi %s716_s15, %s807_s15   ;;  %s678_s14 = sphi %s714_s14, %s806_s14   ;;  %s674_s13 = sphi %s712_s13, %s805_s13   ;;  %s670_s12 = sphi %s710_s12, %s804_s12  }
   0x4   : > { %p23_p0 = scmp.ge.s32.totalorder %s22_s17, 2  ;;  %p66_p2 = scmp.eq.s32.totalorder %s686_s16, 0 }
   0x5   : > { %s58_s19 = sadd.s32 1, %s674_s13  ;;  %p552_p5 = scmp.ge.s32.totalorder %s686_s16, 2 }
   0x6   : > { %s809_s17 = smov (%p23_p0, %s22_s17), 0  ;;  %p67_p3 = por %p66_p2, %p65_p1 }
   0x7   : > { %s55_s18 = ssub.s32 %s682_s15, %s809_s17  ;;  %152 = sbr.rel (%p552_p5) target bundleno = 26 (0x1a), region = 20 }
   0x8   : > { %p56_p4 = scmp.eq.s32.totalorder %s55_s18, 0 }
   0xa   : > { %s745_s20 = scalar_select %p56_p4, %s674_s13, %s58_s19  }
   0xc   : > { %155 = sbr.rel (!%p67_p3) target bundleno = 26 (0x1a), region = 24  ;;  %s157_s21 = sand.u32 (%p67_p3), 1, %s674_s13  }
   0xd   : > { %s554_s22 = sshll.u32 (%p67_p3), %s682_s15, 2  ;;  %s553_s23 = sshll.u32 (%p67_p3), %s157_s21, 6 }
   0xe   : > { %s753_s26 = scalar_lea.vmem (%p67_p3), %s801_s1, %s554_s22  ;;  %s159_s27 = scalar_lea.vmem (%p67_p3), [#allocation2], %s553_s23 }
   0xf   : > { %v178_v0 = vld [vmem:[%s753_s26] sm:$0xf] (%p67_p3)  ;;  %v180_v1 = vld [vmem:[%s753_s26 + $0x8] sm:$0xf] (%p67_p3)  ;;  %v182_v2 = vld [vmem:[%s753_s26 + $0x10] sm:$0xf] (%p67_p3) }
  0x10   : > { %179 = vst [vmem:[%s159_s27] sm:$0xf] (%p67_p3), %v178_v0  ;;  %181 = vst [vmem:[%s159_s27 + $0x4] sm:$0xf] (%p67_p3), %v180_v1  ;;  %v184_v3 = vld [vmem:[%s753_s26 + $0x18] sm:$0xf] (%p67_p3) }
  0x11   : > { %v186_v4 = vld [vmem:[%s753_s26 + $0x20] sm:$0xf]  ;;  %183 = vst [vmem:[%s159_s27 + $0x8] sm:$0xf] %v182_v2  ;;  %185 = vst [vmem:[%s159_s27 + $0xc] sm:$0xf] %v184_v3 }
  0x12   : > { %187 = vst [vmem:[%s159_s27 + $0x10] sm:$0xf] %v186_v4  ;;  %v188_v5 = vld [vmem:[%s753_s26 + $0x28] sm:$0xf]  ;;  %v190_v6 = vld [vmem:[%s753_s26 + $0x30] sm:$0xf] }
  0x13   : > { %v192_v7 = vld [vmem:[%s753_s26 + $0x38] sm:$0xf]  ;;  %189 = vst [vmem:[%s159_s27 + $0x14] sm:$0xf] %v188_v5  ;;  %191 = vst [vmem:[%s159_s27 + $0x18] sm:$0xf] %v190_v6 }
  0x14   : > { %193 = vst [vmem:[%s159_s27 + $0x1c] sm:$0xf] %v192_v7  ;;  %v194_v8 = vld [vmem:[%s753_s26 + $0x40] sm:$0xf]  ;;  %v196_v9 = vld [vmem:[%s753_s26 + $0x48] sm:$0xf] }
  0x15   : > { %v198_v10 = vld [vmem:[%s753_s26 + $0x50] sm:$0xf]  ;;  %195 = vst [vmem:[%s159_s27 + $0x20] sm:$0xf] %v194_v8  ;;  %197 = vst [vmem:[%s159_s27 + $0x24] sm:$0xf] %v196_v9 }
  0x16   : > { %199 = vst [vmem:[%s159_s27 + $0x28] sm:$0xf] %v198_v10  ;;  %v200_v11 = vld [vmem:[%s753_s26 + $0x58] sm:$0xf]  ;;  %v202_v12 = vld [vmem:[%s753_s26 + $0x60] sm:$0xf] }
  0x17   : > { %v204_v13 = vld [vmem:[%s753_s26 + $0x68] sm:$0xf]  ;;  %201 = vst [vmem:[%s159_s27 + $0x2c] sm:$0xf] %v200_v11  ;;  %203 = vst [vmem:[%s159_s27 + $0x30] sm:$0xf] %v202_v12 }
  0x18   : > { %205 = vst [vmem:[%s159_s27 + $0x34] sm:$0xf] %v204_v13  ;;  %v206_v14 = vld [vmem:[%s753_s26 + $0x70] sm:$0xf]  ;;  %v208_v15 = vld [vmem:[%s753_s26 + $0x78] sm:$0xf] }
  0x19   : > { %207 = vst [vmem:[%s159_s27 + $0x38] sm:$0xf] %v206_v14  ;;  %209 = vst [vmem:[%s159_s27 + $0x3c] sm:$0xf] %v208_v15 }
  0x1a PF: > { %p555_p6 = scmp.ge.s32.totalorder %s686_s16, 1  ;;  %p270_p7 = scmp.lt.s32.totalorder %s686_s16, 3 }
  0x1c   : > { %p271_p8 = pnand %p555_p6, %p270_p7 }
  0x1d   : > { %s277_s28 = sand.u32 (!%p271_p8), 1, %s670_s12   ;;  %p314_p9 = scmp.lt.s32.totalorder (!%p271_p8), %s678_s14, 1 }
  0x1e   : > { %274 = sbr.rel (%p271_p8) target bundleno = 267 (0x10b), region = 69  ;;  %s556_s29 = sshll.u32 (!%p271_p8), %s277_s28, 6 }
  0x1f   : > { %s279_s30 = scalar_lea.vmem (!%p271_p8), [#allocation2], %s556_s29 }
  0x23   : > { %v688_v16 = vmov 0.0   ;;  %vm689_vm0 = vmmov 0   ;;  %v640_v17 = vld [vmem:[%s279_s30 + $0x38] sm:$0xff]   ;;  %v641_v18 = vld [vmem:[%s279_s30 + $0x30] sm:$0xff]   ;;  %v642_v19 = vld [vmem:[%s279_s30 + $0x28] sm:$0xff]   ;;  %s811_s14 = smov (!%p314_p9, %s678_s14), 1 }
  0x24   : > { %578 = vmatprep.subr.bf16.mxu0 %v688_v16  ;;  %594 = vmatprep.mubr.msk.bf16.mxu0 %vm689_vm0, %v688_v16  ;;  %v643_v20 = vld [vmem:[%s279_s30 + $0x20] sm:$0xff]   ;;  %v644_v21 = vld [vmem:[%s279_s30 + $0x18] sm:$0xff]   ;;  %v645_v22 = vld [vmem:[%s279_s30 + $0x10] sm:$0xff]   ;;  %s316_s8 = scalar_lea.vmem %s802_s2, %s811_s14  ;;  %s557_s9 = sshll.u32 %s811_s14, 2 }
  0x25   : > { %579 = vmatpush3.bf16.msra.mxu0 %v640_v17  ;;  %v646_v23 = vld [vmem:[%s279_s30 + $0x8] sm:$0xff]   ;;  %v647_v24 = vld [vmem:[%s279_s30] sm:$0xff]   ;;  %s324_s12 = scalar_lea.vmem %s803_s3, %s557_s9 }
  0x26   : > { %580 = vmatprep.subr.bf16.mxu0 %v688_v16  ;;  %v326_v25 = vld [vmem:[%s800_s0] sm:$0xf] }
  0x27   : > { %v558_v26 = vld [vmem:[%s316_s8] ss:$0 sm:$0xff] }
  0x29   : > { %581 = vmatpush3.bf16.msra.mxu0 %v641_v18 }
  0x2a   : > { %582 = vmatprep.subr.bf16.mxu0 %v688_v16 }
  0x2d   : > { %583 = vmatpush3.bf16.msra.mxu0 %v642_v19 }
  0x2e   : > { %584 = vmatprep.subr.bf16.mxu0 %v688_v16 }
  0x31   : > { %585 = vmatpush3.bf16.msra.mxu0 %v643_v20 }
  0x32   : > { %586 = vmatprep.subr.bf16.mxu0 %v688_v16 }
  0x35   : > { %587 = vmatpush3.bf16.msra.mxu0 %v644_v21 }
  0x36   : > { %588 = vmatprep.subr.bf16.mxu0 %v688_v16 }
  0x39   : > { %589 = vmatpush3.bf16.msra.mxu0 %v645_v22 }
  0x3a   : > { %590 = vmatprep.subr.bf16.mxu0 %v688_v16 }
  0x3d   : > { %591 = vmatpush3.bf16.msra.mxu0 %v646_v23 }
  0x3e   : > { %592 = vmatprep.subr.bf16.mxu0 %v688_v16 }
  0x41   : > { %593 = vmatpush3.bf16.msra.mxu0 %v647_v24 }
  0x44   : > { %595 = vmatmul.mubr.bf16.vlgmr.msra.gmra.mxu0 %v326_v25 }
 0x104   : > { %v432_v27 = vpop.f32.mrf.mxu0 }
 0x105   : > { %v433_v28 = vadd.f32 %v558_v26, %v432_v27 }
 0x106   : > { %v596_v29 = vpop.f32.mrf.mxu0 }
 0x107   : > { %v438_v30 = vpack.c.bf16 %v433_v28, %v433_v28 }
 0x108   : > { %v435_v31 = vpop.f32.mrf.mxu0 }
 0x109   : > { %439 = vst [vmem:[%s324_s12] sm:$0xf] %v438_v30 }
 0x10a   : > { %v597_v32 = vpop.f32.mrf.mxu0 }
 0x10b PF: > { %s13_s16 = sadd.s32 1, %s686_s16   ;;  %s804_s12 = smov %s674_s13 }
 0x10c   : > { %p10_p10 = scmp.ge.s32.totalorder %s13_s16, 4   ;;  %s805_s13 = smov %s745_s20 }
 0x10d   : > { %s806_s14 = smov %s682_s15  ;;  %s807_s15 = smov %s809_s17 }
 0x10e   :  { %12 = sbr.rel (!%p10_p10) target bundleno = 3 (0x3), region = 114 }

// kernel: encoder_cnn_forward.103
= control target key start
LH: loop header
LB: loop body
LE: loop exit
PB: predicated region body
PF: predicated region fallthrough
CT: control target
= control target key end

     0   :  { %s717_s15 = smov 0   ;;  %s719_s16 = smov 0   ;;  %s792_s0 = inlined_call_operand.vmem [shape: bf16[8,64], index: 0, kind: input, shape index: {}]   ;;  %s793_s1 = inlined_call_operand.vmem [shape: bf16[64,256], index: 1, kind: input, shape index: {}]   ;;  %s794_s2 = inlined_call_operand.vmem [shape: f32[1,256], index: 2, kind: input, shape index: {}]   ;;  %s795_s3 = inlined_call_operand.vmem [shape: bf16[8,256], index: 3, kind: input, shape index: {}]   ;;  %s796_s4 = inlined_call_operand.vmem [shape: bf16[8,256], index: 4, kind: output, shape index: {}]  }
   0x1   :  { %s721_s17 = smov 0   ;;  %s723_s18 = smov 0  }
   0x2   :  { %s725_s19 = smov 0  }
   0x3 LB: > { %s23_s20 = sadd.s32 1, %s684_s18  ;;  %p66_p1 = scmp.ne.s32.totalorder %s676_s16, %s672_s15  ;;  %s688_s19 = sphi %s725_s19, %s14_s19   ;;  %s684_s18 = sphi %s723_s18, %s800_s18   ;;  %s680_s17 = sphi %s721_s17, %s799_s17   ;;  %s676_s16 = sphi %s719_s16, %s798_s16   ;;  %s672_s15 = sphi %s717_s15, %s797_s15  }
   0x4   : > { %p24_p0 = scmp.ge.s32.totalorder %s23_s20, 2  ;;  %p67_p2 = scmp.eq.s32.totalorder %s688_s19, 0 }
   0x5   : > { %s59_s22 = sadd.s32 1, %s676_s16  ;;  %p572_p5 = scmp.ge.s32.totalorder %s688_s19, 2 }
   0x6   : > { %s802_s20 = smov (%p24_p0, %s23_s20), 0  ;;  %p68_p3 = por %p67_p2, %p66_p1 }
   0x7   : > { %s56_s21 = ssub.s32 %s684_s18, %s802_s20  ;;  %181 = sbr.rel (%p572_p5) target bundleno = 21 (0x15), region = 20 }
   0x8   : > { %p57_p4 = scmp.eq.s32.totalorder %s56_s21, 0 }
   0xa   : > { %s752_s23 = scalar_select %p57_p4, %s676_s16, %s59_s22  }
   0xc   : > { %184 = sbr.rel (!%p68_p3) target bundleno = 21 (0x15), region = 24  ;;  %s186_s24 = sand.u32 (%p68_p3), 1, %s676_s16  }
   0xd   : > { %s574_s25 = sshll.u32 (%p68_p3), %s684_s18, 2  ;;  %s573_s26 = sshll.u32 (%p68_p3), %s186_s24, 5 }
   0xe   : > { %s190_s29 = scalar_lea.vmem (%p68_p3), %s793_s1, %s574_s25  ;;  %s188_s30 = scalar_lea.vmem (%p68_p3), [#allocation2], %s573_s26 }
   0xf   : > { %v207_v0 = vld [vmem:[%s190_s29] sm:$0xf] (%p68_p3)  ;;  %v209_v1 = vld [vmem:[%s190_s29 + $0x8] sm:$0xf] (%p68_p3)  ;;  %v211_v2 = vld [vmem:[%s190_s29 + $0x10] sm:$0xf] (%p68_p3) }
  0x10   : > { %208 = vst [vmem:[%s188_s30] sm:$0xf] (%p68_p3), %v207_v0  ;;  %210 = vst [vmem:[%s188_s30 + $0x4] sm:$0xf] (%p68_p3), %v209_v1  ;;  %v213_v3 = vld [vmem:[%s190_s29 + $0x18] sm:$0xf] (%p68_p3) }
  0x11   : > { %v215_v4 = vld [vmem:[%s190_s29 + $0x20] sm:$0xf]  ;;  %212 = vst [vmem:[%s188_s30 + $0x8] sm:$0xf] %v211_v2  ;;  %214 = vst [vmem:[%s188_s30 + $0xc] sm:$0xf] %v213_v3 }
  0x12   : > { %216 = vst [vmem:[%s188_s30 + $0x10] sm:$0xf] %v215_v4  ;;  %v217_v5 = vld [vmem:[%s190_s29 + $0x28] sm:$0xf]  ;;  %v219_v6 = vld [vmem:[%s190_s29 + $0x30] sm:$0xf] }
  0x13   : > { %v221_v7 = vld [vmem:[%s190_s29 + $0x38] sm:$0xf]  ;;  %218 = vst [vmem:[%s188_s30 + $0x14] sm:$0xf] %v217_v5  ;;  %220 = vst [vmem:[%s188_s30 + $0x18] sm:$0xf] %v219_v6 }
  0x14   : > { %222 = vst [vmem:[%s188_s30 + $0x1c] sm:$0xf] %v221_v7 }
  0x15 PF: > { %p575_p6 = scmp.ge.s32.totalorder %s688_s19, 1  ;;  %p278_p7 = scmp.lt.s32.totalorder %s688_s19, 3 }
  0x17   : > { %p279_p8 = pnand %p575_p6, %p278_p7 }
  0x18   : > { %s285_s5 = sand.u32 (!%p279_p8), 1, %s672_s15   ;;  %p332_p9 = scmp.lt.s32.totalorder (!%p279_p8), %s680_s17, 1 }
  0x19   : > { %282 = sbr.rel (%p279_p8) target bundleno = 249 (0xf9), region = 73  ;;  %s576_s6 = sshll.u32 (!%p279_p8), %s285_s5, 5 }
  0x1a   : > { %s287_s7 = scalar_lea.vmem (!%p279_p8), [#allocation2], %s576_s6 }
  0x1e   : > { %v690_v8 = vmov 0.0   ;;  %vm691_vm0 = vmmov 0   ;;  %v646_v9 = vld [vmem:[%s287_s7 + $0x18] sm:$0xff]   ;;  %v647_v10 = vld [vmem:[%s287_s7 + $0x10] sm:$0xff]   ;;  %v648_v11 = vld [vmem:[%s287_s7 + $0x8] sm:$0xff]   ;;  %vm392_vm1 = vcmask 523264  }
  0x1f   : > { %592 = vmatprep.subr.bf16.mxu0 %v690_v8  ;;  %600 = vmatprep.mubr.msk.bf16.mxu0 %vm691_vm0, %v690_v8  ;;  %v649_v12 = vld [vmem:[%s287_s7] sm:$0xff]   ;;  %s804_s17 = smov (!%p332_p9, %s680_s17), 1 }
  0x20   : > { %593 = vmatpush3.bf16.msra.mxu0 %v646_v9  ;;  %v352_v13 = vld [vmem:[%s792_s0] sm:$0xf]  ;;  %s577_s10 = sshll.u32 %s804_s17, 2  ;;  %s334_s21 = scalar_lea.vmem %s794_s2, %s804_s17 }
  0x21   : > { %594 = vmatprep.subr.bf16.mxu0 %v690_v8  ;;  %s342_s13 = scalar_lea.vmem %s795_s3, %s577_s10  ;;  %v579_v15 = vld [vmem:[%s334_s21] ss:$0 sm:$0xff]  ;;  %s350_s25 = scalar_lea.vmem %s796_s4, %s577_s10 }
  0x22   : > { %v436_v14 = vld [vmem:[%s342_s13] sm:$0xf] }
  0x23   : > { %v437_v16 = vunpack.c.l.bf16 %v436_v14 }
  0x24   : > { %595 = vmatpush3.bf16.msra.mxu0 %v647_v10 }
  0x25   : > { %596 = vmatprep.subr.bf16.mxu0 %v690_v8 }
  0x28   : > { %597 = vmatpush3.bf16.msra.mxu0 %v648_v11 }
  0x29   : > { %598 = vmatprep.subr.bf16.mxu0 %v690_v8 }
  0x2c   : > { %599 = vmatpush3.bf16.msra.mxu0 %v649_v12 }
  0x2f   : > { %601 = vmatmul.mubr.msk.bf16.vlgmr.msra.gmra.mxu0 %vm392_vm1, %v352_v13 }
  0xef   : > { %v430_v17 = vpop.f32.mrf.mxu0 }
  0xf0   : > { %v431_v18 = vadd.f32 %v579_v15, %v430_v17 }
  0xf1   : > { %v602_v19 = vpop.f32.mrf.mxu0 }
  0xf2   : > { %v438_v20 = vadd.f32 %v437_v16, %v431_v18 }
  0xf3   : > { %v433_v21 = vpop.f32.mrf.mxu0 }
  0xf4   : > { %v439_v22 = vmax.f32 %v438_v20, 0.0 }
  0xf5   : > { %v603_v23 = vpop.f32.mrf.mxu0 }
  0xf6   : > { %v440_v24 = vpack.c.bf16 %v439_v22, %v439_v22 }
  0xf8   : > { %441 = vst [vmem:[%s350_s25] sm:$0xf] %v440_v24 }
  0xf9 PF: > { %s14_s19 = sadd.s32 1, %s688_s19   ;;  %s797_s15 = smov %s676_s16 }
  0xfa   : > { %p11_p10 = scmp.ge.s32.totalorder %s14_s19, 4   ;;  %s798_s16 = smov %s752_s23 }
  0xfb   : > { %s799_s17 = smov %s684_s18  ;;  %s800_s18 = smov %s802_s20 }
  0xfc   :  { %13 = sbr.rel (!%p11_p10) target bundleno = 3 (0x3), region = 121 }

// kernel: encoder_cnn_forward.101
= control target key start
LH: loop header
LB: loop body
LE: loop exit
PB: predicated region body
PF: predicated region fallthrough
CT: control target
= control target key end

     0   :  { %8 = vsyncpa [#allocation3], 0  ;;  %s1566_s12 = smov 0   ;;  %s1568_s13 = smov 0   ;;  %s1826_s0 = inlined_call_operand.vmem [shape: bf16[2,4,3,3,64], index: 0, kind: input, shape index: {}]   ;;  %s1827_s1 = inlined_call_operand.vmem [shape: bf16[576,64], index: 1, kind: input, shape index: {}]   ;;  %s1828_s2 = inlined_call_operand.hbm [shape: f32[1,64], index: 2, kind: input, shape index: {}]   ;;  %s1829_s3 = inlined_call_operand.vmem [shape: bf16[2,2,2,64], index: 3, kind: output, shape index: {}]  }
   0x1   :  { %s1570_s14 = smov 0  }
   0x2 LB: > { %s1172_s15 = sadd.s32 4294967295, %s1537_s14   ;;  %s33_s16 = sadd.s32 1, %s1533_s13  ;;  %s1537_s14 = sphi %s1570_s14, %s14_s14   ;;  %s1533_s13 = sphi %s1568_s13, %s1833_s13   ;;  %s1529_s12 = sphi %s1566_s12, %s1832_s12  }
   0x3   : > { %p35_p0 = scmp.ge.s32.totalorder %s33_s16, 2  ;;  %p1174_p1 = scmp.ge.s32.totalorder %s1537_s14, 1 }
   0x4   : > { %p146_p2 = scmp.lt.s32.totalorder %s1537_s14, 3  ;;  %p1591_p4 = scmp.eq.s32.totalorder %s1172_s15, 0 }
   0x5   : > { %s1835_s16 = smov (%p35_p0, %s33_s16), 0  ;;  %s1543_s19 = smov [#allocation2]  }
   0x6   : > { %p1587_p3 = pnand %p1174_p1, %p146_p2  ;;  %s168_s20 = sshll.u32 %s1543_s19, 4  ;;  %s169_s20 = int_to_ptr.vmem [resolvable:$true] %s168_s20 }
   0x7   : > { %s1492_s21 = scalar_lea.vmem %s169_s20, 16  ;;  %s1499_s22 = scalar_lea.vmem %s169_s20, 32 }
   0x8   : > { %p1404_p5 = pneg %p1587_p3  ;;  %p1493_p8 = scmp.ne.s32.totalorder %s169_s20, %s1492_s21 }
   0x9   : > { %p1500_p11 = scmp.lt.s32.totalorder %s169_s20, %s169_s20  ;;  %p1501_p12 = scmp.lt.s32.totalorder %s1499_s22, %s1492_s21 }
   0xa   : > { %p1405_p6 = pnand %p1591_p4, %p1404_p5 }
   0xb   : > { %p1502_p13 = por %p1501_p12, %p1500_p11 }
   0xc   : > { %p1483_p7 = pneg %p1405_p6 }
   0xe   : > { %p1495_p9 = pnand %p1493_p8, %p1483_p7 }
  0x10   : > { %p1496_p10 = pneg %p1495_p9 }
  0x12   : > { %p1503_p0 = pnand %p1502_p13, %p1496_p10 }
  0x14   : > { %1506 = shalt.err (!%p1503_p0)
}
  0x15   : > { %1407 = dma.hbm_to_vmem [thread:$0]  (!%p1405_p6), %s1828_s2, 16, %s169_s20, [#allocation3]  }
  0x16   : > { %189 = sbr.rel (%p1587_p3) target bundleno = 315 (0x13b), region = 32 }
  0x1b   : > { %1524 = dma.done.wait (%p1591_p4), [#allocation3], 16  }
  0x1c   : > { %1526 = vsyncadd (%p1591_p4), [#allocation3], 4294967280  ;;  %p223_p1 = scmp.lt.s32.totalorder %s1529_s12, 1  ;;  %v1620_v0 = vld [vmem:[#allocation2] ss:$0 sm:$0xff]  ;;  %s1622_s6 = smov 0  }
  0x1e   : > { %s1837_s12 = smov (!%p223_p1, %s1529_s12), 1 }
  0x1f   : > { %s1399_s25 = smul.u32 24, %s1837_s12  ;;  %s1181_s26 = sshll.u32 %s1837_s12, 1 }
  0x20   : > { %s1613_s29 = scalar_lea.vmem %s1829_s3, %s1181_s26 }
  0x21   : > { %s1618_s5 = scalar_lea.vmem %s1826_s0, %s1399_s25 }
  0x22 LB: >> { %v1445_v1 = vld [vmem:[%s1827_s1 + $0x18] sm:$0xff]   ;;  %v1544_v2 = vmov 0.0   ;;  %v1447_v4 = vld [vmem:[%s1827_s1 + $0x10] sm:$0xff]   ;;  %vm1545_vm0 = vmmov 0   ;;  %v1449_v6 = vld [vmem:[%s1827_s1 + $0x8] sm:$0xff]   ;;  %s1182_s20 = sshll.u32 %s1541_s6, 1  ;;  %s1541_s6 = sphi %s1622_s6, %s252_s6  }
  0x23   : >> { %1291 = vmatprep.subr.bf16.mxu0 %v1544_v2  ;;  %1303 = vmatprep.subr.bf16.mxu1 %v1544_v2  ;;  %v1446_v3 = vld [vmem:[%s1827_s1 + $0x38] sm:$0xff]   ;;  %v1448_v5 = vld [vmem:[%s1827_s1 + $0x30] sm:$0xff]   ;;  %v1450_v7 = vld [vmem:[%s1827_s1 + $0x28] sm:$0xff]   ;;  %s1657_s23 = scalar_lea.vmem %s1618_s5, %s1182_s20  ;;  %vm295_vm1 = vcmask 523264   ;;  %vm1018_vm2 = vcmask 516096  }
  0x24   : >> { %1292 = vmatpush3.bf16.msra.mxu0 %v1445_v1  ;;  %1299 = vmatprep.mubr.msk.bf16.mxu0 %vm1545_vm0, %v1544_v2  ;;  %v1451_v8 = vld [vmem:[%s1827_s1] sm:$0xff]   ;;  %v1453_v11 = vld [vmem:[%s1827_s1 + $0x58] sm:$0xff]   ;;  %v1455_v14 = vld [vmem:[%s1827_s1 + $0x50] sm:$0xff]  }
  0x25   : >> { %1304 = vmatpush3.bf16.msra.mxu1 %v1446_v3  ;;  %1293 = vmatprep.subr.bf16.mxu0 %v1544_v2  ;;  %v1452_v9 = vld [vmem:[%s1827_s1 + $0x20] sm:$0xff]   ;;  %v1454_v13 = vld [vmem:[%s1827_s1 + $0x78] sm:$0xff]   ;;  %v1456_v15 = vld [vmem:[%s1827_s1 + $0x70] sm:$0xff]  }
  0x26   : >> { %1305 = vmatprep.subr.bf16.mxu1 %v1544_v2  ;;  %1311 = vmatprep.mubr.msk.bf16.mxu1 %vm1545_vm0, %v1544_v2  ;;  %v256_v10 = vld [vmem:[%s1657_s23] sm:$0x1]  ;;  %v1190_v12 = vld [vmem:[%s1657_s23 + $0x6] sm:$0x1]  ;;  %v1457_v18 = vld [vmem:[%s1827_s1 + $0x48] sm:$0xff]  }
  0x27   : >> { %v1196_v16 = vld.sshfl [vmem:[%s1657_s23] sm:$0x3 pattern:$0x76325410]  ;;  %v1458_v19 = vld [vmem:[%s1827_s1 + $0x68] sm:$0xff]   ;;  %v1461_v24 = vld [vmem:[%s1827_s1 + $0x98] sm:$0xff]  }
  0x28   : >> { %1294 = vmatpush3.bf16.msra.mxu0 %v1447_v4  ;;  %v439_v17 = vshll.u32 %v1196_v16, 16  ;;  %v437_v20 = vshrl.u32 %v1196_v16, 16  ;;  %v1459_v22 = vld [vmem:[%s1827_s1 + $0x40] sm:$0xff]   ;;  %v1203_v26 = vld [vmem:[%s1657_s23 + $0xc] sm:$0x1]  ;;  %v1462_v27 = vld [vmem:[%s1827_s1 + $0xb8] sm:$0xff]  }
  0x29   : >> { %1306 = vmatpush3.bf16.msra.mxu1 %v1448_v5  ;;  %1295 = vmatprep.subr.bf16.mxu0 %v1544_v2  ;;  %v1460_v23 = vld [vmem:[%s1827_s1 + $0x60] sm:$0xff]   ;;  %v1463_v28 = vld [vmem:[%s1827_s1 + $0x90] sm:$0xff]   ;;  %v1217_v29 = vld.sshfl [vmem:[%s1657_s23 + $0xc] sm:$0x3 pattern:$0x76325410] }
  0x2a   : >> { %1307 = vmatprep.subr.bf16.mxu1 %v1544_v2  ;;  %v441_v21 = vrot.slane %v439_v17, 1  ;;  %v1464_v30 = vld [vmem:[%s1827_s1 + $0xb0] sm:$0xff]   ;;  %v1465_v31 = vld [vmem:[%s1827_s1 + $0x88] sm:$0xff]   ;;  %v691_v32 = vshll.u32 %v1217_v29, 16  ;;  %v1467_v34 = vld [vmem:[%s1827_s1 + $0x80] sm:$0xff]   ;;  %v689_v35 = vshrl.u32 %v1217_v29, 16 }
  0x2b   : >> { %v1466_v33 = vld [vmem:[%s1827_s1 + $0xa8] sm:$0xff]   ;;  %v1468_v37 = vld [vmem:[%s1827_s1 + $0xa0] sm:$0xff]   ;;  %v1210_v38 = vld [vmem:[%s1657_s23 + $0x12] sm:$0x1] }
  0x2c   : >> { %1296 = vmatpush3.bf16.msra.mxu0 %v1449_v6  ;;  %v442_v25 = vor.u32 %v441_v21, %v437_v20  ;;  %v693_v36 = vrot.slane %v691_v32, 1  ;;  %v1469_v39 = vld [vmem:[%s1827_s1 + $0xd8] sm:$0xff]   ;;  %v1471_v42 = vld [vmem:[%s1827_s1 + $0xd0] sm:$0xff]   ;;  %v1473_v44 = vld [vmem:[%s1827_s1 + $0xc8] sm:$0xff]  }
  0x2d   : >> { %1308 = vmatpush3.bf16.msra.mxu1 %v1450_v7  ;;  %1297 = vmatprep.subr.bf16.mxu0 %v1544_v2  ;;  %v1470_v41 = vld [vmem:[%s1827_s1 + $0xf8] sm:$0xff]   ;;  %v1472_v43 = vld [vmem:[%s1827_s1 + $0xf0] sm:$0xff]   ;;  %v1474_v45 = vld [vmem:[%s1827_s1 + $0xe8] sm:$0xff]  }
  0x2e   : >> { %1309 = vmatprep.subr.bf16.mxu1 %v1544_v2  ;;  %v694_v40 = vor.u32 %v693_v36, %v689_v35  ;;  %v1475_v46 = vld [vmem:[%s1827_s1 + $0xc0] sm:$0xff]   ;;  %v1477_v49 = vld [vmem:[%s1827_s1 + $0x118] sm:$0xff]   ;;  %v1231_v50 = vld [vmem:[%s1657_s23 + $0x8] sm:$0x1] }
  0x2f   : >> { %v1476_v47 = vld [vmem:[%s1827_s1 + $0xe0] sm:$0xff]   ;;  %v1478_v51 = vld [vmem:[%s1827_s1 + $0x110] sm:$0xff]   ;;  %v1479_v54 = vld [vmem:[%s1827_s1 + $0x108] sm:$0xff]  }
  0x30   : >> { %1298 = vmatpush3.bf16.msra.mxu0 %v1451_v8  ;;  %v1224_v48 = vld [vmem:[%s1657_s23 + $0x2] sm:$0x1] }
  0x31   : >> { %1310 = vmatpush3.bf16.msra.mxu1 %v1452_v9  ;;  %1315 = vmatprep.subr.bf16.mxu0 %v1544_v2  ;;  %v1238_v52 = vld.sshfl [vmem:[%s1657_s23 + $0x2] sm:$0x3 pattern:$0x76325410]  ;;  %s1017_s23 = scalar_lea.vmem %s1613_s29, %s1541_s6  ;;  %s252_s6 = sadd.s32 1, %s1541_s6  }
  0x32   : >> { %1327 = vmatprep.subr.bf16.mxu1 %v1544_v2  ;;  %v943_v53 = vshll.u32 %v1238_v52, 16  ;;  %v941_v55 = vshrl.u32 %v1238_v52, 16  ;;  %v1480_v57 = vld [vmem:[%s1827_s1 + $0x100] sm:$0xff]   ;;  %p249_p2 = scmp.ge.s32.totalorder %s252_s6, 2  }
  0x33   : >> { %1300 = vmatmul.mubr.msk.bf16.vlgmr.msra.gmra.mxu0 %vm295_vm1, %v256_v10 }
  0x34   : >> { %1316 = vmatpush3.bf16.msra.mxu0 %v1453_v11  ;;  %1312 = vmatmul.mubr.msk.bf16.vlgmr.msra.gmra.mxu1 %vm295_vm1, %v1190_v12  ;;  %v945_v56 = vrot.slane %v943_v53, 1 }
  0x35   : >> { %1328 = vmatpush3.bf16.msra.mxu1 %v1454_v13  ;;  %1317 = vmatprep.subr.bf16.mxu0 %v1544_v2 }
  0x36   : >> { %1329 = vmatprep.subr.bf16.mxu1 %v1544_v2  ;;  %1323 = vmatprep.mubr.msk.bf16.mxu0 %vm1545_vm0, %v1544_v2  ;;  %v946_v58 = vor.u32 %v945_v56, %v941_v55 }
  0x37   : >> { %1335 = vmatprep.mubr.msk.bf16.mxu1 %vm1545_vm0, %v1544_v2 }
  0x38   : >> { %1318 = vmatpush3.bf16.msra.mxu0 %v1455_v14 }
  0x39   : >> { %1330 = vmatpush3.bf16.msra.mxu1 %v1456_v15  ;;  %1319 = vmatprep.subr.bf16.mxu0 %v1544_v2 }
  0x3a   : >> { %1331 = vmatprep.subr.bf16.mxu1 %v1544_v2 }
  0x3c   : >> { %1320 = vmatpush3.bf16.msra.mxu0 %v1457_v18 }
  0x3d   : >> { %1332 = vmatpush3.bf16.msra.mxu1 %v1458_v19  ;;  %1321 = vmatprep.subr.bf16.mxu0 %v1544_v2 }
  0x3e   : >> { %1333 = vmatprep.subr.bf16.mxu1 %v1544_v2 }
  0x40   : >> { %1322 = vmatpush3.bf16.msra.mxu0 %v1459_v22 }
  0x41   : >> { %1334 = vmatpush3.bf16.msra.mxu1 %v1460_v23  ;;  %1339 = vmatprep.subr.bf16.mxu0 %v1544_v2 }
  0x42   : >> { %1351 = vmatprep.subr.bf16.mxu1 %v1544_v2 }
  0x43   : >> { %1324 = vmatmul.mubr.msk.bf16.vlgmr.msra.gmra.mxu0 %vm295_vm1, %v442_v25 }
  0x44   : >> { %1340 = vmatpush3.bf16.msra.mxu0 %v1461_v24  ;;  %1336 = vmatmul.mubr.msk.bf16.vlgmr.msra.gmra.mxu1 %vm295_vm1, %v1203_v26 }
  0x45   : >> { %1352 = vmatpush3.bf16.msra.mxu1 %v1462_v27  ;;  %1341 = vmatprep.subr.bf16.mxu0 %v1544_v2 }
  0x46   : >> { %1353 = vmatprep.subr.bf16.mxu1 %v1544_v2  ;;  %1347 = vmatprep.mubr.msk.bf16.mxu0 %vm1545_vm0, %v1544_v2 }
  0x47   : >> { %1359 = vmatprep.mubr.msk.bf16.mxu1 %vm1545_vm0, %v1544_v2 }
  0x48   : >> { %1342 = vmatpush3.bf16.msra.mxu0 %v1463_v28 }
  0x49   : >> { %1354 = vmatpush3.bf16.msra.mxu1 %v1464_v30  ;;  %1343 = vmatprep.subr.bf16.mxu0 %v1544_v2 }
  0x4a   : >> { %1355 = vmatprep.subr.bf16.mxu1 %v1544_v2 }
  0x4c   : >> { %1344 = vmatpush3.bf16.msra.mxu0 %v1465_v31 }
  0x4d   : >> { %1356 = vmatpush3.bf16.msra.mxu1 %v1466_v33  ;;  %1345 = vmatprep.subr.bf16.mxu0 %v1544_v2 }
  0x4e   : >> { %1357 = vmatprep.subr.bf16.mxu1 %v1544_v2 }
  0x50   : >> { %1346 = vmatpush3.bf16.msra.mxu0 %v1467_v34 }
  0x51   : >> { %1358 = vmatpush3.bf16.msra.mxu1 %v1468_v37  ;;  %1363 = vmatprep.subr.bf16.mxu0 %v1544_v2 }
  0x52   : >> { %1375 = vmatprep.subr.bf16.mxu1 %v1544_v2 }
  0x53   : >> { %1348 = vmatmul.mubr.msk.bf16.vlgmr.msra.gmra.mxu0 %vm295_vm1, %v1210_v38 }
  0x54   : >> { %1364 = vmatpush3.bf16.msra.mxu0 %v1469_v39  ;;  %1360 = vmatmul.mubr.msk.bf16.vlgmr.msra.gmra.mxu1 %vm295_vm1, %v694_v40 }
  0x55   : >> { %1376 = vmatpush3.bf16.msra.mxu1 %v1470_v41  ;;  %1365 = vmatprep.subr.bf16.mxu0 %v1544_v2 }
  0x56   : >> { %1377 = vmatprep.subr.bf16.mxu1 %v1544_v2  ;;  %1371 = vmatprep.mubr.msk.bf16.mxu0 %vm1545_vm0, %v1544_v2 }
  0x57   : >> { %1383 = vmatprep.mubr.msk.bf16.mxu1 %vm1545_vm0, %v1544_v2 }
  0x58   : >> { %1366 = vmatpush3.bf16.msra.mxu0 %v1471_v42 }
  0x59   : >> { %1378 = vmatpush3.bf16.msra.mxu1 %v1472_v43  ;;  %1367 = vmatprep.subr.bf16.mxu0 %v1544_v2 }
  0x5a   : >> { %1379 = vmatprep.subr.bf16.mxu1 %v1544_v2 }
  0x5c   : >> { %1368 = vmatpush3.bf16.msra.mxu0 %v1473_v44 }
  0x5d   : >> { %1380 = vmatpush3.bf16.msra.mxu1 %v1474_v45  ;;  %1369 = vmatprep.subr.bf16.mxu0 %v1544_v2 }
  0x5e   : >> { %1381 = vmatprep.subr.bf16.mxu1 %v1544_v2 }
  0x60   : >> { %1370 = vmatpush3.bf16.msra.mxu0 %v1475_v46 }
  0x61   : >> { %1382 = vmatpush3.bf16.msra.mxu1 %v1476_v47  ;;  %1387 = vmatprep.subr.bf16.mxu0 %v1544_v2 }
  0x63   : >> { %1372 = vmatmul.mubr.msk.bf16.vlgmr.msra.gmra.mxu0 %vm295_vm1, %v1224_v48 }
  0x64   : >> { %1388 = vmatpush3.bf16.msra.mxu0 %v1477_v49  ;;  %1384 = vmatmul.mubr.msk.bf16.vlgmr.msra.gmra.mxu1 %vm295_vm1, %v1231_v50 }
  0x65   : >> { %1389 = vmatprep.subr.bf16.mxu0 %v1544_v2  ;;  %1395 = vmatprep.mubr.msk.bf16.mxu0 %vm1545_vm0, %v1544_v2 }
  0x68   : >> { %1390 = vmatpush3.bf16.msra.mxu0 %v1478_v51 }
  0x69   : >> { %1391 = vmatprep.subr.bf16.mxu0 %v1544_v2 }
  0x6c   : >> { %1392 = vmatpush3.bf16.msra.mxu0 %v1479_v54 }
  0x6d   : >> { %1393 = vmatprep.subr.bf16.mxu0 %v1544_v2 }
  0x70   : >> { %1394 = vmatpush3.bf16.msra.mxu0 %v1480_v57 }
  0x73   : >> { %1396 = vmatmul.mubr.msk.bf16.vlgmr.msra.gmra.mxu0 %vm295_vm1, %v946_v58 }
  0xf3   : >> { %v333_v59 = vpop.f32.mrf.mxu0 }
  0xf4   : >> { %v412_v60 = vpop.f32.mrf.mxu1  ;;  %v334_v20 = vadd.f32 %v1620_v0, %v333_v59 }
  0xf5   : >> { %v1301_v61 = vpop.f32.mrf.mxu0 }
  0xf6   : >> { %v1313_v62 = vpop.f32.mrf.mxu1  ;;  %v418_v21 = vadd.f32 %v412_v60, %v334_v20 }
  0xf7   : >> { %v336_v63 = vpop.f32.mrf.mxu0 }
  0xf8   : >> { %v415_v1 = vpop.f32.mrf.mxu1 }
  0xf9   : >> { %v1302_v3 = vpop.f32.mrf.mxu0 }
  0xfa   : >> { %v1314_v4 = vpop.f32.mrf.mxu1 }
 0x103   : >> { %v504_v5 = vpop.f32.mrf.mxu0 }
 0x104   : >> { %v584_v6 = vpop.f32.mrf.mxu1  ;;  %v510_v22 = vadd.f32 %v504_v5, %v418_v21 }
 0x105   : >> { %v1325_v7 = vpop.f32.mrf.mxu0 }
 0x106   : >> { %v1337_v8 = vpop.f32.mrf.mxu1  ;;  %v590_v26 = vadd.f32 %v584_v6, %v510_v22 }
 0x107   : >> { %v507_v9 = vpop.f32.mrf.mxu0 }
 0x108   : >> { %v587_v10 = vpop.f32.mrf.mxu1 }
 0x109   : >> { %v1326_v11 = vpop.f32.mrf.mxu0 }
 0x10a   : >> { %v1338_v2 = vpop.f32.mrf.mxu1 }
 0x113   : >> { %v664_v12 = vpop.f32.mrf.mxu0 }
 0x114   : >> { %v756_v13 = vpop.f32.mrf.mxu1  ;;  %v670_v29 = vadd.f32 %v664_v12, %v590_v26 }
 0x115   : >> { %v1349_v14 = vpop.f32.mrf.mxu0 }
 0x116   : >> { %v1361_v15 = vpop.f32.mrf.mxu1  ;;  %v762_v33 = vadd.f32 %v756_v13, %v670_v29 }
 0x117   : >> { %v667_v16 = vpop.f32.mrf.mxu0 }
 0x118   : >> { %v759_v17 = vpop.f32.mrf.mxu1 }
 0x119   : >> { %v1350_v18 = vpop.f32.mrf.mxu0 }
 0x11a   : >> { %v1362_v19 = vpop.f32.mrf.mxu1 }
 0x123   : >> { %v836_v23 = vpop.f32.mrf.mxu0 }
 0x124   : >> { %v916_v24 = vpop.f32.mrf.mxu1  ;;  %v842_v34 = vadd.f32 %v836_v23, %v762_v33 }
 0x125   : >> { %v1373_v25 = vpop.f32.mrf.mxu0 }
 0x126   : >> { %v1385_v27 = vpop.f32.mrf.mxu1  ;;  %v922_v35 = vadd.f32 %v916_v24, %v842_v34 }
 0x127   : >> { %v839_v28 = vpop.f32.mrf.mxu0 }
 0x128   : >> { %v919_v30 = vpop.f32.mrf.mxu1 }
 0x129   : >> { %v1374_v31 = vpop.f32.mrf.mxu0 }
 0x12a   : >> { %v1386_v32 = vpop.f32.mrf.mxu1 }
 0x133   : >> { %v1008_v36 = vpop.f32.mrf.mxu0 }
 0x134   : >> { %v1014_v37 = vadd.f32 %v1008_v36, %v922_v35 }
 0x135   : >> { %v1397_v38 = vpop.f32.mrf.mxu0 }
 0x136   : >> { %v1015_v39 = vmax.f32 %v1014_v37, 0.0  ;;  %251 = sbr.rel (!%p249_p2) target bundleno = 34 (0x22), region = 85 }
 0x137   : >> { %v1011_v40 = vpop.f32.mrf.mxu0 }
 0x138   : >> { %v1016_v41 = vpack.c.bf16 %v1015_v39, %v1015_v39 }
 0x139   : >> { %v1398_v42 = vpop.f32.mrf.mxu0 }
 0x13a   : >> { %1019 = vst.msk [vmem:[%s1017_s23] sm:$0x1] %vm1018_vm2, %v1016_v41 }
 0x13b PF: > { %s14_s14 = sadd.s32 1, %s1537_s14   ;;  %s1832_s12 = smov %s1533_s13 }
 0x13c   : > { %p11_p3 = scmp.ge.s32.totalorder %s14_s14, 4   ;;  %s1833_s13 = smov %s1835_s16 }
 0x13e   :  { %13 = sbr.rel (!%p11_p3) target bundleno = 2 (0x2), region = 96 }
 0x143   :  { %1054 = vsyncpa [#allocation3], 1 }
 0x144   :  { %1056 = vsyncpa [#allocation3 + $0x1], 1 }

// kernel: encoder_cnn_forward.104
= control target key start
LH: loop header
LB: loop body
LE: loop exit
PB: predicated region body
PF: predicated region fallthrough
CT: control target
= control target key end

     0   :  { %vm200_vm0 = vcmask 519168   ;;  %s342_s1 = inlined_call_operand.vmem [shape: bf16[256,64], index: 1, kind: input, shape index: {}]   ;;  %s343_s0 = inlined_call_operand.vmem [shape: bf16[8,256], index: 0, kind: input, shape index: {}]   ;;  %s344_s2 = inlined_call_operand.vmem [shape: f32[1,64], index: 2, kind: input, shape index: {}]   ;;  %s345_s3 = inlined_call_operand.vmem [shape: bf16[8,64], index: 3, kind: output, shape index: {}]  }
   0x1   :  { %v247_v0 = vld [vmem:[%s342_s1 + $0x78] sm:$0xff]   ;;  %v249_v2 = vld [vmem:[%s342_s1 + $0x70] sm:$0xff]   ;;  %v251_v4 = vld [vmem:[%s342_s1 + $0x68] sm:$0xff]  }
   0x2   :  { %v248_v1 = vld [vmem:[%s342_s1 + $0x38] sm:$0xff]   ;;  %225 = vmatprep.subr.bf16.mxu0 %v247_v0  ;;  %v250_v3 = vld [vmem:[%s342_s1 + $0x30] sm:$0xff]   ;;  %v252_v5 = vld [vmem:[%s342_s1 + $0x28] sm:$0xff]  }
   0x3   :  { %226 = vmatpush3.bf16.msra.mxu0 %v248_v1  ;;  %v253_v6 = vld [vmem:[%s342_s1 + $0x60] sm:$0xff]   ;;  %v255_v8 = vld [vmem:[%s342_s1 + $0x58] sm:$0xff]   ;;  %v257_v10 = vld [vmem:[%s342_s1 + $0x50] sm:$0xff]  }
   0x4   :  { %227 = vmatprep.subr.bf16.mxu0 %v249_v2  ;;  %v254_v7 = vld [vmem:[%s342_s1 + $0x20] sm:$0xff]   ;;  %v256_v9 = vld [vmem:[%s342_s1 + $0x18] sm:$0xff]   ;;  %v258_v13 = vld [vmem:[%s342_s1 + $0x10] sm:$0xff]  }
   0x5   :  { %v15_v11 = vld [vmem:[%s343_s0] sm:$0xff]  ;;  %v259_v14 = vld [vmem:[%s342_s1 + $0x48] sm:$0xff]  }
   0x6   :  { %v208_v12 = vcombine.high %v15_v11, %v15_v11  ;;  %v260_v15 = vld [vmem:[%s342_s1 + $0x8] sm:$0xff]   ;;  %v261_v16 = vld [vmem:[%s342_s1 + $0x40] sm:$0xff]   ;;  %v207_v18 = vcombine.low %v15_v11, %v15_v11 }
   0x7   :  { %228 = vmatpush3.bf16.msra.mxu0 %v250_v3  ;;  %v262_v17 = vld [vmem:[%s342_s1] sm:$0xff]  }
   0x8   :  { %229 = vmatprep.subr.bf16.mxu0 %v251_v4  ;;  %190 = vmatprep.mubr.bf16.mxu0 %v208_v12  ;;  %v206_v20 = vld [vmem:[%s344_s2] ss:$0 sm:$0xff] }
   0xb   :  { %230 = vmatpush3.bf16.msra.mxu0 %v252_v5 }
   0xc   :  { %231 = vmatprep.subr.bf16.mxu0 %v253_v6 }
   0xf   :  { %232 = vmatpush3.bf16.msra.mxu0 %v254_v7 }
  0x10   :  { %233 = vmatprep.subr.bf16.mxu0 %v255_v8 }
  0x13   :  { %234 = vmatpush3.bf16.msra.mxu0 %v256_v9 }
  0x14   :  { %235 = vmatprep.subr.bf16.mxu0 %v257_v10 }
  0x17   :  { %236 = vmatpush3.bf16.msra.mxu0 %v258_v13 }
  0x18   :  { %237 = vmatprep.subr.bf16.mxu0 %v259_v14 }
  0x1b   :  { %238 = vmatpush3.bf16.msra.mxu0 %v260_v15 }
  0x1c   :  { %239 = vmatprep.subr.bf16.mxu0 %v261_v16 }
  0x1f   :  { %240 = vmatpush3.bf16.msra.mxu0 %v262_v17 }
  0x22   :  { %191 = vmatmul.mubr.bf16.vlgmr.msra.gmra.mxu0 %v207_v18 }
  0xe2   :  { %v241_v19 = vpop.f32.mrf.mxu0 }
  0xe4   :  { %v242_v21 = vpop.f32.mrf.mxu0 }
  0xe5   :  { %v243_v22 = vadd.f32 %v242_v21, %v241_v19 }
  0xe6   :  { %v244_v23 = vpop.f32.mrf.mxu0 }
  0xe7   :  { %v193_v24 = vadd.f32 %v243_v22, %v206_v20 }
  0xe8   :  { %v245_v25 = vpop.f32.mrf.mxu0 }
  0xe9   :  { %v198_v26 = vmax.f32 %v193_v24, 0.0 }
  0xeb   :  { %v199_v27 = vpack.c.bf16 %v198_v26, %v198_v26 }
  0xed   :  { %201 = vst.msk [vmem:[%s345_s3] sm:$0xf] %vm200_vm0, %v199_v27 }

// kernel: encoder_cnn_forward.110
= control target key start
LH: loop header
LB: loop body
LE: loop exit
PB: predicated region body
PF: predicated region fallthrough
CT: control target
= control target key end

     0   :  { %s382_s6 = smov 0   ;;  %s384_s7 = smov 0   ;;  %s436_s0 = inlined_call_operand.vmem [shape: bf16[2,4,256], index: 0, kind: input, shape index: {}]   ;;  %s437_s1 = inlined_call_operand.vmem [shape: bf16[2,256], index: 1, kind: output, shape index: {}]  }
   0x1   :  { %s386_s8 = smov 0  }
   0x2 LB: > { %s309_s9 = sadd.s32 4294967295, %s368_s8   ;;  %s399_s10 = sadd.s32 1, %s368_s8   ;;  %s368_s8 = sphi %s386_s8, %s440_s8   ;;  %s364_s7 = sphi %s384_s7, %s439_s7   ;;  %s360_s6 = sphi %s382_s6, %s438_s6  }
   0x3   : > { %s15_s11 = ssub.s32 %s368_s8, %s399_s10  ;;  %s18_s12 = sadd.s32 1, %s364_s7 }
   0x4   : > { %p16_p0 = scmp.eq.s32.totalorder %s15_s11, 0  ;;  %p25_p1 = scmp.ne.s32.totalorder %s364_s7, %s360_s6 }
   0x5   : > { %p26_p2 = scmp.eq.s32.totalorder %s368_s8, 0  ;;  %p312_p4 = scmp.ge.s32.totalorder %s368_s8, 2 }
   0x6   : > { %s408_s13 = scalar_select %p16_p0, %s364_s7, %s18_s12  }
   0x7   : > { %p27_p3 = por %p26_p2, %p25_p1  ;;  %77 = sbr.rel (%p312_p4) target bundleno = 17 (0x11), region = 16 }
   0xc   : > { %80 = sbr.rel (!%p27_p3) target bundleno = 17 (0x11), region = 20  ;;  %s82_s14 = sand.u32 (%p27_p3), 1, %s364_s7  }
   0xd   : > { %s314_s15 = sshll.u32 (%p27_p3), %s368_s8, 1  ;;  %s313_s16 = sshll.u32 (%p27_p3), %s82_s14, 2 }
   0xe   : > { %s86_s19 = scalar_lea.vmem (%p27_p3), %s436_s0, %s314_s15  ;;  %s84_s20 = scalar_lea.vmem (%p27_p3), [#allocation2], %s313_s16 }
   0xf   : > { %v103_v0 = vld [vmem:[%s86_s19] sm:$0x3] (%p27_p3)  ;;  %v105_v1 = vld [vmem:[%s86_s19 + $0x4] sm:$0x3] (%p27_p3) }
  0x10   : > { %104 = vst [vmem:[%s84_s20] sm:$0x3] (%p27_p3), %v103_v0  ;;  %106 = vst [vmem:[%s84_s20 + $0x2] sm:$0x3] (%p27_p3), %v105_v1 }
  0x11 PF: > { %p315_p5 = scmp.ge.s32.totalorder %s368_s8, 1  ;;  %p125_p6 = scmp.lt.s32.totalorder %s368_s8, 3 }
  0x13   : > { %p126_p7 = pnand %p315_p5, %p125_p6 }
  0x14   : > { %s132_s21 = sand.u32 (!%p126_p7), 1, %s360_s6   ;;  %p149_p8 = scmp.lt.s32.totalorder (!%p126_p7), %s309_s9, 1 }
  0x15   : > { %129 = sbr.rel (%p126_p7) target bundleno = 64 (0x40), region = 54  ;;  %s316_s22 = sshll.u32 (!%p126_p7), %s132_s21, 2 }
  0x16   : > { %s134_s23 = scalar_lea.vmem (!%p126_p7), [#allocation2], %s316_s22 }
  0x1a   : > { %v152_v2 = vld [vmem:[%s134_s23] sm:$0x3]  ;;  %v153_v3 = vld [vmem:[%s134_s23 + $0x2] sm:$0x3]  ;;  %vm156_vm0 = vcmask 1043456   ;;  %v181_v12 = vlaneseq  ;;  %vm237_vm1 = vcmask 1041409  }
  0x1b   : > { %v154_v4 = vunpack.c.l.bf16 %v152_v2  ;;  %v155_v5 = vunpack.c.l.bf16 %v153_v3  ;;  %v370_v15 = vmov 1966171168   ;;  %v371_v23 = vmov 1935823168   ;;  %s442_s9 = smov (!%p149_p8, %s309_s9), 1 }
  0x1c   : > { %v179_v16 = vunpack.c.l.s4 %v370_v15  ;;  %v182_v19 = vshrl.u32 %v181_v12, 7  ;;  %v207_v24 = vunpack.c.l.s4 %v371_v23  ;;  %s151_s26 = scalar_lea.vmem %s437_s1, %s442_s9 }
  0x1d   : > { %v157_v6 = vsel %vm156_vm0, %v154_v4, 0.0  ;;  %v164_v7 = vsel %vm156_vm0, %v155_v5, 0.0 }
  0x1e   : > { %v158_v8 = vrot.slane %v157_v6, 4  ;;  %v165_v9 = vrot.slane %v164_v7, 4  ;;  %v180_v22 = vunpack.c.0.s8 %v179_v16  ;;  %v208_v30 = vunpack.c.0.s8 %v207_v24 }
  0x20   : > { %v159_v10 = vadd.f32 %v158_v8, %v157_v6  ;;  %v166_v11 = vadd.f32 %v165_v9, %v164_v7  ;;  %v183_v29 = vsub.s32 %v180_v22, %v182_v19  ;;  %v211_v35 = vsub.s32 %v208_v30, %v182_v19 }
  0x22   : > { %v160_v13 = vrot.slane %v159_v10, 2  ;;  %v167_v14 = vrot.slane %v166_v11, 2 }
  0x24   : > { %v161_v17 = vadd.f32 %v160_v13, %v159_v10  ;;  %v168_v18 = vadd.f32 %v167_v14, %v166_v11 }
  0x26   : > { %v162_v20 = vrot.slane %v161_v17, 1  ;;  %v169_v21 = vrot.slane %v168_v18, 1 }
  0x28   : > { %v163_v25 = vadd.f32 %v162_v20, %v161_v17  ;;  %v170_v26 = vadd.f32 %v169_v21, %v168_v18 }
  0x2a   : > { %v172_v27 = vmul.f32 0.25, %v163_v25  ;;  %v173_v28 = vmul.f32 0.25, %v170_v26 }
  0x2c   : > { %v174_v31 = vpack.c.bf16 %v172_v27, %v172_v27  ;;  %v175_v32 = vpack.c.bf16 %v173_v28, %v173_v28 }
  0x2e   : > { %v184_v33 = vrot.slane %v174_v31, %v183_v29  ;;  %v198_v34 = vrot.slane %v175_v32, %v183_v29 }
  0x30   : > { %v191_v36 = vrot.slane %v184_v33, %v183_v29  ;;  %v205_v37 = vrot.slane %v198_v34, %v183_v29 }
  0x32   : > { %v212_v38 = vrot.slane %v191_v36, %v211_v35  ;;  %v226_v39 = vrot.slane %v205_v37, %v211_v35 }
  0x34   : > { %v219_v40 = vrot.slane %v212_v38, %v211_v35  ;;  %v233_v41 = vrot.slane %v226_v39, %v211_v35 }
  0x36   : > { %v234_v42 = vunpack.c.l.b16 %v219_v40  ;;  %v235_v43 = vunpack.c.l.b16 %v233_v41 }
  0x38   : > { %v236_v44 = vrot.slane %v235_v43, 7 }
  0x3a   : > { %v238_v45 = vsel %vm237_vm1, %v236_v44, %v234_v42 }
  0x3b   : > { %v239_v46 = vpack.c.b16 %v238_v45, %v238_v45 }
  0x3d   : > { %v246_v47 = vrot.slane %v239_v46, %v183_v29 }
  0x3f   : > { %317 = vst.sshfl [vmem:[%s151_s26] sm:$0x1 pattern:$0x73625140] %v246_v47 }
  0x40 PF: > { %p8_p9 = scmp.ge.s32.totalorder %s399_s10, 4   ;;  %s438_s6 = smov %s364_s7 }
  0x41   : > { %s439_s7 = smov %s408_s13  ;;  %s440_s8 = smov %s399_s10 }
  0x42   :  { %10 = sbr.rel (!%p8_p9) target bundleno = 2 (0x2), region = 93 }

// kernel: encoder_cnn_forward.111
= control target key start
LH: loop header
LB: loop body
LE: loop exit
PB: predicated region body
PF: predicated region fallthrough
CT: control target
= control target key end

     0   :  { %vm198_vm0 = vcmask 261120   ;;  %s340_s1 = inlined_call_operand.vmem [shape: bf16[256,32], index: 1, kind: input, shape index: {}]   ;;  %s341_s0 = inlined_call_operand.vmem [shape: bf16[8,256], index: 0, kind: input, shape index: {}]   ;;  %s342_s2 = inlined_call_operand.vmem [shape: f32[1,32], index: 2, kind: input, shape index: {}]   ;;  %s343_s3 = inlined_call_operand.vmem [shape: f32[8,32], index: 3, kind: output, shape index: {}]  }
   0x1   :  { %v245_v0 = vld [vmem:[%s340_s1 + $0x78] sm:$0xff]   ;;  %v247_v2 = vld [vmem:[%s340_s1 + $0x70] sm:$0xff]   ;;  %v249_v4 = vld [vmem:[%s340_s1 + $0x68] sm:$0xff]  }
   0x2   :  { %v246_v1 = vld [vmem:[%s340_s1 + $0x38] sm:$0xff]   ;;  %223 = vmatprep.subr.bf16.mxu0 %v245_v0  ;;  %v248_v3 = vld [vmem:[%s340_s1 + $0x30] sm:$0xff]   ;;  %v250_v5 = vld [vmem:[%s340_s1 + $0x28] sm:$0xff]  }
   0x3   :  { %224 = vmatpush3.bf16.msra.mxu0 %v246_v1  ;;  %v251_v6 = vld [vmem:[%s340_s1 + $0x60] sm:$0xff]   ;;  %v253_v8 = vld [vmem:[%s340_s1 + $0x58] sm:$0xff]   ;;  %v255_v10 = vld [vmem:[%s340_s1 + $0x50] sm:$0xff]  }
   0x4   :  { %225 = vmatprep.subr.bf16.mxu0 %v247_v2  ;;  %v252_v7 = vld [vmem:[%s340_s1 + $0x20] sm:$0xff]   ;;  %v254_v9 = vld [vmem:[%s340_s1 + $0x18] sm:$0xff]   ;;  %v256_v13 = vld [vmem:[%s340_s1 + $0x10] sm:$0xff]  }
   0x5   :  { %v15_v11 = vld [vmem:[%s341_s0] sm:$0xff]  ;;  %v257_v14 = vld [vmem:[%s340_s1 + $0x48] sm:$0xff]  }
   0x6   :  { %v206_v12 = vcombine.high %v15_v11, %v15_v11  ;;  %v258_v15 = vld [vmem:[%s340_s1 + $0x8] sm:$0xff]   ;;  %v259_v16 = vld [vmem:[%s340_s1 + $0x40] sm:$0xff]   ;;  %v205_v18 = vcombine.low %v15_v11, %v15_v11 }
   0x7   :  { %226 = vmatpush3.bf16.msra.mxu0 %v248_v3  ;;  %v260_v17 = vld [vmem:[%s340_s1] sm:$0xff]  }
   0x8   :  { %227 = vmatprep.subr.bf16.mxu0 %v249_v4  ;;  %190 = vmatprep.mubr.bf16.mxu0 %v206_v12  ;;  %v204_v20 = vld [vmem:[%s342_s2] ss:$0 sm:$0xff] }
   0xb   :  { %228 = vmatpush3.bf16.msra.mxu0 %v250_v5 }
   0xc   :  { %229 = vmatprep.subr.bf16.mxu0 %v251_v6 }
   0xf   :  { %230 = vmatpush3.bf16.msra.mxu0 %v252_v7 }
  0x10   :  { %231 = vmatprep.subr.bf16.mxu0 %v253_v8 }
  0x13   :  { %232 = vmatpush3.bf16.msra.mxu0 %v254_v9 }
  0x14   :  { %233 = vmatprep.subr.bf16.mxu0 %v255_v10 }
  0x17   :  { %234 = vmatpush3.bf16.msra.mxu0 %v256_v13 }
  0x18   :  { %235 = vmatprep.subr.bf16.mxu0 %v257_v14 }
  0x1b   :  { %236 = vmatpush3.bf16.msra.mxu0 %v258_v15 }
  0x1c   :  { %237 = vmatprep.subr.bf16.mxu0 %v259_v16 }
  0x1f   :  { %238 = vmatpush3.bf16.msra.mxu0 %v260_v17 }
  0x22   :  { %191 = vmatmul.mubr.bf16.vlgmr.msra.gmra.mxu0 %v205_v18 }
  0xe2   :  { %v239_v19 = vpop.f32.mrf.mxu0 }
  0xe4   :  { %v240_v21 = vpop.f32.mrf.mxu0 }
  0xe5   :  { %v241_v22 = vadd.f32 %v240_v21, %v239_v19 }
  0xe6   :  { %v242_v23 = vpop.f32.mrf.mxu0 }
  0xe7   :  { %v193_v24 = vadd.f32 %v241_v22, %v204_v20 }
  0xe8   :  { %v243_v25 = vpop.f32.mrf.mxu0 }
  0xe9   :  { %199 = vst.msk [vmem:[%s343_s3] sm:$0xff] %vm198_vm0, %v193_v24 }

// kernel: encoder_cnn_forward.105
= control target key start
LH: loop header
LB: loop body
LE: loop exit
PB: predicated region body
PF: predicated region fallthrough
CT: control target
= control target key end

     0   :  { %s1518_s12 = smov 0   ;;  %s1520_s13 = smov 0   ;;  %s1755_s0 = inlined_call_operand.vmem [shape: bf16[2,1,4,4,64], index: 0, kind: input, shape index: {}]   ;;  %s1756_s1 = inlined_call_operand.vmem [shape: bf16[576,64], index: 1, kind: input, shape index: {}]   ;;  %s1757_s2 = inlined_call_operand.vmem [shape: f32[1,64], index: 2, kind: input, shape index: {}]   ;;  %s1758_s3 = inlined_call_operand.vmem [shape: bf16[2,2,2,64], index: 3, kind: output, shape index: {}]  }
   0x1   :  { %s1522_s14 = smov 0  }
   0x2 LB: > { %s32_s15 = sadd.s32 1, %s1486_s13  ;;  %p1173_p0 = scmp.ge.s32.totalorder %s1490_s14, 1  ;;  %s1490_s14 = sphi %s1522_s14, %s13_s14   ;;  %s1486_s13 = sphi %s1520_s13, %s1760_s13   ;;  %s1482_s12 = sphi %s1518_s12, %s1759_s12  }
   0x3   : > { %p34_p1 = scmp.ge.s32.totalorder %s32_s15, 2  ;;  %p177_p2 = scmp.lt.s32.totalorder %s1490_s14, 3 }
   0x5   : > { %s1762_s15 = smov (%p34_p1, %s32_s15), 0  ;;  %p178_p3 = pnand %p1173_p0, %p177_p2 }
   0x6   : > { %p214_p4 = scmp.lt.s32.totalorder (!%p178_p3), %s1482_s12, 1  ;;  %s1551_s26 = smov (!%p178_p3), 0  }
   0x7   : > { %181 = sbr.rel (%p178_p3) target bundleno = 296 (0x128), region = 32 }
   0xc   : > { %v1539_v0 = vld [vmem:[%s1757_s2] ss:$0 sm:$0xff]  ;;  %s1764_s12 = smov (!%p214_p4, %s1482_s12), 1 }
   0xd   : > { %s1240_s18 = sshll.u32 %s1764_s12, 3  ;;  %s1176_s19 = sshll.u32 %s1764_s12, 1 }
   0xe   : > { %s1544_s22 = scalar_lea.vmem %s1755_s0, %s1240_s18  ;;  %s1549_s25 = scalar_lea.vmem %s1758_s3, %s1176_s19 }
   0xf LB: >> { %v1428_v1 = vld [vmem:[%s1756_s1 + $0x18] sm:$0xff]   ;;  %v1496_v2 = vmov 0.0   ;;  %v1430_v4 = vld [vmem:[%s1756_s1 + $0x10] sm:$0xff]   ;;  %vm1497_vm0 = vmmov 0   ;;  %s1177_s8 = sshll.u32 %s1494_s26, 1  ;;  %v1432_v6 = vld [vmem:[%s1756_s1 + $0x8] sm:$0xff]   ;;  %s1494_s26 = sphi %s1551_s26, %s246_s26  }
  0x10   : >> { %1286 = vmatprep.subr.bf16.mxu0 %v1496_v2  ;;  %1298 = vmatprep.subr.bf16.mxu1 %v1496_v2  ;;  %v1429_v3 = vld [vmem:[%s1756_s1 + $0x38] sm:$0xff]   ;;  %v1431_v5 = vld [vmem:[%s1756_s1 + $0x30] sm:$0xff]   ;;  %s1581_s11 = scalar_lea.vmem %s1544_s22, %s1177_s8  ;;  %v1433_v7 = vld [vmem:[%s1756_s1 + $0x28] sm:$0xff]   ;;  %vm289_vm1 = vcmask 523264   ;;  %vm1030_vm2 = vcmask 516096  }
  0x11   : >> { %1287 = vmatpush3.bf16.msra.mxu0 %v1428_v1  ;;  %1294 = vmatprep.mubr.msk.bf16.mxu0 %vm1497_vm0, %v1496_v2  ;;  %v1434_v8 = vld [vmem:[%s1756_s1] sm:$0xff]   ;;  %v1436_v15 = vld [vmem:[%s1756_s1 + $0x58] sm:$0xff]   ;;  %v1438_v18 = vld [vmem:[%s1756_s1 + $0x50] sm:$0xff]  }
  0x12   : >> { %1299 = vmatpush3.bf16.msra.mxu1 %v1429_v3  ;;  %1288 = vmatprep.subr.bf16.mxu0 %v1496_v2  ;;  %v1184_v9 = vld.sshfl [vmem:[%s1581_s11] sm:$0x3 pattern:$0x76325410]  ;;  %v1437_v17 = vld [vmem:[%s1756_s1 + $0x78] sm:$0xff]   ;;  %v1439_v19 = vld [vmem:[%s1756_s1 + $0x70] sm:$0xff]  }
  0x13   : >> { %1300 = vmatprep.subr.bf16.mxu1 %v1496_v2  ;;  %1306 = vmatprep.mubr.msk.bf16.mxu1 %vm1497_vm0, %v1496_v2  ;;  %v351_v10 = vshrl.u32 %v1184_v9, 16  ;;  %v353_v11 = vshll.u32 %v1184_v9, 16  ;;  %v1435_v12 = vld [vmem:[%s1756_s1 + $0x20] sm:$0xff]   ;;  %v1440_v20 = vld [vmem:[%s1756_s1 + $0x48] sm:$0xff]   ;;  %v1444_v26 = vld [vmem:[%s1756_s1 + $0x98] sm:$0xff]  }
  0x14   : >> { %v250_v14 = vld [vmem:[%s1581_s11] sm:$0x1]  ;;  %v1441_v21 = vld [vmem:[%s1756_s1 + $0x68] sm:$0xff]   ;;  %v1197_v27 = vld [vmem:[%s1581_s11 + $0x2] sm:$0x1] }
  0x15   : >> { %1289 = vmatpush3.bf16.msra.mxu0 %v1430_v4  ;;  %v355_v13 = vrot.slane %v353_v11, 1  ;;  %v1442_v22 = vld [vmem:[%s1756_s1 + $0x40] sm:$0xff]   ;;  %v1445_v28 = vld [vmem:[%s1756_s1 + $0xb8] sm:$0xff]   ;;  %v1446_v30 = vld [vmem:[%s1756_s1 + $0x90] sm:$0xff]  }
  0x16   : >> { %1301 = vmatpush3.bf16.msra.mxu1 %v1431_v5  ;;  %1290 = vmatprep.subr.bf16.mxu0 %v1496_v2  ;;  %v1190_v23 = vld.sshfl [vmem:[%s1581_s11] sm:$0x2 pattern:$0x76325410]  ;;  %v1447_v31 = vld [vmem:[%s1756_s1 + $0xb0] sm:$0xff]   ;;  %v1448_v33 = vld [vmem:[%s1756_s1 + $0x88] sm:$0xff]  }
  0x17   : >> { %1302 = vmatprep.subr.bf16.mxu1 %v1496_v2  ;;  %v356_v16 = vor.u32 %v355_v13, %v351_v10  ;;  %v1443_v24 = vld [vmem:[%s1756_s1 + $0x60] sm:$0xff]   ;;  %v442_v25 = vrot.slane %v1190_v23, 1  ;;  %v1449_v34 = vld [vmem:[%s1756_s1 + $0xa8] sm:$0xff]   ;;  %v1452_v41 = vld [vmem:[%s1756_s1 + $0xd8] sm:$0xff]  }
  0x18   : >> { %v1204_v29 = vld.sshfl [vmem:[%s1581_s11 + $0x2] sm:$0x3 pattern:$0x76325410]  ;;  %v1453_v43 = vld [vmem:[%s1756_s1 + $0xf8] sm:$0xff]   ;;  %v1454_v44 = vld [vmem:[%s1756_s1 + $0xd0] sm:$0xff]  }
  0x19   : >> { %1291 = vmatpush3.bf16.msra.mxu0 %v1432_v6  ;;  %v611_v32 = vshll.u32 %v1204_v29, 16  ;;  %v609_v35 = vshrl.u32 %v1204_v29, 16  ;;  %v1450_v37 = vld [vmem:[%s1756_s1 + $0x80] sm:$0xff]   ;;  %v1455_v45 = vld [vmem:[%s1756_s1 + $0xf0] sm:$0xff]   ;;  %v1456_v47 = vld [vmem:[%s1756_s1 + $0xc8] sm:$0xff]  }
  0x1a   : >> { %1303 = vmatpush3.bf16.msra.mxu1 %v1433_v7  ;;  %1292 = vmatprep.subr.bf16.mxu0 %v1496_v2  ;;  %v1451_v38 = vld [vmem:[%s1756_s1 + $0xa0] sm:$0xff]   ;;  %v1457_v49 = vld [vmem:[%s1756_s1 + $0xe8] sm:$0xff]   ;;  %v1460_v55 = vld [vmem:[%s1756_s1 + $0x118] sm:$0xff]  }
  0x1b   : >> { %1304 = vmatprep.subr.bf16.mxu1 %v1496_v2  ;;  %v613_v36 = vrot.slane %v611_v32, 1  ;;  %v1211_v39 = vld.sshfl [vmem:[%s1581_s11 + $0x2] sm:$0x2 pattern:$0x76325410]  ;;  %v1461_v57 = vld [vmem:[%s1756_s1 + $0x110] sm:$0xff]  }
  0x1c   : >> { %v700_v42 = vrot.slane %v1211_v39, 1  ;;  %v1225_v46 = vld.sshfl [vmem:[%s1581_s11 + $0x4] sm:$0x3 pattern:$0x76325410]  ;;  %v1462_v58 = vld [vmem:[%s1756_s1 + $0x108] sm:$0xff]  }
  0x1d   : >> { %1293 = vmatpush3.bf16.msra.mxu0 %v1434_v8  ;;  %v614_v40 = vor.u32 %v613_v36, %v609_v35  ;;  %v869_v48 = vshll.u32 %v1225_v46, 16  ;;  %v1458_v50 = vld [vmem:[%s1756_s1 + $0xc0] sm:$0xff]   ;;  %v867_v51 = vshrl.u32 %v1225_v46, 16 }
  0x1e   : >> { %1305 = vmatpush3.bf16.msra.mxu1 %v1435_v12  ;;  %1310 = vmatprep.subr.bf16.mxu0 %v1496_v2  ;;  %v1459_v53 = vld [vmem:[%s1756_s1 + $0xe0] sm:$0xff]  }
  0x1f   : >> { %1322 = vmatprep.subr.bf16.mxu1 %v1496_v2  ;;  %v871_v52 = vrot.slane %v869_v48, 1  ;;  %v1218_v54 = vld [vmem:[%s1581_s11 + $0x4] sm:$0x1] }
  0x20   : >> { %1295 = vmatmul.mubr.msk.bf16.vlgmr.msra.gmra.mxu0 %vm289_vm1, %v250_v14  ;;  %v1463_v59 = vld [vmem:[%s1756_s1 + $0x100] sm:$0xff]  }
  0x21   : >> { %1311 = vmatpush3.bf16.msra.mxu0 %v1436_v15  ;;  %1307 = vmatmul.mubr.msk.bf16.vlgmr.msra.gmra.mxu1 %vm289_vm1, %v356_v16  ;;  %v872_v56 = vor.u32 %v871_v52, %v867_v51  ;;  %v1232_v60 = vld.sshfl [vmem:[%s1581_s11 + $0x4] sm:$0x2 pattern:$0x76325410]  ;;  %s1029_s11 = scalar_lea.vmem %s1549_s25, %s1494_s26  ;;  %s246_s26 = sadd.s32 1, %s1494_s26  }
  0x22   : >> { %1323 = vmatpush3.bf16.msra.mxu1 %v1437_v17  ;;  %1312 = vmatprep.subr.bf16.mxu0 %v1496_v2  ;;  %v958_v61 = vrot.slane %v1232_v60, 1  ;;  %p243_p5 = scmp.ge.s32.totalorder %s246_s26, 2  }
  0x23   : >> { %1324 = vmatprep.subr.bf16.mxu1 %v1496_v2  ;;  %1318 = vmatprep.mubr.msk.bf16.mxu0 %vm1497_vm0, %v1496_v2 }
  0x24   : >> { %1330 = vmatprep.mubr.msk.bf16.mxu1 %vm1497_vm0, %v1496_v2 }
  0x25   : >> { %1313 = vmatpush3.bf16.msra.mxu0 %v1438_v18 }
  0x26   : >> { %1325 = vmatpush3.bf16.msra.mxu1 %v1439_v19  ;;  %1314 = vmatprep.subr.bf16.mxu0 %v1496_v2 }
  0x27   : >> { %1326 = vmatprep.subr.bf16.mxu1 %v1496_v2 }
  0x29   : >> { %1315 = vmatpush3.bf16.msra.mxu0 %v1440_v20 }
  0x2a   : >> { %1327 = vmatpush3.bf16.msra.mxu1 %v1441_v21  ;;  %1316 = vmatprep.subr.bf16.mxu0 %v1496_v2 }
  0x2b   : >> { %1328 = vmatprep.subr.bf16.mxu1 %v1496_v2 }
  0x2d   : >> { %1317 = vmatpush3.bf16.msra.mxu0 %v1442_v22 }
  0x2e   : >> { %1329 = vmatpush3.bf16.msra.mxu1 %v1443_v24  ;;  %1334 = vmatprep.subr.bf16.mxu0 %v1496_v2 }
  0x2f   : >> { %1346 = vmatprep.subr.bf16.mxu1 %v1496_v2 }
  0x30   : >> { %1319 = vmatmul.mubr.msk.bf16.vlgmr.msra.gmra.mxu0 %vm289_vm1, %v442_v25 }
  0x31   : >> { %1335 = vmatpush3.bf16.msra.mxu0 %v1444_v26  ;;  %1331 = vmatmul.mubr.msk.bf16.vlgmr.msra.gmra.mxu1 %vm289_vm1, %v1197_v27 }
  0x32   : >> { %1347 = vmatpush3.bf16.msra.mxu1 %v1445_v28  ;;  %1336 = vmatprep.subr.bf16.mxu0 %v1496_v2 }
  0x33   : >> { %1348 = vmatprep.subr.bf16.mxu1 %v1496_v2  ;;  %1342 = vmatprep.mubr.msk.bf16.mxu0 %vm1497_vm0, %v1496_v2 }
  0x34   : >> { %1354 = vmatprep.mubr.msk.bf16.mxu1 %vm1497_vm0, %v1496_v2 }
  0x35   : >> { %1337 = vmatpush3.bf16.msra.mxu0 %v1446_v30 }
  0x36   : >> { %1349 = vmatpush3.bf16.msra.mxu1 %v1447_v31  ;;  %1338 = vmatprep.subr.bf16.mxu0 %v1496_v2 }
  0x37   : >> { %1350 = vmatprep.subr.bf16.mxu1 %v1496_v2 }
  0x39   : >> { %1339 = vmatpush3.bf16.msra.mxu0 %v1448_v33 }
  0x3a   : >> { %1351 = vmatpush3.bf16.msra.mxu1 %v1449_v34  ;;  %1340 = vmatprep.subr.bf16.mxu0 %v1496_v2 }
  0x3b   : >> { %1352 = vmatprep.subr.bf16.mxu1 %v1496_v2 }
  0x3d   : >> { %1341 = vmatpush3.bf16.msra.mxu0 %v1450_v37 }
  0x3e   : >> { %1353 = vmatpush3.bf16.msra.mxu1 %v1451_v38  ;;  %1358 = vmatprep.subr.bf16.mxu0 %v1496_v2 }
  0x3f   : >> { %1370 = vmatprep.subr.bf16.mxu1 %v1496_v2 }
  0x40   : >> { %1343 = vmatmul.mubr.msk.bf16.vlgmr.msra.gmra.mxu0 %vm289_vm1, %v614_v40 }
  0x41   : >> { %1359 = vmatpush3.bf16.msra.mxu0 %v1452_v41  ;;  %1355 = vmatmul.mubr.msk.bf16.vlgmr.msra.gmra.mxu1 %vm289_vm1, %v700_v42 }
  0x42   : >> { %1371 = vmatpush3.bf16.msra.mxu1 %v1453_v43  ;;  %1360 = vmatprep.subr.bf16.mxu0 %v1496_v2 }
  0x43   : >> { %1372 = vmatprep.subr.bf16.mxu1 %v1496_v2  ;;  %1366 = vmatprep.mubr.msk.bf16.mxu0 %vm1497_vm0, %v1496_v2 }
  0x44   : >> { %1378 = vmatprep.mubr.msk.bf16.mxu1 %vm1497_vm0, %v1496_v2 }
  0x45   : >> { %1361 = vmatpush3.bf16.msra.mxu0 %v1454_v44 }
  0x46   : >> { %1373 = vmatpush3.bf16.msra.mxu1 %v1455_v45  ;;  %1362 = vmatprep.subr.bf16.mxu0 %v1496_v2 }
  0x47   : >> { %1374 = vmatprep.subr.bf16.mxu1 %v1496_v2 }
  0x49   : >> { %1363 = vmatpush3.bf16.msra.mxu0 %v1456_v47 }
  0x4a   : >> { %1375 = vmatpush3.bf16.msra.mxu1 %v1457_v49  ;;  %1364 = vmatprep.subr.bf16.mxu0 %v1496_v2 }
  0x4b   : >> { %1376 = vmatprep.subr.bf16.mxu1 %v1496_v2 }
  0x4d   : >> { %1365 = vmatpush3.bf16.msra.mxu0 %v1458_v50 }
  0x4e   : >> { %1377 = vmatpush3.bf16.msra.mxu1 %v1459_v53  ;;  %1382 = vmatprep.subr.bf16.mxu0 %v1496_v2 }
  0x50   : >> { %1367 = vmatmul.mubr.msk.bf16.vlgmr.msra.gmra.mxu0 %vm289_vm1, %v1218_v54 }
  0x51   : >> { %1383 = vmatpush3.bf16.msra.mxu0 %v1460_v55  ;;  %1379 = vmatmul.mubr.msk.bf16.vlgmr.msra.gmra.mxu1 %vm289_vm1, %v872_v56 }
  0x52   : >> { %1384 = vmatprep.subr.bf16.mxu0 %v1496_v2  ;;  %1390 = vmatprep.mubr.msk.bf16.mxu0 %vm1497_vm0, %v1496_v2 }
  0x55   : >> { %1385 = vmatpush3.bf16.msra.mxu0 %v1461_v57 }
  0x56   : >> { %1386 = vmatprep.subr.bf16.mxu0 %v1496_v2 }
  0x59   : >> { %1387 = vmatpush3.bf16.msra.mxu0 %v1462_v58 }
  0x5a   : >> { %1388 = vmatprep.subr.bf16.mxu0 %v1496_v2 }
  0x5d   : >> { %1389 = vmatpush3.bf16.msra.mxu0 %v1463_v59 }
  0x60   : >> { %1391 = vmatmul.mubr.msk.bf16.vlgmr.msra.gmra.mxu0 %vm289_vm1, %v958_v61 }
  0xe0   : >> { %v327_v62 = vpop.f32.mrf.mxu0 }
  0xe1   : >> { %v418_v63 = vpop.f32.mrf.mxu1  ;;  %v328_v23 = vadd.f32 %v1539_v0, %v327_v62 }
  0xe2   : >> { %v1296_v1 = vpop.f32.mrf.mxu0 }
  0xe3   : >> { %v1308_v3 = vpop.f32.mrf.mxu1  ;;  %v424_v24 = vadd.f32 %v418_v63, %v328_v23 }
  0xe4   : >> { %v330_v4 = vpop.f32.mrf.mxu0 }
  0xe5   : >> { %v421_v5 = vpop.f32.mrf.mxu1 }
  0xe6   : >> { %v1297_v6 = vpop.f32.mrf.mxu0 }
  0xe7   : >> { %v1309_v7 = vpop.f32.mrf.mxu1 }
  0xf0   : >> { %v504_v8 = vpop.f32.mrf.mxu0 }
  0xf1   : >> { %v584_v9 = vpop.f32.mrf.mxu1  ;;  %v510_v25 = vadd.f32 %v504_v8, %v424_v24 }
  0xf2   : >> { %v1320_v10 = vpop.f32.mrf.mxu0 }
  0xf3   : >> { %v1332_v11 = vpop.f32.mrf.mxu1  ;;  %v590_v29 = vadd.f32 %v584_v9, %v510_v25 }
  0xf4   : >> { %v507_v12 = vpop.f32.mrf.mxu0 }
  0xf5   : >> { %v587_v13 = vpop.f32.mrf.mxu1 }
  0xf6   : >> { %v1321_v14 = vpop.f32.mrf.mxu0 }
  0xf7   : >> { %v1333_v2 = vpop.f32.mrf.mxu1 }
 0x100   : >> { %v676_v15 = vpop.f32.mrf.mxu0 }
 0x101   : >> { %v762_v16 = vpop.f32.mrf.mxu1  ;;  %v682_v32 = vadd.f32 %v676_v15, %v590_v29 }
 0x102   : >> { %v1344_v17 = vpop.f32.mrf.mxu0 }
 0x103   : >> { %v1356_v18 = vpop.f32.mrf.mxu1  ;;  %v768_v36 = vadd.f32 %v762_v16, %v682_v32 }
 0x104   : >> { %v679_v19 = vpop.f32.mrf.mxu0 }
 0x105   : >> { %v765_v20 = vpop.f32.mrf.mxu1 }
 0x106   : >> { %v1345_v21 = vpop.f32.mrf.mxu0 }
 0x107   : >> { %v1357_v22 = vpop.f32.mrf.mxu1 }
 0x110   : >> { %v842_v26 = vpop.f32.mrf.mxu0 }
 0x111   : >> { %v934_v27 = vpop.f32.mrf.mxu1  ;;  %v848_v37 = vadd.f32 %v842_v26, %v768_v36 }
 0x112   : >> { %v1368_v28 = vpop.f32.mrf.mxu0 }
 0x113   : >> { %v1380_v30 = vpop.f32.mrf.mxu1  ;;  %v940_v38 = vadd.f32 %v934_v27, %v848_v37 }
 0x114   : >> { %v845_v31 = vpop.f32.mrf.mxu0 }
 0x115   : >> { %v937_v33 = vpop.f32.mrf.mxu1 }
 0x116   : >> { %v1369_v34 = vpop.f32.mrf.mxu0 }
 0x117   : >> { %v1381_v35 = vpop.f32.mrf.mxu1 }
 0x120   : >> { %v1020_v39 = vpop.f32.mrf.mxu0 }
 0x121   : >> { %v1026_v40 = vadd.f32 %v1020_v39, %v940_v38 }
 0x122   : >> { %v1392_v41 = vpop.f32.mrf.mxu0 }
 0x123   : >> { %v1027_v42 = vmax.f32 %v1026_v40, 0.0  ;;  %245 = sbr.rel (!%p243_p5) target bundleno = 15 (0xf), region = 79 }
 0x124   : >> { %v1023_v43 = vpop.f32.mrf.mxu0 }
 0x125   : >> { %v1028_v44 = vpack.c.bf16 %v1027_v42, %v1027_v42 }
 0x126   : >> { %v1393_v45 = vpop.f32.mrf.mxu0 }
 0x127   : >> { %1031 = vst.msk [vmem:[%s1029_s11] sm:$0x1] %vm1030_vm2, %v1028_v44 }
 0x128 PF: > { %s13_s14 = sadd.s32 1, %s1490_s14   ;;  %s1759_s12 = smov %s1486_s13 }
 0x129   : > { %p10_p6 = scmp.ge.s32.totalorder %s13_s14, 4   ;;  %s1760_s13 = smov %s1762_s15 }
 0x12b   :  { %12 = sbr.rel (!%p10_p6) target bundleno = 2 (0x2), region = 90 }

</bundles_post_ra>
